<compile_context>
chip_gen: v6e
topology: v6e:2x2x1
jax: 0.10.0
libtpu: 0.0.40
codegen_flags: <defaults>
</compile_context>

<pallas_src>
import functools

import jax
import jax.numpy as jnp
from jax import lax
from jax.experimental import pallas as pl
from jax.experimental.pallas import tpu as pltpu


_VPU_CHANNEL_THRESHOLD = 16          # <= this many input channels: reduce on the VPU
_VMEM_LIMIT_BYTES = 48 * 1024 * 1024 # explicit scoped-VMEM budget (safe on v5e/v6e/v7x)
_SPATIAL_TILE_CAP = 8192             # max lanes per spatial tile (multiple of 128)


def _pick_spatial_tile(hw, cap=_SPATIAL_TILE_CAP):
    """Largest tile <= cap that divides hw and is a multiple of 128 (else hw)."""
    if hw <= cap:
        return hw
    t = cap - (cap % 128)
    while t >= 128:
        if hw % t == 0:
            return t
        t -= 128
    return hw


def _channel_contract(w, x, n_cin, use_vpu):
    """(C_out, C_in) @ (C_in, L) -> (C_out, L) in f32.

    For small C_in the reduction is an unrolled VPU multiply-accumulate (a
    M<=8, K<=16 matmul would waste the MXU and pay push/pop latency); for large
    C_in it goes to the MXU via jnp.dot.
    """
    if use_vpu:
        acc = w[:, 0:1].astype(jnp.float32) * x[0:1, :].astype(jnp.float32)
        for c in range(1, n_cin):
            acc = acc + (w[:, c:c + 1].astype(jnp.float32) *
                         x[c:c + 1, :].astype(jnp.float32))
        return acc
    return jnp.dot(w.astype(jnp.float32), x.astype(jnp.float32),
                   preferred_element_type=jnp.float32)


# ----------------------------------------------------------------------------
# ConvTranspose2d(C, C, kernel_size=2, stride=2)
# ----------------------------------------------------------------------------
def _conv_transpose2x2_kernel(x_ref, w_ref, b_ref, o_ref, *, n_cin, use_vpu):
    # x_ref : (1, C_in, T)        lane-dense spatial tile of the input
    # w_ref : (4, C_out, C_in)    per-tap weights, tap = di*2 + dj
    # b_ref : (C_out, 1)          bias
    # o_ref : (1, 4, C_out, T)    per-tap outputs (interleaved in the wrapper)
    x = x_ref[0]                                    # (C_in, T)
    b = b_ref[...]                                  # (C_out, 1)
    for tap in range(4):
        y = _channel_contract(w_ref[tap], x, n_cin, use_vpu) + b
        o_ref[0, tap] = y.astype(o_ref.dtype)


def conv_transpose_2x2_s2(x, w, b):
    """x: (N, C_in, H, W); w: (C_in, C_out, 2, 2) (PyTorch ConvTranspose2d layout)."""
    N, Ci, H, W = x.shape
    assert w.shape[0] == Ci and w.shape[2:] == (2, 2)
    Co = w.shape[1]
    HW = H * W
    T = _pick_spatial_tile(HW)
    n_s = HW // T

    x2 = x.reshape(N, Ci, HW)
    w4 = jnp.transpose(w, (2, 3, 1, 0)).reshape(4, Co, Ci).astype(jnp.float32)
    b2 = b.reshape(Co, 1).astype(jnp.float32)
    use_vpu = Ci <= _VPU_CHANNEL_THRESHOLD

    kern = functools.partial(_conv_transpose2x2_kernel, n_cin=Ci, use_vpu=use_vpu)
    out4 = pl.pallas_call(
        kern,
        out_shape=jax.ShapeDtypeStruct((N, 4, Co, HW), x.dtype),
        grid_spec=pltpu.PrefetchScalarGridSpec(
            num_scalar_prefetch=0,
            grid=(N, n_s),
            in_specs=[
                pl.BlockSpec((1, Ci, T), lambda n, s: (n, 0, s)),
                pl.BlockSpec((4, Co, Ci), lambda n, s: (0, 0, 0)),
                pl.BlockSpec((Co, 1), lambda n, s: (0, 0)),
            ],
            out_specs=pl.BlockSpec((1, 4, Co, T), lambda n, s: (n, 0, 0, s)),
        ),
        compiler_params=pltpu.CompilerParams(
            dimension_semantics=("parallel", "parallel"),
            vmem_limit_bytes=_VMEM_LIMIT_BYTES,
        ),
        cost_estimate=pl.CostEstimate(
            flops=2 * N * Ci * Co * 4 * HW,
            transcendentals=0,
            bytes_accessed=4 * (N * Ci * HW + N * 4 * Co * HW + 4 * Co * Ci + Co),
        ),
    )(x2, w4, b2)

    # Interleave taps: out[n, co, 2i+di, 2j+dj] = out4[n, di*2+dj, co, i*W+j]
    out = (out4.reshape(N, 2, 2, Co, H, W)
                .transpose(0, 3, 4, 1, 5, 2)
                .reshape(N, Co, 2 * H, 2 * W))
    return out


# ----------------------------------------------------------------------------
# Conv2d(3x3, padding=1) + folded (inference) BatchNorm + ReLU
# ----------------------------------------------------------------------------
def _conv3x3_bn_relu_kernel(x_ref, w_ref, b_ref, o_ref, *, n_cin, h, wp, use_vpu):
    # x_ref : (1, C_in, Hp*Wp + 2)   zero-padded input, flattened spatial (lane-dense)
    # w_ref : (9, C_out_blk, C_in)   BN-folded weights, tap = dy*3 + dx
    # b_ref : (C_out_blk, 1)         BN-folded bias
    # o_ref : (1, C_out_blk, H*Wp)   output on the width-padded flat grid
    L = h * wp
    acc = jnp.zeros(o_ref.shape[1:], jnp.float32)           # (C_out_blk, L)
    for dy in range(3):
        for dx in range(3):
            off = dy * wp + dx                               # flat shift == 2D shift
            xs = x_ref[0, :, off:off + L]                    # (C_in, L)
            acc = acc + _channel_contract(w_ref[dy * 3 + dx], xs, n_cin, use_vpu)
    acc = acc + b_ref[...]
    o_ref[0] = jnp.maximum(acc, 0.0).astype(o_ref.dtype)


def conv3x3_bn_relu(x, w, b, gamma, beta, mean, var, eps=1e-5):
    """x: (N, C_in, H, W); w: (C_out, C_in, 3, 3); inference-mode BN folded in."""
    N, Ci, H, W = x.shape
    Co = w.shape[0]
    Hp, Wp = H + 2, W + 2
    L = H * Wp

    # Fold BN (running stats) into the conv weights / bias.
    scale = gamma / jnp.sqrt(var + eps)                      # (Co,)
    w_f = w * scale[:, None, None, None]
    b_f = (b - mean) * scale + beta
    w9 = jnp.transpose(w_f, (2, 3, 0, 1)).reshape(9, Co, Ci).astype(jnp.float32)
    b2 = b_f.reshape(Co, 1).astype(jnp.float32)

    # Zero-pad spatially (pad=1), flatten, plus 2 extra flat elements so the
    # largest tap offset (2*Wp+2) stays in-bounds for a full-length slice.
    xp = jnp.pad(x, ((0, 0), (0, 0), (1, 1), (1, 1))).reshape(N, Ci, Hp * Wp)
    xp = jnp.pad(xp, ((0, 0), (0, 0), (0, 2)))
    flat_in = Hp * Wp + 2

    # Optional output-channel tiling axis (keeps weights/acc small for large C_out
    # and gives the second v7x TensorCore work when N is small).
    co_blk = 128 if (Co > 128 and Co % 128 == 0) else Co
    n_co = Co // co_blk
    use_vpu = Ci <= _VPU_CHANNEL_THRESHOLD

    # TODO(synk): for very large images, add a halo-tiled row-block grid axis
    # instead of one full image per grid step.
    kern = functools.partial(_conv3x3_bn_relu_kernel,
                             n_cin=Ci, h=H, wp=Wp, use_vpu=use_vpu)
    out = pl.pallas_call(
        kern,
        out_shape=jax.ShapeDtypeStruct((N, Co, L), x.dtype),
        grid_spec=pltpu.PrefetchScalarGridSpec(
            num_scalar_prefetch=0,
            grid=(N, n_co),
            in_specs=[
                pl.BlockSpec((1, Ci, flat_in), lambda n, c: (n, 0, 0)),
                pl.BlockSpec((9, co_blk, Ci), lambda n, c: (0, c, 0)),
                pl.BlockSpec((co_blk, 1), lambda n, c: (c, 0)),
            ],
            out_specs=pl.BlockSpec((1, co_blk, L), lambda n, c: (n, c, 0)),
        ),
        compiler_params=pltpu.CompilerParams(
            dimension_semantics=("parallel", "parallel"),
            vmem_limit_bytes=_VMEM_LIMIT_BYTES,
        ),
        cost_estimate=pl.CostEstimate(
            flops=2 * N * Ci * Co * 9 * H * W,
            transcendentals=0,
            bytes_accessed=4 * (N * Ci * flat_in + N * Co * L + 9 * Co * Ci + Co),
        ),
    )(xp, w9, b2)

    # Drop the two junk padding columns kept for lane-dense flat addressing.
    return out.reshape(N, Co, H, Wp)[:, :, :, :W]


# ----------------------------------------------------------------------------
# Up_noskip forward
# ----------------------------------------------------------------------------
@jax.jit
def up_noskip_forward(x, up_w, up_b,
                      c1_w, c1_b, bn1_g, bn1_b, bn1_m, bn1_v,
                      c2_w, c2_b, bn2_g, bn2_b, bn2_m, bn2_v):
    y = conv_transpose_2x2_s2(x, up_w, up_b)
    y = conv3x3_bn_relu(y, c1_w, c1_b, bn1_g, bn1_b, bn1_m, bn1_v)
    y = conv3x3_bn_relu(y, c2_w, c2_b, bn2_g, bn2_b, bn2_m, bn2_v)
    return y


# ----------------------------------------------------------------------------
# Pure-JAX reference (inference-mode BN), for validation.
# ----------------------------------------------------------------------------
def _reference_forward(x, up_w, up_b,
                       c1_w, c1_b, bn1_g, bn1_b, bn1_m, bn1_v,
                       c2_w, c2_b, bn2_g, bn2_b, bn2_m, bn2_v, eps=1e-5):
    # ConvTranspose2d(k=2, s=2): out[n,o,2i+k,2j+l] = sum_c x[n,c,i,j] * w[c,o,k,l] + b[o]
    t = jnp.einsum('ncij,cokl->noijkl', x, up_w)
    Nb, Co, Hh, Ww = t.shape[:4]
    up = (t.transpose(0, 1, 2, 4, 3, 5).reshape(Nb, Co, 2 * Hh, 2 * Ww)
          + up_b[None, :, None, None])

    def conv_bn_relu(y, w, b, g, bt, m, v):
        z = lax.conv_general_dilated(y, w, (1, 1), 'SAME',
                                     dimension_numbers=('NCHW', 'OIHW', 'NCHW'))
        z = z + b[None, :, None, None]
        z = (z - m[None, :, None, None]) / jnp.sqrt(v[None, :, None, None] + eps)
        z = z * g[None, :, None, None] + bt[None, :, None, None]
        return jnp.maximum(z, 0.0)

    y = conv_bn_relu(up, c1_w, c1_b, bn1_g, bn1_b, bn1_m, bn1_v)
    y = conv_bn_relu(y, c2_w, c2_b, bn2_g, bn2_b, bn2_m, bn2_v)
    return y


if __name__ == "__main__":
    key = jax.random.PRNGKey(0)
    N, C_in, C_out, H, W = 2, 4, 8, 16, 16
    ks = jax.random.split(key, 12)

    x = jax.random.normal(ks[0], (N, C_in, H, W), dtype=jnp.float32)

    # ConvTranspose2d(C_in, C_in, kernel_size=2, stride=2): weight (C_in, C_in, 2, 2)
    up_w = jax.random.normal(ks[1], (C_in, C_in, 2, 2), jnp.float32) * 0.3
    up_b = jax.random.normal(ks[2], (C_in,), jnp.float32) * 0.1

    # DoubleConv: Conv2d(C_in, C_out, 3, pad=1)+BN+ReLU, Conv2d(C_out, C_out, 3, pad=1)+BN+ReLU
    c1_w = jax.random.normal(ks[3], (C_out, C_in, 3, 3), jnp.float32) * 0.2
    c1_b = jax.random.normal(ks[4], (C_out,), jnp.float32) * 0.1
    bn1_g = 1.0 + 0.1 * jax.random.normal(ks[5], (C_out,), jnp.float32)
    bn1_b = 0.1 * jax.random.normal(ks[6], (C_out,), jnp.float32)
    bn1_m = 0.1 * jax.random.normal(ks[7], (C_out,), jnp.float32)
    bn1_v = 1.0 + 0.1 * jnp.abs(jax.random.normal(ks[8], (C_out,), jnp.float32))

    c2_w = jax.random.normal(ks[9], (C_out, C_out, 3, 3), jnp.float32) * 0.2
    c2_b = jax.random.normal(ks[10], (C_out,), jnp.float32) * 0.1
    bn2_g = jnp.ones((C_out,), jnp.float32)
    bn2_b = jnp.zeros((C_out,), jnp.float32)
    bn2_m = jnp.zeros((C_out,), jnp.float32)
    bn2_v = jnp.ones((C_out,), jnp.float32)

    out = up_noskip_forward(x, up_w, up_b,
                            c1_w, c1_b, bn1_g, bn1_b, bn1_m, bn1_v,
                            c2_w, c2_b, bn2_g, bn2_b, bn2_m, bn2_v)
    out = jax.block_until_ready(out)

    ref = _reference_forward(x, up_w, up_b,
                             c1_w, c1_b, bn1_g, bn1_b, bn1_m, bn1_v,
                             c2_w, c2_b, bn2_g, bn2_b, bn2_m, bn2_v)
    assert out.shape == (N, C_out, 2 * H, 2 * W), out.shape
    max_err = float(jnp.max(jnp.abs(out - ref)))
    assert jnp.allclose(out, ref, atol=1e-4, rtol=1e-4), max_err

    print("KERNEL_OK")
</pallas_src>

<mosaic_0001>
module attributes {stable_mosaic.version = 11 : i64} {
  func.func @_conv_transpose2x2_kernel(%arg0: i32, %arg1: i32, %arg2: memref<1x4x256xf32, #tpu.memory_space<vmem>>, %arg3: memref<4x4x4xf32, #tpu.memory_space<vmem>>, %arg4: memref<4x1xf32, #tpu.memory_space<vmem>>, %arg5: memref<1x4x4x256xf32, #tpu.memory_space<vmem>>) attributes {dimension_semantics = [#tpu.dimension_semantics<parallel>, #tpu.dimension_semantics<parallel>], iteration_bounds = array<i64: 2, 1>, scalar_prefetch = 0 : i64, scratch_operands = 0 : i64, tpu.core_type = #tpu.core_type<tc>, window_params = [{transform_indices = @transform_0, window_bounds = array<i64: 1, 4, 256>}, {pipeline_mode = #tpu.pipeline_mode<synchronous>, transform_indices = @transform_1, window_bounds = array<i64: 4, 4, 4>}, {pipeline_mode = #tpu.pipeline_mode<synchronous>, transform_indices = @transform_2, window_bounds = array<i64: 4, 1>}, {transform_indices = @transform_3, window_bounds = array<i64: 1, 4, 4, 256>}]} {
    %c0 = arith.constant 0 : index
    %c0_0 = arith.constant 0 : index
    %c0_1 = arith.constant 0 : index
    %0 = vector.load %arg2[%c0, %c0_0, %c0_1] : memref<1x4x256xf32, #tpu.memory_space<vmem>>, vector<1x4x256xf32>
    %1 = vector.shape_cast %0 : vector<1x4x256xf32> to vector<4x256xf32>
    %c0_2 = arith.constant 0 : index
    %c0_3 = arith.constant 0 : index
    %2 = vector.load %arg4[%c0_2, %c0_3] : memref<4x1xf32, #tpu.memory_space<vmem>>, vector<4x1xf32>
    %c0_4 = arith.constant 0 : index
    %c0_5 = arith.constant 0 : index
    %c0_6 = arith.constant 0 : index
    %3 = vector.load %arg3[%c0_4, %c0_5, %c0_6] : memref<4x4x4xf32, #tpu.memory_space<vmem>>, vector<1x4x4xf32>
    %4 = vector.shape_cast %3 : vector<1x4x4xf32> to vector<4x4xf32>
    %5 = vector.extract_strided_slice %4 {offsets = [0, 0], sizes = [4, 1], strides = [1, 1]} : vector<4x4xf32> to vector<4x1xf32>
    %6 = vector.extract_strided_slice %1 {offsets = [0, 0], sizes = [1, 256], strides = [1, 1]} : vector<4x256xf32> to vector<1x256xf32>
    %7 = vector.broadcast %5 : vector<4x1xf32> to vector<4x256xf32>
    %8 = vector.broadcast %6 : vector<1x256xf32> to vector<4x256xf32>
    %9 = arith.mulf %7, %8 : vector<4x256xf32>
    %10 = vector.extract_strided_slice %4 {offsets = [0, 1], sizes = [4, 1], strides = [1, 1]} : vector<4x4xf32> to vector<4x1xf32>
    %11 = vector.extract_strided_slice %1 {offsets = [1, 0], sizes = [1, 256], strides = [1, 1]} : vector<4x256xf32> to vector<1x256xf32>
    %12 = vector.broadcast %10 : vector<4x1xf32> to vector<4x256xf32>
    %13 = vector.broadcast %11 : vector<1x256xf32> to vector<4x256xf32>
    %14 = arith.mulf %12, %13 : vector<4x256xf32>
    %15 = arith.addf %9, %14 : vector<4x256xf32>
    %16 = vector.extract_strided_slice %4 {offsets = [0, 2], sizes = [4, 1], strides = [1, 1]} : vector<4x4xf32> to vector<4x1xf32>
    %17 = vector.extract_strided_slice %1 {offsets = [2, 0], sizes = [1, 256], strides = [1, 1]} : vector<4x256xf32> to vector<1x256xf32>
    %18 = vector.broadcast %16 : vector<4x1xf32> to vector<4x256xf32>
    %19 = vector.broadcast %17 : vector<1x256xf32> to vector<4x256xf32>
    %20 = arith.mulf %18, %19 : vector<4x256xf32>
    %21 = arith.addf %15, %20 : vector<4x256xf32>
    %22 = vector.extract_strided_slice %4 {offsets = [0, 3], sizes = [4, 1], strides = [1, 1]} : vector<4x4xf32> to vector<4x1xf32>
    %23 = vector.extract_strided_slice %1 {offsets = [3, 0], sizes = [1, 256], strides = [1, 1]} : vector<4x256xf32> to vector<1x256xf32>
    %24 = vector.broadcast %22 : vector<4x1xf32> to vector<4x256xf32>
    %25 = vector.broadcast %23 : vector<1x256xf32> to vector<4x256xf32>
    %26 = arith.mulf %24, %25 : vector<4x256xf32>
    %27 = arith.addf %21, %26 : vector<4x256xf32>
    %28 = vector.broadcast %2 : vector<4x1xf32> to vector<4x256xf32>
    %29 = arith.addf %27, %28 : vector<4x256xf32>
    %c0_7 = arith.constant 0 : index
    %c0_8 = arith.constant 0 : index
    %c0_9 = arith.constant 0 : index
    %c0_10 = arith.constant 0 : index
    %30 = vector.load %arg5[%c0_7, %c0_8, %c0_9, %c0_10] : memref<1x4x4x256xf32, #tpu.memory_space<vmem>>, vector<1x1x4x256xf32>
    %31 = vector.shape_cast %30 : vector<1x1x4x256xf32> to vector<4x256xf32>
    %32 = vector.shape_cast %29 : vector<4x256xf32> to vector<1x1x4x256xf32>
    tpu.vector_store %arg5[%c0_7, %c0_8, %c0_9, %c0_10], %32 {strides = array<i32>} : memref<1x4x4x256xf32, #tpu.memory_space<vmem>>, vector<1x1x4x256xf32>,
    %c1 = arith.constant 1 : index
    %c0_11 = arith.constant 0 : index
    %c0_12 = arith.constant 0 : index
    %33 = vector.load %arg3[%c1, %c0_11, %c0_12] : memref<4x4x4xf32, #tpu.memory_space<vmem>>, vector<1x4x4xf32>
    %34 = vector.shape_cast %33 : vector<1x4x4xf32> to vector<4x4xf32>
    %35 = vector.extract_strided_slice %34 {offsets = [0, 0], sizes = [4, 1], strides = [1, 1]} : vector<4x4xf32> to vector<4x1xf32>
    %36 = vector.extract_strided_slice %1 {offsets = [0, 0], sizes = [1, 256], strides = [1, 1]} : vector<4x256xf32> to vector<1x256xf32>
    %37 = vector.broadcast %35 : vector<4x1xf32> to vector<4x256xf32>
    %38 = vector.broadcast %36 : vector<1x256xf32> to vector<4x256xf32>
    %39 = arith.mulf %37, %38 : vector<4x256xf32>
    %40 = vector.extract_strided_slice %34 {offsets = [0, 1], sizes = [4, 1], strides = [1, 1]} : vector<4x4xf32> to vector<4x1xf32>
    %41 = vector.extract_strided_slice %1 {offsets = [1, 0], sizes = [1, 256], strides = [1, 1]} : vector<4x256xf32> to vector<1x256xf32>
    %42 = vector.broadcast %40 : vector<4x1xf32> to vector<4x256xf32>
    %43 = vector.broadcast %41 : vector<1x256xf32> to vector<4x256xf32>
    %44 = arith.mulf %42, %43 : vector<4x256xf32>
    %45 = arith.addf %39, %44 : vector<4x256xf32>
    %46 = vector.extract_strided_slice %34 {offsets = [0, 2], sizes = [4, 1], strides = [1, 1]} : vector<4x4xf32> to vector<4x1xf32>
    %47 = vector.extract_strided_slice %1 {offsets = [2, 0], sizes = [1, 256], strides = [1, 1]} : vector<4x256xf32> to vector<1x256xf32>
    %48 = vector.broadcast %46 : vector<4x1xf32> to vector<4x256xf32>
    %49 = vector.broadcast %47 : vector<1x256xf32> to vector<4x256xf32>
    %50 = arith.mulf %48, %49 : vector<4x256xf32>
    %51 = arith.addf %45, %50 : vector<4x256xf32>
    %52 = vector.extract_strided_slice %34 {offsets = [0, 3], sizes = [4, 1], strides = [1, 1]} : vector<4x4xf32> to vector<4x1xf32>
    %53 = vector.extract_strided_slice %1 {offsets = [3, 0], sizes = [1, 256], strides = [1, 1]} : vector<4x256xf32> to vector<1x256xf32>
    %54 = vector.broadcast %52 : vector<4x1xf32> to vector<4x256xf32>
    %55 = vector.broadcast %53 : vector<1x256xf32> to vector<4x256xf32>
    %56 = arith.mulf %54, %55 : vector<4x256xf32>
    %57 = arith.addf %51, %56 : vector<4x256xf32>
    %58 = vector.broadcast %2 : vector<4x1xf32> to vector<4x256xf32>
    %59 = arith.addf %57, %58 : vector<4x256xf32>
    %c0_13 = arith.constant 0 : index
    %c1_14 = arith.constant 1 : index
    %c0_15 = arith.constant 0 : index
    %c0_16 = arith.constant 0 : index
    %60 = vector.load %arg5[%c0_13, %c1_14, %c0_15, %c0_16] : memref<1x4x4x256xf32, #tpu.memory_space<vmem>>, vector<1x1x4x256xf32>
    %61 = vector.shape_cast %60 : vector<1x1x4x256xf32> to vector<4x256xf32>
    %62 = vector.shape_cast %59 : vector<4x256xf32> to vector<1x1x4x256xf32>
    tpu.vector_store %arg5[%c0_13, %c1_14, %c0_15, %c0_16], %62 {strides = array<i32>} : memref<1x4x4x256xf32, #tpu.memory_space<vmem>>, vector<1x1x4x256xf32>,
    %c2 = arith.constant 2 : index
    %c0_17 = arith.constant 0 : index
    %c0_18 = arith.constant 0 : index
    %63 = vector.load %arg3[%c2, %c0_17, %c0_18] : memref<4x4x4xf32, #tpu.memory_space<vmem>>, vector<1x4x4xf32>
    %64 = vector.shape_cast %63 : vector<1x4x4xf32> to vector<4x4xf32>
    %65 = vector.extract_strided_slice %64 {offsets = [0, 0], sizes = [4, 1], strides = [1, 1]} : vector<4x4xf32> to vector<4x1xf32>
    %66 = vector.extract_strided_slice %1 {offsets = [0, 0], sizes = [1, 256], strides = [1, 1]} : vector<4x256xf32> to vector<1x256xf32>
    %67 = vector.broadcast %65 : vector<4x1xf32> to vector<4x256xf32>
    %68 = vector.broadcast %66 : vector<1x256xf32> to vector<4x256xf32>
    %69 = arith.mulf %67, %68 : vector<4x256xf32>
    %70 = vector.extract_strided_slice %64 {offsets = [0, 1], sizes = [4, 1], strides = [1, 1]} : vector<4x4xf32> to vector<4x1xf32>
    %71 = vector.extract_strided_slice %1 {offsets = [1, 0], sizes = [1, 256], strides = [1, 1]} : vector<4x256xf32> to vector<1x256xf32>
    %72 = vector.broadcast %70 : vector<4x1xf32> to vector<4x256xf32>
    %73 = vector.broadcast %71 : vector<1x256xf32> to vector<4x256xf32>
    %74 = arith.mulf %72, %73 : vector<4x256xf32>
    %75 = arith.addf %69, %74 : vector<4x256xf32>
    %76 = vector.extract_strided_slice %64 {offsets = [0, 2], sizes = [4, 1], strides = [1, 1]} : vector<4x4xf32> to vector<4x1xf32>
    %77 = vector.extract_strided_slice %1 {offsets = [2, 0], sizes = [1, 256], strides = [1, 1]} : vector<4x256xf32> to vector<1x256xf32>
    %78 = vector.broadcast %76 : vector<4x1xf32> to vector<4x256xf32>
    %79 = vector.broadcast %77 : vector<1x256xf32> to vector<4x256xf32>
    %80 = arith.mulf %78, %79 : vector<4x256xf32>
    %81 = arith.addf %75, %80 : vector<4x256xf32>
    %82 = vector.extract_strided_slice %64 {offsets = [0, 3], sizes = [4, 1], strides = [1, 1]} : vector<4x4xf32> to vector<4x1xf32>
    %83 = vector.extract_strided_slice %1 {offsets = [3, 0], sizes = [1, 256], strides = [1, 1]} : vector<4x256xf32> to vector<1x256xf32>
    %84 = vector.broadcast %82 : vector<4x1xf32> to vector<4x256xf32>
    %85 = vector.broadcast %83 : vector<1x256xf32> to vector<4x256xf32>
    %86 = arith.mulf %84, %85 : vector<4x256xf32>
    %87 = arith.addf %81, %86 : vector<4x256xf32>
    %88 = vector.broadcast %2 : vector<4x1xf32> to vector<4x256xf32>
    %89 = arith.addf %87, %88 : vector<4x256xf32>
    %c0_19 = arith.constant 0 : index
    %c2_20 = arith.constant 2 : index
    %c0_21 = arith.constant 0 : index
    %c0_22 = arith.constant 0 : index
    %90 = vector.load %arg5[%c0_19, %c2_20, %c0_21, %c0_22] : memref<1x4x4x256xf32, #tpu.memory_space<vmem>>, vector<1x1x4x256xf32>
    %91 = vector.shape_cast %90 : vector<1x1x4x256xf32> to vector<4x256xf32>
    %92 = vector.shape_cast %89 : vector<4x256xf32> to vector<1x1x4x256xf32>
    tpu.vector_store %arg5[%c0_19, %c2_20, %c0_21, %c0_22], %92 {strides = array<i32>} : memref<1x4x4x256xf32, #tpu.memory_space<vmem>>, vector<1x1x4x256xf32>,
    %c3 = arith.constant 3 : index
    %c0_23 = arith.constant 0 : index
    %c0_24 = arith.constant 0 : index
    %93 = vector.load %arg3[%c3, %c0_23, %c0_24] : memref<4x4x4xf32, #tpu.memory_space<vmem>>, vector<1x4x4xf32>
    %94 = vector.shape_cast %93 : vector<1x4x4xf32> to vector<4x4xf32>
    %95 = vector.extract_strided_slice %94 {offsets = [0, 0], sizes = [4, 1], strides = [1, 1]} : vector<4x4xf32> to vector<4x1xf32>
    %96 = vector.extract_strided_slice %1 {offsets = [0, 0], sizes = [1, 256], strides = [1, 1]} : vector<4x256xf32> to vector<1x256xf32>
    %97 = vector.broadcast %95 : vector<4x1xf32> to vector<4x256xf32>
    %98 = vector.broadcast %96 : vector<1x256xf32> to vector<4x256xf32>
    %99 = arith.mulf %97, %98 : vector<4x256xf32>
    %100 = vector.extract_strided_slice %94 {offsets = [0, 1], sizes = [4, 1], strides = [1, 1]} : vector<4x4xf32> to vector<4x1xf32>
    %101 = vector.extract_strided_slice %1 {offsets = [1, 0], sizes = [1, 256], strides = [1, 1]} : vector<4x256xf32> to vector<1x256xf32>
    %102 = vector.broadcast %100 : vector<4x1xf32> to vector<4x256xf32>
    %103 = vector.broadcast %101 : vector<1x256xf32> to vector<4x256xf32>
    %104 = arith.mulf %102, %103 : vector<4x256xf32>
    %105 = arith.addf %99, %104 : vector<4x256xf32>
    %106 = vector.extract_strided_slice %94 {offsets = [0, 2], sizes = [4, 1], strides = [1, 1]} : vector<4x4xf32> to vector<4x1xf32>
    %107 = vector.extract_strided_slice %1 {offsets = [2, 0], sizes = [1, 256], strides = [1, 1]} : vector<4x256xf32> to vector<1x256xf32>
    %108 = vector.broadcast %106 : vector<4x1xf32> to vector<4x256xf32>
    %109 = vector.broadcast %107 : vector<1x256xf32> to vector<4x256xf32>
    %110 = arith.mulf %108, %109 : vector<4x256xf32>
    %111 = arith.addf %105, %110 : vector<4x256xf32>
    %112 = vector.extract_strided_slice %94 {offsets = [0, 3], sizes = [4, 1], strides = [1, 1]} : vector<4x4xf32> to vector<4x1xf32>
    %113 = vector.extract_strided_slice %1 {offsets = [3, 0], sizes = [1, 256], strides = [1, 1]} : vector<4x256xf32> to vector<1x256xf32>
    %114 = vector.broadcast %112 : vector<4x1xf32> to vector<4x256xf32>
    %115 = vector.broadcast %113 : vector<1x256xf32> to vector<4x256xf32>
    %116 = arith.mulf %114, %115 : vector<4x256xf32>
    %117 = arith.addf %111, %116 : vector<4x256xf32>
    %118 = vector.broadcast %2 : vector<4x1xf32> to vector<4x256xf32>
    %119 = arith.addf %117, %118 : vector<4x256xf32>
    %c0_25 = arith.constant 0 : index
    %c3_26 = arith.constant 3 : index
    %c0_27 = arith.constant 0 : index
    %c0_28 = arith.constant 0 : index
    %120 = vector.load %arg5[%c0_25, %c3_26, %c0_27, %c0_28] : memref<1x4x4x256xf32, #tpu.memory_space<vmem>>, vector<1x1x4x256xf32>
    %121 = vector.shape_cast %120 : vector<1x1x4x256xf32> to vector<4x256xf32>
    %122 = vector.shape_cast %119 : vector<4x256xf32> to vector<1x1x4x256xf32>
    tpu.vector_store %arg5[%c0_25, %c3_26, %c0_27, %c0_28], %122 {strides = array<i32>} : memref<1x4x4x256xf32, #tpu.memory_space<vmem>>, vector<1x1x4x256xf32>,
    return
  }
  func.func @transform_0(%arg0: i32, %arg1: i32) -> (i32, i32, i32) {
    %c0_i32 = arith.constant 0 : i32
    %c0_i32_0 = arith.constant 0 : i32
    return %arg0, %c0_i32, %arg1 : i32, i32, i32
  }
  func.func @transform_1(%arg0: i32, %arg1: i32) -> (i32, i32, i32) {
    %c0_i32 = arith.constant 0 : i32
    %c0_i32_0 = arith.constant 0 : i32
    %c0_i32_1 = arith.constant 0 : i32
    %c0_i32_2 = arith.constant 0 : i32
    return %c0_i32, %c0_i32_0, %c0_i32_1 : i32, i32, i32
  }
  func.func @transform_2(%arg0: i32, %arg1: i32) -> (i32, i32) {
    %c0_i32 = arith.constant 0 : i32
    %c0_i32_0 = arith.constant 0 : i32
    %c0_i32_1 = arith.constant 0 : i32
    return %c0_i32, %c0_i32_0 : i32, i32
  }
  func.func @transform_3(%arg0: i32, %arg1: i32) -> (i32, i32, i32, i32) {
    %c0_i32 = arith.constant 0 : i32
    %c0_i32_0 = arith.constant 0 : i32
    %c0_i32_1 = arith.constant 0 : i32
    return %arg0, %c0_i32, %c0_i32_0, %arg1 : i32, i32, i32, i32
  }
}

module attributes {stable_mosaic.version = 11 : i64} {
  func.func @_conv3x3_bn_relu_kernel(%arg0: i32, %arg1: i32, %arg2: memref<1x4x1158xf32, #tpu.memory_space<vmem>>, %arg3: memref<9x8x4xf32, #tpu.memory_space<vmem>>, %arg4: memref<8x1xf32, #tpu.memory_space<vmem>>, %arg5: memref<1x8x1088xf32, #tpu.memory_space<vmem>>) attributes {dimension_semantics = [#tpu.dimension_semantics<parallel>, #tpu.dimension_semantics<parallel>], iteration_bounds = array<i64: 2, 1>, scalar_prefetch = 0 : i64, scratch_operands = 0 : i64, tpu.core_type = #tpu.core_type<tc>, window_params = [{transform_indices = @transform_0, window_bounds = array<i64: 1, 4, 1158>}, {transform_indices = @transform_1, window_bounds = array<i64: 9, 8, 4>}, {transform_indices = @transform_2, window_bounds = array<i64: 8, 1>}, {transform_indices = @transform_3, window_bounds = array<i64: 1, 8, 1088>}]} {
    %cst = arith.constant 0.000000e+00 : f32
    %0 = vector.broadcast %cst : f32 to vector<8x1088xf32>
    %c0 = arith.constant 0 : index
    %c0_0 = arith.constant 0 : index
    %c0_1 = arith.constant 0 : index
    %1 = vector.load %arg2[%c0, %c0_0, %c0_1] : memref<1x4x1158xf32, #tpu.memory_space<vmem>>, vector<1x4x1088xf32>
    %2 = vector.shape_cast %1 : vector<1x4x1088xf32> to vector<4x1088xf32>
    %c0_2 = arith.constant 0 : index
    %c0_3 = arith.constant 0 : index
    %c0_4 = arith.constant 0 : index
    %3 = vector.load %arg3[%c0_2, %c0_3, %c0_4] : memref<9x8x4xf32, #tpu.memory_space<vmem>>, vector<1x8x4xf32>
    %4 = vector.shape_cast %3 : vector<1x8x4xf32> to vector<8x4xf32>
    %5 = vector.extract_strided_slice %4 {offsets = [0, 0], sizes = [8, 1], strides = [1, 1]} : vector<8x4xf32> to vector<8x1xf32>
    %6 = vector.extract_strided_slice %2 {offsets = [0, 0], sizes = [1, 1088], strides = [1, 1]} : vector<4x1088xf32> to vector<1x1088xf32>
    %7 = vector.broadcast %5 : vector<8x1xf32> to vector<8x1088xf32>
    %8 = vector.broadcast %6 : vector<1x1088xf32> to vector<8x1088xf32>
    %9 = arith.mulf %7, %8 : vector<8x1088xf32>
    %10 = vector.extract_strided_slice %4 {offsets = [0, 1], sizes = [8, 1], strides = [1, 1]} : vector<8x4xf32> to vector<8x1xf32>
    %11 = vector.extract_strided_slice %2 {offsets = [1, 0], sizes = [1, 1088], strides = [1, 1]} : vector<4x1088xf32> to vector<1x1088xf32>
    %12 = vector.broadcast %10 : vector<8x1xf32> to vector<8x1088xf32>
    %13 = vector.broadcast %11 : vector<1x1088xf32> to vector<8x1088xf32>
    %14 = arith.mulf %12, %13 : vector<8x1088xf32>
    %15 = arith.addf %9, %14 : vector<8x1088xf32>
    %16 = vector.extract_strided_slice %4 {offsets = [0, 2], sizes = [8, 1], strides = [1, 1]} : vector<8x4xf32> to vector<8x1xf32>
    %17 = vector.extract_strided_slice %2 {offsets = [2, 0], sizes = [1, 1088], strides = [1, 1]} : vector<4x1088xf32> to vector<1x1088xf32>
    %18 = vector.broadcast %16 : vector<8x1xf32> to vector<8x1088xf32>
    %19 = vector.broadcast %17 : vector<1x1088xf32> to vector<8x1088xf32>
    %20 = arith.mulf %18, %19 : vector<8x1088xf32>
    %21 = arith.addf %15, %20 : vector<8x1088xf32>
    %22 = vector.extract_strided_slice %4 {offsets = [0, 3], sizes = [8, 1], strides = [1, 1]} : vector<8x4xf32> to vector<8x1xf32>
    %23 = vector.extract_strided_slice %2 {offsets = [3, 0], sizes = [1, 1088], strides = [1, 1]} : vector<4x1088xf32> to vector<1x1088xf32>
    %24 = vector.broadcast %22 : vector<8x1xf32> to vector<8x1088xf32>
    %25 = vector.broadcast %23 : vector<1x1088xf32> to vector<8x1088xf32>
    %26 = arith.mulf %24, %25 : vector<8x1088xf32>
    %27 = arith.addf %21, %26 : vector<8x1088xf32>
    %28 = arith.addf %0, %27 : vector<8x1088xf32>
    %c0_5 = arith.constant 0 : index
    %c0_6 = arith.constant 0 : index
    %c1 = arith.constant 1 : index
    %29 = vector.load %arg2[%c0_5, %c0_6, %c1] : memref<1x4x1158xf32, #tpu.memory_space<vmem>>, vector<1x4x1088xf32>
    %30 = vector.shape_cast %29 : vector<1x4x1088xf32> to vector<4x1088xf32>
    %c1_7 = arith.constant 1 : index
    %c0_8 = arith.constant 0 : index
    %c0_9 = arith.constant 0 : index
    %31 = vector.load %arg3[%c1_7, %c0_8, %c0_9] : memref<9x8x4xf32, #tpu.memory_space<vmem>>, vector<1x8x4xf32>
    %32 = vector.shape_cast %31 : vector<1x8x4xf32> to vector<8x4xf32>
    %33 = vector.extract_strided_slice %32 {offsets = [0, 0], sizes = [8, 1], strides = [1, 1]} : vector<8x4xf32> to vector<8x1xf32>
    %34 = vector.extract_strided_slice %30 {offsets = [0, 0], sizes = [1, 1088], strides = [1, 1]} : vector<4x1088xf32> to vector<1x1088xf32>
    %35 = vector.broadcast %33 : vector<8x1xf32> to vector<8x1088xf32>
    %36 = vector.broadcast %34 : vector<1x1088xf32> to vector<8x1088xf32>
    %37 = arith.mulf %35, %36 : vector<8x1088xf32>
    %38 = vector.extract_strided_slice %32 {offsets = [0, 1], sizes = [8, 1], strides = [1, 1]} : vector<8x4xf32> to vector<8x1xf32>
    %39 = vector.extract_strided_slice %30 {offsets = [1, 0], sizes = [1, 1088], strides = [1, 1]} : vector<4x1088xf32> to vector<1x1088xf32>
    %40 = vector.broadcast %38 : vector<8x1xf32> to vector<8x1088xf32>
    %41 = vector.broadcast %39 : vector<1x1088xf32> to vector<8x1088xf32>
    %42 = arith.mulf %40, %41 : vector<8x1088xf32>
    %43 = arith.addf %37, %42 : vector<8x1088xf32>
    %44 = vector.extract_strided_slice %32 {offsets = [0, 2], sizes = [8, 1], strides = [1, 1]} : vector<8x4xf32> to vector<8x1xf32>
    %45 = vector.extract_strided_slice %30 {offsets = [2, 0], sizes = [1, 1088], strides = [1, 1]} : vector<4x1088xf32> to vector<1x1088xf32>
    %46 = vector.broadcast %44 : vector<8x1xf32> to vector<8x1088xf32>
    %47 = vector.broadcast %45 : vector<1x1088xf32> to vector<8x1088xf32>
    %48 = arith.mulf %46, %47 : vector<8x1088xf32>
    %49 = arith.addf %43, %48 : vector<8x1088xf32>
    %50 = vector.extract_strided_slice %32 {offsets = [0, 3], sizes = [8, 1], strides = [1, 1]} : vector<8x4xf32> to vector<8x1xf32>
    %51 = vector.extract_strided_slice %30 {offsets = [3, 0], sizes = [1, 1088], strides = [1, 1]} : vector<4x1088xf32> to vector<1x1088xf32>
    %52 = vector.broadcast %50 : vector<8x1xf32> to vector<8x1088xf32>
    %53 = vector.broadcast %51 : vector<1x1088xf32> to vector<8x1088xf32>
    %54 = arith.mulf %52, %53 : vector<8x1088xf32>
    %55 = arith.addf %49, %54 : vector<8x1088xf32>
    %56 = arith.addf %28, %55 : vector<8x1088xf32>
    %c0_10 = arith.constant 0 : index
    %c0_11 = arith.constant 0 : index
    %c2 = arith.constant 2 : index
    %57 = vector.load %arg2[%c0_10, %c0_11, %c2] : memref<1x4x1158xf32, #tpu.memory_space<vmem>>, vector<1x4x1088xf32>
    %58 = vector.shape_cast %57 : vector<1x4x1088xf32> to vector<4x1088xf32>
    %c2_12 = arith.constant 2 : index
    %c0_13 = arith.constant 0 : index
    %c0_14 = arith.constant 0 : index
    %59 = vector.load %arg3[%c2_12, %c0_13, %c0_14] : memref<9x8x4xf32, #tpu.memory_space<vmem>>, vector<1x8x4xf32>
    %60 = vector.shape_cast %59 : vector<1x8x4xf32> to vector<8x4xf32>
    %61 = vector.extract_strided_slice %60 {offsets = [0, 0], sizes = [8, 1], strides = [1, 1]} : vector<8x4xf32> to vector<8x1xf32>
    %62 = vector.extract_strided_slice %58 {offsets = [0, 0], sizes = [1, 1088], strides = [1, 1]} : vector<4x1088xf32> to vector<1x1088xf32>
    %63 = vector.broadcast %61 : vector<8x1xf32> to vector<8x1088xf32>
    %64 = vector.broadcast %62 : vector<1x1088xf32> to vector<8x1088xf32>
    %65 = arith.mulf %63, %64 : vector<8x1088xf32>
    %66 = vector.extract_strided_slice %60 {offsets = [0, 1], sizes = [8, 1], strides = [1, 1]} : vector<8x4xf32> to vector<8x1xf32>
    %67 = vector.extract_strided_slice %58 {offsets = [1, 0], sizes = [1, 1088], strides = [1, 1]} : vector<4x1088xf32> to vector<1x1088xf32>
    %68 = vector.broadcast %66 : vector<8x1xf32> to vector<8x1088xf32>
    %69 = vector.broadcast %67 : vector<1x1088xf32> to vector<8x1088xf32>
    %70 = arith.mulf %68, %69 : vector<8x1088xf32>
    %71 = arith.addf %65, %70 : vector<8x1088xf32>
    %72 = vector.extract_strided_slice %60 {offsets = [0, 2], sizes = [8, 1], strides = [1, 1]} : vector<8x4xf32> to vector<8x1xf32>
    %73 = vector.extract_strided_slice %58 {offsets = [2, 0], sizes = [1, 1088], strides = [1, 1]} : vector<4x1088xf32> to vector<1x1088xf32>
    %74 = vector.broadcast %72 : vector<8x1xf32> to vector<8x1088xf32>
    %75 = vector.broadcast %73 : vector<1x1088xf32> to vector<8x1088xf32>
    %76 = arith.mulf %74, %75 : vector<8x1088xf32>
    %77 = arith.addf %71, %76 : vector<8x1088xf32>
    %78 = vector.extract_strided_slice %60 {offsets = [0, 3], sizes = [8, 1], strides = [1, 1]} : vector<8x4xf32> to vector<8x1xf32>
    %79 = vector.extract_strided_slice %58 {offsets = [3, 0], sizes = [1, 1088], strides = [1, 1]} : vector<4x1088xf32> to vector<1x1088xf32>
    %80 = vector.broadcast %78 : vector<8x1xf32> to vector<8x1088xf32>
    %81 = vector.broadcast %79 : vector<1x1088xf32> to vector<8x1088xf32>
    %82 = arith.mulf %80, %81 : vector<8x1088xf32>
    %83 = arith.addf %77, %82 : vector<8x1088xf32>
    %84 = arith.addf %56, %83 : vector<8x1088xf32>
    %c0_15 = arith.constant 0 : index
    %c0_16 = arith.constant 0 : index
    %c34 = arith.constant 34 : index
    %85 = vector.load %arg2[%c0_15, %c0_16, %c34] : memref<1x4x1158xf32, #tpu.memory_space<vmem>>, vector<1x4x1088xf32>
    %86 = vector.shape_cast %85 : vector<1x4x1088xf32> to vector<4x1088xf32>
    %c3 = arith.constant 3 : index
    %c0_17 = arith.constant 0 : index
    %c0_18 = arith.constant 0 : index
    %87 = vector.load %arg3[%c3, %c0_17, %c0_18] : memref<9x8x4xf32, #tpu.memory_space<vmem>>, vector<1x8x4xf32>
    %88 = vector.shape_cast %87 : vector<1x8x4xf32> to vector<8x4xf32>
    %89 = vector.extract_strided_slice %88 {offsets = [0, 0], sizes = [8, 1], strides = [1, 1]} : vector<8x4xf32> to vector<8x1xf32>
    %90 = vector.extract_strided_slice %86 {offsets = [0, 0], sizes = [1, 1088], strides = [1, 1]} : vector<4x1088xf32> to vector<1x1088xf32>
    %91 = vector.broadcast %89 : vector<8x1xf32> to vector<8x1088xf32>
    %92 = vector.broadcast %90 : vector<1x1088xf32> to vector<8x1088xf32>
    %93 = arith.mulf %91, %92 : vector<8x1088xf32>
    %94 = vector.extract_strided_slice %88 {offsets = [0, 1], sizes = [8, 1], strides = [1, 1]} : vector<8x4xf32> to vector<8x1xf32>
    %95 = vector.extract_strided_slice %86 {offsets = [1, 0], sizes = [1, 1088], strides = [1, 1]} : vector<4x1088xf32> to vector<1x1088xf32>
    %96 = vector.broadcast %94 : vector<8x1xf32> to vector<8x1088xf32>
    %97 = vector.broadcast %95 : vector<1x1088xf32> to vector<8x1088xf32>
    %98 = arith.mulf %96, %97 : vector<8x1088xf32>
    %99 = arith.addf %93, %98 : vector<8x1088xf32>
    %100 = vector.extract_strided_slice %88 {offsets = [0, 2], sizes = [8, 1], strides = [1, 1]} : vector<8x4xf32> to vector<8x1xf32>
    %101 = vector.extract_strided_slice %86 {offsets = [2, 0], sizes = [1, 1088], strides = [1, 1]} : vector<4x1088xf32> to vector<1x1088xf32>
    %102 = vector.broadcast %100 : vector<8x1xf32> to vector<8x1088xf32>
    %103 = vector.broadcast %101 : vector<1x1088xf32> to vector<8x1088xf32>
    %104 = arith.mulf %102, %103 : vector<8x1088xf32>
    %105 = arith.addf %99, %104 : vector<8x1088xf32>
    %106 = vector.extract_strided_slice %88 {offsets = [0, 3], sizes = [8, 1], strides = [1, 1]} : vector<8x4xf32> to vector<8x1xf32>
    %107 = vector.extract_strided_slice %86 {offsets = [3, 0], sizes = [1, 1088], strides = [1, 1]} : vector<4x1088xf32> to vector<1x1088xf32>
    %108 = vector.broadcast %106 : vector<8x1xf32> to vector<8x1088xf32>
    %109 = vector.broadcast %107 : vector<1x1088xf32> to vector<8x1088xf32>
    %110 = arith.mulf %108, %109 : vector<8x1088xf32>
    %111 = arith.addf %105, %110 : vector<8x1088xf32>
    %112 = arith.addf %84, %111 : vector<8x1088xf32>
    %c0_19 = arith.constant 0 : index
    %c0_20 = arith.constant 0 : index
    %c35 = arith.constant 35 : index
    %113 = vector.load %arg2[%c0_19, %c0_20, %c35] : memref<1x4x1158xf32, #tpu.memory_space<vmem>>, vector<1x4x1088xf32>
    %114 = vector.shape_cast %113 : vector<1x4x1088xf32> to vector<4x1088xf32>
    %c4 = arith.constant 4 : index
    %c0_21 = arith.constant 0 : index
    %c0_22 = arith.constant 0 : index
    %115 = vector.load %arg3[%c4, %c0_21, %c0_22] : memref<9x8x4xf32, #tpu.memory_space<vmem>>, vector<1x8x4xf32>
    %116 = vector.shape_cast %115 : vector<1x8x4xf32> to vector<8x4xf32>
    %117 = vector.extract_strided_slice %116 {offsets = [0, 0], sizes = [8, 1], strides = [1, 1]} : vector<8x4xf32> to vector<8x1xf32>
    %118 = vector.extract_strided_slice %114 {offsets = [0, 0], sizes = [1, 1088], strides = [1, 1]} : vector<4x1088xf32> to vector<1x1088xf32>
    %119 = vector.broadcast %117 : vector<8x1xf32> to vector<8x1088xf32>
    %120 = vector.broadcast %118 : vector<1x1088xf32> to vector<8x1088xf32>
    %121 = arith.mulf %119, %120 : vector<8x1088xf32>
    %122 = vector.extract_strided_slice %116 {offsets = [0, 1], sizes = [8, 1], strides = [1, 1]} : vector<8x4xf32> to vector<8x1xf32>
    %123 = vector.extract_strided_slice %114 {offsets = [1, 0], sizes = [1, 1088], strides = [1, 1]} : vector<4x1088xf32> to vector<1x1088xf32>
    %124 = vector.broadcast %122 : vector<8x1xf32> to vector<8x1088xf32>
    %125 = vector.broadcast %123 : vector<1x1088xf32> to vector<8x1088xf32>
    %126 = arith.mulf %124, %125 : vector<8x1088xf32>
    %127 = arith.addf %121, %126 : vector<8x1088xf32>
    %128 = vector.extract_strided_slice %116 {offsets = [0, 2], sizes = [8, 1], strides = [1, 1]} : vector<8x4xf32> to vector<8x1xf32>
    %129 = vector.extract_strided_slice %114 {offsets = [2, 0], sizes = [1, 1088], strides = [1, 1]} : vector<4x1088xf32> to vector<1x1088xf32>
    %130 = vector.broadcast %128 : vector<8x1xf32> to vector<8x1088xf32>
    %131 = vector.broadcast %129 : vector<1x1088xf32> to vector<8x1088xf32>
    %132 = arith.mulf %130, %131 : vector<8x1088xf32>
    %133 = arith.addf %127, %132 : vector<8x1088xf32>
    %134 = vector.extract_strided_slice %116 {offsets = [0, 3], sizes = [8, 1], strides = [1, 1]} : vector<8x4xf32> to vector<8x1xf32>
    %135 = vector.extract_strided_slice %114 {offsets = [3, 0], sizes = [1, 1088], strides = [1, 1]} : vector<4x1088xf32> to vector<1x1088xf32>
    %136 = vector.broadcast %134 : vector<8x1xf32> to vector<8x1088xf32>
    %137 = vector.broadcast %135 : vector<1x1088xf32> to vector<8x1088xf32>
    %138 = arith.mulf %136, %137 : vector<8x1088xf32>
    %139 = arith.addf %133, %138 : vector<8x1088xf32>
    %140 = arith.addf %112, %139 : vector<8x1088xf32>
    %c0_23 = arith.constant 0 : index
    %c0_24 = arith.constant 0 : index
    %c36 = arith.constant 36 : index
    %141 = vector.load %arg2[%c0_23, %c0_24, %c36] : memref<1x4x1158xf32, #tpu.memory_space<vmem>>, vector<1x4x1088xf32>
    %142 = vector.shape_cast %141 : vector<1x4x1088xf32> to vector<4x1088xf32>
    %c5 = arith.constant 5 : index
    %c0_25 = arith.constant 0 : index
    %c0_26 = arith.constant 0 : index
    %143 = vector.load %arg3[%c5, %c0_25, %c0_26] : memref<9x8x4xf32, #tpu.memory_space<vmem>>, vector<1x8x4xf32>
    %144 = vector.shape_cast %143 : vector<1x8x4xf32> to vector<8x4xf32>
    %145 = vector.extract_strided_slice %144 {offsets = [0, 0], sizes = [8, 1], strides = [1, 1]} : vector<8x4xf32> to vector<8x1xf32>
    %146 = vector.extract_strided_slice %142 {offsets = [0, 0], sizes = [1, 1088], strides = [1, 1]} : vector<4x1088xf32> to vector<1x1088xf32>
    %147 = vector.broadcast %145 : vector<8x1xf32> to vector<8x1088xf32>
    %148 = vector.broadcast %146 : vector<1x1088xf32> to vector<8x1088xf32>
    %149 = arith.mulf %147, %148 : vector<8x1088xf32>
    %150 = vector.extract_strided_slice %144 {offsets = [0, 1], sizes = [8, 1], strides = [1, 1]} : vector<8x4xf32> to vector<8x1xf32>
    %151 = vector.extract_strided_slice %142 {offsets = [1, 0], sizes = [1, 1088], strides = [1, 1]} : vector<4x1088xf32> to vector<1x1088xf32>
    %152 = vector.broadcast %150 : vector<8x1xf32> to vector<8x1088xf32>
    %153 = vector.broadcast %151 : vector<1x1088xf32> to vector<8x1088xf32>
    %154 = arith.mulf %152, %153 : vector<8x1088xf32>
    %155 = arith.addf %149, %154 : vector<8x1088xf32>
    %156 = vector.extract_strided_slice %144 {offsets = [0, 2], sizes = [8, 1], strides = [1, 1]} : vector<8x4xf32> to vector<8x1xf32>
    %157 = vector.extract_strided_slice %142 {offsets = [2, 0], sizes = [1, 1088], strides = [1, 1]} : vector<4x1088xf32> to vector<1x1088xf32>
    %158 = vector.broadcast %156 : vector<8x1xf32> to vector<8x1088xf32>
    %159 = vector.broadcast %157 : vector<1x1088xf32> to vector<8x1088xf32>
    %160 = arith.mulf %158, %159 : vector<8x1088xf32>
    %161 = arith.addf %155, %160 : vector<8x1088xf32>
    %162 = vector.extract_strided_slice %144 {offsets = [0, 3], sizes = [8, 1], strides = [1, 1]} : vector<8x4xf32> to vector<8x1xf32>
    %163 = vector.extract_strided_slice %142 {offsets = [3, 0], sizes = [1, 1088], strides = [1, 1]} : vector<4x1088xf32> to vector<1x1088xf32>
    %164 = vector.broadcast %162 : vector<8x1xf32> to vector<8x1088xf32>
    %165 = vector.broadcast %163 : vector<1x1088xf32> to vector<8x1088xf32>
    %166 = arith.mulf %164, %165 : vector<8x1088xf32>
    %167 = arith.addf %161, %166 : vector<8x1088xf32>
    %168 = arith.addf %140, %167 : vector<8x1088xf32>
    %c0_27 = arith.constant 0 : index
    %c0_28 = arith.constant 0 : index
    %c68 = arith.constant 68 : index
    %169 = vector.load %arg2[%c0_27, %c0_28, %c68] : memref<1x4x1158xf32, #tpu.memory_space<vmem>>, vector<1x4x1088xf32>
    %170 = vector.shape_cast %169 : vector<1x4x1088xf32> to vector<4x1088xf32>
    %c6 = arith.constant 6 : index
    %c0_29 = arith.constant 0 : index
    %c0_30 = arith.constant 0 : index
    %171 = vector.load %arg3[%c6, %c0_29, %c0_30] : memref<9x8x4xf32, #tpu.memory_space<vmem>>, vector<1x8x4xf32>
    %172 = vector.shape_cast %171 : vector<1x8x4xf32> to vector<8x4xf32>
    %173 = vector.extract_strided_slice %172 {offsets = [0, 0], sizes = [8, 1], strides = [1, 1]} : vector<8x4xf32> to vector<8x1xf32>
    %174 = vector.extract_strided_slice %170 {offsets = [0, 0], sizes = [1, 1088], strides = [1, 1]} : vector<4x1088xf32> to vector<1x1088xf32>
    %175 = vector.broadcast %173 : vector<8x1xf32> to vector<8x1088xf32>
    %176 = vector.broadcast %174 : vector<1x1088xf32> to vector<8x1088xf32>
    %177 = arith.mulf %175, %176 : vector<8x1088xf32>
    %178 = vector.extract_strided_slice %172 {offsets = [0, 1], sizes = [8, 1], strides = [1, 1]} : vector<8x4xf32> to vector<8x1xf32>
    %179 = vector.extract_strided_slice %170 {offsets = [1, 0], sizes = [1, 1088], strides = [1, 1]} : vector<4x1088xf32> to vector<1x1088xf32>
    %180 = vector.broadcast %178 : vector<8x1xf32> to vector<8x1088xf32>
    %181 = vector.broadcast %179 : vector<1x1088xf32> to vector<8x1088xf32>
    %182 = arith.mulf %180, %181 : vector<8x1088xf32>
    %183 = arith.addf %177, %182 : vector<8x1088xf32>
    %184 = vector.extract_strided_slice %172 {offsets = [0, 2], sizes = [8, 1], strides = [1, 1]} : vector<8x4xf32> to vector<8x1xf32>
    %185 = vector.extract_strided_slice %170 {offsets = [2, 0], sizes = [1, 1088], strides = [1, 1]} : vector<4x1088xf32> to vector<1x1088xf32>
    %186 = vector.broadcast %184 : vector<8x1xf32> to vector<8x1088xf32>
    %187 = vector.broadcast %185 : vector<1x1088xf32> to vector<8x1088xf32>
    %188 = arith.mulf %186, %187 : vector<8x1088xf32>
    %189 = arith.addf %183, %188 : vector<8x1088xf32>
    %190 = vector.extract_strided_slice %172 {offsets = [0, 3], sizes = [8, 1], strides = [1, 1]} : vector<8x4xf32> to vector<8x1xf32>
    %191 = vector.extract_strided_slice %170 {offsets = [3, 0], sizes = [1, 1088], strides = [1, 1]} : vector<4x1088xf32> to vector<1x1088xf32>
    %192 = vector.broadcast %190 : vector<8x1xf32> to vector<8x1088xf32>
    %193 = vector.broadcast %191 : vector<1x1088xf32> to vector<8x1088xf32>
    %194 = arith.mulf %192, %193 : vector<8x1088xf32>
    %195 = arith.addf %189, %194 : vector<8x1088xf32>
    %196 = arith.addf %168, %195 : vector<8x1088xf32>
    %c0_31 = arith.constant 0 : index
    %c0_32 = arith.constant 0 : index
    %c69 = arith.constant 69 : index
    %197 = vector.load %arg2[%c0_31, %c0_32, %c69] : memref<1x4x1158xf32, #tpu.memory_space<vmem>>, vector<1x4x1088xf32>
    %198 = vector.shape_cast %197 : vector<1x4x1088xf32> to vector<4x1088xf32>
    %c7 = arith.constant 7 : index
    %c0_33 = arith.constant 0 : index
    %c0_34 = arith.constant 0 : index
    %199 = vector.load %arg3[%c7, %c0_33, %c0_34] : memref<9x8x4xf32, #tpu.memory_space<vmem>>, vector<1x8x4xf32>
    %200 = vector.shape_cast %199 : vector<1x8x4xf32> to vector<8x4xf32>
    %201 = vector.extract_strided_slice %200 {offsets = [0, 0], sizes = [8, 1], strides = [1, 1]} : vector<8x4xf32> to vector<8x1xf32>
    %202 = vector.extract_strided_slice %198 {offsets = [0, 0], sizes = [1, 1088], strides = [1, 1]} : vector<4x1088xf32> to vector<1x1088xf32>
    %203 = vector.broadcast %201 : vector<8x1xf32> to vector<8x1088xf32>
    %204 = vector.broadcast %202 : vector<1x1088xf32> to vector<8x1088xf32>
    %205 = arith.mulf %203, %204 : vector<8x1088xf32>
    %206 = vector.extract_strided_slice %200 {offsets = [0, 1], sizes = [8, 1], strides = [1, 1]} : vector<8x4xf32> to vector<8x1xf32>
    %207 = vector.extract_strided_slice %198 {offsets = [1, 0], sizes = [1, 1088], strides = [1, 1]} : vector<4x1088xf32> to vector<1x1088xf32>
    %208 = vector.broadcast %206 : vector<8x1xf32> to vector<8x1088xf32>
    %209 = vector.broadcast %207 : vector<1x1088xf32> to vector<8x1088xf32>
    %210 = arith.mulf %208, %209 : vector<8x1088xf32>
    %211 = arith.addf %205, %210 : vector<8x1088xf32>
    %212 = vector.extract_strided_slice %200 {offsets = [0, 2], sizes = [8, 1], strides = [1, 1]} : vector<8x4xf32> to vector<8x1xf32>
    %213 = vector.extract_strided_slice %198 {offsets = [2, 0], sizes = [1, 1088], strides = [1, 1]} : vector<4x1088xf32> to vector<1x1088xf32>
    %214 = vector.broadcast %212 : vector<8x1xf32> to vector<8x1088xf32>
    %215 = vector.broadcast %213 : vector<1x1088xf32> to vector<8x1088xf32>
    %216 = arith.mulf %214, %215 : vector<8x1088xf32>
    %217 = arith.addf %211, %216 : vector<8x1088xf32>
    %218 = vector.extract_strided_slice %200 {offsets = [0, 3], sizes = [8, 1], strides = [1, 1]} : vector<8x4xf32> to vector<8x1xf32>
    %219 = vector.extract_strided_slice %198 {offsets = [3, 0], sizes = [1, 1088], strides = [1, 1]} : vector<4x1088xf32> to vector<1x1088xf32>
    %220 = vector.broadcast %218 : vector<8x1xf32> to vector<8x1088xf32>
    %221 = vector.broadcast %219 : vector<1x1088xf32> to vector<8x1088xf32>
    %222 = arith.mulf %220, %221 : vector<8x1088xf32>
    %223 = arith.addf %217, %222 : vector<8x1088xf32>
    %224 = arith.addf %196, %223 : vector<8x1088xf32>
    %c0_35 = arith.constant 0 : index
    %c0_36 = arith.constant 0 : index
    %c70 = arith.constant 70 : index
    %225 = vector.load %arg2[%c0_35, %c0_36, %c70] : memref<1x4x1158xf32, #tpu.memory_space<vmem>>, vector<1x4x1088xf32>
    %226 = vector.shape_cast %225 : vector<1x4x1088xf32> to vector<4x1088xf32>
    %c8 = arith.constant 8 : index
    %c0_37 = arith.constant 0 : index
    %c0_38 = arith.constant 0 : index
    %227 = vector.load %arg3[%c8, %c0_37, %c0_38] : memref<9x8x4xf32, #tpu.memory_space<vmem>>, vector<1x8x4xf32>
    %228 = vector.shape_cast %227 : vector<1x8x4xf32> to vector<8x4xf32>
    %229 = vector.extract_strided_slice %228 {offsets = [0, 0], sizes = [8, 1], strides = [1, 1]} : vector<8x4xf32> to vector<8x1xf32>
    %230 = vector.extract_strided_slice %226 {offsets = [0, 0], sizes = [1, 1088], strides = [1, 1]} : vector<4x1088xf32> to vector<1x1088xf32>
    %231 = vector.broadcast %229 : vector<8x1xf32> to vector<8x1088xf32>
    %232 = vector.broadcast %230 : vector<1x1088xf32> to vector<8x1088xf32>
    %233 = arith.mulf %231, %232 : vector<8x1088xf32>
    %234 = vector.extract_strided_slice %228 {offsets = [0, 1], sizes = [8, 1], strides = [1, 1]} : vector<8x4xf32> to vector<8x1xf32>
    %235 = vector.extract_strided_slice %226 {offsets = [1, 0], sizes = [1, 1088], strides = [1, 1]} : vector<4x1088xf32> to vector<1x1088xf32>
    %236 = vector.broadcast %234 : vector<8x1xf32> to vector<8x1088xf32>
    %237 = vector.broadcast %235 : vector<1x1088xf32> to vector<8x1088xf32>
    %238 = arith.mulf %236, %237 : vector<8x1088xf32>
    %239 = arith.addf %233, %238 : vector<8x1088xf32>
    %240 = vector.extract_strided_slice %228 {offsets = [0, 2], sizes = [8, 1], strides = [1, 1]} : vector<8x4xf32> to vector<8x1xf32>
    %241 = vector.extract_strided_slice %226 {offsets = [2, 0], sizes = [1, 1088], strides = [1, 1]} : vector<4x1088xf32> to vector<1x1088xf32>
    %242 = vector.broadcast %240 : vector<8x1xf32> to vector<8x1088xf32>
    %243 = vector.broadcast %241 : vector<1x1088xf32> to vector<8x1088xf32>
    %244 = arith.mulf %242, %243 : vector<8x1088xf32>
    %245 = arith.addf %239, %244 : vector<8x1088xf32>
    %246 = vector.extract_strided_slice %228 {offsets = [0, 3], sizes = [8, 1], strides = [1, 1]} : vector<8x4xf32> to vector<8x1xf32>
    %247 = vector.extract_strided_slice %226 {offsets = [3, 0], sizes = [1, 1088], strides = [1, 1]} : vector<4x1088xf32> to vector<1x1088xf32>
    %248 = vector.broadcast %246 : vector<8x1xf32> to vector<8x1088xf32>
    %249 = vector.broadcast %247 : vector<1x1088xf32> to vector<8x1088xf32>
    %250 = arith.mulf %248, %249 : vector<8x1088xf32>
    %251 = arith.addf %245, %250 : vector<8x1088xf32>
    %252 = arith.addf %224, %251 : vector<8x1088xf32>
    %c0_39 = arith.constant 0 : index
    %c0_40 = arith.constant 0 : index
    %253 = vector.load %arg4[%c0_39, %c0_40] : memref<8x1xf32, #tpu.memory_space<vmem>>, vector<8x1xf32>
    %254 = vector.broadcast %253 : vector<8x1xf32> to vector<8x1088xf32>
    %255 = arith.addf %252, %254 : vector<8x1088xf32>
    %cst_41 = arith.constant 0.000000e+00 : f32
    %256 = vector.broadcast %cst_41 : f32 to vector<8x1088xf32>
    %257 = arith.maximumf %255, %256 : vector<8x1088xf32>
    %c0_42 = arith.constant 0 : index
    %c0_43 = arith.constant 0 : index
    %c0_44 = arith.constant 0 : index
    %258 = vector.load %arg5[%c0_42, %c0_43, %c0_44] : memref<1x8x1088xf32, #tpu.memory_space<vmem>>, vector<1x8x1088xf32>
    %259 = vector.shape_cast %258 : vector<1x8x1088xf32> to vector<8x1088xf32>
    %260 = vector.shape_cast %257 : vector<8x1088xf32> to vector<1x8x1088xf32>
    tpu.vector_store %arg5[%c0_42, %c0_43, %c0_44], %260 {strides = array<i32>} : memref<1x8x1088xf32, #tpu.memory_space<vmem>>, vector<1x8x1088xf32>,
    return
  }
  func.func @transform_0(%arg0: i32, %arg1: i32) -> (i32, i32, i32) {
    %c0_i32 = arith.constant 0 : i32
    %c0_i32_0 = arith.constant 0 : i32
    %c0_i32_1 = arith.constant 0 : i32
    return %arg0, %c0_i32, %c0_i32_0 : i32, i32, i32
  }
  func.func @transform_1(%arg0: i32, %arg1: i32) -> (i32, i32, i32) {
    %c0_i32 = arith.constant 0 : i32
    %c0_i32_0 = arith.constant 0 : i32
    %c0_i32_1 = arith.constant 0 : i32
    return %c0_i32, %arg1, %c0_i32_0 : i32, i32, i32
  }
  func.func @transform_2(%arg0: i32, %arg1: i32) -> (i32, i32) {
    %c0_i32 = arith.constant 0 : i32
    %c0_i32_0 = arith.constant 0 : i32
    return %arg1, %c0_i32 : i32, i32
  }
  func.func @transform_3(%arg0: i32, %arg1: i32) -> (i32, i32, i32) {
    %c0_i32 = arith.constant 0 : i32
    %c0_i32_0 = arith.constant 0 : i32
    return %arg0, %arg1, %c0_i32 : i32, i32, i32
  }
}

module attributes {stable_mosaic.version = 11 : i64} {
  func.func @_conv3x3_bn_relu_kernel(%arg0: i32, %arg1: i32, %arg2: memref<1x8x1158xf32, #tpu.memory_space<vmem>>, %arg3: memref<9x8x8xf32, #tpu.memory_space<vmem>>, %arg4: memref<8x1xf32, #tpu.memory_space<vmem>>, %arg5: memref<1x8x1088xf32, #tpu.memory_space<vmem>>) attributes {dimension_semantics = [#tpu.dimension_semantics<parallel>, #tpu.dimension_semantics<parallel>], iteration_bounds = array<i64: 2, 1>, scalar_prefetch = 0 : i64, scratch_operands = 0 : i64, tpu.core_type = #tpu.core_type<tc>, window_params = [{transform_indices = @transform_0, window_bounds = array<i64: 1, 8, 1158>}, {transform_indices = @transform_1, window_bounds = array<i64: 9, 8, 8>}, {transform_indices = @transform_2, window_bounds = array<i64: 8, 1>}, {transform_indices = @transform_3, window_bounds = array<i64: 1, 8, 1088>}]} {
    %cst = arith.constant 0.000000e+00 : f32
    %0 = vector.broadcast %cst : f32 to vector<8x1088xf32>
    %c0 = arith.constant 0 : index
    %c0_0 = arith.constant 0 : index
    %c0_1 = arith.constant 0 : index
    %1 = vector.load %arg2[%c0, %c0_0, %c0_1] : memref<1x8x1158xf32, #tpu.memory_space<vmem>>, vector<1x8x1088xf32>
    %2 = vector.shape_cast %1 : vector<1x8x1088xf32> to vector<8x1088xf32>
    %c0_2 = arith.constant 0 : index
    %c0_3 = arith.constant 0 : index
    %c0_4 = arith.constant 0 : index
    %3 = vector.load %arg3[%c0_2, %c0_3, %c0_4] : memref<9x8x8xf32, #tpu.memory_space<vmem>>, vector<1x8x8xf32>
    %4 = vector.shape_cast %3 : vector<1x8x8xf32> to vector<8x8xf32>
    %5 = vector.extract_strided_slice %4 {offsets = [0, 0], sizes = [8, 1], strides = [1, 1]} : vector<8x8xf32> to vector<8x1xf32>
    %6 = vector.extract_strided_slice %2 {offsets = [0, 0], sizes = [1, 1088], strides = [1, 1]} : vector<8x1088xf32> to vector<1x1088xf32>
    %7 = vector.broadcast %5 : vector<8x1xf32> to vector<8x1088xf32>
    %8 = vector.broadcast %6 : vector<1x1088xf32> to vector<8x1088xf32>
    %9 = arith.mulf %7, %8 : vector<8x1088xf32>
    %10 = vector.extract_strided_slice %4 {offsets = [0, 1], sizes = [8, 1], strides = [1, 1]} : vector<8x8xf32> to vector<8x1xf32>
    %11 = vector.extract_strided_slice %2 {offsets = [1, 0], sizes = [1, 1088], strides = [1, 1]} : vector<8x1088xf32> to vector<1x1088xf32>
    %12 = vector.broadcast %10 : vector<8x1xf32> to vector<8x1088xf32>
    %13 = vector.broadcast %11 : vector<1x1088xf32> to vector<8x1088xf32>
    %14 = arith.mulf %12, %13 : vector<8x1088xf32>
    %15 = arith.addf %9, %14 : vector<8x1088xf32>
    %16 = vector.extract_strided_slice %4 {offsets = [0, 2], sizes = [8, 1], strides = [1, 1]} : vector<8x8xf32> to vector<8x1xf32>
    %17 = vector.extract_strided_slice %2 {offsets = [2, 0], sizes = [1, 1088], strides = [1, 1]} : vector<8x1088xf32> to vector<1x1088xf32>
    %18 = vector.broadcast %16 : vector<8x1xf32> to vector<8x1088xf32>
    %19 = vector.broadcast %17 : vector<1x1088xf32> to vector<8x1088xf32>
    %20 = arith.mulf %18, %19 : vector<8x1088xf32>
    %21 = arith.addf %15, %20 : vector<8x1088xf32>
    %22 = vector.extract_strided_slice %4 {offsets = [0, 3], sizes = [8, 1], strides = [1, 1]} : vector<8x8xf32> to vector<8x1xf32>
    %23 = vector.extract_strided_slice %2 {offsets = [3, 0], sizes = [1, 1088], strides = [1, 1]} : vector<8x1088xf32> to vector<1x1088xf32>
    %24 = vector.broadcast %22 : vector<8x1xf32> to vector<8x1088xf32>
    %25 = vector.broadcast %23 : vector<1x1088xf32> to vector<8x1088xf32>
    %26 = arith.mulf %24, %25 : vector<8x1088xf32>
    %27 = arith.addf %21, %26 : vector<8x1088xf32>
    %28 = vector.extract_strided_slice %4 {offsets = [0, 4], sizes = [8, 1], strides = [1, 1]} : vector<8x8xf32> to vector<8x1xf32>
    %29 = vector.extract_strided_slice %2 {offsets = [4, 0], sizes = [1, 1088], strides = [1, 1]} : vector<8x1088xf32> to vector<1x1088xf32>
    %30 = vector.broadcast %28 : vector<8x1xf32> to vector<8x1088xf32>
    %31 = vector.broadcast %29 : vector<1x1088xf32> to vector<8x1088xf32>
    %32 = arith.mulf %30, %31 : vector<8x1088xf32>
    %33 = arith.addf %27, %32 : vector<8x1088xf32>
    %34 = vector.extract_strided_slice %4 {offsets = [0, 5], sizes = [8, 1], strides = [1, 1]} : vector<8x8xf32> to vector<8x1xf32>
    %35 = vector.extract_strided_slice %2 {offsets = [5, 0], sizes = [1, 1088], strides = [1, 1]} : vector<8x1088xf32> to vector<1x1088xf32>
    %36 = vector.broadcast %34 : vector<8x1xf32> to vector<8x1088xf32>
    %37 = vector.broadcast %35 : vector<1x1088xf32> to vector<8x1088xf32>
    %38 = arith.mulf %36, %37 : vector<8x1088xf32>
    %39 = arith.addf %33, %38 : vector<8x1088xf32>
    %40 = vector.extract_strided_slice %4 {offsets = [0, 6], sizes = [8, 1], strides = [1, 1]} : vector<8x8xf32> to vector<8x1xf32>
    %41 = vector.extract_strided_slice %2 {offsets = [6, 0], sizes = [1, 1088], strides = [1, 1]} : vector<8x1088xf32> to vector<1x1088xf32>
    %42 = vector.broadcast %40 : vector<8x1xf32> to vector<8x1088xf32>
    %43 = vector.broadcast %41 : vector<1x1088xf32> to vector<8x1088xf32>
    %44 = arith.mulf %42, %43 : vector<8x1088xf32>
    %45 = arith.addf %39, %44 : vector<8x1088xf32>
    %46 = vector.extract_strided_slice %4 {offsets = [0, 7], sizes = [8, 1], strides = [1, 1]} : vector<8x8xf32> to vector<8x1xf32>
    %47 = vector.extract_strided_slice %2 {offsets = [7, 0], sizes = [1, 1088], strides = [1, 1]} : vector<8x1088xf32> to vector<1x1088xf32>
    %48 = vector.broadcast %46 : vector<8x1xf32> to vector<8x1088xf32>
    %49 = vector.broadcast %47 : vector<1x1088xf32> to vector<8x1088xf32>
    %50 = arith.mulf %48, %49 : vector<8x1088xf32>
    %51 = arith.addf %45, %50 : vector<8x1088xf32>
    %52 = arith.addf %0, %51 : vector<8x1088xf32>
    %c0_5 = arith.constant 0 : index
    %c0_6 = arith.constant 0 : index
    %c1 = arith.constant 1 : index
    %53 = vector.load %arg2[%c0_5, %c0_6, %c1] : memref<1x8x1158xf32, #tpu.memory_space<vmem>>, vector<1x8x1088xf32>
    %54 = vector.shape_cast %53 : vector<1x8x1088xf32> to vector<8x1088xf32>
    %c1_7 = arith.constant 1 : index
    %c0_8 = arith.constant 0 : index
    %c0_9 = arith.constant 0 : index
    %55 = vector.load %arg3[%c1_7, %c0_8, %c0_9] : memref<9x8x8xf32, #tpu.memory_space<vmem>>, vector<1x8x8xf32>
    %56 = vector.shape_cast %55 : vector<1x8x8xf32> to vector<8x8xf32>
    %57 = vector.extract_strided_slice %56 {offsets = [0, 0], sizes = [8, 1], strides = [1, 1]} : vector<8x8xf32> to vector<8x1xf32>
    %58 = vector.extract_strided_slice %54 {offsets = [0, 0], sizes = [1, 1088], strides = [1, 1]} : vector<8x1088xf32> to vector<1x1088xf32>
    %59 = vector.broadcast %57 : vector<8x1xf32> to vector<8x1088xf32>
    %60 = vector.broadcast %58 : vector<1x1088xf32> to vector<8x1088xf32>
    %61 = arith.mulf %59, %60 : vector<8x1088xf32>
    %62 = vector.extract_strided_slice %56 {offsets = [0, 1], sizes = [8, 1], strides = [1, 1]} : vector<8x8xf32> to vector<8x1xf32>
    %63 = vector.extract_strided_slice %54 {offsets = [1, 0], sizes = [1, 1088], strides = [1, 1]} : vector<8x1088xf32> to vector<1x1088xf32>
    %64 = vector.broadcast %62 : vector<8x1xf32> to vector<8x1088xf32>
    %65 = vector.broadcast %63 : vector<1x1088xf32> to vector<8x1088xf32>
    %66 = arith.mulf %64, %65 : vector<8x1088xf32>
    %67 = arith.addf %61, %66 : vector<8x1088xf32>
    %68 = vector.extract_strided_slice %56 {offsets = [0, 2], sizes = [8, 1], strides = [1, 1]} : vector<8x8xf32> to vector<8x1xf32>
    %69 = vector.extract_strided_slice %54 {offsets = [2, 0], sizes = [1, 1088], strides = [1, 1]} : vector<8x1088xf32> to vector<1x1088xf32>
    %70 = vector.broadcast %68 : vector<8x1xf32> to vector<8x1088xf32>
    %71 = vector.broadcast %69 : vector<1x1088xf32> to vector<8x1088xf32>
    %72 = arith.mulf %70, %71 : vector<8x1088xf32>
    %73 = arith.addf %67, %72 : vector<8x1088xf32>
    %74 = vector.extract_strided_slice %56 {offsets = [0, 3], sizes = [8, 1], strides = [1, 1]} : vector<8x8xf32> to vector<8x1xf32>
    %75 = vector.extract_strided_slice %54 {offsets = [3, 0], sizes = [1, 1088], strides = [1, 1]} : vector<8x1088xf32> to vector<1x1088xf32>
    %76 = vector.broadcast %74 : vector<8x1xf32> to vector<8x1088xf32>
    %77 = vector.broadcast %75 : vector<1x1088xf32> to vector<8x1088xf32>
    %78 = arith.mulf %76, %77 : vector<8x1088xf32>
    %79 = arith.addf %73, %78 : vector<8x1088xf32>
    %80 = vector.extract_strided_slice %56 {offsets = [0, 4], sizes = [8, 1], strides = [1, 1]} : vector<8x8xf32> to vector<8x1xf32>
    %81 = vector.extract_strided_slice %54 {offsets = [4, 0], sizes = [1, 1088], strides = [1, 1]} : vector<8x1088xf32> to vector<1x1088xf32>
    %82 = vector.broadcast %80 : vector<8x1xf32> to vector<8x1088xf32>
    %83 = vector.broadcast %81 : vector<1x1088xf32> to vector<8x1088xf32>
    %84 = arith.mulf %82, %83 : vector<8x1088xf32>
    %85 = arith.addf %79, %84 : vector<8x1088xf32>
    %86 = vector.extract_strided_slice %56 {offsets = [0, 5], sizes = [8, 1], strides = [1, 1]} : vector<8x8xf32> to vector<8x1xf32>
    %87 = vector.extract_strided_slice %54 {offsets = [5, 0], sizes = [1, 1088], strides = [1, 1]} : vector<8x1088xf32> to vector<1x1088xf32>
    %88 = vector.broadcast %86 : vector<8x1xf32> to vector<8x1088xf32>
    %89 = vector.broadcast %87 : vector<1x1088xf32> to vector<8x1088xf32>
    %90 = arith.mulf %88, %89 : vector<8x1088xf32>
    %91 = arith.addf %85, %90 : vector<8x1088xf32>
    %92 = vector.extract_strided_slice %56 {offsets = [0, 6], sizes = [8, 1], strides = [1, 1]} : vector<8x8xf32> to vector<8x1xf32>
    %93 = vector.extract_strided_slice %54 {offsets = [6, 0], sizes = [1, 1088], strides = [1, 1]} : vector<8x1088xf32> to vector<1x1088xf32>
    %94 = vector.broadcast %92 : vector<8x1xf32> to vector<8x1088xf32>
    %95 = vector.broadcast %93 : vector<1x1088xf32> to vector<8x1088xf32>
    %96 = arith.mulf %94, %95 : vector<8x1088xf32>
    %97 = arith.addf %91, %96 : vector<8x1088xf32>
    %98 = vector.extract_strided_slice %56 {offsets = [0, 7], sizes = [8, 1], strides = [1, 1]} : vector<8x8xf32> to vector<8x1xf32>
    %99 = vector.extract_strided_slice %54 {offsets = [7, 0], sizes = [1, 1088], strides = [1, 1]} : vector<8x1088xf32> to vector<1x1088xf32>
    %100 = vector.broadcast %98 : vector<8x1xf32> to vector<8x1088xf32>
    %101 = vector.broadcast %99 : vector<1x1088xf32> to vector<8x1088xf32>
    %102 = arith.mulf %100, %101 : vector<8x1088xf32>
    %103 = arith.addf %97, %102 : vector<8x1088xf32>
    %104 = arith.addf %52, %103 : vector<8x1088xf32>
    %c0_10 = arith.constant 0 : index
    %c0_11 = arith.constant 0 : index
    %c2 = arith.constant 2 : index
    %105 = vector.load %arg2[%c0_10, %c0_11, %c2] : memref<1x8x1158xf32, #tpu.memory_space<vmem>>, vector<1x8x1088xf32>
    %106 = vector.shape_cast %105 : vector<1x8x1088xf32> to vector<8x1088xf32>
    %c2_12 = arith.constant 2 : index
    %c0_13 = arith.constant 0 : index
    %c0_14 = arith.constant 0 : index
    %107 = vector.load %arg3[%c2_12, %c0_13, %c0_14] : memref<9x8x8xf32, #tpu.memory_space<vmem>>, vector<1x8x8xf32>
    %108 = vector.shape_cast %107 : vector<1x8x8xf32> to vector<8x8xf32>
    %109 = vector.extract_strided_slice %108 {offsets = [0, 0], sizes = [8, 1], strides = [1, 1]} : vector<8x8xf32> to vector<8x1xf32>
    %110 = vector.extract_strided_slice %106 {offsets = [0, 0], sizes = [1, 1088], strides = [1, 1]} : vector<8x1088xf32> to vector<1x1088xf32>
    %111 = vector.broadcast %109 : vector<8x1xf32> to vector<8x1088xf32>
    %112 = vector.broadcast %110 : vector<1x1088xf32> to vector<8x1088xf32>
    %113 = arith.mulf %111, %112 : vector<8x1088xf32>
    %114 = vector.extract_strided_slice %108 {offsets = [0, 1], sizes = [8, 1], strides = [1, 1]} : vector<8x8xf32> to vector<8x1xf32>
    %115 = vector.extract_strided_slice %106 {offsets = [1, 0], sizes = [1, 1088], strides = [1, 1]} : vector<8x1088xf32> to vector<1x1088xf32>
    %116 = vector.broadcast %114 : vector<8x1xf32> to vector<8x1088xf32>
    %117 = vector.broadcast %115 : vector<1x1088xf32> to vector<8x1088xf32>
    %118 = arith.mulf %116, %117 : vector<8x1088xf32>
    %119 = arith.addf %113, %118 : vector<8x1088xf32>
    %120 = vector.extract_strided_slice %108 {offsets = [0, 2], sizes = [8, 1], strides = [1, 1]} : vector<8x8xf32> to vector<8x1xf32>
    %121 = vector.extract_strided_slice %106 {offsets = [2, 0], sizes = [1, 1088], strides = [1, 1]} : vector<8x1088xf32> to vector<1x1088xf32>
    %122 = vector.broadcast %120 : vector<8x1xf32> to vector<8x1088xf32>
    %123 = vector.broadcast %121 : vector<1x1088xf32> to vector<8x1088xf32>
    %124 = arith.mulf %122, %123 : vector<8x1088xf32>
    %125 = arith.addf %119, %124 : vector<8x1088xf32>
    %126 = vector.extract_strided_slice %108 {offsets = [0, 3], sizes = [8, 1], strides = [1, 1]} : vector<8x8xf32> to vector<8x1xf32>
    %127 = vector.extract_strided_slice %106 {offsets = [3, 0], sizes = [1, 1088], strides = [1, 1]} : vector<8x1088xf32> to vector<1x1088xf32>
    %128 = vector.broadcast %126 : vector<8x1xf32> to vector<8x1088xf32>
    %129 = vector.broadcast %127 : vector<1x1088xf32> to vector<8x1088xf32>
    %130 = arith.mulf %128, %129 : vector<8x1088xf32>
    %131 = arith.addf %125, %130 : vector<8x1088xf32>
    %132 = vector.extract_strided_slice %108 {offsets = [0, 4], sizes = [8, 1], strides = [1, 1]} : vector<8x8xf32> to vector<8x1xf32>
    %133 = vector.extract_strided_slice %106 {offsets = [4, 0], sizes = [1, 1088], strides = [1, 1]} : vector<8x1088xf32> to vector<1x1088xf32>
    %134 = vector.broadcast %132 : vector<8x1xf32> to vector<8x1088xf32>
    %135 = vector.broadcast %133 : vector<1x1088xf32> to vector<8x1088xf32>
    %136 = arith.mulf %134, %135 : vector<8x1088xf32>
    %137 = arith.addf %131, %136 : vector<8x1088xf32>
    %138 = vector.extract_strided_slice %108 {offsets = [0, 5], sizes = [8, 1], strides = [1, 1]} : vector<8x8xf32> to vector<8x1xf32>
    %139 = vector.extract_strided_slice %106 {offsets = [5, 0], sizes = [1, 1088], strides = [1, 1]} : vector<8x1088xf32> to vector<1x1088xf32>
    %140 = vector.broadcast %138 : vector<8x1xf32> to vector<8x1088xf32>
    %141 = vector.broadcast %139 : vector<1x1088xf32> to vector<8x1088xf32>
    %142 = arith.mulf %140, %141 : vector<8x1088xf32>
    %143 = arith.addf %137, %142 : vector<8x1088xf32>
    %144 = vector.extract_strided_slice %108 {offsets = [0, 6], sizes = [8, 1], strides = [1, 1]} : vector<8x8xf32> to vector<8x1xf32>
    %145 = vector.extract_strided_slice %106 {offsets = [6, 0], sizes = [1, 1088], strides = [1, 1]} : vector<8x1088xf32> to vector<1x1088xf32>
    %146 = vector.broadcast %144 : vector<8x1xf32> to vector<8x1088xf32>
    %147 = vector.broadcast %145 : vector<1x1088xf32> to vector<8x1088xf32>
    %148 = arith.mulf %146, %147 : vector<8x1088xf32>
    %149 = arith.addf %143, %148 : vector<8x1088xf32>
    %150 = vector.extract_strided_slice %108 {offsets = [0, 7], sizes = [8, 1], strides = [1, 1]} : vector<8x8xf32> to vector<8x1xf32>
    %151 = vector.extract_strided_slice %106 {offsets = [7, 0], sizes = [1, 1088], strides = [1, 1]} : vector<8x1088xf32> to vector<1x1088xf32>
    %152 = vector.broadcast %150 : vector<8x1xf32> to vector<8x1088xf32>
    %153 = vector.broadcast %151 : vector<1x1088xf32> to vector<8x1088xf32>
    %154 = arith.mulf %152, %153 : vector<8x1088xf32>
    %155 = arith.addf %149, %154 : vector<8x1088xf32>
    %156 = arith.addf %104, %155 : vector<8x1088xf32>
    %c0_15 = arith.constant 0 : index
    %c0_16 = arith.constant 0 : index
    %c34 = arith.constant 34 : index
    %157 = vector.load %arg2[%c0_15, %c0_16, %c34] : memref<1x8x1158xf32, #tpu.memory_space<vmem>>, vector<1x8x1088xf32>
    %158 = vector.shape_cast %157 : vector<1x8x1088xf32> to vector<8x1088xf32>
    %c3 = arith.constant 3 : index
    %c0_17 = arith.constant 0 : index
    %c0_18 = arith.constant 0 : index
    %159 = vector.load %arg3[%c3, %c0_17, %c0_18] : memref<9x8x8xf32, #tpu.memory_space<vmem>>, vector<1x8x8xf32>
    %160 = vector.shape_cast %159 : vector<1x8x8xf32> to vector<8x8xf32>
    %161 = vector.extract_strided_slice %160 {offsets = [0, 0], sizes = [8, 1], strides = [1, 1]} : vector<8x8xf32> to vector<8x1xf32>
    %162 = vector.extract_strided_slice %158 {offsets = [0, 0], sizes = [1, 1088], strides = [1, 1]} : vector<8x1088xf32> to vector<1x1088xf32>
    %163 = vector.broadcast %161 : vector<8x1xf32> to vector<8x1088xf32>
    %164 = vector.broadcast %162 : vector<1x1088xf32> to vector<8x1088xf32>
    %165 = arith.mulf %163, %164 : vector<8x1088xf32>
    %166 = vector.extract_strided_slice %160 {offsets = [0, 1], sizes = [8, 1], strides = [1, 1]} : vector<8x8xf32> to vector<8x1xf32>
    %167 = vector.extract_strided_slice %158 {offsets = [1, 0], sizes = [1, 1088], strides = [1, 1]} : vector<8x1088xf32> to vector<1x1088xf32>
    %168 = vector.broadcast %166 : vector<8x1xf32> to vector<8x1088xf32>
    %169 = vector.broadcast %167 : vector<1x1088xf32> to vector<8x1088xf32>
    %170 = arith.mulf %168, %169 : vector<8x1088xf32>
    %171 = arith.addf %165, %170 : vector<8x1088xf32>
    %172 = vector.extract_strided_slice %160 {offsets = [0, 2], sizes = [8, 1], strides = [1, 1]} : vector<8x8xf32> to vector<8x1xf32>
    %173 = vector.extract_strided_slice %158 {offsets = [2, 0], sizes = [1, 1088], strides = [1, 1]} : vector<8x1088xf32> to vector<1x1088xf32>
    %174 = vector.broadcast %172 : vector<8x1xf32> to vector<8x1088xf32>
    %175 = vector.broadcast %173 : vector<1x1088xf32> to vector<8x1088xf32>
    %176 = arith.mulf %174, %175 : vector<8x1088xf32>
    %177 = arith.addf %171, %176 : vector<8x1088xf32>
    %178 = vector.extract_strided_slice %160 {offsets = [0, 3], sizes = [8, 1], strides = [1, 1]} : vector<8x8xf32> to vector<8x1xf32>
    %179 = vector.extract_strided_slice %158 {offsets = [3, 0], sizes = [1, 1088], strides = [1, 1]} : vector<8x1088xf32> to vector<1x1088xf32>
    %180 = vector.broadcast %178 : vector<8x1xf32> to vector<8x1088xf32>
    %181 = vector.broadcast %179 : vector<1x1088xf32> to vector<8x1088xf32>
    %182 = arith.mulf %180, %181 : vector<8x1088xf32>
    %183 = arith.addf %177, %182 : vector<8x1088xf32>
    %184 = vector.extract_strided_slice %160 {offsets = [0, 4], sizes = [8, 1], strides = [1, 1]} : vector<8x8xf32> to vector<8x1xf32>
    %185 = vector.extract_strided_slice %158 {offsets = [4, 0], sizes = [1, 1088], strides = [1, 1]} : vector<8x1088xf32> to vector<1x1088xf32>
    %186 = vector.broadcast %184 : vector<8x1xf32> to vector<8x1088xf32>
    %187 = vector.broadcast %185 : vector<1x1088xf32> to vector<8x1088xf32>
    %188 = arith.mulf %186, %187 : vector<8x1088xf32>
    %189 = arith.addf %183, %188 : vector<8x1088xf32>
    %190 = vector.extract_strided_slice %160 {offsets = [0, 5], sizes = [8, 1], strides = [1, 1]} : vector<8x8xf32> to vector<8x1xf32>
    %191 = vector.extract_strided_slice %158 {offsets = [5, 0], sizes = [1, 1088], strides = [1, 1]} : vector<8x1088xf32> to vector<1x1088xf32>
    %192 = vector.broadcast %190 : vector<8x1xf32> to vector<8x1088xf32>
    %193 = vector.broadcast %191 : vector<1x1088xf32> to vector<8x1088xf32>
    %194 = arith.mulf %192, %193 : vector<8x1088xf32>
    %195 = arith.addf %189, %194 : vector<8x1088xf32>
    %196 = vector.extract_strided_slice %160 {offsets = [0, 6], sizes = [8, 1], strides = [1, 1]} : vector<8x8xf32> to vector<8x1xf32>
    %197 = vector.extract_strided_slice %158 {offsets = [6, 0], sizes = [1, 1088], strides = [1, 1]} : vector<8x1088xf32> to vector<1x1088xf32>
    %198 = vector.broadcast %196 : vector<8x1xf32> to vector<8x1088xf32>
    %199 = vector.broadcast %197 : vector<1x1088xf32> to vector<8x1088xf32>
    %200 = arith.mulf %198, %199 : vector<8x1088xf32>
    %201 = arith.addf %195, %200 : vector<8x1088xf32>
    %202 = vector.extract_strided_slice %160 {offsets = [0, 7], sizes = [8, 1], strides = [1, 1]} : vector<8x8xf32> to vector<8x1xf32>
    %203 = vector.extract_strided_slice %158 {offsets = [7, 0], sizes = [1, 1088], strides = [1, 1]} : vector<8x1088xf32> to vector<1x1088xf32>
    %204 = vector.broadcast %202 : vector<8x1xf32> to vector<8x1088xf32>
    %205 = vector.broadcast %203 : vector<1x1088xf32> to vector<8x1088xf32>
    %206 = arith.mulf %204, %205 : vector<8x1088xf32>
    %207 = arith.addf %201, %206 : vector<8x1088xf32>
    %208 = arith.addf %156, %207 : vector<8x1088xf32>
    %c0_19 = arith.constant 0 : index
    %c0_20 = arith.constant 0 : index
    %c35 = arith.constant 35 : index
    %209 = vector.load %arg2[%c0_19, %c0_20, %c35] : memref<1x8x1158xf32, #tpu.memory_space<vmem>>, vector<1x8x1088xf32>
    %210 = vector.shape_cast %209 : vector<1x8x1088xf32> to vector<8x1088xf32>
    %c4 = arith.constant 4 : index
    %c0_21 = arith.constant 0 : index
    %c0_22 = arith.constant 0 : index
    %211 = vector.load %arg3[%c4, %c0_21, %c0_22] : memref<9x8x8xf32, #tpu.memory_space<vmem>>, vector<1x8x8xf32>
    %212 = vector.shape_cast %211 : vector<1x8x8xf32> to vector<8x8xf32>
    %213 = vector.extract_strided_slice %212 {offsets = [0, 0], sizes = [8, 1], strides = [1, 1]} : vector<8x8xf32> to vector<8x1xf32>
    %214 = vector.extract_strided_slice %210 {offsets = [0, 0], sizes = [1, 1088], strides = [1, 1]} : vector<8x1088xf32> to vector<1x1088xf32>
    %215 = vector.broadcast %213 : vector<8x1xf32> to vector<8x1088xf32>
    %216 = vector.broadcast %214 : vector<1x1088xf32> to vector<8x1088xf32>
    %217 = arith.mulf %215, %216 : vector<8x1088xf32>
    %218 = vector.extract_strided_slice %212 {offsets = [0, 1], sizes = [8, 1], strides = [1, 1]} : vector<8x8xf32> to vector<8x1xf32>
    %219 = vector.extract_strided_slice %210 {offsets = [1, 0], sizes = [1, 1088], strides = [1, 1]} : vector<8x1088xf32> to vector<1x1088xf32>
    %220 = vector.broadcast %218 : vector<8x1xf32> to vector<8x1088xf32>
    %221 = vector.broadcast %219 : vector<1x1088xf32> to vector<8x1088xf32>
    %222 = arith.mulf %220, %221 : vector<8x1088xf32>
    %223 = arith.addf %217, %222 : vector<8x1088xf32>
    %224 = vector.extract_strided_slice %212 {offsets = [0, 2], sizes = [8, 1], strides = [1, 1]} : vector<8x8xf32> to vector<8x1xf32>
    %225 = vector.extract_strided_slice %210 {offsets = [2, 0], sizes = [1, 1088], strides = [1, 1]} : vector<8x1088xf32> to vector<1x1088xf32>
    %226 = vector.broadcast %224 : vector<8x1xf32> to vector<8x1088xf32>
    %227 = vector.broadcast %225 : vector<1x1088xf32> to vector<8x1088xf32>
    %228 = arith.mulf %226, %227 : vector<8x1088xf32>
    %229 = arith.addf %223, %228 : vector<8x1088xf32>
    %230 = vector.extract_strided_slice %212 {offsets = [0, 3], sizes = [8, 1], strides = [1, 1]} : vector<8x8xf32> to vector<8x1xf32>
    %231 = vector.extract_strided_slice %210 {offsets = [3, 0], sizes = [1, 1088], strides = [1, 1]} : vector<8x1088xf32> to vector<1x1088xf32>
    %232 = vector.broadcast %230 : vector<8x1xf32> to vector<8x1088xf32>
    %233 = vector.broadcast %231 : vector<1x1088xf32> to vector<8x1088xf32>
    %234 = arith.mulf %232, %233 : vector<8x1088xf32>
    %235 = arith.addf %229, %234 : vector<8x1088xf32>
    %236 = vector.extract_strided_slice %212 {offsets = [0, 4], sizes = [8, 1], strides = [1, 1]} : vector<8x8xf32> to vector<8x1xf32>
    %237 = vector.extract_strided_slice %210 {offsets = [4, 0], sizes = [1, 1088], strides = [1, 1]} : vector<8x1088xf32> to vector<1x1088xf32>
    %238 = vector.broadcast %236 : vector<8x1xf32> to vector<8x1088xf32>
    %239 = vector.broadcast %237 : vector<1x1088xf32> to vector<8x1088xf32>
    %240 = arith.mulf %238, %239 : vector<8x1088xf32>
    %241 = arith.addf %235, %240 : vector<8x1088xf32>
    %242 = vector.extract_strided_slice %212 {offsets = [0, 5], sizes = [8, 1], strides = [1, 1]} : vector<8x8xf32> to vector<8x1xf32>
    %243 = vector.extract_strided_slice %210 {offsets = [5, 0], sizes = [1, 1088], strides = [1, 1]} : vector<8x1088xf32> to vector<1x1088xf32>
    %244 = vector.broadcast %242 : vector<8x1xf32> to vector<8x1088xf32>
    %245 = vector.broadcast %243 : vector<1x1088xf32> to vector<8x1088xf32>
    %246 = arith.mulf %244, %245 : vector<8x1088xf32>
    %247 = arith.addf %241, %246 : vector<8x1088xf32>
    %248 = vector.extract_strided_slice %212 {offsets = [0, 6], sizes = [8, 1], strides = [1, 1]} : vector<8x8xf32> to vector<8x1xf32>
    %249 = vector.extract_strided_slice %210 {offsets = [6, 0], sizes = [1, 1088], strides = [1, 1]} : vector<8x1088xf32> to vector<1x1088xf32>
    %250 = vector.broadcast %248 : vector<8x1xf32> to vector<8x1088xf32>
    %251 = vector.broadcast %249 : vector<1x1088xf32> to vector<8x1088xf32>
    %252 = arith.mulf %250, %251 : vector<8x1088xf32>
    %253 = arith.addf %247, %252 : vector<8x1088xf32>
    %254 = vector.extract_strided_slice %212 {offsets = [0, 7], sizes = [8, 1], strides = [1, 1]} : vector<8x8xf32> to vector<8x1xf32>
    %255 = vector.extract_strided_slice %210 {offsets = [7, 0], sizes = [1, 1088], strides = [1, 1]} : vector<8x1088xf32> to vector<1x1088xf32>
    %256 = vector.broadcast %254 : vector<8x1xf32> to vector<8x1088xf32>
    %257 = vector.broadcast %255 : vector<1x1088xf32> to vector<8x1088xf32>
    %258 = arith.mulf %256, %257 : vector<8x1088xf32>
    %259 = arith.addf %253, %258 : vector<8x1088xf32>
    %260 = arith.addf %208, %259 : vector<8x1088xf32>
    %c0_23 = arith.constant 0 : index
    %c0_24 = arith.constant 0 : index
    %c36 = arith.constant 36 : index
    %261 = vector.load %arg2[%c0_23, %c0_24, %c36] : memref<1x8x1158xf32, #tpu.memory_space<vmem>>, vector<1x8x1088xf32>
    %262 = vector.shape_cast %261 : vector<1x8x1088xf32> to vector<8x1088xf32>
    %c5 = arith.constant 5 : index
    %c0_25 = arith.constant 0 : index
    %c0_26 = arith.constant 0 : index
    %263 = vector.load %arg3[%c5, %c0_25, %c0_26] : memref<9x8x8xf32, #tpu.memory_space<vmem>>, vector<1x8x8xf32>
    %264 = vector.shape_cast %263 : vector<1x8x8xf32> to vector<8x8xf32>
    %265 = vector.extract_strided_slice %264 {offsets = [0, 0], sizes = [8, 1], strides = [1, 1]} : vector<8x8xf32> to vector<8x1xf32>
    %266 = vector.extract_strided_slice %262 {offsets = [0, 0], sizes = [1, 1088], strides = [1, 1]} : vector<8x1088xf32> to vector<1x1088xf32>
    %267 = vector.broadcast %265 : vector<8x1xf32> to vector<8x1088xf32>
    %268 = vector.broadcast %266 : vector<1x1088xf32> to vector<8x1088xf32>
    %269 = arith.mulf %267, %268 : vector<8x1088xf32>
    %270 = vector.extract_strided_slice %264 {offsets = [0, 1], sizes = [8, 1], strides = [1, 1]} : vector<8x8xf32> to vector<8x1xf32>
    %271 = vector.extract_strided_slice %262 {offsets = [1, 0], sizes = [1, 1088], strides = [1, 1]} : vector<8x1088xf32> to vector<1x1088xf32>
    %272 = vector.broadcast %270 : vector<8x1xf32> to vector<8x1088xf32>
    %273 = vector.broadcast %271 : vector<1x1088xf32> to vector<8x1088xf32>
    %274 = arith.mulf %272, %273 : vector<8x1088xf32>
    %275 = arith.addf %269, %274 : vector<8x1088xf32>
    %276 = vector.extract_strided_slice %264 {offsets = [0, 2], sizes = [8, 1], strides = [1, 1]} : vector<8x8xf32> to vector<8x1xf32>
    %277 = vector.extract_strided_slice %262 {offsets = [2, 0], sizes = [1, 1088], strides = [1, 1]} : vector<8x1088xf32> to vector<1x1088xf32>
    %278 = vector.broadcast %276 : vector<8x1xf32> to vector<8x1088xf32>
    %279 = vector.broadcast %277 : vector<1x1088xf32> to vector<8x1088xf32>
    %280 = arith.mulf %278, %279 : vector<8x1088xf32>
    %281 = arith.addf %275, %280 : vector<8x1088xf32>
    %282 = vector.extract_strided_slice %264 {offsets = [0, 3], sizes = [8, 1], strides = [1, 1]} : vector<8x8xf32> to vector<8x1xf32>
    %283 = vector.extract_strided_slice %262 {offsets = [3, 0], sizes = [1, 1088], strides = [1, 1]} : vector<8x1088xf32> to vector<1x1088xf32>
    %284 = vector.broadcast %282 : vector<8x1xf32> to vector<8x1088xf32>
    %285 = vector.broadcast %283 : vector<1x1088xf32> to vector<8x1088xf32>
    %286 = arith.mulf %284, %285 : vector<8x1088xf32>
    %287 = arith.addf %281, %286 : vector<8x1088xf32>
    %288 = vector.extract_strided_slice %264 {offsets = [0, 4], sizes = [8, 1], strides = [1, 1]} : vector<8x8xf32> to vector<8x1xf32>
    %289 = vector.extract_strided_slice %262 {offsets = [4, 0], sizes = [1, 1088], strides = [1, 1]} : vector<8x1088xf32> to vector<1x1088xf32>
    %290 = vector.broadcast %288 : vector<8x1xf32> to vector<8x1088xf32>
    %291 = vector.broadcast %289 : vector<1x1088xf32> to vector<8x1088xf32>
    %292 = arith.mulf %290, %291 : vector<8x1088xf32>
    %293 = arith.addf %287, %292 : vector<8x1088xf32>
    %294 = vector.extract_strided_slice %264 {offsets = [0, 5], sizes = [8, 1], strides = [1, 1]} : vector<8x8xf32> to vector<8x1xf32>
    %295 = vector.extract_strided_slice %262 {offsets = [5, 0], sizes = [1, 1088], strides = [1, 1]} : vector<8x1088xf32> to vector<1x1088xf32>
    %296 = vector.broadcast %294 : vector<8x1xf32> to vector<8x1088xf32>
    %297 = vector.broadcast %295 : vector<1x1088xf32> to vector<8x1088xf32>
    %298 = arith.mulf %296, %297 : vector<8x1088xf32>
    %299 = arith.addf %293, %298 : vector<8x1088xf32>
    %300 = vector.extract_strided_slice %264 {offsets = [0, 6], sizes = [8, 1], strides = [1, 1]} : vector<8x8xf32> to vector<8x1xf32>
    %301 = vector.extract_strided_slice %262 {offsets = [6, 0], sizes = [1, 1088], strides = [1, 1]} : vector<8x1088xf32> to vector<1x1088xf32>
    %302 = vector.broadcast %300 : vector<8x1xf32> to vector<8x1088xf32>
    %303 = vector.broadcast %301 : vector<1x1088xf32> to vector<8x1088xf32>
    %304 = arith.mulf %302, %303 : vector<8x1088xf32>
    %305 = arith.addf %299, %304 : vector<8x1088xf32>
    %306 = vector.extract_strided_slice %264 {offsets = [0, 7], sizes = [8, 1], strides = [1, 1]} : vector<8x8xf32> to vector<8x1xf32>
    %307 = vector.extract_strided_slice %262 {offsets = [7, 0], sizes = [1, 1088], strides = [1, 1]} : vector<8x1088xf32> to vector<1x1088xf32>
    %308 = vector.broadcast %306 : vector<8x1xf32> to vector<8x1088xf32>
    %309 = vector.broadcast %307 : vector<1x1088xf32> to vector<8x1088xf32>
    %310 = arith.mulf %308, %309 : vector<8x1088xf32>
    %311 = arith.addf %305, %310 : vector<8x1088xf32>
    %312 = arith.addf %260, %311 : vector<8x1088xf32>
    %c0_27 = arith.constant 0 : index
    %c0_28 = arith.constant 0 : index
    %c68 = arith.constant 68 : index
    %313 = vector.load %arg2[%c0_27, %c0_28, %c68] : memref<1x8x1158xf32, #tpu.memory_space<vmem>>, vector<1x8x1088xf32>
    %314 = vector.shape_cast %313 : vector<1x8x1088xf32> to vector<8x1088xf32>
    %c6 = arith.constant 6 : index
    %c0_29 = arith.constant 0 : index
    %c0_30 = arith.constant 0 : index
    %315 = vector.load %arg3[%c6, %c0_29, %c0_30] : memref<9x8x8xf32, #tpu.memory_space<vmem>>, vector<1x8x8xf32>
    %316 = vector.shape_cast %315 : vector<1x8x8xf32> to vector<8x8xf32>
    %317 = vector.extract_strided_slice %316 {offsets = [0, 0], sizes = [8, 1], strides = [1, 1]} : vector<8x8xf32> to vector<8x1xf32>
    %318 = vector.extract_strided_slice %314 {offsets = [0, 0], sizes = [1, 1088], strides = [1, 1]} : vector<8x1088xf32> to vector<1x1088xf32>
    %319 = vector.broadcast %317 : vector<8x1xf32> to vector<8x1088xf32>
    %320 = vector.broadcast %318 : vector<1x1088xf32> to vector<8x1088xf32>
    %321 = arith.mulf %319, %320 : vector<8x1088xf32>
    %322 = vector.extract_strided_slice %316 {offsets = [0, 1], sizes = [8, 1], strides = [1, 1]} : vector<8x8xf32> to vector<8x1xf32>
    %323 = vector.extract_strided_slice %314 {offsets = [1, 0], sizes = [1, 1088], strides = [1, 1]} : vector<8x1088xf32> to vector<1x1088xf32>
    %324 = vector.broadcast %322 : vector<8x1xf32> to vector<8x1088xf32>
    %325 = vector.broadcast %323 : vector<1x1088xf32> to vector<8x1088xf32>
    %326 = arith.mulf %324, %325 : vector<8x1088xf32>
    %327 = arith.addf %321, %326 : vector<8x1088xf32>
    %328 = vector.extract_strided_slice %316 {offsets = [0, 2], sizes = [8, 1], strides = [1, 1]} : vector<8x8xf32> to vector<8x1xf32>
    %329 = vector.extract_strided_slice %314 {offsets = [2, 0], sizes = [1, 1088], strides = [1, 1]} : vector<8x1088xf32> to vector<1x1088xf32>
    %330 = vector.broadcast %328 : vector<8x1xf32> to vector<8x1088xf32>
    %331 = vector.broadcast %329 : vector<1x1088xf32> to vector<8x1088xf32>
    %332 = arith.mulf %330, %331 : vector<8x1088xf32>
    %333 = arith.addf %327, %332 : vector<8x1088xf32>
    %334 = vector.extract_strided_slice %316 {offsets = [0, 3], sizes = [8, 1], strides = [1, 1]} : vector<8x8xf32> to vector<8x1xf32>
    %335 = vector.extract_strided_slice %314 {offsets = [3, 0], sizes = [1, 1088], strides = [1, 1]} : vector<8x1088xf32> to vector<1x1088xf32>
    %336 = vector.broadcast %334 : vector<8x1xf32> to vector<8x1088xf32>
    %337 = vector.broadcast %335 : vector<1x1088xf32> to vector<8x1088xf32>
    %338 = arith.mulf %336, %337 : vector<8x1088xf32>
    %339 = arith.addf %333, %338 : vector<8x1088xf32>
    %340 = vector.extract_strided_slice %316 {offsets = [0, 4], sizes = [8, 1], strides = [1, 1]} : vector<8x8xf32> to vector<8x1xf32>
    %341 = vector.extract_strided_slice %314 {offsets = [4, 0], sizes = [1, 1088], strides = [1, 1]} : vector<8x1088xf32> to vector<1x1088xf32>
    %342 = vector.broadcast %340 : vector<8x1xf32> to vector<8x1088xf32>
    %343 = vector.broadcast %341 : vector<1x1088xf32> to vector<8x1088xf32>
    %344 = arith.mulf %342, %343 : vector<8x1088xf32>
    %345 = arith.addf %339, %344 : vector<8x1088xf32>
    %346 = vector.extract_strided_slice %316 {offsets = [0, 5], sizes = [8, 1], strides = [1, 1]} : vector<8x8xf32> to vector<8x1xf32>
    %347 = vector.extract_strided_slice %314 {offsets = [5, 0], sizes = [1, 1088], strides = [1, 1]} : vector<8x1088xf32> to vector<1x1088xf32>
    %348 = vector.broadcast %346 : vector<8x1xf32> to vector<8x1088xf32>
    %349 = vector.broadcast %347 : vector<1x1088xf32> to vector<8x1088xf32>
    %350 = arith.mulf %348, %349 : vector<8x1088xf32>
    %351 = arith.addf %345, %350 : vector<8x1088xf32>
    %352 = vector.extract_strided_slice %316 {offsets = [0, 6], sizes = [8, 1], strides = [1, 1]} : vector<8x8xf32> to vector<8x1xf32>
    %353 = vector.extract_strided_slice %314 {offsets = [6, 0], sizes = [1, 1088], strides = [1, 1]} : vector<8x1088xf32> to vector<1x1088xf32>
    %354 = vector.broadcast %352 : vector<8x1xf32> to vector<8x1088xf32>
    %355 = vector.broadcast %353 : vector<1x1088xf32> to vector<8x1088xf32>
    %356 = arith.mulf %354, %355 : vector<8x1088xf32>
    %357 = arith.addf %351, %356 : vector<8x1088xf32>
    %358 = vector.extract_strided_slice %316 {offsets = [0, 7], sizes = [8, 1], strides = [1, 1]} : vector<8x8xf32> to vector<8x1xf32>
    %359 = vector.extract_strided_slice %314 {offsets = [7, 0], sizes = [1, 1088], strides = [1, 1]} : vector<8x1088xf32> to vector<1x1088xf32>
    %360 = vector.broadcast %358 : vector<8x1xf32> to vector<8x1088xf32>
    %361 = vector.broadcast %359 : vector<1x1088xf32> to vector<8x1088xf32>
    %362 = arith.mulf %360, %361 : vector<8x1088xf32>
    %363 = arith.addf %357, %362 : vector<8x1088xf32>
    %364 = arith.addf %312, %363 : vector<8x1088xf32>
    %c0_31 = arith.constant 0 : index
    %c0_32 = arith.constant 0 : index
    %c69 = arith.constant 69 : index
    %365 = vector.load %arg2[%c0_31, %c0_32, %c69] : memref<1x8x1158xf32, #tpu.memory_space<vmem>>, vector<1x8x1088xf32>
    %366 = vector.shape_cast %365 : vector<1x8x1088xf32> to vector<8x1088xf32>
    %c7 = arith.constant 7 : index
    %c0_33 = arith.constant 0 : index
    %c0_34 = arith.constant 0 : index
    %367 = vector.load %arg3[%c7, %c0_33, %c0_34] : memref<9x8x8xf32, #tpu.memory_space<vmem>>, vector<1x8x8xf32>
    %368 = vector.shape_cast %367 : vector<1x8x8xf32> to vector<8x8xf32>
    %369 = vector.extract_strided_slice %368 {offsets = [0, 0], sizes = [8, 1], strides = [1, 1]} : vector<8x8xf32> to vector<8x1xf32>
    %370 = vector.extract_strided_slice %366 {offsets = [0, 0], sizes = [1, 1088], strides = [1, 1]} : vector<8x1088xf32> to vector<1x1088xf32>
    %371 = vector.broadcast %369 : vector<8x1xf32> to vector<8x1088xf32>
    %372 = vector.broadcast %370 : vector<1x1088xf32> to vector<8x1088xf32>
    %373 = arith.mulf %371, %372 : vector<8x1088xf32>
    %374 = vector.extract_strided_slice %368 {offsets = [0, 1], sizes = [8, 1], strides = [1, 1]} : vector<8x8xf32> to vector<8x1xf32>
    %375 = vector.extract_strided_slice %366 {offsets = [1, 0], sizes = [1, 1088], strides = [1, 1]} : vector<8x1088xf32> to vector<1x1088xf32>
    %376 = vector.broadcast %374 : vector<8x1xf32> to vector<8x1088xf32>
    %377 = vector.broadcast %375 : vector<1x1088xf32> to vector<8x1088xf32>
    %378 = arith.mulf %376, %377 : vector<8x1088xf32>
    %379 = arith.addf %373, %378 : vector<8x1088xf32>
    %380 = vector.extract_strided_slice %368 {offsets = [0, 2], sizes = [8, 1], strides = [1, 1]} : vector<8x8xf32> to vector<8x1xf32>
    %381 = vector.extract_strided_slice %366 {offsets = [2, 0], sizes = [1, 1088], strides = [1, 1]} : vector<8x1088xf32> to vector<1x1088xf32>
    %382 = vector.broadcast %380 : vector<8x1xf32> to vector<8x1088xf32>
    %383 = vector.broadcast %381 : vector<1x1088xf32> to vector<8x1088xf32>
    %384 = arith.mulf %382, %383 : vector<8x1088xf32>
    %385 = arith.addf %379, %384 : vector<8x1088xf32>
    %386 = vector.extract_strided_slice %368 {offsets = [0, 3], sizes = [8, 1], strides = [1, 1]} : vector<8x8xf32> to vector<8x1xf32>
    %387 = vector.extract_strided_slice %366 {offsets = [3, 0], sizes = [1, 1088], strides = [1, 1]} : vector<8x1088xf32> to vector<1x1088xf32>
    %388 = vector.broadcast %386 : vector<8x1xf32> to vector<8x1088xf32>
    %389 = vector.broadcast %387 : vector<1x1088xf32> to vector<8x1088xf32>
    %390 = arith.mulf %388, %389 : vector<8x1088xf32>
    %391 = arith.addf %385, %390 : vector<8x1088xf32>
    %392 = vector.extract_strided_slice %368 {offsets = [0, 4], sizes = [8, 1], strides = [1, 1]} : vector<8x8xf32> to vector<8x1xf32>
    %393 = vector.extract_strided_slice %366 {offsets = [4, 0], sizes = [1, 1088], strides = [1, 1]} : vector<8x1088xf32> to vector<1x1088xf32>
    %394 = vector.broadcast %392 : vector<8x1xf32> to vector<8x1088xf32>
    %395 = vector.broadcast %393 : vector<1x1088xf32> to vector<8x1088xf32>
    %396 = arith.mulf %394, %395 : vector<8x1088xf32>
    %397 = arith.addf %391, %396 : vector<8x1088xf32>
    %398 = vector.extract_strided_slice %368 {offsets = [0, 5], sizes = [8, 1], strides = [1, 1]} : vector<8x8xf32> to vector<8x1xf32>
    %399 = vector.extract_strided_slice %366 {offsets = [5, 0], sizes = [1, 1088], strides = [1, 1]} : vector<8x1088xf32> to vector<1x1088xf32>
    %400 = vector.broadcast %398 : vector<8x1xf32> to vector<8x1088xf32>
    %401 = vector.broadcast %399 : vector<1x1088xf32> to vector<8x1088xf32>
    %402 = arith.mulf %400, %401 : vector<8x1088xf32>
    %403 = arith.addf %397, %402 : vector<8x1088xf32>
    %404 = vector.extract_strided_slice %368 {offsets = [0, 6], sizes = [8, 1], strides = [1, 1]} : vector<8x8xf32> to vector<8x1xf32>
    %405 = vector.extract_strided_slice %366 {offsets = [6, 0], sizes = [1, 1088], strides = [1, 1]} : vector<8x1088xf32> to vector<1x1088xf32>
    %406 = vector.broadcast %404 : vector<8x1xf32> to vector<8x1088xf32>
    %407 = vector.broadcast %405 : vector<1x1088xf32> to vector<8x1088xf32>
    %408 = arith.mulf %406, %407 : vector<8x1088xf32>
    %409 = arith.addf %403, %408 : vector<8x1088xf32>
    %410 = vector.extract_strided_slice %368 {offsets = [0, 7], sizes = [8, 1], strides = [1, 1]} : vector<8x8xf32> to vector<8x1xf32>
    %411 = vector.extract_strided_slice %366 {offsets = [7, 0], sizes = [1, 1088], strides = [1, 1]} : vector<8x1088xf32> to vector<1x1088xf32>
    %412 = vector.broadcast %410 : vector<8x1xf32> to vector<8x1088xf32>
    %413 = vector.broadcast %411 : vector<1x1088xf32> to vector<8x1088xf32>
    %414 = arith.mulf %412, %413 : vector<8x1088xf32>
    %415 = arith.addf %409, %414 : vector<8x1088xf32>
    %416 = arith.addf %364, %415 : vector<8x1088xf32>
    %c0_35 = arith.constant 0 : index
    %c0_36 = arith.constant 0 : index
    %c70 = arith.constant 70 : index
    %417 = vector.load %arg2[%c0_35, %c0_36, %c70] : memref<1x8x1158xf32, #tpu.memory_space<vmem>>, vector<1x8x1088xf32>
    %418 = vector.shape_cast %417 : vector<1x8x1088xf32> to vector<8x1088xf32>
    %c8 = arith.constant 8 : index
    %c0_37 = arith.constant 0 : index
    %c0_38 = arith.constant 0 : index
    %419 = vector.load %arg3[%c8, %c0_37, %c0_38] : memref<9x8x8xf32, #tpu.memory_space<vmem>>, vector<1x8x8xf32>
    %420 = vector.shape_cast %419 : vector<1x8x8xf32> to vector<8x8xf32>
    %421 = vector.extract_strided_slice %420 {offsets = [0, 0], sizes = [8, 1], strides = [1, 1]} : vector<8x8xf32> to vector<8x1xf32>
    %422 = vector.extract_strided_slice %418 {offsets = [0, 0], sizes = [1, 1088], strides = [1, 1]} : vector<8x1088xf32> to vector<1x1088xf32>
    %423 = vector.broadcast %421 : vector<8x1xf32> to vector<8x1088xf32>
    %424 = vector.broadcast %422 : vector<1x1088xf32> to vector<8x1088xf32>
    %425 = arith.mulf %423, %424 : vector<8x1088xf32>
    %426 = vector.extract_strided_slice %420 {offsets = [0, 1], sizes = [8, 1], strides = [1, 1]} : vector<8x8xf32> to vector<8x1xf32>
    %427 = vector.extract_strided_slice %418 {offsets = [1, 0], sizes = [1, 1088], strides = [1, 1]} : vector<8x1088xf32> to vector<1x1088xf32>
    %428 = vector.broadcast %426 : vector<8x1xf32> to vector<8x1088xf32>
    %429 = vector.broadcast %427 : vector<1x1088xf32> to vector<8x1088xf32>
    %430 = arith.mulf %428, %429 : vector<8x1088xf32>
    %431 = arith.addf %425, %430 : vector<8x1088xf32>
    %432 = vector.extract_strided_slice %420 {offsets = [0, 2], sizes = [8, 1], strides = [1, 1]} : vector<8x8xf32> to vector<8x1xf32>
    %433 = vector.extract_strided_slice %418 {offsets = [2, 0], sizes = [1, 1088], strides = [1, 1]} : vector<8x1088xf32> to vector<1x1088xf32>
    %434 = vector.broadcast %432 : vector<8x1xf32> to vector<8x1088xf32>
    %435 = vector.broadcast %433 : vector<1x1088xf32> to vector<8x1088xf32>
    %436 = arith.mulf %434, %435 : vector<8x1088xf32>
    %437 = arith.addf %431, %436 : vector<8x1088xf32>
    %438 = vector.extract_strided_slice %420 {offsets = [0, 3], sizes = [8, 1], strides = [1, 1]} : vector<8x8xf32> to vector<8x1xf32>
    %439 = vector.extract_strided_slice %418 {offsets = [3, 0], sizes = [1, 1088], strides = [1, 1]} : vector<8x1088xf32> to vector<1x1088xf32>
    %440 = vector.broadcast %438 : vector<8x1xf32> to vector<8x1088xf32>
    %441 = vector.broadcast %439 : vector<1x1088xf32> to vector<8x1088xf32>
    %442 = arith.mulf %440, %441 : vector<8x1088xf32>
    %443 = arith.addf %437, %442 : vector<8x1088xf32>
    %444 = vector.extract_strided_slice %420 {offsets = [0, 4], sizes = [8, 1], strides = [1, 1]} : vector<8x8xf32> to vector<8x1xf32>
    %445 = vector.extract_strided_slice %418 {offsets = [4, 0], sizes = [1, 1088], strides = [1, 1]} : vector<8x1088xf32> to vector<1x1088xf32>
    %446 = vector.broadcast %444 : vector<8x1xf32> to vector<8x1088xf32>
    %447 = vector.broadcast %445 : vector<1x1088xf32> to vector<8x1088xf32>
    %448 = arith.mulf %446, %447 : vector<8x1088xf32>
    %449 = arith.addf %443, %448 : vector<8x1088xf32>
    %450 = vector.extract_strided_slice %420 {offsets = [0, 5], sizes = [8, 1], strides = [1, 1]} : vector<8x8xf32> to vector<8x1xf32>
    %451 = vector.extract_strided_slice %418 {offsets = [5, 0], sizes = [1, 1088], strides = [1, 1]} : vector<8x1088xf32> to vector<1x1088xf32>
    %452 = vector.broadcast %450 : vector<8x1xf32> to vector<8x1088xf32>
    %453 = vector.broadcast %451 : vector<1x1088xf32> to vector<8x1088xf32>
    %454 = arith.mulf %452, %453 : vector<8x1088xf32>
    %455 = arith.addf %449, %454 : vector<8x1088xf32>
    %456 = vector.extract_strided_slice %420 {offsets = [0, 6], sizes = [8, 1], strides = [1, 1]} : vector<8x8xf32> to vector<8x1xf32>
    %457 = vector.extract_strided_slice %418 {offsets = [6, 0], sizes = [1, 1088], strides = [1, 1]} : vector<8x1088xf32> to vector<1x1088xf32>
    %458 = vector.broadcast %456 : vector<8x1xf32> to vector<8x1088xf32>
    %459 = vector.broadcast %457 : vector<1x1088xf32> to vector<8x1088xf32>
    %460 = arith.mulf %458, %459 : vector<8x1088xf32>
    %461 = arith.addf %455, %460 : vector<8x1088xf32>
    %462 = vector.extract_strided_slice %420 {offsets = [0, 7], sizes = [8, 1], strides = [1, 1]} : vector<8x8xf32> to vector<8x1xf32>
    %463 = vector.extract_strided_slice %418 {offsets = [7, 0], sizes = [1, 1088], strides = [1, 1]} : vector<8x1088xf32> to vector<1x1088xf32>
    %464 = vector.broadcast %462 : vector<8x1xf32> to vector<8x1088xf32>
    %465 = vector.broadcast %463 : vector<1x1088xf32> to vector<8x1088xf32>
    %466 = arith.mulf %464, %465 : vector<8x1088xf32>
    %467 = arith.addf %461, %466 : vector<8x1088xf32>
    %468 = arith.addf %416, %467 : vector<8x1088xf32>
    %c0_39 = arith.constant 0 : index
    %c0_40 = arith.constant 0 : index
    %469 = vector.load %arg4[%c0_39, %c0_40] : memref<8x1xf32, #tpu.memory_space<vmem>>, vector<8x1xf32>
    %470 = vector.broadcast %469 : vector<8x1xf32> to vector<8x1088xf32>
    %471 = arith.addf %468, %470 : vector<8x1088xf32>
    %cst_41 = arith.constant 0.000000e+00 : f32
    %472 = vector.broadcast %cst_41 : f32 to vector<8x1088xf32>
    %473 = arith.maximumf %471, %472 : vector<8x1088xf32>
    %c0_42 = arith.constant 0 : index
    %c0_43 = arith.constant 0 : index
    %c0_44 = arith.constant 0 : index
    %474 = vector.load %arg5[%c0_42, %c0_43, %c0_44] : memref<1x8x1088xf32, #tpu.memory_space<vmem>>, vector<1x8x1088xf32>
    %475 = vector.shape_cast %474 : vector<1x8x1088xf32> to vector<8x1088xf32>
    %476 = vector.shape_cast %473 : vector<8x1088xf32> to vector<1x8x1088xf32>
    tpu.vector_store %arg5[%c0_42, %c0_43, %c0_44], %476 {strides = array<i32>} : memref<1x8x1088xf32, #tpu.memory_space<vmem>>, vector<1x8x1088xf32>,
    return
  }
  func.func @transform_0(%arg0: i32, %arg1: i32) -> (i32, i32, i32) {
    %c0_i32 = arith.constant 0 : i32
    %c0_i32_0 = arith.constant 0 : i32
    %c0_i32_1 = arith.constant 0 : i32
    return %arg0, %c0_i32, %c0_i32_0 : i32, i32, i32
  }
  func.func @transform_1(%arg0: i32, %arg1: i32) -> (i32, i32, i32) {
    %c0_i32 = arith.constant 0 : i32
    %c0_i32_0 = arith.constant 0 : i32
    %c0_i32_1 = arith.constant 0 : i32
    return %c0_i32, %arg1, %c0_i32_0 : i32, i32, i32
  }
  func.func @transform_2(%arg0: i32, %arg1: i32) -> (i32, i32) {
    %c0_i32 = arith.constant 0 : i32
    %c0_i32_0 = arith.constant 0 : i32
    return %arg1, %c0_i32 : i32, i32
  }
  func.func @transform_3(%arg0: i32, %arg1: i32) -> (i32, i32, i32) {
    %c0_i32 = arith.constant 0 : i32
    %c0_i32_0 = arith.constant 0 : i32
    return %arg0, %arg1, %c0_i32 : i32, i32, i32
  }
}

</mosaic_0001>

<bundles_post_ra>
// kernel: up_noskip_forward.3
= control target key start
LH: loop header
LB: loop body
LE: loop exit
PB: predicated region body
PF: predicated region fallthrough
CT: control target
= control target key end

     0   :  { %s644_s12 = smov 0   ;;  %s646_s13 = smov 0   ;;  %s700_s0 = inlined_call_operand.vmem [shape: f32[2,4,256], index: 0, kind: input, shape index: {}]   ;;  %s701_s1 = inlined_call_operand.vmem [shape: f32[4,4,4], index: 1, kind: input, shape index: {}]   ;;  %s702_s2 = inlined_call_operand.vmem [shape: f32[4,1], index: 2, kind: input, shape index: {}]   ;;  %s703_s3 = inlined_call_operand.vmem [shape: f32[2,4,4,256], index: 3, kind: output, shape index: {}]  }
   0x1   :  { %s648_s14 = smov 0  }
   0x2 LB: > { %s25_s15 = sadd.s32 1, %s614_s13  ;;  %p543_p0 = scmp.ge.s32.totalorder %s618_s14, 1  ;;  %s618_s14 = sphi %s648_s14, %s13_s14   ;;  %s614_s13 = sphi %s646_s13, %s705_s13   ;;  %s610_s12 = sphi %s644_s12, %s704_s12  }
   0x3   : > { %p27_p1 = scmp.ge.s32.totalorder %s25_s15, 2  ;;  %p158_p2 = scmp.lt.s32.totalorder %s618_s14, 3 }
   0x5   : > { %s707_s15 = smov (%p27_p1, %s25_s15), 0  ;;  %p159_p3 = pnand %p543_p0, %p158_p2 }
   0x6   : > { %p191_p4 = scmp.lt.s32.totalorder (!%p159_p3), %s610_s12, 1 }
   0x7   : > { %162 = sbr.rel (%p159_p3) target bundleno = 185 (0xb9), region = 32 }
   0xc   : > { %v548_v0 = vld [vmem:[%s701_s1 + $0x4] sm:$0xf]  ;;  %v212_v1 = vld [vmem:[%s701_s1] sm:$0xf]  ;;  %v620_v2 = vmov 0   ;;  %v621_v3 = vmov 1   ;;  %v219_v13 = vlaneseq }
   0xd   : > { %588 = vset.pattern.permute.xlu1 %v620_v2  ;;  %586 = vset.pattern.permute.xlu0 %v620_v2  ;;  %v550_v4 = vld [vmem:[%s701_s1 + $0x8] sm:$0xf]  ;;  %v552_v5 = vld [vmem:[%s701_s1 + $0xc] sm:$0xf]  ;;  %v622_v6 = vmov 2   ;;  %v623_v7 = vmov 3  }
   0xe   : > { %333 = vperm.xlu1 %588, %v548_v0   ;;  %215 = vperm.xlu0 %586, %v212_v1   ;;  %v211_v8 = vld [vmem:[%s702_s2] sm:$0xf]  ;;  %s709_s12 = smov (!%p191_p4, %s610_s12), 1  ;;  %v220_v14 = vshrl.u32 %v219_v13, 7 }
   0xf   : > { %s556_s26 = sshll.u32 %s709_s12, 3  ;;  %s557_s30 = sshll.u32 %s709_s12, 5 }
  0x10   : > { %s198_s29 = scalar_lea.vmem %s700_s0, %s556_s26  ;;  %v221_v17 = vsub.s32 0, %v220_v14  ;;  %v225_v18 = vsub.s32 4, %v220_v14  ;;  %v245_v21 = vsub.s32 1, %v220_v14  ;;  %v249_v22 = vsub.s32 5, %v220_v14  ;;  %s208_s6 = scalar_lea.vmem %s703_s3, %s557_s30 }
  0x11   : > { %v210_v20 = vld [vmem:[%s198_s29] sm:$0xff]  ;;  %v271_v24 = vsub.s32 2, %v220_v14  ;;  %v275_v25 = vsub.s32 6, %v220_v14  ;;  %v297_v33 = vsub.s32 3, %v220_v14  ;;  %v301_v34 = vsub.s32 7, %v220_v14 }
  0x12   : > { %589 = vset.pattern.permute.xlu1 %v621_v3  ;;  %587 = vset.pattern.permute.xlu0 %v621_v3  ;;  %v222_v26 = vrot.slane %v210_v20, %v221_v17  ;;  %v226_v27 = vrot.slane %v210_v20, %v225_v18  ;;  %v246_v28 = vrot.slane %v210_v20, %v245_v21 }
  0x13   : > { %339 = vperm.xlu1 %589, %v548_v0   ;;  %240 = vperm.xlu0 %587, %v212_v1   ;;  %v250_v29 = vrot.slane %v210_v20, %v249_v22  ;;  %v272_v31 = vrot.slane %v210_v20, %v271_v24  ;;  %v276_v32 = vrot.slane %v210_v20, %v275_v25 }
  0x14   : > { %v232_v35 = vrot.slane %v222_v26, %v221_v17  ;;  %v236_v36 = vrot.slane %v226_v27, %v221_v17  ;;  %v256_v37 = vrot.slane %v246_v28, %v245_v21  ;;  %v298_v43 = vrot.slane %v210_v20, %v297_v33 }
  0x15   : > { %v260_v38 = vrot.slane %v250_v29, %v245_v21  ;;  %v282_v41 = vrot.slane %v272_v31, %v271_v24  ;;  %v286_v42 = vrot.slane %v276_v32, %v271_v24  ;;  %v302_v44 = vrot.slane %v210_v20, %v301_v34 }
  0x16   : > { %v308_v63 = vrot.slane %v298_v43, %v297_v33 }
  0x17   : > { %590 = vset.pattern.permute.xlu1 %v620_v2  ;;  %380 = vperm.xlu0 %587, %v550_v4  }
  0x18   : > { %374 = vperm.xlu1 %590, %v550_v4  }
  0x1b   : > { %421 = vperm.xlu0 %587, %v552_v5  }
  0x1c   : > { %415 = vperm.xlu1 %590, %v552_v5  }
  0x1f   : > { %592 = vset.pattern.permute.xlu0 %v622_v6 }
  0x20   : > { %591 = vset.pattern.permute.xlu1 %v622_v6  ;;  %347 = vperm.xlu0 %592, %v548_v0  }
  0x21   : > { %266 = vperm.xlu1 %591, %v212_v1  }
  0x24   : > { %593 = vset.pattern.permute.xlu0 %v623_v7 }
  0x25   : > { %388 = vperm.xlu1 %591, %v550_v4   ;;  %292 = vperm.xlu0 %593, %v212_v1  }
  0x29   : > { %429 = vperm.xlu1 %591, %v552_v5   ;;  %437 = vperm.xlu0 %593, %v552_v5  }
  0x2d   : > { %594 = vset.pattern.permute.xlu1 %v623_v7 }
  0x2e   : > { %355 = vperm.xlu1 %594, %v548_v0   ;;  %v312_v0 = vrot.slane %v302_v44, %v297_v33 }
  0x32   : > { %396 = vperm.xlu1 %594, %v550_v4  }
  0x36   : > { %595 = vset.pattern.permute.xlu1 %v620_v2 }
  0x37   : > { %319 = vperm.xlu1 %595, %v211_v8  }
  0x89   : > { %v334_v9 = vpop.permute.xlu1 %333  ;;  %v216_v10 = vpop.permute.xlu0 %215 }
  0x8a   : > { %v336_v45 = vmul.f32 %v334_v9, %v232_v35  ;;  %v337_v46 = vmul.f32 %v334_v9, %v236_v36  ;;  %v237_v47 = vmul.f32 %v232_v35, %v216_v10  ;;  %v238_v48 = vmul.f32 %v236_v36, %v216_v10 }
  0x8e   : > { %v340_v11 = vpop.permute.xlu1 %339  ;;  %v241_v12 = vpop.permute.xlu0 %240 }
  0x8f   : > { %v342_v49 = vmul.f32 %v340_v11, %v256_v37  ;;  %v343_v50 = vmul.f32 %v340_v11, %v260_v38  ;;  %v261_v51 = vmul.f32 %v256_v37, %v241_v12  ;;  %v262_v52 = vmul.f32 %v260_v38, %v241_v12 }
  0x91   : > { %v344_v1 = vadd.f32 %v342_v49, %v336_v45  ;;  %v345_v2 = vadd.f32 %v343_v50, %v337_v46  ;;  %v263_v5 = vadd.f32 %v261_v51, %v237_v47  ;;  %v264_v6 = vadd.f32 %v262_v52, %v238_v48 }
  0x92   : > { %v381_v16 = vpop.permute.xlu0 %380 }
  0x93   : > { %v375_v15 = vpop.permute.xlu1 %374  ;;  %v383_v56 = vmul.f32 %v381_v16, %v256_v37  ;;  %v384_v57 = vmul.f32 %v381_v16, %v260_v38 }
  0x94   : > { %v377_v54 = vmul.f32 %v375_v15, %v232_v35  ;;  %v378_v55 = vmul.f32 %v375_v15, %v236_v36 }
  0x96   : > { %v422_v23 = vpop.permute.xlu0 %421  ;;  %v385_v7 = vadd.f32 %v383_v56, %v377_v54  ;;  %v386_v8 = vadd.f32 %v384_v57, %v378_v55 }
  0x97   : > { %v416_v19 = vpop.permute.xlu1 %415  ;;  %v424_v60 = vmul.f32 %v422_v23, %v256_v37  ;;  %v425_v61 = vmul.f32 %v422_v23, %v260_v38 }
  0x98   : > { %v418_v58 = vmul.f32 %v416_v19, %v232_v35  ;;  %v419_v59 = vmul.f32 %v416_v19, %v236_v36 }
  0x9a   : > { %v426_v10 = vadd.f32 %v424_v60, %v418_v58  ;;  %v427_v11 = vadd.f32 %v425_v61, %v419_v59 }
  0x9b   : > { %v348_v39 = vpop.permute.xlu0 %347 }
  0x9c   : > { %v267_v30 = vpop.permute.xlu1 %266  ;;  %v350_v15 = vmul.f32 %v348_v39, %v282_v41  ;;  %v351_v16 = vmul.f32 %v348_v39, %v286_v42 }
  0x9d   : > { %v287_v17 = vmul.f32 %v282_v41, %v267_v30  ;;  %v288_v18 = vmul.f32 %v286_v42, %v267_v30 }
  0x9e   : > { %v352_v33 = vadd.f32 %v350_v15, %v344_v1  ;;  %v353_v34 = vadd.f32 %v351_v16, %v345_v2 }
  0x9f   : > { %v289_v35 = vadd.f32 %v287_v17, %v263_v5  ;;  %v290_v36 = vadd.f32 %v288_v18, %v264_v6 }
  0xa0   : > { %v389_v40 = vpop.permute.xlu1 %388  ;;  %v293_v62 = vpop.permute.xlu0 %292 }
  0xa1   : > { %v391_v3 = vmul.f32 %v389_v40, %v282_v41  ;;  %v392_v4 = vmul.f32 %v389_v40, %v286_v42  ;;  %v313_v21 = vmul.f32 %v308_v63, %v293_v62  ;;  %v314_v22 = vmul.f32 %v312_v0, %v293_v62 }
  0xa3   : > { %v393_v19 = vadd.f32 %v391_v3, %v385_v7  ;;  %v394_v20 = vadd.f32 %v392_v4, %v386_v8  ;;  %v315_v38 = vadd.f32 %v313_v21, %v289_v35  ;;  %v316_v39 = vadd.f32 %v314_v22, %v290_v36 }
  0xa4   : > { %v430_v53 = vpop.permute.xlu1 %429  ;;  %v438_v14 = vpop.permute.xlu0 %437 }
  0xa5   : > { %v432_v12 = vmul.f32 %v430_v53, %v282_v41  ;;  %v433_v13 = vmul.f32 %v430_v53, %v286_v42  ;;  %v440_v23 = vmul.f32 %v438_v14, %v308_v63  ;;  %v441_v24 = vmul.f32 %v438_v14, %v312_v0 }
  0xa7   : > { %v434_v28 = vadd.f32 %v432_v12, %v426_v10  ;;  %v435_v29 = vadd.f32 %v433_v13, %v427_v11 }
  0xa9   : > { %v356_v9 = vpop.permute.xlu1 %355  ;;  %v442_v42 = vadd.f32 %v440_v23, %v434_v28  ;;  %v443_v43 = vadd.f32 %v441_v24, %v435_v29 }
  0xaa   : > { %v358_v25 = vmul.f32 %v356_v9, %v308_v63  ;;  %v359_v26 = vmul.f32 %v356_v9, %v312_v0 }
  0xac   : > { %v360_v40 = vadd.f32 %v358_v25, %v352_v33  ;;  %v361_v41 = vadd.f32 %v359_v26, %v353_v34 }
  0xad   : > { %v397_v27 = vpop.permute.xlu1 %396 }
  0xae   : > { %v399_v31 = vmul.f32 %v397_v27, %v308_v63  ;;  %v400_v32 = vmul.f32 %v397_v27, %v312_v0 }
  0xb0   : > { %v401_v37 = vadd.f32 %v399_v31, %v393_v19  ;;  %v402_v30 = vadd.f32 %v400_v32, %v394_v20 }
  0xb2   : > { %v320_v44 = vpop.permute.xlu1 %319 }
  0xb3   : > { %v322_v45 = vadd.f32 %v320_v44, %v315_v38  ;;  %v323_v46 = vadd.f32 %v320_v44, %v316_v39  ;;  %v362_v47 = vadd.f32 %v360_v40, %v320_v44  ;;  %v363_v48 = vadd.f32 %v361_v41, %v320_v44 }
  0xb4   : > { %v403_v49 = vadd.f32 %v401_v37, %v320_v44  ;;  %v404_v50 = vadd.f32 %v402_v30, %v320_v44  ;;  %v444_v51 = vadd.f32 %v442_v42, %v320_v44  ;;  %v445_v52 = vadd.f32 %v443_v43, %v320_v44 }
  0xb5   : > { %v326_v53 = vcombine.low %v322_v45, %v323_v46  ;;  %v366_v54 = vcombine.low %v362_v47, %v363_v48 }
  0xb6   : > { %v407_v55 = vcombine.low %v403_v49, %v404_v50  ;;  %v448_v56 = vcombine.low %v444_v51, %v445_v52 }
  0xb7   : > { %328 = vst [vmem:[%s208_s6] sm:$0xff] %v326_v53  ;;  %549 = vst [vmem:[%s208_s6 + $0x8] sm:$0xff] %v366_v54 }
  0xb8   : > { %551 = vst [vmem:[%s208_s6 + $0x10] sm:$0xff] %v407_v55  ;;  %553 = vst [vmem:[%s208_s6 + $0x18] sm:$0xff] %v448_v56 }
  0xb9 PF: > { %s13_s14 = sadd.s32 1, %s618_s14   ;;  %s704_s12 = smov %s614_s13 }
  0xba   : > { %p10_p5 = scmp.ge.s32.totalorder %s13_s14, 4   ;;  %s705_s13 = smov %s707_s15 }
  0xbc   :  { %12 = sbr.rel (!%p10_p5) target bundleno = 2 (0x2), region = 68 }

// kernel: up_noskip_forward.4
= control target key start
LH: loop header
LB: loop body
LE: loop exit
PB: predicated region body
PF: predicated region fallthrough
CT: control target
= control target key end

     0   :  { %s2434_s12 = smov 0   ;;  %s2436_s13 = smov 0   ;;  %s3936_s0 = inlined_call_operand.vmem [shape: f32[2,4,1158], index: 0, kind: input, shape index: {}]   ;;  %s3937_s1 = inlined_call_operand.vmem [shape: f32[9,8,4], index: 1, kind: input, shape index: {}]   ;;  %s3938_s2 = inlined_call_operand.vmem [shape: f32[8,1], index: 2, kind: input, shape index: {}]   ;;  %s3939_s3 = inlined_call_operand.vmem [shape: f32[2,8,1088], index: 3, kind: output, shape index: {}]  }
   0x1   :  { %s2438_s14 = smov 0  }
   0x2 LB: > { %s25_s15 = sadd.s32 1, %s2396_s13  ;;  %p2296_p0 = scmp.ge.s32.totalorder %s2400_s14, 1  ;;  %s2400_s14 = sphi %s2438_s14, %s13_s14   ;;  %s2396_s13 = sphi %s2436_s13, %s4228_s13   ;;  %s2392_s12 = sphi %s2434_s12, %s4227_s12  }
   0x3   : > { %p27_p1 = scmp.ge.s32.totalorder %s25_s15, 2  ;;  %p169_p2 = scmp.lt.s32.totalorder %s2400_s14, 3 }
   0x5   : > { %s4230_s15 = smov (%p27_p1, %s25_s15), 0  ;;  %p170_p3 = pnand %p2296_p0, %p169_p2 }
   0x7   : > { %173 = sbr.rel (%p170_p3) target bundleno = 580 (0x244), region = 32 }
   0xc   : > { %v2299_v0 = vld [vmem:[%s3937_s1 + $0x8] sm:$0xff]  ;;  %v232_v1 = vld [vmem:[%s3937_s1] sm:$0xff]  ;;  %v3942_v2 = vmov 3   ;;  %v3944_v3 = vmov 2   ;;  %v2301_v4 = vld [vmem:[%s3937_s1 + $0x18] sm:$0xff]  ;;  %v3946_v5 = vmov 1   ;;  %v243_v11 = vlaneseq }
   0xd   : > { %2351 = vset.pattern.permute.xlu0 %v3942_v2  ;;  %2347 = vset.pattern.permute.xlu1 %v3944_v3  ;;  %v3940_v6 = vmov 0   ;;  %v2300_v7 = vld [vmem:[%s3937_s1 + $0x10] sm:$0xff]  ;;  %v2302_v8 = vld [vmem:[%s3937_s1 + $0x20] sm:$0xff]  ;;  %v2494_v10 = vld [vmem:[%s3937_s1 + $0x28] sm:$0xff]  ;;  %p205_p4 = scmp.lt.s32.totalorder %s2392_s12, 1  ;;  %s2406_s7 = smov 127  }
   0xe   : > { %712 = vperm.xlu0 %2351, %v2299_v0   ;;  %437 = vperm.xlu1 %2347, %v232_v1   ;;  %v2482_v9 = vld [vmem:[%s3937_s1 + $0x30] sm:$0xff]  ;;  %4059 = vst [vmem:[#allocation3_spill] sm:$0xff] %v2494_v10  ;;  %v244_v12 = vshrl.u32 %v243_v11, 7  ;;  %s2407_s8 = smov 126   ;;  %s2408_s9 = smov 94   ;;  %vm760_vm0 = vcmask 1039360  }
   0xf   : > { %4058 = vst [vmem:[#allocation2_spill] sm:$0xff] %v2482_v9  ;;  %s4232_s12 = smov (!%p205_p4, %s2392_s12), 1  ;;  %s2409_s10 = smov 93   ;;  %vm896_vm1 = vcmask 1031168   ;;  %vm1032_vm2 = vcmask 769024   ;;  %vm1168_vm3 = vcmask 760832  }
  0x10   : > { %s2309_s30 = smul.u32 40, %s4232_s12  ;;  %v2515_v13 = vsub.s32 0, %v244_v12  ;;  %v2517_v14 = vsub.s32 1, %v244_v12  ;;  %v2519_v15 = vsub.s32 2, %v244_v12  ;;  %v2521_v16 = vsub.s32 3, %v244_v12  ;;  %s2410_s21 = smov 92  }
  0x11   : > { %v2527_v19 = vsub.s32 4, %v244_v12  ;;  %v2536_v23 = vsub.s32 5, %v244_v12  ;;  %v2538_v24 = vsub.s32 6, %v244_v12  ;;  %v2557_v36 = vsub.s32 7, %v244_v12  ;;  %s2411_s22 = smov 60   ;;  %s2412_s23 = smov 59  }
  0x12   : > { %984 = vperm.xlu0 %2351, %v2301_v4   ;;  %2348 = vset.pattern.permute.xlu1 %v3942_v2  ;;  %s2513_s6 = scalar_lea.vmem %s3936_s0, %s2309_s30  ;;  %4060 = vst [vmem:[#allocation4_spill] sm:$0xff] %v2515_v13  ;;  %4061 = vst [vmem:[#allocation5_spill] sm:$0xff] %v2517_v14  ;;  %s2413_s24 = smov 58   ;;  %vm1304_vm4 = vcmask 752640   ;;  %vm1820_vm5 = vcmask 490496   ;;  %vm1967_vm6 = vcmask 482304  }
  0x13   : > { %540 = vperm.xlu1 %2348, %v232_v1   ;;  %4062 = vst [vmem:[#allocation6_spill] sm:$0xff] %v2519_v15  ;;  %4063 = vst [vmem:[#allocation7_spill] sm:$0xff] %v2521_v16  ;;  %v2524_v17 = vld [vmem:[%s2513_s6 + $0x8] sm:$0xff]  ;;  %v227_v18 = vld [vmem:[%s2513_s6] sm:$0xff]  ;;  %vm2114_vm7 = vcmask 474112   ;;  %s2310_s27 = smul.u32 72, %s4232_s12 }
  0x14   : > { %4064 = vst [vmem:[#allocation8_spill] sm:$0xff] %v2527_v19  ;;  %v254_v20 = vrot.slane %v2524_v17, %v2515_v13  ;;  %v348_v21 = vrot.slane %v2524_v17, %v2517_v14  ;;  %v2534_v22 = vld [vmem:[%s2513_s6 + $0x10] sm:$0xff]  ;;  %4065 = vst [vmem:[#allocation9_spill] sm:$0xff] %v2536_v23  ;;  %v451_v25 = vrot.slane %v2524_v17, %v2519_v15  ;;  %v2596_v51 = vld [vmem:[%s2513_s6 + $0x18] sm:$0xff]  ;;  %vm2174_vm8 = vcmask 523264  }
  0x15   : > { %4066 = vst [vmem:[#allocation10_spill] sm:$0xff] %v2538_v24  ;;  %v554_v26 = vrot.slane %v2524_v17, %v2521_v16  ;;  %v246_v27 = vrot.slane %v227_v18, %v2515_v13  ;;  %v340_v28 = vrot.slane %v227_v18, %v2517_v14  ;;  %v443_v29 = vrot.slane %v227_v18, %v2519_v15  ;;  %v231_v60 = vld [vmem:[%s2513_s6 + $0x20] sm:$0xf]  ;;  %s3888_s29 = scalar_lea.vmem %s3939_s3, %s2310_s27 }
  0x16   : > { %2357 = vset.pattern.permute.xlu0 %v3946_v5  ;;  %v546_v30 = vrot.slane %v227_v18, %v2521_v16  ;;  %v262_v31 = vrot.slane %v2534_v22, %v2515_v13  ;;  %v356_v32 = vrot.slane %v2534_v22, %v2517_v14  ;;  %v459_v33 = vrot.slane %v2534_v22, %v2519_v15 }
  0x17   : > { %334 = vperm.xlu0 %2357, %v232_v1   ;;  %2349 = vset.pattern.permute.xlu1 %v3940_v6  ;;  %v562_v34 = vrot.slane %v2534_v22, %v2521_v16  ;;  %v250_v35 = vrot.slane %v227_v18, %v2527_v19  ;;  %4067 = vst [vmem:[#allocation11_spill] sm:$0xff] %v2557_v36 }
  0x18   : > { %655 = vperm.xlu1 %2349, %v2299_v0   ;;  %v2560_v37 = vrot.slane %v254_v20, %v2515_v13  ;;  %v2563_v38 = vrot.slane %v348_v21, %v2517_v14  ;;  %v344_v39 = vrot.slane %v227_v18, %v2536_v23  ;;  %v447_v40 = vrot.slane %v227_v18, %v2538_v24 }
  0x19   : > { %v2572_v43 = vrot.slane %v451_v25, %v2519_v15  ;;  %v2575_v44 = vrot.slane %v554_v26, %v2521_v16  ;;  %v2578_v45 = vrot.slane %v246_v27, %v2515_v13  ;;  %v2581_v46 = vrot.slane %v340_v28, %v2517_v14 }
  0x1a   : > { %v2584_v47 = vrot.slane %v443_v29, %v2519_v15  ;;  %v2587_v48 = vrot.slane %v546_v30, %v2521_v16  ;;  %v2590_v49 = vrot.slane %v262_v31, %v2515_v13  ;;  %v2593_v50 = vrot.slane %v356_v32, %v2517_v14 }
  0x1b   : > { %668 = vperm.xlu0 %2357, %v2299_v0   ;;  %4069 = vst [vmem:[#allocation13_spill] sm:$0xff] %v2575_v44  ;;  %v2599_v52 = vrot.slane %v459_v33, %v2519_v15  ;;  %v2602_v53 = vrot.slane %v562_v34, %v2521_v16  ;;  %v2605_v54 = vrot.slane %v250_v35, %v2515_v13 }
  0x1c   : > { %2350 = vset.pattern.permute.xlu1 %v3944_v3  ;;  %4070 = vst [vmem:[#allocation14_spill] sm:$0xff] %v2587_v48  ;;  %4071 = vst [vmem:[#allocation15_spill] sm:$0xff] %v2590_v49  ;;  %v550_v55 = vrot.slane %v227_v18, %v2557_v36  ;;  %v2609_v56 = vrot.slane %v344_v39, %v2517_v14  ;;  %v2612_v57 = vrot.slane %v447_v40, %v2519_v15 }
  0x1d   : > { %690 = vperm.xlu1 %2350, %v2299_v0   ;;  %4072 = vst [vmem:[#allocation16_spill] sm:$0xff] %v2593_v50  ;;  %4073 = vst [vmem:[#allocation17_spill] sm:$0xff] %v2605_v54  ;;  %v270_v58 = vrot.slane %v2596_v51, %v2515_v13  ;;  %v364_v59 = vrot.slane %v2596_v51, %v2517_v14  ;;  %v467_v62 = vrot.slane %v2596_v51, %v2519_v15 }
  0x1e   : > { %4074 = vst [vmem:[#allocation18_spill] sm:$0xff] %v2609_v56  ;;  %v570_v63 = vrot.slane %v2596_v51, %v2521_v16  ;;  %v258_v0 = vrot.slane %v2524_v17, %v2527_v19  ;;  %v278_v11 = vrot.slane %v231_v60, %v2515_v13  ;;  %v372_v12 = vrot.slane %v231_v60, %v2517_v14 }
  0x1f   : > { %804 = vperm.xlu0 %2357, %v2300_v7   ;;  %v2638_v18 = vrot.slane %v550_v55, %v2521_v16  ;;  %v475_v20 = vrot.slane %v231_v60, %v2519_v15  ;;  %v578_v21 = vrot.slane %v231_v60, %v2521_v16  ;;  %v266_v25 = vrot.slane %v2534_v22, %v2527_v19 }
  0x20   : > { %v2645_v26 = vrot.slane %v270_v58, %v2515_v13  ;;  %v2648_v27 = vrot.slane %v364_v59, %v2517_v14  ;;  %v463_v28 = vrot.slane %v2534_v22, %v2538_v24  ;;  %v2655_v29 = vrot.slane %v467_v62, %v2519_v15 }
  0x21   : > { %2352 = vset.pattern.permute.xlu1 %v3940_v6  ;;  %4077 = vst [vmem:[#allocation21_spill] sm:$0xff] %v2638_v18  ;;  %v2658_v30 = vrot.slane %v570_v63, %v2521_v16  ;;  %v2661_v31 = vrot.slane %v258_v0, %v2515_v13  ;;  %v2675_v39 = vrot.slane %v278_v11, %v2515_v13 }
  0x22   : > { %791 = vperm.xlu1 %2352, %v2300_v7   ;;  %4078 = vst [vmem:[#allocation22_spill] sm:$0xff] %v2645_v26  ;;  %4079 = vst [vmem:[#allocation23_spill] sm:$0xff] %v2648_v27  ;;  %v2678_v40 = vrot.slane %v372_v12, %v2517_v14  ;;  %v2683_v58 = vrot.slane %v475_v20, %v2519_v15  ;;  %v2686_v59 = vrot.slane %v578_v21, %v2521_v16 }
  0x23   : > { %940 = vperm.xlu0 %2357, %v2301_v4   ;;  %4080 = vst [vmem:[#allocation24_spill] sm:$0xff] %v2655_v29  ;;  %4081 = vst [vmem:[#allocation25_spill] sm:$0xff] %v2658_v30  ;;  %v2689_v60 = vrot.slane %v266_v25, %v2515_v13  ;;  %v2697_v0 = vrot.slane %v463_v28, %v2519_v15  ;;  %v471_v20 = vrot.slane %v2596_v51, %v2538_v24 }
  0x24   : > { %4082 = vst [vmem:[#allocation26_spill] sm:$0xff] %v2661_v31  ;;  %4085 = vst [vmem:[#allocation29_spill] sm:$0xff] %v2678_v40 }
  0x26   : > { %2353 = vset.pattern.permute.xlu1 %v3944_v3 }
  0x27   : > { %1076 = vperm.xlu0 %2357, %v2302_v8   ;;  %826 = vperm.xlu1 %2353, %v2300_v7  }
  0x2b   : > { %2359 = vset.pattern.permute.xlu0 %v3940_v6  ;;  %2354 = vset.pattern.permute.xlu1 %v3942_v2 }
  0x2c   : > { %235 = vperm.xlu0 %2359, %v232_v1   ;;  %848 = vperm.xlu1 %2354, %v2300_v7   ;;  %v352_v1 = vrot.slane %v2524_v17, %v2536_v23  ;;  %v455_v7 = vrot.slane %v2524_v17, %v2538_v24 }
  0x2e   : > { %v2664_v32 = vrot.slane %v352_v1, %v2517_v14  ;;  %v2669_v34 = vrot.slane %v455_v7, %v2519_v15  ;;  %v274_v1 = vrot.slane %v2596_v51, %v2527_v19  ;;  %v368_v7 = vrot.slane %v2596_v51, %v2536_v23 }
  0x30   : > { %2355 = vset.pattern.permute.xlu1 %v3940_v6  ;;  %1340 = vperm.xlu0 %2359, %v2482_v9   ;;  %4083 = vst [vmem:[#allocation27_spill] sm:$0xff] %v2664_v32 }
  0x31   : > { %927 = vperm.xlu1 %2355, %v2301_v4  }
  0x34   : > { %2366 = vset.pattern.permute.xlu0 %v3944_v3 }
  0x35   : > { %2356 = vset.pattern.permute.xlu1 %v3944_v3 }
  0x36   : > { %962 = vperm.xlu1 %2356, %v2301_v4  }
  0x3a   : > { %2358 = vset.pattern.permute.xlu1 %v3940_v6 }
  0x3b   : > { %1063 = vperm.xlu1 %2358, %v2302_v8  }
  0x3f   : > { %2360 = vset.pattern.permute.xlu1 %v3944_v3 }
  0x40   : > { %1098 = vperm.xlu1 %2360, %v2302_v8  }
  0x44   : > { %2361 = vset.pattern.permute.xlu1 %v3942_v2 }
  0x45   : > { %1120 = vperm.xlu1 %2361, %v2302_v8   ;;  %v558_v8 = vrot.slane %v2524_v17, %v2557_v36  ;;  %v360_v17 = vrot.slane %v2534_v22, %v2536_v23 }
  0x47   : > { %v2672_v35 = vrot.slane %v558_v8, %v2521_v16  ;;  %v2694_v63 = vrot.slane %v360_v17, %v2517_v14 }
  0x49   : > { %2362 = vset.pattern.permute.xlu1 %v3940_v6 }
  0x4a   : > { %1199 = vperm.xlu1 %2362, %v2494_v10  }
  0x4e   : > { %2363 = vset.pattern.permute.xlu1 %v3944_v3 }
  0x4f   : > { %1234 = vperm.xlu1 %2363, %v2494_v10  }
  0x53   : > { %2364 = vset.pattern.permute.xlu1 %v3946_v5 }
  0x54   : > { %1449 = vperm.xlu1 %2364, %v2482_v9  }
  0x58   : > { %2365 = vset.pattern.permute.xlu1 %v3942_v2 }
  0x59   : > { %1256 = vperm.xlu1 %2365, %v2494_v10  }
  0x5d   : > { %2368 = vset.pattern.permute.xlu1 %v3940_v6 }
  0x89   : > { %v2567_v41 = vpop.permute.xlu0 %712  ;;  %v2569_v42 = vpop.permute.xlu1 %437 }
  0x8a   : > { %4068 = vst [vmem:[#allocation12_spill] sm:$0xff] %v2569_v42  ;;  %v717_v11 = vmul.f32 %v2567_v41, %v2575_v44  ;;  %v715_v12 = vmul.f32 %v2567_v41, %v2587_v48 }
  0x8d   : > { %v2619_v61 = vpop.permute.xlu0 %984 }
  0x8e   : > { %4075 = vst [vmem:[#allocation19_spill] sm:$0xff] %v2619_v61  ;;  %v2629_v4 = vpop.permute.xlu1 %540 }
  0x8f   : > { %4076 = vst [vmem:[#allocation20_spill] sm:$0xff] %v2629_v4 }
  0x92   : > { %v2666_v33 = vpop.permute.xlu0 %334 }
  0x93   : > { %4084 = vst [vmem:[#allocation28_spill] sm:$0xff] %v2666_v33  ;;  %v2680_v55 = vpop.permute.xlu1 %655 }
  0x94   : > { %v660_v8 = vmul.f32 %v2680_v55, %v2560_v37  ;;  %v658_v25 = vmul.f32 %v2680_v55, %v2578_v45  ;;  %v662_v17 = vmul.f32 %v2680_v55, %v2590_v49  ;;  %v659_v28 = vmul.f32 %v2680_v55, %v2605_v54 }
  0x95   : > { %v664_v6 = vmul.f32 %v2680_v55, %v2645_v26  ;;  %v661_v42 = vmul.f32 %v2680_v55, %v2661_v31 }
  0x96   : > { %v669_v21 = vpop.permute.xlu0 %668 }
  0x97   : > { %v673_v2 = vmul.f32 %v669_v21, %v2563_v38  ;;  %v671_v3 = vmul.f32 %v669_v21, %v2581_v46  ;;  %v675_v5 = vmul.f32 %v669_v21, %v2593_v50  ;;  %v672_v62 = vmul.f32 %v669_v21, %v2609_v56 }
  0x98   : > { %v691_v24 = vpop.permute.xlu1 %690  ;;  %v677_v4 = vmul.f32 %v669_v21, %v2648_v27  ;;  %v674_v33 = vmul.f32 %v669_v21, %v2664_v32  ;;  %v679_v10 = vmul.f32 %v669_v21, %v2678_v40 }
  0x99   : > { %v682_v9 = vadd.f32 %v673_v2, %v660_v8  ;;  %v695_v23 = vmul.f32 %v691_v24, %v2572_v43  ;;  %v680_v19 = vadd.f32 %v671_v3, %v658_v25  ;;  %v693_v61 = vmul.f32 %v691_v24, %v2584_v47 }
  0x9a   : > { %v684_v26 = vadd.f32 %v675_v5, %v662_v17  ;;  %v697_v44 = vmul.f32 %v691_v24, %v2599_v52  ;;  %v681_v50 = vadd.f32 %v672_v62, %v659_v28  ;;  %v694_v56 = vmul.f32 %v691_v24, %v2612_v57 }
  0x9b   : > { %v704_v27 = vadd.f32 %v695_v23, %v682_v9  ;;  %v702_v48 = vadd.f32 %v693_v61, %v680_v19  ;;  %v686_v49 = vadd.f32 %v677_v4, %v664_v6  ;;  %v699_v31 = vmul.f32 %v691_v24, %v2655_v29 }
  0x9c   : > { %v706_v32 = vadd.f32 %v697_v44, %v684_v26  ;;  %v703_v54 = vadd.f32 %v694_v56, %v681_v50  ;;  %v683_v40 = vadd.f32 %v674_v33, %v661_v42  ;;  %v696_v2 = vmul.f32 %v691_v24, %v2669_v34 }
  0x9d   : > { %v2734_v8 = vpop.permute.xlu1 %791  ;;  %v726_v3 = vadd.f32 %v717_v11, %v704_v27  ;;  %v724_v25 = vadd.f32 %v715_v12, %v702_v48  ;;  %v676_v5 = vmul.f32 %v669_v21, %v2694_v63  ;;  %v574_v62 = vrot.slane %v2596_v51, %v2557_v36  ;;  %v2780_v11 = vpop.permute.xlu0 %804 }
  0x9e   : > { %v719_v9 = vmul.f32 %v2567_v41, %v2602_v53  ;;  %v716_v6 = vmul.f32 %v2567_v41, %v2638_v18  ;;  %v666_v19 = vmul.f32 %v2680_v55, %v2675_v39  ;;  %v2746_v23 = vrot.slane %v274_v1, %v2515_v13 }
  0x9f   : > { %746 = vrot.lane.b32.xlu0 %v726_v3, %s2406_s7  ;;  %742 = vrot.lane.b32.xlu1 %v724_v25, %s2406_s7  ;;  %v708_v42 = vadd.f32 %v699_v31, %v686_v49  ;;  %v663_v44 = vmul.f32 %v2680_v55, %v2689_v60  ;;  %v2753_v48 = vrot.slane %v368_v7, %v2517_v14 }
  0xa0   : > { %4086 = vst [vmem:[#allocation30_spill] sm:$0xff] %v2746_v23  ;;  %v728_v50 = vadd.f32 %v719_v9, %v706_v32  ;;  %v725_v51 = vadd.f32 %v716_v6, %v703_v54  ;;  %v705_v56 = vadd.f32 %v696_v2, %v683_v40  ;;  %v688_v61 = vadd.f32 %v679_v10, %v666_v19 }
  0xa1   : > { %v701_v4 = vmul.f32 %v691_v24, %v2683_v58  ;;  %v685_v26 = vadd.f32 %v676_v5, %v663_v44  ;;  %v698_v27 = vmul.f32 %v691_v24, %v2697_v0  ;;  %v678_v33 = vmul.f32 %v669_v21, %v2753_v48 }
  0xa2   : > { %v2758_v1 = vpop.permute.xlu1 %826  ;;  %v721_v49 = vmul.f32 %v2567_v41, %v2658_v30  ;;  %v4087_v31 = vrot.slane %v2534_v22, %v2557_v36  ;;  %v2769_v10 = vrot.slane %v471_v20, %v2519_v15  ;;  %v665_v54 = vmul.f32 %v2680_v55, %v2746_v23 }
  0xa3   : > { %750 = vrot.lane.b32.xlu0 %v728_v50, %s2406_s7  ;;  %744 = vrot.lane.b32.xlu1 %v725_v51, %s2406_s7  ;;  %v718_v40 = vmul.f32 %v2567_v41, %v2672_v35  ;;  %v2778_v7 = vrot.slane %v574_v62, %v2521_v16  ;;  %v710_v17 = vadd.f32 %v701_v4, %v688_v61  ;;  %v4090_v50 = vld [vmem:[#allocation15_spill] sm:$0xff] }
  0xa4   : > { %v2766_v32 = vrot.slane %v4087_v31, %v2521_v16  ;;  %4088 = vst [vmem:[#allocation31_spill] sm:$0xff] %v2769_v10  ;;  %v730_v22 = vadd.f32 %v721_v49, %v708_v42  ;;  %v687_v12 = vadd.f32 %v678_v33, %v665_v54  ;;  %v700_v20 = vmul.f32 %v691_v24, %v2769_v10  ;;  %v4089_v42 = vld [vmem:[#allocation17_spill] sm:$0xff]  ;;  %v4092_v49 = vld [vmem:[#allocation18_spill] sm:$0xff]  ;;  %v4093_v54 = vld [vmem:[#allocation16_spill] sm:$0xff] }
  0xa5   : > { %v727_v21 = vadd.f32 %v718_v40, %v705_v56  ;;  %v707_v28 = vadd.f32 %v698_v27, %v685_v26  ;;  %v794_v55 = vmul.f32 %v2734_v8, %v2578_v45  ;;  %v723_v2 = vmul.f32 %v2567_v41, %v2686_v59  ;;  %v4091_v26 = vld [vmem:[#allocation14_spill] sm:$0xff] }
  0xa6   : > { %v720_v3 = vmul.f32 %v2567_v41, %v2766_v32  ;;  %v796_v25 = vmul.f32 %v2734_v8, %v2560_v37  ;;  %v807_v24 = vmul.f32 %v2780_v11, %v2581_v46  ;;  %v829_v62 = vmul.f32 %v2758_v1, %v2584_v47 }
  0xa7   : > { %v2791_v5 = vpop.permute.xlu1 %848  ;;  %754 = vrot.lane.b32.xlu0 %v730_v22, %s2406_s7  ;;  %748 = vrot.lane.b32.xlu1 %v727_v21, %s2406_s7  ;;  %v722_v9 = vmul.f32 %v2567_v41, %v2778_v7  ;;  %v709_v6 = vadd.f32 %v700_v20, %v687_v12  ;;  %v809_v19 = vmul.f32 %v2780_v11, %v2563_v38 }
  0xa8   : > { %v795_v44 = vmul.f32 %v2734_v8, %v4089_v42  ;;  %v798_v51 = vmul.f32 %v2734_v8, %v4090_v50  ;;  %v732_v56 = vadd.f32 %v723_v2, %v710_v17  ;;  %v729_v61 = vadd.f32 %v720_v3, %v707_v28 }
  0xa9   : > { %v816_v4 = vadd.f32 %v807_v24, %v794_v55  ;;  %v851_v27 = vmul.f32 %v2791_v5, %v4091_v26  ;;  %v818_v33 = vadd.f32 %v809_v19, %v796_v25  ;;  %v831_v41 = vmul.f32 %v2758_v1, %v2572_v43  ;;  %v4094_v55 = vld [vmem:[#allocation26_spill] sm:$0xff]  ;;  %v4095_v25 = vld [vmem:[#allocation13_spill] sm:$0xff] }
  0xaa   : > { %v808_v31 = vmul.f32 %v2780_v11, %v4092_v49  ;;  %v811_v40 = vmul.f32 %v2780_v11, %v4093_v54  ;;  %v830_v12 = vmul.f32 %v2758_v1, %v2612_v57  ;;  %v833_v20 = vmul.f32 %v2758_v1, %v2599_v52 }
  0xab   : > { %758 = vrot.lane.b32.xlu0 %v732_v56, %s2406_s7  ;;  %752 = vrot.lane.b32.xlu1 %v729_v61, %s2406_s7  ;;  %v838_v22 = vadd.f32 %v829_v62, %v816_v4  ;;  %v731_v21 = vadd.f32 %v722_v9, %v709_v6  ;;  %v797_v2 = vmul.f32 %v2734_v8, %v4094_v55  ;;  %v4096_v56 = vld [vmem:[#allocation27_spill] sm:$0xff] }
  0xac   : > { %v817_v17 = vadd.f32 %v808_v31, %v795_v44  ;;  %v820_v28 = vadd.f32 %v811_v40, %v798_v51  ;;  %v853_v24 = vmul.f32 %v2791_v5, %v4095_v25  ;;  %v852_v19 = vmul.f32 %v2791_v5, %v2638_v18  ;;  %v2833_v6 = vpop.permute.xlu1 %927  ;;  %v4097_v40 = vld [vmem:[#allocation22_spill] sm:$0xff] }
  0xad   : > { %v860_v3 = vadd.f32 %v851_v27, %v838_v22  ;;  %v855_v62 = vmul.f32 %v2791_v5, %v2602_v53  ;;  %v810_v61 = vmul.f32 %v2780_v11, %v4096_v56  ;;  %v832_v9 = vmul.f32 %v2758_v1, %v2669_v34 }
  0xae   : > { %v840_v44 = vadd.f32 %v831_v41, %v818_v33  ;;  %v839_v51 = vadd.f32 %v830_v12, %v817_v17  ;;  %v842_v4 = vadd.f32 %v833_v20, %v820_v28  ;;  %v854_v31 = vmul.f32 %v2791_v5, %v2672_v35 }
  0xaf   : > { %878 = vrot.lane.b32.xlu0 %v860_v3, %s2407_s8  ;;  %756 = vrot.lane.b32.xlu1 %v731_v21, %s2406_s7  ;;  %v819_v27 = vadd.f32 %v810_v61, %v797_v2  ;;  %v800_v22 = vmul.f32 %v2734_v8, %v4097_v40  ;;  %v799_v14 = vmul.f32 %v2734_v8, %v2689_v60  ;;  %v4098_v3 = vld [vmem:[#allocation23_spill] sm:$0xff] }
  0xb0   : > { %v862_v16 = vadd.f32 %v853_v24, %v840_v44  ;;  %v861_v15 = vadd.f32 %v852_v19, %v839_v51  ;;  %v864_v36 = vadd.f32 %v855_v62, %v842_v4  ;;  %v813_v21 = vmul.f32 %v2780_v11, %v4098_v3  ;;  %v4099_v19 = vld [vmem:[#allocation29_spill] sm:$0xff] }
  0xb1   : > { %v841_v13 = vadd.f32 %v832_v9, %v819_v27  ;;  %v835_v33 = vmul.f32 %v2758_v1, %v2655_v29  ;;  %v802_v41 = vmul.f32 %v2734_v8, %v2675_v39  ;;  %v857_v12 = vmul.f32 %v2791_v5, %v2658_v30 }
  0xb2   : > { %v812_v20 = vmul.f32 %v2780_v11, %v2694_v63  ;;  %v834_v17 = vmul.f32 %v2758_v1, %v2697_v0  ;;  %v822_v2 = vadd.f32 %v813_v21, %v800_v22  ;;  %v856_v24 = vmul.f32 %v2791_v5, %v2766_v32 }
  0xb3   : > { %882 = vrot.lane.b32.xlu0 %v862_v16, %s2407_s8  ;;  %880 = vrot.lane.b32.xlu1 %v861_v15, %s2407_s8  ;;  %v863_v28 = vadd.f32 %v854_v31, %v841_v13  ;;  %v815_v62 = vmul.f32 %v2780_v11, %v4099_v19  ;;  %v2861_v16 = vpop.permute.xlu0 %940  ;;  %v2863_v15 = vpop.permute.xlu1 %962  ;;  %v837_v9 = vmul.f32 %v2758_v1, %v2683_v58 }
  0xb4   : > { %v821_v61 = vadd.f32 %v812_v20, %v799_v14  ;;  %v859_v44 = vmul.f32 %v2791_v5, %v2686_v59  ;;  %v801_v13 = vmul.f32 %v2734_v8, %v2746_v23  ;;  %v844_v51 = vadd.f32 %v835_v33, %v822_v2 }
  0xb5   : > { %v824_v4 = vadd.f32 %v815_v62, %v802_v41  ;;  %v814_v27 = vmul.f32 %v2780_v11, %v2753_v48  ;;  %v932_v31 = vmul.f32 %v2833_v6, %v2560_v37  ;;  %v836_v22 = vmul.f32 %v2758_v1, %v2769_v10 }
  0xb6   : > { %v843_v14 = vadd.f32 %v834_v17, %v821_v61  ;;  %v930_v21 = vmul.f32 %v2833_v6, %v2578_v45  ;;  %v866_v8 = vadd.f32 %v857_v12, %v844_v51  ;;  %v858_v33 = vmul.f32 %v2791_v5, %v2778_v7 }
  0xb7   : > { %886 = vrot.lane.b32.xlu0 %v864_v36, %s2407_s8  ;;  %884 = vrot.lane.b32.xlu1 %v863_v28, %s2407_s8  ;;  %v945_v11 = vmul.f32 %v2861_v16, %v2563_v38  ;;  %v967_v41 = vmul.f32 %v2863_v15, %v2572_v43  ;;  %v823_v20 = vadd.f32 %v814_v27, %v801_v13  ;;  %v2893_v5 = vpop.permute.xlu1 %1063 }
  0xb8   : > { %v865_v36 = vadd.f32 %v856_v24, %v843_v14  ;;  %v943_v17 = vmul.f32 %v2861_v16, %v2581_v46  ;;  %v965_v1 = vmul.f32 %v2863_v15, %v2584_v47  ;;  %v846_v28 = vadd.f32 %v837_v9, %v824_v4 }
  0xb9   : > { %v954_v2 = vadd.f32 %v945_v11, %v932_v31  ;;  %v934_v12 = vmul.f32 %v2833_v6, %v4090_v50  ;;  %v845_v62 = vadd.f32 %v836_v22, %v823_v20  ;;  %v931_v61 = vmul.f32 %v2833_v6, %v4089_v42 }
  0xba   : > { %v952_v24 = vadd.f32 %v943_v17, %v930_v21  ;;  %v868_v13 = vadd.f32 %v859_v44, %v846_v28  ;;  %v947_v9 = vmul.f32 %v2861_v16, %v4093_v54  ;;  %v969_v4 = vmul.f32 %v2863_v15, %v2599_v52  ;;  %v4100_v21 = vld [vmem:[#allocation19_spill] sm:$0xff] }
  0xbb   : > { %890 = vrot.lane.b32.xlu0 %v866_v8, %s2407_s8  ;;  %888 = vrot.lane.b32.xlu1 %v865_v36, %s2407_s8  ;;  %v976_v51 = vadd.f32 %v967_v41, %v954_v2  ;;  %v867_v27 = vadd.f32 %v858_v33, %v845_v62  ;;  %v944_v14 = vmul.f32 %v2861_v16, %v4092_v49  ;;  %v2921_v2 = vpop.permute.xlu1 %1098 }
  0xbc   : > { %v974_v31 = vadd.f32 %v965_v1, %v952_v24  ;;  %v966_v22 = vmul.f32 %v2863_v15, %v2612_v57  ;;  %v989_v8 = vmul.f32 %v4100_v21, %v4095_v25  ;;  %v956_v11 = vadd.f32 %v947_v9, %v934_v12 }
  0xbd   : > { %v936_v44 = vmul.f32 %v2833_v6, %v4097_v40  ;;  %v987_v33 = vmul.f32 %v4100_v21, %v4091_v26  ;;  %v953_v41 = vadd.f32 %v944_v14, %v931_v61  ;;  %v933_v36 = vmul.f32 %v2833_v6, %v4094_v55 }
  0xbe   : > { %v998_v20 = vadd.f32 %v989_v8, %v976_v51  ;;  %v978_v17 = vadd.f32 %v969_v4, %v956_v11  ;;  %v949_v1 = vmul.f32 %v2861_v16, %v4098_v3  ;;  %v971_v28 = vmul.f32 %v2863_v15, %v2655_v29 }
  0xbf   : > { %894 = vrot.lane.b32.xlu0 %v868_v13, %s2407_s8  ;;  %892 = vrot.lane.b32.xlu1 %v867_v27, %s2407_s8  ;;  %v996_v12 = vadd.f32 %v987_v33, %v974_v31  ;;  %v975_v62 = vadd.f32 %v966_v22, %v953_v41  ;;  %v946_v24 = vmul.f32 %v2861_v16, %v4096_v56 }
  0xc0   : > { %v968_v61 = vmul.f32 %v2863_v15, %v2669_v34  ;;  %v991_v13 = vmul.f32 %v4100_v21, %v2602_v53  ;;  %v958_v51 = vadd.f32 %v949_v1, %v936_v44  ;;  %v938_v9 = vmul.f32 %v2833_v6, %v2675_v39  ;;  %v2941_v44 = vpop.permute.xlu0 %1076 }
  0xc1   : > { %v988_v4 = vmul.f32 %v4100_v21, %v2638_v18  ;;  %v955_v27 = vadd.f32 %v946_v24, %v933_v36  ;;  %v935_v31 = vmul.f32 %v2833_v6, %v2689_v60  ;;  %v951_v8 = vmul.f32 %v2861_v16, %v4099_v19 }
  0xc2   : > { %v1000_v14 = vadd.f32 %v991_v13, %v978_v17  ;;  %v980_v22 = vadd.f32 %v971_v28, %v958_v51  ;;  %v973_v11 = vmul.f32 %v2863_v15, %v2683_v58  ;;  %v970_v36 = vmul.f32 %v2863_v15, %v2697_v0 }
  0xc3   : > { %1018 = vrot.lane.b32.xlu0 %v998_v20, %s2408_s9  ;;  %1014 = vrot.lane.b32.xlu1 %v996_v12, %s2408_s9  ;;  %v997_v33 = vadd.f32 %v988_v4, %v975_v62  ;;  %v977_v41 = vadd.f32 %v968_v61, %v955_v27  ;;  %v948_v20 = vmul.f32 %v2861_v16, %v2694_v63  ;;  %v2951_v12 = vpop.permute.xlu1 %1120 }
  0xc4   : > { %v993_v17 = vmul.f32 %v4100_v21, %v2658_v30  ;;  %v960_v1 = vadd.f32 %v951_v8, %v938_v9  ;;  %v1066_v28 = vmul.f32 %v2893_v5, %v2578_v45  ;;  %v990_v62 = vmul.f32 %v4100_v21, %v2672_v35 }
  0xc5   : > { %v957_v24 = vadd.f32 %v948_v20, %v935_v31  ;;  %v937_v61 = vmul.f32 %v2833_v6, %v2746_v23  ;;  %v1079_v9 = vmul.f32 %v2941_v44, %v2581_v46  ;;  %v1101_v4 = vmul.f32 %v2921_v2, %v2584_v47 }
  0xc6   : > { %v1002_v13 = vadd.f32 %v993_v17, %v980_v22  ;;  %v982_v51 = vadd.f32 %v973_v11, %v960_v1  ;;  %v999_v27 = vadd.f32 %v990_v62, %v977_v41  ;;  %v995_v31 = vmul.f32 %v4100_v21, %v2686_v59 }
  0xc7   : > { %1022 = vrot.lane.b32.xlu0 %v1000_v14, %s2408_s9  ;;  %1016 = vrot.lane.b32.xlu1 %v997_v33, %s2408_s9  ;;  %v979_v8 = vadd.f32 %v970_v36, %v957_v24  ;;  %v950_v14 = vmul.f32 %v2861_v16, %v2753_v48  ;;  %v972_v33 = vmul.f32 %v2863_v15, %v2769_v10 }
  0xc8   : > { %v1088_v6 = vadd.f32 %v1079_v9, %v1066_v28  ;;  %v1123_v22 = vmul.f32 %v2951_v12, %v4091_v26  ;;  %v992_v11 = vmul.f32 %v4100_v21, %v2766_v32  ;;  %v1068_v16 = vmul.f32 %v2893_v5, %v2560_v37 }
  0xc9   : > { %v959_v41 = vadd.f32 %v950_v14, %v937_v61  ;;  %v1004_v20 = vadd.f32 %v995_v31, %v982_v51  ;;  %v1081_v36 = vmul.f32 %v2941_v44, %v2563_v38  ;;  %v1103_v28 = vmul.f32 %v2921_v2, %v2572_v43 }
  0xca   : > { %v1110_v15 = vadd.f32 %v1101_v4, %v1088_v6  ;;  %v1001_v17 = vadd.f32 %v992_v11, %v979_v8  ;;  %v1067_v62 = vmul.f32 %v2893_v5, %v4089_v42  ;;  %v994_v61 = vmul.f32 %v4100_v21, %v2778_v7 }
  0xcb   : > { %1026 = vrot.lane.b32.xlu0 %v1002_v13, %s2408_s9  ;;  %1020 = vrot.lane.b32.xlu1 %v999_v27, %s2408_s9  ;;  %v981_v1 = vadd.f32 %v972_v33, %v959_v41  ;;  %v1125_v13 = vmul.f32 %v2951_v12, %v4095_v25  ;;  %v1070_v51 = vmul.f32 %v2893_v5, %v4090_v50  ;;  %v3005_v41 = vpop.permute.xlu1 %1199 }
  0xcc   : > { %v1132_v24 = vadd.f32 %v1123_v22, %v1110_v15  ;;  %v1090_v9 = vadd.f32 %v1081_v36, %v1068_v16  ;;  %v1080_v4 = vmul.f32 %v2941_v44, %v4092_v49  ;;  %v1102_v27 = vmul.f32 %v2921_v2, %v2612_v57  ;;  %4101 = vst [vmem:[#allocation17_spill] sm:$0xff] %v3005_v41 }
  0xcd   : > { %v1124_v21 = vmul.f32 %v2951_v12, %v2638_v18  ;;  %v1083_v8 = vmul.f32 %v2941_v44, %v4093_v54  ;;  %v1105_v14 = vmul.f32 %v2921_v2, %v2599_v52  ;;  %v1069_v33 = vmul.f32 %v2893_v5, %v4094_v55 }
  0xce   : > { %v1003_v31 = vadd.f32 %v994_v61, %v981_v1  ;;  %v1112_v6 = vadd.f32 %v1103_v28, %v1090_v9  ;;  %v1089_v22 = vadd.f32 %v1080_v4, %v1067_v62  ;;  %v1072_v11 = vmul.f32 %v2893_v5, %v4097_v40 }
  0xcf   : > { %1030 = vrot.lane.b32.xlu0 %v1004_v20, %s2408_s9  ;;  %1024 = vrot.lane.b32.xlu1 %v1001_v17, %s2408_s9  ;;  %v1092_v16 = vadd.f32 %v1083_v8, %v1070_v51  ;;  %v1127_v20 = vmul.f32 %v2951_v12, %v2602_v53  ;;  %v1082_v15 = vmul.f32 %v2941_v44, %v4096_v56 }
  0xd0   : > { %v1104_v36 = vmul.f32 %v2921_v2, %v2669_v34  ;;  %v1111_v17 = vadd.f32 %v1102_v27, %v1089_v22  ;;  %v1085_v1 = vmul.f32 %v2941_v44, %v4098_v3  ;;  %v1107_v28 = vmul.f32 %v2921_v2, %v2655_v29 }
  0xd1   : > { %v1134_v62 = vadd.f32 %v1125_v13, %v1112_v6  ;;  %v1114_v61 = vadd.f32 %v1105_v14, %v1092_v16  ;;  %v1091_v51 = vadd.f32 %v1082_v15, %v1069_v33  ;;  %v1126_v9 = vmul.f32 %v2951_v12, %v2672_v35  ;;  %v3033_v6 = vpop.permute.xlu1 %1234 }
  0xd2   : > { %v1133_v4 = vadd.f32 %v1124_v21, %v1111_v17  ;;  %v1094_v8 = vadd.f32 %v1085_v1, %v1072_v11  ;;  %v1071_v27 = vmul.f32 %v2893_v5, %v2689_v60  ;;  %v1084_v13 = vmul.f32 %v2941_v44, %v2694_v63  ;;  %4102 = vst [vmem:[#allocation15_spill] sm:$0xff] %v3033_v6  ;;  %v3036_v11 = vld [vmem:[%s2513_s6] sm:$0xff]  ;;  %v3045_v17 = vld [vmem:[%s2513_s6 + $0x8] sm:$0xff]  ;;  %v3047_v1 = vpop.permute.xlu0 %235 }
  0xd3   : > { %1150 = vrot.lane.b32.xlu0 %v1132_v24, %s2409_s10  ;;  %1028 = vrot.lane.b32.xlu1 %v1003_v31, %s2408_s9  ;;  %v1129_v24 = vmul.f32 %v2951_v12, %v2658_v30  ;;  %v1136_v31 = vadd.f32 %v1127_v20, %v1114_v61  ;;  %v1113_v22 = vadd.f32 %v1104_v36, %v1091_v51  ;;  %v4109_v30 = vld [vmem:[#allocation5_spill] sm:$0xff] }
  0xd4   : > { %v1116_v14 = vadd.f32 %v1107_v28, %v1094_v8  ;;  %v1106_v21 = vmul.f32 %v2921_v2, %v2697_v0  ;;  %v1074_v33 = vmul.f32 %v2893_v5, %v2675_v39  ;;  %4103 = vst [vmem:[#allocation14_spill] sm:$0xff] %v3036_v11  ;;  %v1128_v20 = vmul.f32 %v2951_v12, %v2766_v32  ;;  %v4105_v8 = vld [vmem:[#allocation8_spill] sm:$0xff] }
  0xd5   : > { %v1135_v16 = vadd.f32 %v1126_v9, %v1113_v22  ;;  %v1087_v15 = vmul.f32 %v2941_v44, %v4099_v19  ;;  %v1073_v36 = vmul.f32 %v2893_v5, %v2746_v23  ;;  %4104 = vst [vmem:[#allocation16_spill] sm:$0xff] %v3045_v17  ;;  %v1109_v61 = vmul.f32 %v2921_v2, %v2683_v58  ;;  %v4106_v22 = vld [vmem:[#allocation9_spill] sm:$0xff] }
  0xd6   : > { %v1138_v28 = vadd.f32 %v1129_v24, %v1116_v14  ;;  %v1131_v51 = vmul.f32 %v2951_v12, %v2686_v59  ;;  %v1086_v9 = vmul.f32 %v2941_v44, %v2753_v48  ;;  %v1355_v5 = vrot.slane %v3036_v11, %v4105_v8  ;;  %v4107_v14 = vld [vmem:[#allocation4_spill] sm:$0xff] }
  0xd7   : > { %1154 = vrot.lane.b32.xlu0 %v1134_v62, %s2409_s10  ;;  %1152 = vrot.lane.b32.xlu1 %v1133_v4, %s2409_s10  ;;  %v1093_v62 = vadd.f32 %v1084_v13, %v1071_v27  ;;  %v1108_v4 = vmul.f32 %v2921_v2, %v2769_v10  ;;  %v1459_v6 = vrot.slane %v3036_v11, %v4106_v22 }
  0xd8   : > { %v1096_v27 = vadd.f32 %v1087_v15, %v1074_v33  ;;  %v1363_v13 = vrot.slane %v3045_v17, %v4105_v8  ;;  %v1095_v44 = vadd.f32 %v1086_v9, %v1073_v36  ;;  %v1130_v2 = vmul.f32 %v2951_v12, %v2778_v7 }
  0xd9   : > { %v1115_v24 = vadd.f32 %v1106_v21, %v1093_v62  ;;  %v3068_v41 = vrot.slane %v1355_v5, %v4107_v14  ;;  %v3071_v10 = vrot.slane %v1459_v6, %v4109_v30  ;;  %v3075_v21 = vpop.permute.xlu0 %1340  ;;  %v1467_v15 = vrot.slane %v3045_v17, %v4106_v22  ;;  %v3089_v62 = vld [vmem:[%s2513_s6 + $0x10] sm:$0xff]  ;;  %v3099_v5 = vld [vmem:[%s2513_s6 + $0x18] sm:$0xff] }
  0xda   : > { %v3078_v33 = vrot.slane %v1363_v13, %v4107_v14  ;;  %v1117_v12 = vadd.f32 %v1108_v4, %v1095_v44  ;;  %4112 = vst [vmem:[#allocation23_spill] sm:$0xff] %v3089_v62  ;;  %4114 = vst [vmem:[#allocation8_spill] sm:$0xff] %v3099_v5  ;;  %v1475_v44 = vrot.slane %v3089_v62, %v4106_v22 }
  0xdb   : > { %1158 = vrot.lane.b32.xlu0 %v1136_v31, %s2409_s10  ;;  %1156 = vrot.lane.b32.xlu1 %v1135_v16, %s2409_s10  ;;  %4108 = vst [vmem:[#allocation26_spill] sm:$0xff] %v3068_v41  ;;  %4110 = vst [vmem:[#allocation13_spill] sm:$0xff] %v3071_v10  ;;  %v1137_v29 = vadd.f32 %v1128_v20, %v1115_v24  ;;  %v1118_v31 = vadd.f32 %v1109_v61, %v1096_v27  ;;  %v3073_v16 = vpop.permute.xlu1 %1449 }
  0xdc   : > { %4111 = vst [vmem:[#allocation22_spill] sm:$0xff] %v3078_v33  ;;  %v1439_v36 = vmul.f32 %v3068_v41, %v3075_v21  ;;  %v1543_v6 = vmul.f32 %v3071_v10, %v3073_v16  ;;  %v1351_v20 = vrot.slane %v3036_v11, %v4107_v14  ;;  %v1441_v9 = vmul.f32 %v3078_v33, %v3075_v21  ;;  %v3158_v33 = vld [vmem:[%s2513_s6 + $0x20] sm:$0xff] }
  0xdd   : > { %v1140_v61 = vadd.f32 %v1131_v51, %v1118_v31  ;;  %v3096_v4 = vrot.slane %v1467_v15, %v4109_v30  ;;  %v1139_v24 = vadd.f32 %v1130_v2, %v1117_v12  ;;  %v1371_v51 = vrot.slane %v3089_v62, %v4105_v8  ;;  %4124 = vst [vmem:[#allocation38_spill] sm:$0xff] %v3158_v33 }
  0xde   : > { %v3101_v27 = vadd.f32 %v1543_v6, %v1439_v36  ;;  %v3104_v13 = vrot.slane %v1351_v20, %v4107_v14  ;;  %v1359_v2 = vrot.slane %v3045_v17, %v4107_v14  ;;  %v1463_v12 = vrot.slane %v3045_v17, %v4109_v30 }
  0xdf   : > { %1162 = vrot.lane.b32.xlu0 %v1138_v28, %s2409_s10  ;;  %1160 = vrot.lane.b32.xlu1 %v1137_v29, %s2409_s10  ;;  %4113 = vst [vmem:[#allocation19_spill] sm:$0xff] %v3096_v4  ;;  %v1455_v28 = vrot.slane %v3036_v11, %v4109_v30  ;;  %v1545_v29 = vmul.f32 %v3096_v4, %v3073_v16 }
  0xe0   : > { %4115 = vst [vmem:[#allocation9_spill] sm:$0xff] %v3101_v27  ;;  %4116 = vst [vmem:[#allocation4_spill] sm:$0xff] %v3104_v13  ;;  %v1438_v31 = vmul.f32 %v3104_v13, %v3075_v21  ;;  %v1379_v36 = vrot.slane %v3099_v5, %v4105_v8  ;;  %v3130_v20 = vrot.slane %v1371_v51, %v4107_v14 }
  0xe1   : > { %v3119_v15 = vrot.slane %v1455_v28, %v4109_v30  ;;  %v3127_v6 = vadd.f32 %v1545_v29, %v1441_v9  ;;  %v3133_v13 = vrot.slane %v1475_v44, %v4109_v30  ;;  %v3138_v28 = vld [vmem:[%s3937_s1 + $0x38] sm:$0xff]  ;;  %v3146_v9 = vrot.slane %v1463_v12, %v4109_v30 }
  0xe2   : > { %4119 = vst [vmem:[#allocation33_spill] sm:$0xff] %v3130_v20  ;;  %v1443_v29 = vmul.f32 %v3130_v20, %v3075_v21  ;;  %v1483_v44 = vrot.slane %v3099_v5, %v4106_v22  ;;  %v4126_v20 = vld [vmem:[#allocation2_spill] sm:$0xff] }
  0xe3   : > { %4117 = vst [vmem:[#allocation5_spill] sm:$0xff] %v3119_v15  ;;  %1166 = vrot.lane.b32.xlu0 %v1140_v61, %s2409_s10  ;;  %1164 = vrot.lane.b32.xlu1 %v1139_v24, %s2409_s10  ;;  %4118 = vst [vmem:[#allocation32_spill] sm:$0xff] %v3127_v6  ;;  %v1542_v4 = vmul.f32 %v3119_v15, %v3073_v16  ;;  %v3143_v61 = vrot.slane %v1359_v2, %v4107_v14 }
  0xe4   : > { %4120 = vst [vmem:[#allocation34_spill] sm:$0xff] %v3133_v13  ;;  %4122 = vst [vmem:[#allocation36_spill] sm:$0xff] %v3146_v9  ;;  %v3149_v24 = vrot.slane %v1379_v36, %v4107_v14  ;;  %v1547_v51 = vmul.f32 %v3133_v13, %v3073_v16  ;;  %v1544_v12 = vmul.f32 %v3146_v9, %v3073_v16 }
  0xe5   : > { %4121 = vst [vmem:[#allocation35_spill] sm:$0xff] %v3143_v61  ;;  %v3160_v15 = vadd.f32 %v1542_v4, %v1438_v31  ;;  %v1440_v2 = vmul.f32 %v3143_v61, %v3075_v21  ;;  %v1367_v36 = vrot.slane %v3089_v62, %v4107_v14  ;;  %v3175_v4 = vrot.slane %v1483_v44, %v4109_v30 }
  0xe6   : > { %4123 = vst [vmem:[#allocation37_spill] sm:$0xff] %v3149_v24  ;;  %v3170_v13 = vadd.f32 %v1547_v51, %v1443_v29  ;;  %v1445_v10 = vmul.f32 %v3149_v24, %v3075_v21  ;;  %v1471_v9 = vrot.slane %v3089_v62, %v4109_v30  ;;  %v1387_v61 = vrot.slane %v3158_v33, %v4105_v8 }
  0xe7   : > { %4125 = vst [vmem:[#allocation39_spill] sm:$0xff] %v3160_v15  ;;  %1563 = vperm.xlu0 %2366, %v4126_v20   ;;  %1852 = vperm.xlu1 %2368, %v3138_v28   ;;  %4128 = vst [vmem:[#allocation40_spill] sm:$0xff] %v3175_v4  ;;  %v3177_v31 = vadd.f32 %v1544_v12, %v1440_v2  ;;  %v1491_v20 = vrot.slane %v3158_v33, %v4106_v22  ;;  %v4133_v24 = vmov 1  }
  0xe8   : > { %4127 = vst [vmem:[#allocation2_spill] sm:$0xff] %v3170_v13  ;;  %v1549_v29 = vmul.f32 %v3175_v4, %v3073_v16  ;;  %v1375_v51 = vrot.slane %v3099_v5, %v4107_v14  ;;  %v1479_v44 = vrot.slane %v3099_v5, %v4109_v30  ;;  %v3192_v2 = vrot.slane %v1367_v36, %v4107_v14  ;;  %v4137_v36 = vld [vmem:[#allocation3_spill] sm:$0xff] }
  0xe9   : > { %4129 = vst [vmem:[#allocation41_spill] sm:$0xff] %v3177_v31  ;;  %v3195_v12 = vrot.slane %v1471_v9, %v4109_v30  ;;  %v3198_v8 = vrot.slane %v1387_v61, %v4107_v14  ;;  %v3205_v4 = vrot.slane %v1491_v20, %v4109_v30  ;;  %v2306_v61 = vld [vmem:[%s3937_s1 + $0x40] sm:$0xff]  ;;  %v4145_v13 = vmov 0  }
  0xea   : > { %4130 = vst [vmem:[#allocation42_spill] sm:$0xff] %v3192_v2  ;;  %v3202_v22 = vadd.f32 %v1549_v29, %v1445_v10  ;;  %v3208_v41 = vrot.slane %v1375_v51, %v4107_v14  ;;  %v3213_v9 = vrot.slane %v1479_v44, %v4109_v30  ;;  %v1442_v10 = vmul.f32 %v3192_v2, %v3075_v21 }
  0xeb   : > { %4131 = vst [vmem:[#allocation43_spill] sm:$0xff] %v3195_v12  ;;  %4132 = vst [vmem:[#allocation44_spill] sm:$0xff] %v3198_v8  ;;  %2367 = vset.pattern.permute.xlu0 %v4133_v24  ;;  %2369 = vset.pattern.permute.xlu1 %v4133_v24  ;;  %v1383_v24 = vrot.slane %v3158_v33, %v4107_v14  ;;  %v1546_v20 = vmul.f32 %v3195_v12, %v3073_v16 }
  0xec   : > { %4134 = vst [vmem:[#allocation45_spill] sm:$0xff] %v3202_v22  ;;  %4135 = vst [vmem:[#allocation46_spill] sm:$0xff] %v3205_v4  ;;  %1212 = vperm.xlu0 %2367, %v4137_v36   ;;  %1866 = vperm.xlu1 %2369, %v3138_v28   ;;  %v1447_v29 = vmul.f32 %v3198_v8, %v3075_v21  ;;  %v1551_v51 = vmul.f32 %v3205_v4, %v3073_v16  ;;  %v4139_v36 = vmov 2   ;;  %v4144_v4 = vmov 3  }
  0xed   : > { %4136 = vst [vmem:[#allocation47_spill] sm:$0xff] %v3208_v41  ;;  %4138 = vst [vmem:[#allocation3_spill] sm:$0xff] %v3213_v9  ;;  %v1444_v44 = vmul.f32 %v3208_v41, %v3075_v21  ;;  %v1548_v2 = vmul.f32 %v3213_v9, %v3073_v16  ;;  %v3234_v22 = vadd.f32 %v1546_v20, %v1442_v10  ;;  %v2377_v9 = vld [vmem:[%s3937_s1 + $0x30] sm:$0xff] }
  0xee   : > { %v3236_v12 = vadd.f32 %v1551_v51, %v1447_v29  ;;  %v3241_v8 = vrot.slane %v1383_v24, %v4107_v14  ;;  %v1487_v41 = vrot.slane %v3158_v33, %v4109_v30  ;;  %v4149_v29 = vld [vmem:[#allocation12_spill] sm:$0xff]  ;;  %v328_v15 = vmul.f32 %v4090_v50, %v3047_v1 }
  0xef   : > { %4140 = vst [vmem:[#allocation48_spill] sm:$0xff] %v3234_v22  ;;  %v3238_v31 = vadd.f32 %v1548_v2, %v1444_v44  ;;  %v521_v51 = vmul.f32 %v2584_v47, %v4149_v29  ;;  %v522_v44 = vmul.f32 %v2612_v57, %v4149_v29  ;;  %v529_v22 = vmul.f32 %v2683_v58, %v4149_v29  ;;  %v4150_v33 = vld [vmem:[#allocation20_spill] sm:$0xff] }
  0xf0   : > { %2013 = vperm.xlu0 %2367, %v2306_v61   ;;  %2370 = vset.pattern.permute.xlu1 %v4139_v36  ;;  %4141 = vst [vmem:[#allocation49_spill] sm:$0xff] %v3236_v12  ;;  %4143 = vst [vmem:[#allocation51_spill] sm:$0xff] %v3241_v8  ;;  %v1446_v2 = vmul.f32 %v3241_v8, %v3075_v21  ;;  %v3253_v10 = vrot.slane %v1487_v41, %v4109_v30 }
  0xf1   : > { %1890 = vperm.xlu1 %2370, %v3138_v28   ;;  %4142 = vst [vmem:[#allocation50_spill] sm:$0xff] %v3238_v31  ;;  %v325_v30 = vmul.f32 %v4089_v42, %v3047_v1  ;;  %v324_v41 = vmul.f32 %v2578_v45, %v3047_v1  ;;  %v329_v6 = vmul.f32 %v2689_v60, %v3047_v1 }
  0xf2   : > { %4146 = vst [vmem:[#allocation52_spill] sm:$0xff] %v3253_v10  ;;  %v1550_v14 = vmul.f32 %v3253_v10, %v3073_v16  ;;  %v4148_v16 = vld [vmem:[#allocation28_spill] sm:$0xff] }
  0xf3   : > { %v418_v21 = vmul.f32 %v2581_v46, %v4148_v16  ;;  %v426_v12 = vmul.f32 %v4099_v19, %v4148_v16 }
  0xf4   : > { %2372 = vset.pattern.permute.xlu0 %v4144_v4  ;;  %v3258_v24 = vadd.f32 %v1550_v14, %v1446_v2  ;;  %v421_v2 = vmul.f32 %v4096_v56, %v4148_v16  ;;  %v523_v14 = vmul.f32 %v2572_v43, %v4149_v29  ;;  %v330_v56 = vmul.f32 %v4097_v40, %v3047_v1 }
  0xf5   : > { %1677 = vperm.xlu0 %2372, %v2377_v9   ;;  %2371 = vset.pattern.permute.xlu1 %v4145_v13  ;;  %v427_v20 = vadd.f32 %v418_v21, %v324_v41  ;;  %v332_v41 = vmul.f32 %v2675_v39, %v3047_v1 }
  0xf6   : > { %1999 = vperm.xlu1 %2371, %v2306_v61   ;;  %4147 = vst [vmem:[#allocation53_spill] sm:$0xff] %v3258_v24 }
  0xf9   : > { %2061 = vperm.xlu0 %2372, %v2306_v61  }
  0xfa   : > { %2373 = vset.pattern.permute.xlu1 %v4144_v4  ;;  %v419_v4 = vmul.f32 %v4092_v49, %v4148_v16 }
  0xfb   : > { %1914 = vperm.xlu1 %2373, %v3138_v28   ;;  %v3272_v28 = vpop.permute.xlu1 %1256 }
  0xfc   : > { %v428_v9 = vadd.f32 %v419_v4, %v325_v30  ;;  %v524_v30 = vmul.f32 %v2669_v34, %v4149_v29  ;;  %v530_v4 = vadd.f32 %v521_v51, %v427_v20  ;;  %v625_v20 = vmul.f32 %v2638_v18, %v4150_v33 }
  0xfd   : > { %2376 = vset.pattern.permute.xlu0 %v4145_v13  ;;  %v435_v51 = vadd.f32 %v426_v12, %v332_v41  ;;  %v331_v12 = vmul.f32 %v2746_v23, %v3047_v1 }
  0xfe   : > { %v531_v21 = vadd.f32 %v522_v44, %v428_v9  ;;  %v624_v9 = vmul.f32 %v4091_v26, %v4150_v33  ;;  %v422_v44 = vmul.f32 %v4093_v54, %v4148_v16 }
  0xff   : > { %2374 = vset.pattern.permute.xlu1 %v4139_v36  ;;  %v420_v36 = vmul.f32 %v2563_v38, %v4148_v16 }
 0x100   : > { %2037 = vperm.xlu1 %2374, %v2306_v61   ;;  %v326_v61 = vmul.f32 %v2560_v37, %v3047_v1  ;;  %v633_v27 = vadd.f32 %v624_v9, %v530_v4  ;;  %v431_v11 = vadd.f32 %v422_v44, %v328_v15  ;;  %v424_v15 = vmul.f32 %v4098_v3, %v4148_v16 }
 0x101   : > { %v538_v4 = vadd.f32 %v529_v22, %v435_v51 }
 0x102   : > { %v429_v10 = vadd.f32 %v420_v36, %v326_v61  ;;  %v525_v61 = vmul.f32 %v2599_v52, %v4149_v29  ;;  %v423_v36 = vmul.f32 %v2694_v63, %v4148_v16 }
 0x104   : > { %2375 = vset.pattern.permute.xlu1 %v4145_v13  ;;  %v327_v13 = vmul.f32 %v4094_v55, %v3047_v1  ;;  %v532_v5 = vadd.f32 %v523_v14, %v429_v10  ;;  %v432_v19 = vadd.f32 %v423_v36, %v329_v6  ;;  %v425_v6 = vmul.f32 %v2753_v48, %v4148_v16  ;;  %v4151_v16 = vld [vmem:[#allocation24_spill] sm:$0xff] }
 0x105   : > { %v433_v36 = vadd.f32 %v424_v15, %v330_v56  ;;  %v527_v51 = vmul.f32 %v4151_v16, %v4149_v29 }
 0x106   : > { %v430_v8 = vadd.f32 %v421_v2, %v327_v13  ;;  %v526_v13 = vmul.f32 %v2697_v0, %v4149_v29  ;;  %v634_v2 = vadd.f32 %v625_v20, %v531_v21  ;;  %v626_v21 = vmul.f32 %v4095_v25, %v4150_v33 }
 0x107   : > { %v534_v20 = vadd.f32 %v525_v61, %v431_v11  ;;  %v434_v23 = vadd.f32 %v425_v6, %v331_v12  ;;  %v4152_v11 = vld [vmem:[#allocation31_spill] sm:$0xff] }
 0x108   : > { %v533_v62 = vadd.f32 %v524_v30, %v430_v8  ;;  %v627_v8 = vmul.f32 %v2672_v35, %v4150_v33  ;;  %v635_v30 = vadd.f32 %v626_v21, %v532_v5  ;;  %v535_v44 = vadd.f32 %v526_v13, %v432_v19 }
 0x109   : > { %v528_v19 = vmul.f32 %v4152_v11, %v4149_v29  ;;  %v631_v29 = vmul.f32 %v2778_v7, %v4150_v33 }
 0x10a   : > { %v636_v1 = vadd.f32 %v627_v8, %v533_v62  ;;  %v629_v62 = vmul.f32 %v2766_v32, %v4150_v33 }
 0x10b   : > { %v537_v21 = vadd.f32 %v528_v19, %v434_v23 }
 0x111   : > { %v747_v24 = vpop.permute.xlu0 %746  ;;  %v743_v31 = vpop.permute.xlu1 %742 }
 0x115   : > { %v751_v17 = vpop.permute.xlu0 %750  ;;  %v745_v18 = vpop.permute.xlu1 %744 }
 0x116   : > { %v761_v41 = vsel %vm760_vm0, %v743_v31, %v745_v18  ;;  %v762_v49 = vsel %vm760_vm0, %v745_v18, %v747_v24  ;;  %v632_v18 = vmul.f32 %v2686_v59, %v4150_v33 }
 0x117   : > { %v778_v10 = vadd.f32 %v761_v41, %v633_v27  ;;  %v779_v14 = vadd.f32 %v762_v49, %v634_v2  ;;  %v628_v2 = vmul.f32 %v2602_v53, %v4150_v33  ;;  %v536_v41 = vadd.f32 %v527_v51, %v433_v36 }
 0x118   : > { %v641_v56 = vadd.f32 %v632_v18, %v538_v4 }
 0x119   : > { %v755_v31 = vpop.permute.xlu0 %754  ;;  %v749_v9 = vpop.permute.xlu1 %748  ;;  %v637_v13 = vadd.f32 %v628_v2, %v534_v20  ;;  %v640_v20 = vadd.f32 %v631_v29, %v537_v21 }
 0x11a   : > { %v763_v49 = vsel %vm760_vm0, %v747_v24, %v749_v9  ;;  %v764_v27 = vsel %vm760_vm0, %v749_v9, %v751_v17  ;;  %v638_v24 = vadd.f32 %v629_v62, %v535_v44  ;;  %v4153_v9 = vld [vmem:[#allocation25_spill] sm:$0xff] }
 0x11b   : > { %v780_v5 = vadd.f32 %v763_v49, %v635_v30  ;;  %v781_v22 = vadd.f32 %v764_v27, %v636_v1  ;;  %v630_v49 = vmul.f32 %v4153_v9, %v4150_v33 }
 0x11d   : > { %v759_v61 = vpop.permute.xlu0 %758  ;;  %v753_v12 = vpop.permute.xlu1 %752  ;;  %v639_v18 = vadd.f32 %v630_v49, %v536_v41 }
 0x11e   : > { %v786_v8 = vadd.f32 %v759_v61, %v641_v56  ;;  %v765_v15 = vsel %vm760_vm0, %v751_v17, %v753_v12  ;;  %v766_v6 = vsel %vm760_vm0, %v753_v12, %v755_v31 }
 0x11f   : > { %v782_v30 = vadd.f32 %v765_v15, %v637_v13  ;;  %v783_v1 = vadd.f32 %v766_v6, %v638_v24 }
 0x121   : > { %v879_v4 = vpop.permute.xlu0 %878  ;;  %v757_v44 = vpop.permute.xlu1 %756 }
 0x122   : > { %v767_v36 = vsel %vm760_vm0, %v755_v31, %v757_v44  ;;  %v768_v23 = vsel %vm760_vm0, %v757_v44, %v759_v61 }
 0x123   : > { %v784_v27 = vadd.f32 %v767_v36, %v639_v18  ;;  %v785_v17 = vadd.f32 %v768_v23, %v640_v20 }
 0x125   : > { %v883_v2 = vpop.permute.xlu0 %882  ;;  %v881_v62 = vpop.permute.xlu1 %880 }
 0x126   : > { %v897_v51 = vsel %vm896_vm1, %v879_v4, %v881_v62  ;;  %v898_v19 = vsel %vm896_vm1, %v881_v62, %v883_v2 }
 0x127   : > { %v914_v56 = vadd.f32 %v897_v51, %v778_v10  ;;  %v915_v13 = vadd.f32 %v898_v19, %v779_v14 }
 0x129   : > { %v887_v33 = vpop.permute.xlu0 %886  ;;  %v885_v24 = vpop.permute.xlu1 %884 }
 0x12a   : > { %v899_v12 = vsel %vm896_vm1, %v883_v2, %v885_v24  ;;  %v900_v41 = vsel %vm896_vm1, %v885_v24, %v887_v33 }
 0x12b   : > { %v916_v31 = vadd.f32 %v899_v12, %v780_v5  ;;  %v917_v21 = vadd.f32 %v900_v41, %v781_v22 }
 0x12d   : > { %v891_v61 = vpop.permute.xlu0 %890  ;;  %v889_v15 = vpop.permute.xlu1 %888 }
 0x12e   : > { %v901_v6 = vsel %vm896_vm1, %v887_v33, %v889_v15  ;;  %v902_v49 = vsel %vm896_vm1, %v889_v15, %v891_v61 }
 0x12f   : > { %v918_v29 = vadd.f32 %v901_v6, %v782_v30  ;;  %v919_v4 = vadd.f32 %v902_v49, %v783_v1 }
 0x131   : > { %v895_v18 = vpop.permute.xlu0 %894  ;;  %v893_v20 = vpop.permute.xlu1 %892 }
 0x132   : > { %v922_v10 = vadd.f32 %v895_v18, %v786_v8  ;;  %v903_v14 = vsel %vm896_vm1, %v891_v61, %v893_v20  ;;  %v904_v44 = vsel %vm896_vm1, %v893_v20, %v895_v18 }
 0x133   : > { %v920_v36 = vadd.f32 %v903_v14, %v784_v27  ;;  %v921_v23 = vadd.f32 %v904_v44, %v785_v17 }
 0x135   : > { %v1019_v2 = vpop.permute.xlu0 %1018  ;;  %v1015_v5 = vpop.permute.xlu1 %1014 }
 0x139   : > { %v1023_v22 = vpop.permute.xlu0 %1022  ;;  %v1017_v62 = vpop.permute.xlu1 %1016 }
 0x13a   : > { %v1033_v51 = vsel %vm1032_vm2, %v1015_v5, %v1017_v62  ;;  %v1034_v19 = vsel %vm1032_vm2, %v1017_v62, %v1019_v2 }
 0x13b   : > { %v1050_v30 = vadd.f32 %v1033_v51, %v914_v56  ;;  %v1051_v1 = vadd.f32 %v1034_v19, %v915_v13 }
 0x13d   : > { %v1027_v33 = vpop.permute.xlu0 %1026  ;;  %v1021_v24 = vpop.permute.xlu1 %1020 }
 0x13e   : > { %v1035_v8 = vsel %vm1032_vm2, %v1019_v2, %v1021_v24  ;;  %v1036_v12 = vsel %vm1032_vm2, %v1021_v24, %v1023_v22 }
 0x13f   : > { %v1052_v41 = vadd.f32 %v1035_v8, %v916_v31  ;;  %v1053_v27 = vadd.f32 %v1036_v12, %v917_v21 }
 0x141   : > { %v1031_v17 = vpop.permute.xlu0 %1030  ;;  %v1025_v61 = vpop.permute.xlu1 %1024 }
 0x142   : > { %v1058_v15 = vadd.f32 %v1031_v17, %v922_v10  ;;  %v1037_v6 = vsel %vm1032_vm2, %v1023_v22, %v1025_v61  ;;  %v1038_v49 = vsel %vm1032_vm2, %v1025_v61, %v1027_v33 }
 0x143   : > { %v1054_v18 = vadd.f32 %v1037_v6, %v918_v29  ;;  %v1055_v20 = vadd.f32 %v1038_v49, %v919_v4 }
 0x145   : > { %v1151_v14 = vpop.permute.xlu0 %1150  ;;  %v1029_v56 = vpop.permute.xlu1 %1028 }
 0x146   : > { %v1039_v13 = vsel %vm1032_vm2, %v1027_v33, %v1029_v56  ;;  %v1040_v44 = vsel %vm1032_vm2, %v1029_v56, %v1031_v17 }
 0x147   : > { %v1056_v2 = vadd.f32 %v1039_v13, %v920_v36  ;;  %v1057_v5 = vadd.f32 %v1040_v44, %v921_v23  ;;  %v4163_v44 = vld [vmem:[#allocation17_spill] sm:$0xff] }
 0x149   : > { %v1155_v31 = vpop.permute.xlu0 %1154  ;;  %v1153_v21 = vpop.permute.xlu1 %1152 }
 0x14a   : > { %v1169_v62 = vsel %vm1168_vm3, %v1151_v14, %v1153_v21  ;;  %v1170_v10 = vsel %vm1168_vm3, %v1153_v21, %v1155_v31  ;;  %v1202_v21 = vmul.f32 %v4163_v44, %v2578_v45 }
 0x14b   : > { %v3364_v22 = vadd.f32 %v1169_v62, %v1050_v30  ;;  %v3366_v51 = vadd.f32 %v1170_v10, %v1051_v1  ;;  %v1208_v62 = vmul.f32 %v4163_v44, %v4097_v40 }
 0x14d   : > { %4154 = vst [vmem:[#allocation28_spill] sm:$0xff] %v3364_v22  ;;  %4155 = vst [vmem:[#allocation12_spill] sm:$0xff] %v3366_v51  ;;  %v1159_v29 = vpop.permute.xlu0 %1158  ;;  %v1157_v4 = vpop.permute.xlu1 %1156 }
 0x14e   : > { %v1171_v19 = vsel %vm1168_vm3, %v1155_v31, %v1157_v4  ;;  %v1172_v33 = vsel %vm1168_vm3, %v1157_v4, %v1159_v29 }
 0x14f   : > { %v3370_v24 = vadd.f32 %v1171_v19, %v1052_v41  ;;  %v3372_v36 = vadd.f32 %v1172_v33, %v1053_v27 }
 0x151   : > { %4156 = vst [vmem:[#allocation20_spill] sm:$0xff] %v3370_v24  ;;  %4157 = vst [vmem:[#allocation24_spill] sm:$0xff] %v3372_v36  ;;  %v1163_v23 = vpop.permute.xlu0 %1162  ;;  %v1161_v8 = vpop.permute.xlu1 %1160 }
 0x152   : > { %v1173_v12 = vsel %vm1168_vm3, %v1159_v29, %v1161_v8  ;;  %v1174_v17 = vsel %vm1168_vm3, %v1161_v8, %v1163_v23 }
 0x153   : > { %v3376_v30 = vadd.f32 %v1173_v12, %v1054_v18  ;;  %v3378_v1 = vadd.f32 %v1174_v17, %v1055_v20  ;;  %v1204_v18 = vmul.f32 %v4163_v44, %v2560_v37  ;;  %v4164_v20 = vld [vmem:[#allocation15_spill] sm:$0xff]  ;;  %v1205_v37 = vmul.f32 %v4163_v44, %v4094_v55 }
 0x154   : > { %v1239_v31 = vmul.f32 %v4164_v20, %v2572_v43  ;;  %v1210_v43 = vmul.f32 %v4163_v44, %v2675_v39  ;;  %v1237_v45 = vmul.f32 %v4164_v20, %v2584_v47  ;;  %v1238_v40 = vmul.f32 %v4164_v20, %v2612_v57 }
 0x155   : > { %4158 = vst [vmem:[#allocation31_spill] sm:$0xff] %v3376_v30  ;;  %4159 = vst [vmem:[#allocation25_spill] sm:$0xff] %v3378_v1  ;;  %v1167_v61 = vpop.permute.xlu0 %1166  ;;  %v1165_v6 = vpop.permute.xlu1 %1164  ;;  %v1243_v55 = vmul.f32 %v4164_v20, %v4151_v16  ;;  %v1240_v39 = vmul.f32 %v4164_v20, %v2669_v34  ;;  %v1242_v47 = vmul.f32 %v4164_v20, %v2697_v0  ;;  %v4165_v0 = vld [vmem:[#allocation18_spill] sm:$0xff] }
 0x156   : > { %v3380_v49 = vadd.f32 %v1167_v61, %v1058_v15  ;;  %v1175_v14 = vsel %vm1168_vm3, %v1163_v23, %v1165_v6  ;;  %v1176_v41 = vsel %vm1168_vm3, %v1165_v6, %v1167_v61  ;;  %v1261_v15 = vmul.f32 %v3272_v28, %v4095_v25  ;;  %v4167_v23 = vld [vmem:[#allocation29_spill] sm:$0xff]  ;;  %v4168_v1 = vld [vmem:[#allocation10_spill] sm:$0xff] }
 0x157   : > { %v3384_v27 = vadd.f32 %v1175_v14, %v1056_v2  ;;  %v3386_v56 = vadd.f32 %v1176_v41, %v1057_v5  ;;  %v1206_v2 = vmul.f32 %v4163_v44, %v4090_v50  ;;  %v1203_v5 = vmul.f32 %v4163_v44, %v4089_v42 }
 0x158   : > { %4160 = vst [vmem:[#allocation54_spill] sm:$0xff] %v3380_v49  ;;  %v1207_v25 = vmul.f32 %v4163_v44, %v2689_v60  ;;  %v1259_v50 = vmul.f32 %v3272_v28, %v4091_v26  ;;  %v1241_v42 = vmul.f32 %v4164_v20, %v2599_v52  ;;  %v1245_v60 = vmul.f32 %v4164_v20, %v2683_v58 }
 0x159   : > { %4161 = vst [vmem:[#allocation55_spill] sm:$0xff] %v3384_v27  ;;  %4162 = vst [vmem:[#allocation56_spill] sm:$0xff] %v3386_v56  ;;  %v1265_v26 = vmul.f32 %v3272_v28, %v4153_v9  ;;  %v1262_v52 = vmul.f32 %v3272_v28, %v2672_v35  ;;  %v1267_v57 = vmul.f32 %v3272_v28, %v2686_v59  ;;  %v4166_v9 = vld [vmem:[#allocation27_spill] sm:$0xff] }
 0x15a   : > { %v1264_v16 = vmul.f32 %v3272_v28, %v2766_v32 }
 0x162   : > { %v3388_v13 = vpop.permute.xlu0 %1563 }
 0x167   : > { %v1213_v10 = vpop.permute.xlu0 %1212 }
 0x168   : > { %v1217_v34 = vmul.f32 %v1213_v10, %v2563_v38  ;;  %v1215_v58 = vmul.f32 %v1213_v10, %v2581_v46  ;;  %v1219_v29 = vmul.f32 %v1213_v10, %v4093_v54  ;;  %v1216_v4 = vmul.f32 %v1213_v10, %v4165_v0 }
 0x169   : > { %v1221_v19 = vmul.f32 %v1213_v10, %v4098_v3  ;;  %v1218_v33 = vmul.f32 %v1213_v10, %v4166_v9  ;;  %v1223_v35 = vmul.f32 %v1213_v10, %v4167_v23  ;;  %v1220_v8 = vmul.f32 %v1213_v10, %v2694_v63  ;;  %v4169_v63 = vld [vmem:[#allocation14_spill] sm:$0xff] }
 0x16a   : > { %v1226_v59 = vadd.f32 %v1217_v34, %v1204_v18  ;;  %v1224_v12 = vadd.f32 %v1215_v58, %v1202_v21  ;;  %v1228_v17 = vadd.f32 %v1219_v29, %v1206_v2  ;;  %v1225_v32 = vadd.f32 %v1216_v4, %v1203_v5  ;;  %v4170_v21 = vld [vmem:[#allocation30_spill] sm:$0xff] }
 0x16b   : > { %v1230_v61 = vadd.f32 %v1221_v19, %v1208_v62  ;;  %v1227_v38 = vadd.f32 %v1218_v33, %v1205_v37  ;;  %v1232_v6 = vadd.f32 %v1223_v35, %v1210_v43  ;;  %v1229_v46 = vadd.f32 %v1220_v8, %v1207_v25  ;;  %v4177_v19 = vld [vmem:[#allocation8_spill] sm:$0xff] }
 0x16c   : > { %v1248_v14 = vadd.f32 %v1239_v31, %v1226_v59  ;;  %v1246_v54 = vadd.f32 %v1237_v45, %v1224_v12  ;;  %v1250_v41 = vadd.f32 %v1241_v42, %v1228_v17  ;;  %v1247_v0 = vadd.f32 %v1238_v40, %v1225_v32  ;;  %v4172_v42 = vld [vmem:[#allocation11_spill] sm:$0xff] }
 0x16d   : > { %v1252_v49 = vadd.f32 %v1243_v55, %v1230_v61  ;;  %v1249_v3 = vadd.f32 %v1240_v39, %v1227_v38  ;;  %v1254_v56 = vadd.f32 %v1245_v60, %v1232_v6  ;;  %v1251_v9 = vadd.f32 %v1242_v47, %v1229_v46  ;;  %v4173_v55 = vld [vmem:[#allocation6_spill] sm:$0xff]  ;;  %v4174_v60 = vld [vmem:[#allocation16_spill] sm:$0xff] }
 0x16e   : > { %v1270_v27 = vadd.f32 %v1261_v15, %v1248_v14  ;;  %v1268_v23 = vadd.f32 %v1259_v50, %v1246_v54  ;;  %v1573_v18 = vrot.slane %v4169_v63, %v4168_v1  ;;  %v1209_v2 = vmul.f32 %v4163_v44, %v4170_v21  ;;  %v4171_v15 = vld [vmem:[#allocation21_spill] sm:$0xff]  ;;  %v3453_v50 = vpop.permute.xlu0 %2013 }
 0x16f   : > { %v1274_v5 = vadd.f32 %v1265_v26, %v1252_v49  ;;  %v1271_v62 = vadd.f32 %v1262_v52, %v1249_v3  ;;  %v1276_v37 = vadd.f32 %v1267_v57, %v1254_v56  ;;  %v1273_v43 = vadd.f32 %v1264_v16, %v1251_v9  ;;  %v3479_v16 = vpop.permute.xlu1 %1852 }
 0x170   : > { %1290 = vrot.lane.b32.xlu0 %v1270_v27, %s2410_s21  ;;  %1286 = vrot.lane.b32.xlu1 %v1268_v23, %s2410_s21  ;;  %v1263_v31 = vmul.f32 %v3272_v28, %v2602_v53  ;;  %v1260_v25 = vmul.f32 %v3272_v28, %v4171_v15  ;;  %v1222_v45 = vmul.f32 %v1213_v10, %v2753_v48  ;;  %v4175_v10 = vld [vmem:[#allocation7_spill] sm:$0xff] }
 0x171   : > { %v1244_v49 = vmul.f32 %v4164_v20, %v4152_v11  ;;  %v1687_v27 = vrot.slane %v4169_v63, %v4172_v42  ;;  %v3460_v39 = vrot.slane %v1573_v18, %v4173_v55  ;;  %v1266_v53 = vmul.f32 %v3272_v28, %v2778_v7  ;;  %v4176_v28 = vld [vmem:[#allocation23_spill] sm:$0xff] }
 0x172   : > { %v1272_v56 = vadd.f32 %v1263_v31, %v1250_v41  ;;  %v1269_v44 = vadd.f32 %v1260_v25, %v1247_v0  ;;  %v1231_v40 = vadd.f32 %v1222_v45, %v1209_v2  ;;  %v1581_v11 = vrot.slane %v4174_v60, %v4168_v1  ;;  %v3481_v34 = vpop.permute.xlu0 %1677  ;;  %v4180_v0 = vld [vmem:[#allocation9_spill] sm:$0xff]  ;;  %v4182_v2 = vld [vmem:[#allocation38_spill] sm:$0xff] }
 0x173   : > { %v1569_v20 = vrot.slane %v4169_v63, %v4173_v55  ;;  %v1695_v47 = vrot.slane %v4174_v60, %v4172_v42  ;;  %v3473_v26 = vrot.slane %v1687_v27, %v4175_v10  ;;  %v1683_v7 = vrot.slane %v4169_v63, %v4175_v10  ;;  %v3535_v63 = vpop.permute.xlu1 %1866 }
 0x174   : > { %1294 = vrot.lane.b32.xlu0 %v1272_v56, %s2410_s21  ;;  %1288 = vrot.lane.b32.xlu1 %v1269_v44, %s2410_s21  ;;  %v1253_v48 = vadd.f32 %v1244_v49, %v1231_v40  ;;  %v1589_v57 = vrot.slane %v4176_v28, %v4168_v1  ;;  %v1703_v58 = vrot.slane %v4176_v28, %v4172_v42  ;;  %v4183_v56 = vld [vmem:[#allocation32_spill] sm:$0xff] }
 0x175   : > { %v1577_v29 = vrot.slane %v4174_v60, %v4173_v55  ;;  %v1691_v4 = vrot.slane %v4174_v60, %v4175_v10  ;;  %v1597_v33 = vrot.slane %v4177_v19, %v4168_v1  ;;  %v1657_v35 = vmul.f32 %v3460_v39, %v3388_v13 }
 0x176   : > { %v1275_v52 = vadd.f32 %v1266_v53, %v1253_v48  ;;  %v3496_v8 = vrot.slane %v1581_v11, %v4173_v55  ;;  %v3499_v59 = vrot.slane %v1569_v20, %v4173_v55  ;;  %v3502_v12 = vrot.slane %v1695_v47, %v4175_v10 }
 0x177   : > { %v1711_v17 = vrot.slane %v4177_v19, %v4172_v42  ;;  %v1771_v32 = vmul.f32 %v3473_v26, %v3481_v34  ;;  %v3509_v61 = vrot.slane %v1683_v7, %v4175_v10  ;;  %v3512_v38 = vrot.slane %v1589_v57, %v4173_v55 }
 0x178   : > { %1298 = vrot.lane.b32.xlu0 %v1274_v5, %s2410_s21  ;;  %1292 = vrot.lane.b32.xlu1 %v1271_v62, %s2410_s21  ;;  %v1585_v6 = vrot.slane %v4176_v28, %v4173_v55  ;;  %v3517_v46 = vrot.slane %v1703_v58, %v4175_v10  ;;  %v3520_v14 = vrot.slane %v1577_v29, %v4173_v55 }
 0x179   : > { %v3523_v54 = vrot.slane %v1691_v4, %v4175_v10  ;;  %v3526_v41 = vrot.slane %v1597_v33, %v4173_v55  ;;  %v1667_v3 = vadd.f32 %v1657_v35, %v4180_v0  ;;  %v1659_v9 = vmul.f32 %v3496_v8, %v3388_v13  ;;  %v4186_v35 = vld [vmem:[#allocation41_spill] sm:$0xff] }
 0x17a   : > { %4178 = vst [vmem:[#allocation17_spill] sm:$0xff] %v3517_v46  ;;  %v1656_v23 = vmul.f32 %v3499_v59, %v3388_v13  ;;  %v3538_v18 = vrot.slane %v1711_v17, %v4175_v10  ;;  %v1699_v21 = vrot.slane %v4176_v28, %v4175_v10  ;;  %v1605_v5 = vrot.slane %v4182_v2, %v4168_v1  ;;  %v3582_v28 = vpop.permute.xlu1 %1890 }
 0x17b   : > { %4179 = vst [vmem:[#allocation15_spill] sm:$0xff] %v3526_v41  ;;  %v1719_v62 = vrot.slane %v4182_v2, %v4172_v42  ;;  %v1770_v31 = vmul.f32 %v3509_v61, %v3481_v34  ;;  %v3551_v15 = vrot.slane %v1585_v6, %v4173_v55  ;;  %v1661_v25 = vmul.f32 %v3512_v38, %v3388_v13  ;;  %v4184_v42 = vld [vmem:[#allocation39_spill] sm:$0xff]  ;;  %v4187_v6 = vld [vmem:[#allocation45_spill] sm:$0xff] }
 0x17c   : > { %1302 = vrot.lane.b32.xlu0 %v1276_v37, %s2410_s21  ;;  %1296 = vrot.lane.b32.xlu1 %v1273_v43, %s2410_s21  ;;  %4181 = vst [vmem:[#allocation18_spill] sm:$0xff] %v3538_v18  ;;  %v1781_v37 = vadd.f32 %v1771_v32, %v1667_v3  ;;  %v1773_v43 = vmul.f32 %v3502_v12, %v3481_v34 }
 0x17d   : > { %v1593_v45 = vrot.slane %v4177_v19, %v4173_v55  ;;  %v1707_v1 = vrot.slane %v4177_v19, %v4175_v10  ;;  %v1601_v49 = vrot.slane %v4182_v2, %v4173_v55  ;;  %v1669_v44 = vadd.f32 %v1659_v9, %v4183_v56  ;;  %v4185_v19 = vld [vmem:[#allocation2_spill] sm:$0xff] }
 0x17e   : > { %v1666_v27 = vadd.f32 %v1656_v23, %v4184_v42  ;;  %v1658_v40 = vmul.f32 %v3520_v14, %v3388_v13  ;;  %v1663_v53 = vmul.f32 %v3526_v41, %v3388_v13  ;;  %v3570_v48 = vrot.slane %v1699_v21, %v4175_v10  ;;  %v4193_v42 = vld [vmem:[#allocation4_spill] sm:$0xff] }
 0x17f   : > { %v3573_v60 = vrot.slane %v1605_v5, %v4173_v55  ;;  %v3576_v11 = vrot.slane %v1719_v62, %v4175_v10  ;;  %v1783_v20 = vadd.f32 %v1773_v43, %v1669_v44  ;;  %v1772_v7 = vmul.f32 %v3523_v54, %v3481_v34  ;;  %v4188_v5 = vld [vmem:[#allocation26_spill] sm:$0xff]  ;;  %v4190_v43 = vld [vmem:[#allocation48_spill] sm:$0xff] }
 0x180   : > { %1802 = vrot.lane.b32.xlu0 %v1781_v37, %s2411_s22  ;;  %1300 = vrot.lane.b32.xlu1 %v1275_v52, %s2410_s21  ;;  %v1780_v47 = vadd.f32 %v1770_v31, %v1666_v27  ;;  %v1775_v52 = vmul.f32 %v3517_v46, %v3481_v34  ;;  %v1660_v57 = vmul.f32 %v3551_v15, %v3388_v13  ;;  %v4189_v37 = vld [vmem:[#allocation13_spill] sm:$0xff] }
 0x181   : > { %v3587_v58 = vrot.slane %v1593_v45, %v4173_v55  ;;  %v3590_v29 = vrot.slane %v1707_v1, %v4175_v10  ;;  %v1715_v4 = vrot.slane %v4182_v2, %v4175_v10  ;;  %v1671_v33 = vadd.f32 %v1661_v25, %v4185_v19  ;;  %v4191_v45 = vld [vmem:[#allocation22_spill] sm:$0xff] }
 0x182   : > { %v1668_v17 = vadd.f32 %v1658_v40, %v4186_v35  ;;  %v3599_v32 = vrot.slane %v1601_v49, %v4173_v55  ;;  %v1673_v0 = vadd.f32 %v1663_v53, %v4187_v6  ;;  %v1777_v3 = vmul.f32 %v3538_v18, %v3481_v34  ;;  %v4192_v49 = vld [vmem:[#allocation19_spill] sm:$0xff]  ;;  %v4194_v40 = vld [vmem:[#allocation5_spill] sm:$0xff] }
 0x183   : > { %v1774_v9 = vmul.f32 %v3570_v48, %v3481_v34  ;;  %v1665_v23 = vmul.f32 %v3573_v60, %v3388_v13  ;;  %v1785_v21 = vadd.f32 %v1775_v52, %v1671_v33  ;;  %v1856_v62 = vmul.f32 %v3479_v16, %v4188_v5 }
 0x184   : > { %1806 = vrot.lane.b32.xlu0 %v1783_v20, %s2411_s22  ;;  %1800 = vrot.lane.b32.xlu1 %v1780_v47, %s2411_s22  ;;  %v1782_v2 = vadd.f32 %v1772_v7, %v1668_v17  ;;  %v1870_v55 = vmul.f32 %v3535_v63, %v4189_v37  ;;  %v1670_v31 = vadd.f32 %v1660_v57, %v4190_v43  ;;  %v3628_v20 = vpop.permute.xlu1 %1999  ;;  %v4195_v7 = vld [vmem:[#allocation49_spill] sm:$0xff]  ;;  %v4196_v17 = vld [vmem:[#allocation50_spill] sm:$0xff] }
 0x185   : > { %v1662_v25 = vmul.f32 %v3587_v58, %v3388_v13  ;;  %v1858_v1 = vmul.f32 %v3479_v16, %v4191_v45  ;;  %v1872_v56 = vmul.f32 %v3535_v63, %v4192_v49  ;;  %v3622_v44 = vrot.slane %v1715_v4, %v4175_v10 }
 0x186   : > { %v1855_v27 = vmul.f32 %v3479_v16, %v4193_v42  ;;  %v1869_v53 = vmul.f32 %v3535_v63, %v4194_v40  ;;  %v1787_v47 = vadd.f32 %v1777_v3, %v1673_v0  ;;  %v1784_v52 = vadd.f32 %v1774_v9, %v1670_v31  ;;  %v4197_v9 = vld [vmem:[#allocation33_spill] sm:$0xff]  ;;  %v4199_v31 = vld [vmem:[#allocation35_spill] sm:$0xff] }
 0x187   : > { %v1675_v57 = vadd.f32 %v1665_v23, %v4195_v7  ;;  %v1664_v19 = vmul.f32 %v3599_v32, %v3388_v13  ;;  %v1779_v33 = vmul.f32 %v3576_v11, %v3481_v34  ;;  %v1776_v10 = vmul.f32 %v3590_v29, %v3481_v34  ;;  %v4201_v7 = vld [vmem:[#allocation53_spill] sm:$0xff] }
 0x188   : > { %1810 = vrot.lane.b32.xlu0 %v1785_v21, %s2411_s22  ;;  %1804 = vrot.lane.b32.xlu1 %v1782_v2, %s2411_s22  ;;  %v1880_v4 = vadd.f32 %v1870_v55, %v1856_v62  ;;  %v1894_v35 = vmul.f32 %v3582_v28, %v3460_v39  ;;  %v1672_v6 = vadd.f32 %v1662_v25, %v4196_v17  ;;  %v4198_v2 = vld [vmem:[#allocation34_spill] sm:$0xff]  ;;  %v3650_v55 = vpop.permute.xlu1 %1914 }
 0x189   : > { %v1882_v21 = vadd.f32 %v1872_v56, %v1858_v1  ;;  %v1896_v0 = vmul.f32 %v3582_v28, %v3496_v8  ;;  %v1893_v3 = vmul.f32 %v3582_v28, %v3499_v59  ;;  %v1879_v13 = vadd.f32 %v1869_v53, %v1855_v27  ;;  %v4200_v1 = vld [vmem:[#allocation36_spill] sm:$0xff] }
 0x18a   : > { %v1860_v23 = vmul.f32 %v3479_v16, %v4197_v9  ;;  %v1874_v62 = vmul.f32 %v3535_v63, %v4198_v2  ;;  %v1778_v43 = vmul.f32 %v3622_v44, %v3481_v34  ;;  %v1857_v25 = vmul.f32 %v3479_v16, %v4199_v31 }
 0x18b   : > { %v1871_v56 = vmul.f32 %v3535_v63, %v4200_v1  ;;  %v1904_v27 = vadd.f32 %v1894_v35, %v1880_v4  ;;  %v1918_v53 = vmul.f32 %v3650_v55, %v3473_v26  ;;  %v1674_v17 = vadd.f32 %v1664_v19, %v4201_v7  ;;  %v4202_v4 = vld [vmem:[#allocation37_spill] sm:$0xff] }
 0x18c   : > { %1814 = vrot.lane.b32.xlu0 %v1787_v47, %s2411_s22  ;;  %1808 = vrot.lane.b32.xlu1 %v1784_v52, %s2411_s22  ;;  %v1789_v47 = vadd.f32 %v1779_v33, %v1675_v57  ;;  %v1786_v52 = vadd.f32 %v1776_v10, %v1672_v6  ;;  %v1906_v30 = vadd.f32 %v1896_v0, %v1882_v21  ;;  %v4203_v6 = vld [vmem:[#allocation40_spill] sm:$0xff] }
 0x18d   : > { %v1920_v36 = vmul.f32 %v3650_v55, %v3502_v12  ;;  %v1917_v34 = vmul.f32 %v3650_v55, %v3509_v61  ;;  %v1903_v24 = vadd.f32 %v1893_v3, %v1879_v13  ;;  %v1884_v57 = vadd.f32 %v1874_v62, %v1860_v23  ;;  %v4205_v3 = vld [vmem:[#allocation43_spill] sm:$0xff] }
 0x18e   : > { %v1898_v33 = vmul.f32 %v3582_v28, %v3512_v38  ;;  %v1881_v10 = vadd.f32 %v1871_v56, %v1857_v25  ;;  %v1895_v19 = vmul.f32 %v3582_v28, %v3520_v14  ;;  %v1862_v35 = vmul.f32 %v3479_v16, %v4202_v4  ;;  %v4206_v56 = vld [vmem:[#allocation44_spill] sm:$0xff] }
 0x18f   : > { %v1876_v21 = vmul.f32 %v3535_v63, %v4203_v6  ;;  %v1788_v0 = vadd.f32 %v1778_v43, %v1674_v17  ;;  %v1928_v7 = vadd.f32 %v1918_v53, %v1904_v27  ;;  %v1873_v13 = vmul.f32 %v3535_v63, %v4205_v3  ;;  %v4207_v53 = vld [vmem:[#allocation46_spill] sm:$0xff] }
 0x190   : > { %1818 = vrot.lane.b32.xlu0 %v1789_v47, %s2411_s22  ;;  %1812 = vrot.lane.b32.xlu1 %v1786_v52, %s2411_s22  ;;  %v4204_v47 = vld [vmem:[#allocation42_spill] sm:$0xff]  ;;  %v1930_v23 = vadd.f32 %v1920_v36, %v1906_v30  ;;  %v1922_v62 = vmul.f32 %v3650_v55, %v3517_v46  ;;  %v1919_v25 = vmul.f32 %v3650_v55, %v3523_v54  ;;  %v4208_v46 = vld [vmem:[#allocation47_spill] sm:$0xff] }
 0x191   : > { %v1859_v52 = vmul.f32 %v3479_v16, %v4204_v47  ;;  %v1908_v43 = vadd.f32 %v1898_v33, %v1884_v57  ;;  %v1864_v27 = vmul.f32 %v3479_v16, %v4206_v56  ;;  %v1878_v17 = vmul.f32 %v3535_v63, %v4207_v53  ;;  %v4209_v57 = vld [vmem:[#allocation3_spill] sm:$0xff] }
 0x192   : > { %v1927_v51 = vadd.f32 %v1917_v34, %v1903_v24  ;;  %v1905_v36 = vadd.f32 %v1895_v19, %v1881_v10  ;;  %v1886_v30 = vadd.f32 %v1876_v21, %v1862_v35  ;;  %v1900_v22 = vmul.f32 %v3582_v28, %v3526_v41  ;;  %v4210_v21 = vld [vmem:[#allocation51_spill] sm:$0xff] }
 0x193   : > { %v1883_v6 = vadd.f32 %v1873_v13, %v1859_v52  ;;  %v1875_v33 = vmul.f32 %v3535_v63, %v4209_v57  ;;  %v1924_v56 = vmul.f32 %v3650_v55, %v3538_v18  ;;  %v1932_v24 = vadd.f32 %v1922_v62, %v1908_v43  ;;  %v4211_v13 = vld [vmem:[#allocation52_spill] sm:$0xff]  ;;  %v3709_v18 = vpop.permute.xlu1 %2037 }
 0x194   : > { %1816 = vrot.lane.b32.xlu1 %v1788_v0, %s2411_s22  ;;  %1949 = vrot.lane.b32.xlu0 %v1928_v7, %s2412_s23  ;;  %v1897_v0 = vmul.f32 %v3582_v28, %v3551_v15  ;;  %v1861_v7 = vmul.f32 %v3479_v16, %v4208_v46  ;;  %v1888_v34 = vadd.f32 %v1878_v17, %v1864_v27  ;;  %v3725_v17 = vpop.permute.xlu0 %2061 }
 0x195   : > { %v1902_v10 = vmul.f32 %v3582_v28, %v3573_v60  ;;  %v1910_v19 = vadd.f32 %v1900_v22, %v1886_v30  ;;  %v1921_v35 = vmul.f32 %v3650_v55, %v3570_v48  ;;  %v1863_v52 = vmul.f32 %v3479_v16, %v4210_v21 }
 0x196   : > { %v1877_v53 = vmul.f32 %v3535_v63, %v4211_v13  ;;  %v1907_v41 = vadd.f32 %v1897_v0, %v1883_v6  ;;  %v1899_v62 = vmul.f32 %v3582_v28, %v3587_v58  ;;  %v2002_v22 = vmul.f32 %v3628_v20, %v4193_v42 }
 0x197   : > { %v1912_v43 = vadd.f32 %v1902_v10, %v1888_v34  ;;  %v1926_v16 = vmul.f32 %v3650_v55, %v3576_v11  ;;  %v2016_v6 = vmul.f32 %v3453_v50, %v4194_v40  ;;  %v2040_v27 = vmul.f32 %v3709_v18, %v3499_v59 }
 0x198   : > { %1953 = vrot.lane.b32.xlu0 %v1930_v23, %s2412_s23  ;;  %1947 = vrot.lane.b32.xlu1 %v1927_v51, %s2412_s23  ;;  %v1929_v23 = vadd.f32 %v1919_v25, %v1905_v36  ;;  %v1885_v51 = vadd.f32 %v1875_v33, %v1861_v7  ;;  %v1887_v63 = vadd.f32 %v1877_v53, %v1863_v52 }
 0x199   : > { %v1901_v25 = vmul.f32 %v3582_v28, %v3599_v32  ;;  %v1934_v42 = vadd.f32 %v1924_v56, %v1910_v19  ;;  %v1931_v36 = vadd.f32 %v1921_v35, %v1907_v41  ;;  %v1923_v0 = vmul.f32 %v3650_v55, %v3590_v29 }
 0x19a   : > { %v1909_v30 = vadd.f32 %v1899_v62, %v1885_v51  ;;  %v2026_v7 = vadd.f32 %v2016_v6, %v2002_v22  ;;  %v1925_v28 = vmul.f32 %v3650_v55, %v3622_v44  ;;  %v2004_v40 = vmul.f32 %v3628_v20, %v4199_v31 }
 0x19b   : > { %v1936_v59 = vadd.f32 %v1926_v16, %v1912_v43  ;;  %v1911_v53 = vadd.f32 %v1901_v25, %v1887_v63  ;;  %v2064_v41 = vmul.f32 %v3725_v17, %v3509_v61  ;;  %v2042_v34 = vmul.f32 %v3709_v18, %v3520_v14 }
 0x19c   : > { %1957 = vrot.lane.b32.xlu0 %v1932_v24, %s2412_s23  ;;  %1951 = vrot.lane.b32.xlu1 %v1929_v23, %s2412_s23  ;;  %v2050_v33 = vadd.f32 %v2040_v27, %v2026_v7  ;;  %v1933_v56 = vadd.f32 %v1923_v0, %v1909_v30  ;;  %v2018_v24 = vmul.f32 %v3453_v50, %v4200_v1 }
 0x19d   : > { %v2003_v10 = vmul.f32 %v3628_v20, %v4188_v5  ;;  %v2017_v55 = vmul.f32 %v3453_v50, %v4189_v37  ;;  %v2041_v61 = vmul.f32 %v3709_v18, %v3460_v39  ;;  %v2006_v1 = vmul.f32 %v3628_v20, %v4204_v47 }
 0x19e   : > { %v2028_v31 = vadd.f32 %v2018_v24, %v2004_v40  ;;  %v1935_v19 = vadd.f32 %v1925_v28, %v1911_v53  ;;  %v2074_v35 = vadd.f32 %v2064_v41, %v2050_v33  ;;  %v2066_v14 = vmul.f32 %v3725_v17, %v3523_v54  ;;  %v4214_v33 = vld [vmem:[#allocation15_spill] sm:$0xff] }
 0x19f   : > { %v2027_v52 = vadd.f32 %v2017_v55, %v2003_v10  ;;  %v2020_v37 = vmul.f32 %v3453_v50, %v4205_v3  ;;  %v2044_v23 = vmul.f32 %v3709_v18, %v3551_v15  ;;  %v2065_v51 = vmul.f32 %v3725_v17, %v3473_v26  ;;  %v2142_v15 = vld [vmem:[%s3938_s2] sm:$0xff] }
 0x1a0   : > { %1961 = vrot.lane.b32.xlu0 %v1934_v42, %s2412_s23  ;;  %1955 = vrot.lane.b32.xlu1 %v1931_v36, %s2412_s23  ;;  %v2052_v5 = vadd.f32 %v2042_v34, %v2028_v31  ;;  %v2005_v39 = vmul.f32 %v3628_v20, %v4191_v45  ;;  %v2008_v62 = vmul.f32 %v3628_v20, %v4208_v46  ;;  %v4216_v10 = vld [vmem:[#allocation18_spill] sm:$0xff] }
 0x1a1   : > { %v2051_v54 = vadd.f32 %v2041_v61, %v2027_v52  ;;  %v2030_v47 = vadd.f32 %v2020_v37, %v2006_v1  ;;  %v2068_v26 = vmul.f32 %v3725_v17, %v3570_v48  ;;  %v2019_v45 = vmul.f32 %v3453_v50, %v4192_v49  ;;  %v4217_v61 = vld [vmem:[#allocation46_spill] sm:$0xff] }
 0x1a2   : > { %v2043_v3 = vmul.f32 %v3709_v18, %v3496_v8  ;;  %v2076_v22 = vadd.f32 %v2066_v14, %v2052_v5  ;;  %v2022_v16 = vmul.f32 %v3453_v50, %v4209_v57  ;;  %v2046_v46 = vmul.f32 %v3709_v18, %v3587_v58 }
 0x1a3   : > { %v2054_v43 = vadd.f32 %v2044_v23, %v2030_v47  ;;  %v2029_v63 = vadd.f32 %v2019_v45, %v2005_v39  ;;  %v2067_v25 = vmul.f32 %v3725_v17, %v3502_v12  ;;  %v2007_v48 = vmul.f32 %v3628_v20, %v4197_v9 }
 0x1a4   : > { %1965 = vrot.lane.b32.xlu0 %v1936_v59, %s2412_s23  ;;  %1959 = vrot.lane.b32.xlu1 %v1933_v56, %s2412_s23  ;;  %v2075_v49 = vadd.f32 %v2065_v51, %v2051_v54  ;;  %v2032_v8 = vadd.f32 %v2022_v16, %v2008_v62  ;;  %v2010_v6 = vmul.f32 %v3628_v20, %v4210_v21  ;;  %v4215_v56 = vld [vmem:[#allocation44_spill] sm:$0xff] }
 0x1a5   : > { %v2053_v27 = vadd.f32 %v2043_v3, %v2029_v63  ;;  %v2070_v57 = vmul.f32 %v3725_v17, %v3590_v29  ;;  %v2021_v58 = vmul.f32 %v3453_v50, %v4198_v2  ;;  %v2045_v12 = vmul.f32 %v3709_v18, %v3512_v38  ;;  %v4212_v38 = vld [vmem:[#allocation17_spill] sm:$0xff] }
 0x1a6   : > { %v2078_v42 = vadd.f32 %v2068_v26, %v2054_v43  ;;  %v2056_v9 = vadd.f32 %v2046_v46, %v2032_v8  ;;  %v2024_v36 = vmul.f32 %v3453_v50, %v4211_v13  ;;  %v2048_v30 = vmul.f32 %v3709_v18, %v3599_v32  ;;  %v4213_v32 = vld [vmem:[#allocation40_spill] sm:$0xff] }
 0x1a7   : > { %v2031_v0 = vadd.f32 %v2021_v58, %v2007_v48  ;;  %v2009_v2 = vmul.f32 %v3628_v20, %v4202_v4  ;;  %v2077_v21 = vadd.f32 %v2067_v25, %v2053_v27  ;;  %v2069_v28 = vmul.f32 %v3725_v17, %v4212_v38  ;;  %v4218_v38 = vld [vmem:[#allocation28_spill] sm:$0xff] }
 0x1a8   : > { %1963 = vrot.lane.b32.xlu1 %v1935_v19, %s2412_s23  ;;  %2094 = vrot.lane.b32.xlu0 %v2074_v35, %s2413_s24  ;;  %v2034_v29 = vadd.f32 %v2024_v36, %v2010_v6  ;;  %v2072_v13 = vmul.f32 %v3725_v17, %v3622_v44  ;;  %v2080_v40 = vadd.f32 %v2070_v57, %v2056_v9 }
 0x1a9   : > { %v2055_v7 = vadd.f32 %v2045_v12, %v2031_v0  ;;  %v2023_v53 = vmul.f32 %v3453_v50, %v4213_v32  ;;  %v2047_v41 = vmul.f32 %v3709_v18, %v4214_v33  ;;  %v2011_v24 = vmul.f32 %v3628_v20, %v4215_v56  ;;  %v4220_v33 = vld [vmem:[#allocation20_spill] sm:$0xff] }
 0x1aa   : > { %v2058_v59 = vadd.f32 %v2048_v30, %v2034_v29  ;;  %v2071_v44 = vmul.f32 %v3725_v17, %v4216_v10  ;;  %v2025_v1 = vmul.f32 %v3453_v50, %v4217_v61  ;;  %v2049_v19 = vmul.f32 %v3709_v18, %v3573_v60  ;;  %v4222_v10 = vld [vmem:[#allocation31_spill] sm:$0xff] }
 0x1ab   : > { %v2033_v4 = vadd.f32 %v2023_v53, %v2009_v2  ;;  %v2079_v34 = vadd.f32 %v2069_v28, %v2055_v7  ;;  %v2073_v20 = vmul.f32 %v3725_v17, %v3576_v11 }
 0x1ac   : > { %2145 = vperm.xlu1 %2375, %v2142_v15   ;;  %2098 = vrot.lane.b32.xlu0 %v2076_v22, %s2413_s24  ;;  %v2082_v55 = vadd.f32 %v2072_v13, %v2058_v59  ;;  %v2035_v35 = vadd.f32 %v2025_v1, %v2011_v24  ;;  %v4219_v13 = vld [vmem:[#allocation12_spill] sm:$0xff] }
 0x1ad   : > { %v2057_v31 = vadd.f32 %v2047_v41, %v2033_v4  ;;  %v4221_v4 = vld [vmem:[#allocation24_spill] sm:$0xff] }
 0x1ae   : > { %v2059_v5 = vadd.f32 %v2049_v19, %v2035_v35  ;;  %v4224_v19 = vld [vmem:[#allocation55_spill] sm:$0xff] }
 0x1af   : > { %v2081_v14 = vadd.f32 %v2071_v44, %v2057_v31 }
 0x1b0   : > { %2096 = vrot.lane.b32.xlu1 %v2075_v49, %s2413_s24  ;;  %2102 = vrot.lane.b32.xlu0 %v2078_v42, %s2413_s24  ;;  %v2083_v52 = vadd.f32 %v2073_v20, %v2059_v5 }
 0x1b4   : > { %2100 = vrot.lane.b32.xlu1 %v2077_v21, %s2413_s24  ;;  %2106 = vrot.lane.b32.xlu0 %v2080_v40, %s2413_s24 }
 0x1b8   : > { %2104 = vrot.lane.b32.xlu1 %v2079_v34, %s2413_s24  ;;  %2110 = vrot.lane.b32.xlu0 %v2082_v55, %s2413_s24  ;;  %v4223_v55 = vld [vmem:[#allocation25_spill] sm:$0xff] }
 0x1bc   : > { %2108 = vrot.lane.b32.xlu1 %v2081_v14, %s2413_s24  ;;  %v4225_v14 = vld [vmem:[#allocation56_spill] sm:$0xff] }
 0x1c0   : > { %2112 = vrot.lane.b32.xlu1 %v2083_v52, %s2413_s24 }
 0x1e2   : > { %v1291_v37 = vpop.permute.xlu0 %1290  ;;  %v1287_v50 = vpop.permute.xlu1 %1286 }
 0x1e6   : > { %v1295_v23 = vpop.permute.xlu0 %1294  ;;  %v1289_v51 = vpop.permute.xlu1 %1288 }
 0x1e7   : > { %v1305_v42 = vsel %vm1304_vm4, %v1287_v50, %v1289_v51  ;;  %v1306_v9 = vsel %vm1304_vm4, %v1289_v51, %v1291_v37 }
 0x1e8   : > { %v1322_v28 = vadd.f32 %v1305_v42, %v4218_v38  ;;  %v1323_v40 = vadd.f32 %v1306_v9, %v4219_v13 }
 0x1ea   : > { %v1299_v18 = vpop.permute.xlu0 %1298  ;;  %v1293_v60 = vpop.permute.xlu1 %1292 }
 0x1eb   : > { %v1307_v36 = vsel %vm1304_vm4, %v1291_v37, %v1293_v60  ;;  %v1308_v30 = vsel %vm1304_vm4, %v1293_v60, %v1295_v23 }
 0x1ec   : > { %v1324_v41 = vadd.f32 %v1307_v36, %v4220_v33  ;;  %v1325_v56 = vadd.f32 %v1308_v30, %v4221_v4 }
 0x1ee   : > { %v3823_v39 = vpop.permute.xlu0 %1302  ;;  %v1297_v54 = vpop.permute.xlu1 %1296 }
 0x1ef   : > { %v1309_v29 = vsel %vm1304_vm4, %v1295_v23, %v1297_v54  ;;  %v1310_v2 = vsel %vm1304_vm4, %v1297_v54, %v1299_v18 }
 0x1f0   : > { %v1326_v44 = vadd.f32 %v1309_v29, %v4222_v10  ;;  %v1327_v31 = vadd.f32 %v1310_v2, %v4223_v55  ;;  %v4226_v55 = vld [vmem:[#allocation54_spill] sm:$0xff] }
 0x1f2   : > { %v1803_v47 = vpop.permute.xlu0 %1802  ;;  %v1301_v62 = vpop.permute.xlu1 %1300 }
 0x1f3   : > { %v1311_v59 = vsel %vm1304_vm4, %v1299_v18, %v1301_v62  ;;  %v1312_v32 = vsel %vm1304_vm4, %v1301_v62, %v3823_v39 }
 0x1f4   : > { %v1328_v35 = vadd.f32 %v1311_v59, %v4224_v19  ;;  %v1329_v5 = vadd.f32 %v1312_v32, %v4225_v14 }
 0x1f6   : > { %v1807_v15 = vpop.permute.xlu0 %1806  ;;  %v1801_v26 = vpop.permute.xlu1 %1800 }
 0x1f7   : > { %v1821_v21 = vsel %vm1820_vm5, %v1801_v26, %v1803_v47 }
 0x1f8   : > { %v1839_v61 = vadd.f32 %v1821_v21, %v1322_v28 }
 0x1fa   : > { %v1811_v45 = vpop.permute.xlu0 %1810  ;;  %v1805_v11 = vpop.permute.xlu1 %1804 }
 0x1fb   : > { %v1822_v7 = vsel %vm1820_vm5, %v1803_v47, %v1805_v11  ;;  %v1823_v20 = vsel %vm1820_vm5, %v1805_v11, %v1807_v15 }
 0x1fc   : > { %v1840_v1 = vadd.f32 %v1822_v7, %v1323_v40  ;;  %v1841_v11 = vadd.f32 %v1823_v20, %v1324_v41 }
 0x1fe   : > { %v3825_v17 = vpop.permute.xlu0 %1814  ;;  %v1809_v3 = vpop.permute.xlu1 %1808 }
 0x1ff   : > { %v1824_v52 = vsel %vm1820_vm5, %v1807_v15, %v1809_v3  ;;  %v1825_v37 = vsel %vm1820_vm5, %v1809_v3, %v1811_v45 }
 0x200   : > { %v1843_v3 = vadd.f32 %v1825_v37, %v1326_v44 }
 0x202   : > { %v3827_v22 = vpop.permute.xlu0 %1818  ;;  %v1813_v43 = vpop.permute.xlu1 %1812 }
 0x203   : > { %v1826_v50 = vsel %vm1820_vm5, %v1811_v45, %v1813_v43  ;;  %v1827_v45 = vsel %vm1820_vm5, %v1813_v43, %v3825_v17 }
 0x204   : > { %v1844_v42 = vadd.f32 %v1826_v50, %v1327_v31  ;;  %v1845_v13 = vadd.f32 %v1827_v45, %v1328_v35  ;;  %v1330_v31 = vadd.f32 %v3823_v39, %v4226_v55 }
 0x206   : > { %v1950_v16 = vpop.permute.xlu0 %1949  ;;  %v3829_v46 = vpop.permute.xlu1 %1816 }
 0x20a   : > { %v1954_v63 = vpop.permute.xlu0 %1953  ;;  %v1948_v25 = vpop.permute.xlu1 %1947 }
 0x20b   : > { %v1968_v24 = vsel %vm1967_vm6, %v1948_v25, %v1950_v16 }
 0x20c   : > { %v1986_v23 = vadd.f32 %v1968_v24, %v1839_v61 }
 0x20e   : > { %v3831_v48 = vpop.permute.xlu0 %1957  ;;  %v1952_v49 = vpop.permute.xlu1 %1951 }
 0x20f   : > { %v1969_v34 = vsel %vm1967_vm6, %v1950_v16, %v1952_v49  ;;  %v1970_v54 = vsel %vm1967_vm6, %v1952_v49, %v1954_v63  ;;  %v1842_v16 = vadd.f32 %v1824_v52, %v1325_v56  ;;  %v1828_v49 = vsel %vm1820_vm5, %v3825_v17, %v3829_v46 }
 0x210   : > { %v1987_v51 = vadd.f32 %v1969_v34, %v1840_v1  ;;  %v1988_v9 = vadd.f32 %v1970_v54, %v1841_v11  ;;  %v1846_v40 = vadd.f32 %v1828_v49, %v1329_v5 }
 0x212   : > { %v3833_v8 = vpop.permute.xlu0 %1961  ;;  %v1956_v6 = vpop.permute.xlu1 %1955 }
 0x213   : > { %v1971_v47 = vsel %vm1967_vm6, %v1954_v63, %v1956_v6  ;;  %v1972_v29 = vsel %vm1967_vm6, %v1956_v6, %v3831_v48 }
 0x214   : > { %v1989_v63 = vadd.f32 %v1971_v47, %v1842_v16  ;;  %v1990_v59 = vadd.f32 %v1972_v29, %v1843_v3 }
 0x216   : > { %v3835_v27 = vpop.permute.xlu0 %1965  ;;  %v3837_v57 = vpop.permute.xlu1 %1959 }
 0x217   : > { %v1973_v2 = vsel %vm1967_vm6, %v3831_v48, %v3837_v57  ;;  %v1829_v48 = vsel %vm1820_vm5, %v3829_v46, %v3827_v22  ;;  %v1974_v4 = vsel %vm1967_vm6, %v3837_v57, %v3833_v8 }
 0x218   : > { %v1991_v32 = vadd.f32 %v1973_v2, %v1844_v42  ;;  %v1992_v61 = vadd.f32 %v1974_v4, %v1845_v13  ;;  %v1847_v14 = vadd.f32 %v1829_v48, %v1330_v31 }
 0x21a   : > { %v2095_v58 = vpop.permute.xlu0 %2094  ;;  %v3839_v12 = vpop.permute.xlu1 %1963 }
 0x21b   : > { %v1975_v22 = vsel %vm1967_vm6, %v3833_v8, %v3839_v12  ;;  %v1976_v5 = vsel %vm1967_vm6, %v3839_v12, %v3835_v27 }
 0x21c   : > { %v1993_v1 = vadd.f32 %v1975_v22, %v1846_v40 }
 0x21e   : > { %v2099_v0 = vpop.permute.xlu0 %2098 }
 0x222   : > { %v2103_v18 = vpop.permute.xlu0 %2102 }
 0x226   : > { %v2107_v21 = vpop.permute.xlu0 %2106 }
 0x227   : > { %v3854_v53 = vpop.permute.xlu1 %2145 }
 0x22a   : > { %v2111_v19 = vpop.permute.xlu0 %2110 }
 0x22b   : > { %v2097_v60 = vpop.permute.xlu1 %2096 }
 0x22c   : > { %v2115_v62 = vsel %vm2114_vm7, %v2095_v58, %v2097_v60  ;;  %v2116_v26 = vsel %vm2114_vm7, %v2097_v60, %v2099_v0 }
 0x22d   : > { %v2133_v15 = vadd.f32 %v2115_v62, %v1986_v23  ;;  %v2134_v25 = vadd.f32 %v2116_v26, %v1987_v51  ;;  %v1994_v51 = vadd.f32 %v1976_v5, %v1847_v14 }
 0x22f   : > { %v2148_v36 = vadd.f32 %v3854_v53, %v2133_v15  ;;  %v2149_v58 = vadd.f32 %v3854_v53, %v2134_v25  ;;  %v2101_v30 = vpop.permute.xlu1 %2100 }
 0x230   : > { %v2117_v17 = vsel %vm2114_vm7, %v2099_v0, %v2101_v30  ;;  %v2118_v43 = vsel %vm2114_vm7, %v2101_v30, %v2103_v18 }
 0x231   : > { %v2157_v7 = vmax.f32 %v2148_v36, 0.0  ;;  %v2158_v38 = vmax.f32 %v2149_v58, 0.0  ;;  %v2135_v28 = vadd.f32 %v2117_v17, %v1988_v9  ;;  %v2136_v6 = vadd.f32 %v2118_v43, %v1989_v63 }
 0x233   : > { %2166 = vst [vmem:[%s3888_s29] sm:$0xff] %v2157_v7  ;;  %2167 = vst [vmem:[%s3888_s29 + $0x8] sm:$0xff] %v2158_v38  ;;  %v2150_v0 = vadd.f32 %v3854_v53, %v2135_v28  ;;  %v2151_v33 = vadd.f32 %v3854_v53, %v2136_v6  ;;  %v2105_v41 = vpop.permute.xlu1 %2104 }
 0x234   : > { %v2119_v46 = vsel %vm2114_vm7, %v2103_v18, %v2105_v41  ;;  %v2120_v56 = vsel %vm2114_vm7, %v2105_v41, %v2107_v21 }
 0x235   : > { %v2159_v24 = vmax.f32 %v2150_v0, 0.0  ;;  %v2160_v34 = vmax.f32 %v2151_v33, 0.0  ;;  %v2137_v10 = vadd.f32 %v2119_v46, %v1990_v59  ;;  %v2138_v44 = vadd.f32 %v2120_v56, %v1991_v32 }
 0x237   : > { %2168 = vst [vmem:[%s3888_s29 + $0x10] sm:$0xff] %v2159_v24  ;;  %2169 = vst [vmem:[%s3888_s29 + $0x18] sm:$0xff] %v2160_v34  ;;  %v2152_v8 = vadd.f32 %v3854_v53, %v2137_v10  ;;  %v2153_v57 = vadd.f32 %v3854_v53, %v2138_v44  ;;  %v2109_v35 = vpop.permute.xlu1 %2108 }
 0x238   : > { %v2121_v20 = vsel %vm2114_vm7, %v2107_v21, %v2109_v35  ;;  %v2122_v39 = vsel %vm2114_vm7, %v2109_v35, %v2111_v19 }
 0x239   : > { %v2161_v52 = vmax.f32 %v2152_v8, 0.0  ;;  %v2162_v37 = vmax.f32 %v2153_v57, 0.0  ;;  %v2139_v50 = vadd.f32 %v2121_v20, %v1992_v61  ;;  %v2140_v23 = vadd.f32 %v2122_v39, %v1993_v1 }
 0x23b   : > { %2170 = vst [vmem:[%s3888_s29 + $0x20] sm:$0xff] %v2161_v52  ;;  %2171 = vst [vmem:[%s3888_s29 + $0x28] sm:$0xff] %v2162_v37  ;;  %v2154_v18 = vadd.f32 %v3854_v53, %v2139_v50  ;;  %v2155_v60 = vadd.f32 %v3854_v53, %v2140_v23  ;;  %v2113_v54 = vpop.permute.xlu1 %2112 }
 0x23c   : > { %v2123_v27 = vsel %vm2114_vm7, %v2111_v19, %v2113_v54 }
 0x23d   : > { %v2163_v12 = vmax.f32 %v2154_v18, 0.0  ;;  %v2164_v47 = vmax.f32 %v2155_v60, 0.0  ;;  %v2141_v62 = vadd.f32 %v2123_v27, %v1994_v51 }
 0x23f   : > { %2172 = vst [vmem:[%s3888_s29 + $0x30] sm:$0xff] %v2163_v12  ;;  %2173 = vst [vmem:[%s3888_s29 + $0x38] sm:$0xff] %v2164_v47  ;;  %v2156_v26 = vadd.f32 %v3854_v53, %v2141_v62 }
 0x241   : > { %v2165_v11 = vmax.f32 %v2156_v26, 0.0 }
 0x243   : > { %2175 = vst.msk [vmem:[%s3888_s29 + $0x40] sm:$0xff] %vm2174_vm8, %v2165_v11 }
 0x244 PF: > { %s13_s14 = sadd.s32 1, %s2400_s14   ;;  %s4227_s12 = smov %s2396_s13 }
 0x245   : > { %p10_p5 = scmp.ge.s32.totalorder %s13_s14, 4   ;;  %s4228_s13 = smov %s4230_s15 }
 0x247   :  { %12 = sbr.rel (!%p10_p5) target bundleno = 2 (0x2), region = 76 }

// kernel: up_noskip_forward.5
= control target key start
LH: loop header
LB: loop body
LE: loop exit
PB: predicated region body
PF: predicated region fallthrough
CT: control target
= control target key end

     0   :  { %s3212_s12 = smov 0   ;;  %s3214_s13 = smov 0   ;;  %s5894_s0 = inlined_call_operand.vmem [shape: f32[2,8,1158], index: 0, kind: input, shape index: {}]   ;;  %s5895_s1 = inlined_call_operand.vmem [shape: f32[9,8,8], index: 1, kind: input, shape index: {}]   ;;  %s5896_s2 = inlined_call_operand.vmem [shape: f32[8,1], index: 2, kind: input, shape index: {}]   ;;  %s5897_s3 = inlined_call_operand.vmem [shape: f32[2,8,1088], index: 3, kind: output, shape index: {}]  }
   0x1   :  { %s3216_s14 = smov 0  }
   0x2 LB: > { %s25_s15 = sadd.s32 1, %s3170_s13  ;;  %p3035_p0 = scmp.ge.s32.totalorder %s3174_s14, 1  ;;  %s3174_s14 = sphi %s3216_s14, %s13_s14   ;;  %s3170_s13 = sphi %s3214_s13, %s7100_s13   ;;  %s3166_s12 = sphi %s3212_s12, %s7099_s12  }
   0x3   : > { %p27_p1 = scmp.ge.s32.totalorder %s25_s15, 2  ;;  %p169_p2 = scmp.lt.s32.totalorder %s3174_s14, 3 }
   0x5   : > { %s7102_s15 = smov (%p27_p1, %s25_s15), 0  ;;  %p170_p3 = pnand %p3035_p0, %p169_p2 }
   0x7   : > { %173 = sbr.rel (%p170_p3) target bundleno = 994 (0x3e2), region = 32 }
   0xc   : > { %v236_v0 = vld [vmem:[%s5895_s1] sm:$0xff]  ;;  %v5900_v1 = vmov 2   ;;  %v5904_v2 = vmov 1   ;;  %v3038_v3 = vld [vmem:[%s5895_s1 + $0x8] sm:$0xff]  ;;  %v5912_v4 = vmov 3   ;;  %v3039_v5 = vld [vmem:[%s5895_s1 + $0x10] sm:$0xff]  ;;  %v242_v13 = vlaneseq }
   0xd   : > { %3091 = vset.pattern.permute.xlu1 %v5900_v1  ;;  %3090 = vset.pattern.permute.xlu0 %v5904_v2  ;;  %v5910_v6 = vmov 4   ;;  %v3040_v7 = vld [vmem:[%s5895_s1 + $0x18] sm:$0xff]  ;;  %v5902_v8 = vmov 6   ;;  %v5898_v9 = vmov 0   ;;  %v5906_v10 = vmov 7   ;;  %v3041_v11 = vld [vmem:[%s5895_s1 + $0x20] sm:$0xff] }
   0xe   : > { %346 = vperm.xlu1 %3091, %v236_v0   ;;  %288 = vperm.xlu0 %3090, %v236_v0   ;;  %v5908_v12 = vmov 5   ;;  %p205_p4 = scmp.lt.s32.totalorder %s3166_s12, 1  ;;  %v3278_v14 = vshrl.u32 %v242_v13, 7  ;;  %s3184_s30 = smov 127   ;;  %vm1571_vm0 = vcmask 760832   ;;  %vm899_vm1 = vcmask 1039360  }
   0xf   : > { %s3185_s4 = smov 126   ;;  %s3186_s5 = smov 94   ;;  %vm1795_vm2 = vcmask 752640   ;;  %vm1123_vm3 = vcmask 1031168   ;;  %vm1347_vm4 = vcmask 769024   ;;  %vm2367_vm5 = vcmask 490496  }
  0x10   : > { %s7104_s12 = smov (!%p205_p4, %s3166_s12), 1  ;;  %v3286_v15 = vsub.s32 1, %v3278_v14  ;;  %v3289_v16 = vsub.s32 2, %v3278_v14  ;;  %v3292_v17 = vsub.s32 3, %v3278_v14  ;;  %v3295_v18 = vsub.s32 4, %v3278_v14  ;;  %s3187_s8 = smov 93  }
  0x11   : > { %s3048_s26 = smul.u32 80, %s7104_s12  ;;  %v3301_v20 = vsub.s32 6, %v3278_v14  ;;  %v3307_v22 = vsub.s32 0, %v3278_v14  ;;  %v3337_v31 = vsub.s32 7, %v3278_v14  ;;  %s3188_s11 = smov 92   ;;  %vm2610_vm6 = vcmask 482304  }
  0x12   : > { %3092 = vset.pattern.permute.xlu1 %v5912_v4  ;;  %3098 = vset.pattern.permute.xlu0 %v5912_v4  ;;  %6281 = vst [vmem:[#allocation2_spill] sm:$0xff] %v3286_v15  ;;  %6282 = vst [vmem:[#allocation3_spill] sm:$0xff] %v3289_v16  ;;  %s3189_s24 = smov 60   ;;  %s3190_s25 = smov 59   ;;  %vm2853_vm7 = vcmask 474112   ;;  %vm2913_vm8 = vcmask 523264  }
  0x13   : > { %404 = vperm.xlu1 %3092, %v236_v0   ;;  %763 = vperm.xlu0 %3098, %v3038_v3   ;;  %s3283_s29 = scalar_lea.vmem %s5894_s0, %s3048_s26  ;;  %6283 = vst [vmem:[#allocation4_spill] sm:$0xff] %v3292_v17  ;;  %6284 = vst [vmem:[#allocation5_spill] sm:$0xff] %v3295_v18  ;;  %s3191_s28 = smov 58  }
  0x14   : > { %v3298_v19 = vld [vmem:[%s3283_s29 + $0x8] sm:$0xff]  ;;  %6285 = vst [vmem:[#allocation6_spill] sm:$0xff] %v3301_v20  ;;  %v3304_v21 = vld [vmem:[%s3283_s29] sm:$0xff]  ;;  %6286 = vst [vmem:[#allocation7_spill] sm:$0xff] %v3307_v22 }
  0x15   : > { %v3315_v25 = vrot.slane %v3298_v19, %v3286_v15  ;;  %v3319_v26 = vrot.slane %v3298_v19, %v3289_v16  ;;  %v3323_v27 = vrot.slane %v3298_v19, %v3292_v17  ;;  %v3327_v28 = vrot.slane %v3298_v19, %v3295_v18  ;;  %v3330_v29 = vld [vmem:[%s3283_s29 + $0x18] sm:$0xff]  ;;  %6294 = vst [vmem:[#allocation15_spill] sm:$0xff] %v3337_v31  ;;  %v3364_v38 = vld [vmem:[%s3283_s29 + $0x10] sm:$0xff]  ;;  %v232_v47 = vld [vmem:[%s3283_s29 + $0x28] sm:$0xff] }
  0x16   : > { %v3334_v30 = vrot.slane %v3298_v19, %v3301_v20  ;;  %v3341_v32 = vrot.slane %v3304_v21, %v3286_v15  ;;  %v3345_v33 = vrot.slane %v3304_v21, %v3289_v16  ;;  %v3349_v34 = vrot.slane %v3304_v21, %v3292_v17  ;;  %v231_v58 = vld [vmem:[%s3283_s29 + $0x20] sm:$0xff] }
  0x17   : > { %3093 = vset.pattern.permute.xlu1 %v5910_v6  ;;  %987 = vperm.xlu0 %3098, %v3039_v5   ;;  %6289 = vst [vmem:[#allocation10_spill] sm:$0xff] %v3315_v25  ;;  %6290 = vst [vmem:[#allocation11_spill] sm:$0xff] %v3319_v26  ;;  %v3353_v35 = vrot.slane %v3304_v21, %v3295_v18  ;;  %v3357_v36 = vrot.slane %v3304_v21, %v3301_v20 }
  0x18   : > { %462 = vperm.xlu1 %3093, %v236_v0   ;;  %6291 = vst [vmem:[#allocation12_spill] sm:$0xff] %v3323_v27  ;;  %6292 = vst [vmem:[#allocation13_spill] sm:$0xff] %v3327_v28  ;;  %v3361_v37 = vrot.slane %v3330_v29, %v3286_v15  ;;  %v3368_v39 = vrot.slane %v3298_v19, %v3307_v22  ;;  %v3372_v40 = vrot.slane %v3330_v29, %v3289_v16 }
  0x19   : > { %6293 = vst [vmem:[#allocation14_spill] sm:$0xff] %v3334_v30  ;;  %6295 = vst [vmem:[#allocation16_spill] sm:$0xff] %v3341_v32  ;;  %v3376_v41 = vrot.slane %v3330_v29, %v3292_v17  ;;  %v3380_v42 = vrot.slane %v3330_v29, %v3295_v18  ;;  %v3384_v43 = vrot.slane %v3304_v21, %v3307_v22 }
  0x1a   : > { %6296 = vst [vmem:[#allocation17_spill] sm:$0xff] %v3345_v33  ;;  %6297 = vst [vmem:[#allocation18_spill] sm:$0xff] %v3349_v34  ;;  %v3388_v44 = vrot.slane %v3330_v29, %v3307_v22  ;;  %v3392_v45 = vrot.slane %v3330_v29, %v3301_v20  ;;  %v3396_v46 = vrot.slane %v3364_v38, %v3307_v22 }
  0x1b   : > { %1211 = vperm.xlu0 %3098, %v3040_v7   ;;  %6298 = vst [vmem:[#allocation19_spill] sm:$0xff] %v3353_v35  ;;  %6299 = vst [vmem:[#allocation20_spill] sm:$0xff] %v3357_v36  ;;  %v3405_v50 = vrot.slane %v3298_v19, %v3337_v31  ;;  %v3409_v51 = vrot.slane %v3304_v21, %v3337_v31  ;;  %v3413_v52 = vrot.slane %v3364_v38, %v3286_v15 }
  0x1c   : > { %3094 = vset.pattern.permute.xlu1 %v5902_v8  ;;  %6300 = vst [vmem:[#allocation21_spill] sm:$0xff] %v3361_v37  ;;  %6301 = vst [vmem:[#allocation22_spill] sm:$0xff] %v3368_v39  ;;  %v3417_v53 = vrot.slane %v3364_v38, %v3289_v16  ;;  %v3421_v54 = vrot.slane %v3330_v29, %v3337_v31  ;;  %v3425_v55 = vrot.slane %v3364_v38, %v3292_v17 }
  0x1d   : > { %578 = vperm.xlu1 %3094, %v236_v0   ;;  %6302 = vst [vmem:[#allocation23_spill] sm:$0xff] %v3372_v40  ;;  %6303 = vst [vmem:[#allocation24_spill] sm:$0xff] %v3376_v41  ;;  %v3429_v56 = vrot.slane %v3364_v38, %v3295_v18  ;;  %v3433_v57 = vrot.slane %v3364_v38, %v3301_v20  ;;  %v3438_v59 = vrot.slane %v3364_v38, %v3337_v31 }
  0x1e   : > { %6304 = vst [vmem:[#allocation25_spill] sm:$0xff] %v3380_v42  ;;  %6305 = vst [vmem:[#allocation26_spill] sm:$0xff] %v3384_v43  ;;  %v3441_v60 = vrot.slane %v232_v47, %v3307_v22  ;;  %v3444_v61 = vrot.slane %v232_v47, %v3286_v15  ;;  %v3447_v62 = vrot.slane %v232_v47, %v3289_v16 }
  0x1f   : > { %3109 = vset.pattern.permute.xlu0 %v5898_v9  ;;  %6306 = vst [vmem:[#allocation27_spill] sm:$0xff] %v3388_v44  ;;  %6307 = vst [vmem:[#allocation28_spill] sm:$0xff] %v3392_v45  ;;  %v3450_v63 = vrot.slane %v232_v47, %v3292_v17  ;;  %v3465_v13 = vrot.slane %v231_v58, %v3307_v22  ;;  %v3468_v9 = vrot.slane %v231_v58, %v3286_v15 }
  0x20   : > { %239 = vperm.xlu0 %3109, %v236_v0   ;;  %6308 = vst [vmem:[#allocation29_spill] sm:$0xff] %v3396_v46  ;;  %6310 = vst [vmem:[#allocation31_spill] sm:$0xff] %v3405_v50 }
  0x21   : > { %3095 = vset.pattern.permute.xlu1 %v5906_v10  ;;  %6311 = vst [vmem:[#allocation32_spill] sm:$0xff] %v3409_v51  ;;  %6312 = vst [vmem:[#allocation33_spill] sm:$0xff] %v3413_v52 }
  0x22   : > { %636 = vperm.xlu1 %3095, %v236_v0   ;;  %6313 = vst [vmem:[#allocation34_spill] sm:$0xff] %v3417_v53  ;;  %6314 = vst [vmem:[#allocation35_spill] sm:$0xff] %v3421_v54  ;;  %v3453_v0 = vrot.slane %v232_v47, %v3295_v18  ;;  %v3505_v54 = vsub.s32 5, %v3278_v14 }
  0x23   : > { %6315 = vst [vmem:[#allocation36_spill] sm:$0xff] %v3425_v55  ;;  %6316 = vst [vmem:[#allocation37_spill] sm:$0xff] %v3429_v56 }
  0x24   : > { %706 = vperm.xlu0 %3109, %v3038_v3   ;;  %6317 = vst [vmem:[#allocation38_spill] sm:$0xff] %v3433_v57  ;;  %6318 = vst [vmem:[#allocation39_spill] sm:$0xff] %v3438_v59  ;;  %v235_v59 = vld [vmem:[%s3283_s29 + $0x40] sm:$0xff] }
  0x25   : > { %6319 = vst [vmem:[#allocation40_spill] sm:$0xff] %v3441_v60  ;;  %6320 = vst [vmem:[#allocation41_spill] sm:$0xff] %v3444_v61  ;;  %v3537_v36 = vrot.slane %v235_v59, %v3286_v15  ;;  %v3540_v30 = vrot.slane %v235_v59, %v3289_v16 }
  0x26   : > { %3096 = vset.pattern.permute.xlu1 %v5904_v2  ;;  %6321 = vst [vmem:[#allocation42_spill] sm:$0xff] %v3447_v62  ;;  %6322 = vst [vmem:[#allocation43_spill] sm:$0xff] %v3450_v63 }
  0x27   : > { %719 = vperm.xlu1 %3096, %v3038_v3   ;;  %6323 = vst [vmem:[#allocation44_spill] sm:$0xff] %v3453_v0  ;;  %6326 = vst [vmem:[#allocation47_spill] sm:$0xff] %v3465_v13  ;;  %v3548_v0 = vrot.slane %v235_v59, %v3292_v17 }
  0x28   : > { %930 = vperm.xlu0 %3109, %v3039_v5   ;;  %6327 = vst [vmem:[#allocation48_spill] sm:$0xff] %v3468_v9  ;;  %6339 = vst [vmem:[#allocation60_spill] sm:$0xff] %v3505_v54 }
  0x29   : > { %6350 = vst [vmem:[#allocation71_spill] sm:$0xff] %v3537_v36  ;;  %6351 = vst [vmem:[#allocation72_spill] sm:$0xff] %v3540_v30 }
  0x2a   : > { %6354 = vst [vmem:[#allocation75_spill] sm:$0xff] %v3548_v0 }
  0x2b   : > { %3097 = vset.pattern.permute.xlu1 %v5900_v1 }
  0x2c   : > { %741 = vperm.xlu1 %3097, %v3038_v3   ;;  %1154 = vperm.xlu0 %3109, %v3040_v7  }
  0x30   : > { %3099 = vset.pattern.permute.xlu1 %v5910_v6  ;;  %1378 = vperm.xlu0 %3109, %v3041_v11  }
  0x31   : > { %785 = vperm.xlu1 %3099, %v3038_v3  }
  0x34   : > { %3113 = vset.pattern.permute.xlu0 %v5902_v8  ;;  %v3474_v8 = vrot.slane %v231_v58, %v3292_v17 }
  0x35   : > { %3100 = vset.pattern.permute.xlu1 %v5908_v12  ;;  %829 = vperm.xlu0 %3113, %v3038_v3  }
  0x36   : > { %807 = vperm.xlu1 %3100, %v3038_v3   ;;  %6329 = vst [vmem:[#allocation50_spill] sm:$0xff] %v3474_v8 }
  0x39   : > { %1053 = vperm.xlu0 %3113, %v3039_v5  }
  0x3a   : > { %3101 = vset.pattern.permute.xlu1 %v5906_v10 }
  0x3b   : > { %851 = vperm.xlu1 %3101, %v3038_v3   ;;  %v3456_v3 = vrot.slane %v232_v47, %v3301_v20 }
  0x3d   : > { %1277 = vperm.xlu0 %3113, %v3040_v7   ;;  %6324 = vst [vmem:[#allocation45_spill] sm:$0xff] %v3456_v3 }
  0x3f   : > { %3102 = vset.pattern.permute.xlu1 %v5904_v2 }
  0x40   : > { %943 = vperm.xlu1 %3102, %v3039_v5  }
  0x44   : > { %3103 = vset.pattern.permute.xlu1 %v5900_v1 }
  0x45   : > { %965 = vperm.xlu1 %3103, %v3039_v5  }
  0x49   : > { %3104 = vset.pattern.permute.xlu1 %v5910_v6 }
  0x4a   : > { %1009 = vperm.xlu1 %3104, %v3039_v5  }
  0x4e   : > { %3105 = vset.pattern.permute.xlu1 %v5908_v12 }
  0x4f   : > { %1031 = vperm.xlu1 %3105, %v3039_v5  }
  0x53   : > { %3106 = vset.pattern.permute.xlu1 %v5906_v10 }
  0x54   : > { %1075 = vperm.xlu1 %3106, %v3039_v5   ;;  %v3459_v5 = vrot.slane %v232_v47, %v3337_v31 }
  0x56   : > { %6325 = vst [vmem:[#allocation46_spill] sm:$0xff] %v3459_v5 }
  0x58   : > { %3107 = vset.pattern.permute.xlu1 %v5904_v2 }
  0x59   : > { %1167 = vperm.xlu1 %3107, %v3040_v7  }
  0x5d   : > { %3108 = vset.pattern.permute.xlu1 %v5900_v1 }
  0x5e   : > { %1189 = vperm.xlu1 %3108, %v3040_v7  }
  0x62   : > { %3110 = vset.pattern.permute.xlu1 %v5910_v6  ;;  %v3485_v6 = vrot.slane %v231_v58, %v3337_v31 }
  0x63   : > { %1233 = vperm.xlu1 %3110, %v3040_v7  }
  0x64   : > { %6333 = vst [vmem:[#allocation54_spill] sm:$0xff] %v3485_v6 }
  0x67   : > { %3111 = vset.pattern.permute.xlu1 %v5908_v12  ;;  %v3482_v12 = vrot.slane %v231_v58, %v3301_v20 }
  0x68   : > { %1255 = vperm.xlu1 %3111, %v3040_v7  }
  0x69   : > { %6332 = vst [vmem:[#allocation53_spill] sm:$0xff] %v3482_v12 }
  0x6c   : > { %3112 = vset.pattern.permute.xlu1 %v5906_v10  ;;  %v3479_v10 = vrot.slane %v231_v58, %v3295_v18 }
  0x6d   : > { %1299 = vperm.xlu1 %3112, %v3040_v7   ;;  %v234_v7 = vld [vmem:[%s3283_s29 + $0x38] sm:$0xff] }
  0x6e   : > { %6331 = vst [vmem:[#allocation52_spill] sm:$0xff] %v3479_v10  ;;  %v3488_v4 = vrot.slane %v234_v7, %v3307_v22  ;;  %v3501_v5 = vrot.slane %v234_v7, %v3295_v18  ;;  %v3508_v6 = vrot.slane %v234_v7, %v3301_v20  ;;  %v3511_v51 = vrot.slane %v234_v7, %v3337_v31 }
  0x6f   : > { %v3545_v10 = vrot.slane %v235_v59, %v3307_v22 }
  0x70   : > { %6334 = vst [vmem:[#allocation55_spill] sm:$0xff] %v3488_v4  ;;  %6338 = vst [vmem:[#allocation59_spill] sm:$0xff] %v3501_v5 }
  0x71   : > { %3114 = vset.pattern.permute.xlu1 %v5904_v2  ;;  %6340 = vst [vmem:[#allocation61_spill] sm:$0xff] %v3508_v6  ;;  %6341 = vst [vmem:[#allocation62_spill] sm:$0xff] %v3511_v51 }
  0x72   : > { %1391 = vperm.xlu1 %3114, %v3041_v11   ;;  %6353 = vst [vmem:[#allocation74_spill] sm:$0xff] %v3545_v10 }
  0x76   : > { %3115 = vset.pattern.permute.xlu1 %v5900_v1  ;;  %v3471_v1 = vrot.slane %v231_v58, %v3289_v16 }
  0x78   : > { %6328 = vst [vmem:[#allocation49_spill] sm:$0xff] %v3471_v1 }
  0x89   : > { %v3309_v23 = vpop.permute.xlu1 %346  ;;  %v3311_v24 = vpop.permute.xlu0 %288 }
  0x8a   : > { %6287 = vst [vmem:[#allocation8_spill] sm:$0xff] %v3309_v23  ;;  %6288 = vst [vmem:[#allocation9_spill] sm:$0xff] %v3311_v24  ;;  %v3492_v23 = vrot.slane %v234_v7, %v3286_v15  ;;  %v3495_v24 = vrot.slane %v234_v7, %v3289_v16 }
  0x8c   : > { %6335 = vst [vmem:[#allocation56_spill] sm:$0xff] %v3492_v23  ;;  %6336 = vst [vmem:[#allocation57_spill] sm:$0xff] %v3495_v24 }
  0x8e   : > { %v3399_v48 = vpop.permute.xlu1 %404  ;;  %v3401_v49 = vpop.permute.xlu0 %763 }
  0x8f   : > { %6309 = vst [vmem:[#allocation30_spill] sm:$0xff] %v3399_v48  ;;  %v233_v48 = vld [vmem:[%s3283_s29 + $0x30] sm:$0xff] }
  0x90   : > { %v3514_v50 = vrot.slane %v233_v48, %v3307_v22  ;;  %v3519_v3 = vrot.slane %v233_v48, %v3286_v15  ;;  %v3522_v57 = vrot.slane %v233_v48, %v3289_v16  ;;  %v3525_v14 = vrot.slane %v233_v48, %v3292_v17 }
  0x91   : > { %v3528_v45 = vrot.slane %v233_v48, %v3295_v18  ;;  %v3531_v6 = vrot.slane %v233_v48, %v3301_v20  ;;  %v3534_v51 = vrot.slane %v233_v48, %v3337_v31  ;;  %v3558_v15 = vrot.slane %v3298_v19, %v3505_v54 }
  0x92   : > { %v3462_v11 = vpop.permute.xlu0 %987  ;;  %6342 = vst [vmem:[#allocation63_spill] sm:$0xff] %v3514_v50  ;;  %6344 = vst [vmem:[#allocation65_spill] sm:$0xff] %v3519_v3  ;;  %v3562_v16 = vrot.slane %v3304_v21, %v3505_v54  ;;  %v3566_v22 = vrot.slane %v3330_v29, %v3505_v54  ;;  %v3579_v19 = vrot.slane %v231_v58, %v3505_v54 }
  0x93   : > { %v3476_v2 = vpop.permute.xlu1 %462  ;;  %6345 = vst [vmem:[#allocation66_spill] sm:$0xff] %v3522_v57  ;;  %6346 = vst [vmem:[#allocation67_spill] sm:$0xff] %v3525_v14  ;;  %v3582_v21 = vrot.slane %v234_v7, %v3505_v54  ;;  %v3588_v29 = vmul.f32 %v3401_v49, %v3323_v27  ;;  %v3602_v58 = vmul.f32 %v3401_v49, %v3376_v41 }
  0x94   : > { %6330 = vst [vmem:[#allocation51_spill] sm:$0xff] %v3476_v2  ;;  %v3498_v2 = vrot.slane %v234_v7, %v3292_v17  ;;  %6347 = vst [vmem:[#allocation68_spill] sm:$0xff] %v3528_v45  ;;  %v3551_v45 = vrot.slane %v235_v59, %v3295_v18  ;;  %v3569_v17 = vrot.slane %v235_v59, %v3337_v31 }
  0x95   : > { %6348 = vst [vmem:[#allocation69_spill] sm:$0xff] %v3531_v6  ;;  %6349 = vst [vmem:[#allocation70_spill] sm:$0xff] %v3534_v51  ;;  %v3554_v6 = vrot.slane %v235_v59, %v3301_v20  ;;  %v3573_v18 = vrot.slane %v3364_v38, %v3505_v54  ;;  %v3576_v20 = vrot.slane %v232_v47, %v3505_v54 }
  0x96   : > { %6337 = vst [vmem:[#allocation58_spill] sm:$0xff] %v3498_v2  ;;  %v3516_v12 = vpop.permute.xlu0 %1211  ;;  %6355 = vst [vmem:[#allocation76_spill] sm:$0xff] %v3551_v45  ;;  %v3592_v31 = vmul.f32 %v3401_v49, %v3349_v34  ;;  %v3595_v38 = vrot.slane %v233_v48, %v3505_v54  ;;  %v3598_v47 = vrot.slane %v235_v59, %v3505_v54 }
  0x97   : > { %6343 = vst [vmem:[#allocation64_spill] sm:$0xff] %v3516_v12  ;;  %6356 = vst [vmem:[#allocation77_spill] sm:$0xff] %v3554_v6  ;;  %v3606_v7 = vmul.f32 %v3401_v49, %v3425_v55  ;;  %v3620_v59 = vmul.f32 %v3401_v49, %v3498_v2  ;;  %v3624_v54 = vmul.f32 %v3401_v49, %v3525_v14 }
  0x98   : > { %v3542_v5 = vpop.permute.xlu1 %578  ;;  %6357 = vst [vmem:[#allocation78_spill] sm:$0xff] %v3558_v15  ;;  %6358 = vst [vmem:[#allocation79_spill] sm:$0xff] %v3562_v16  ;;  %v3628_v6 = vmul.f32 %v3401_v49, %v3548_v0  ;;  %v3636_v45 = vmul.f32 %v3462_v11, %v3349_v34  ;;  %v3644_v51 = vmul.f32 %v3462_v11, %v3425_v55 }
  0x99   : > { %6352 = vst [vmem:[#allocation73_spill] sm:$0xff] %v3542_v5  ;;  %6359 = vst [vmem:[#allocation80_spill] sm:$0xff] %v3566_v22 }
  0x9a   : > { %6360 = vst [vmem:[#allocation81_spill] sm:$0xff] %v3569_v17  ;;  %6361 = vst [vmem:[#allocation82_spill] sm:$0xff] %v3573_v18  ;;  %v3614_v17 = vmul.f32 %v3401_v49, %v3474_v8 }
  0x9b   : > { %6362 = vst [vmem:[#allocation83_spill] sm:$0xff] %v3576_v20  ;;  %6363 = vst [vmem:[#allocation84_spill] sm:$0xff] %v3579_v19  ;;  %v3584_v5 = vpop.permute.xlu0 %239 }
  0x9c   : > { %6364 = vst [vmem:[#allocation85_spill] sm:$0xff] %v3582_v21  ;;  %6365 = vst [vmem:[#allocation86_spill] sm:$0xff] %v3584_v5  ;;  %v3610_v5 = vmul.f32 %v3401_v49, %v3450_v63  ;;  %v3648_v49 = vmul.f32 %v3462_v11, %v3450_v63 }
  0x9d   : > { %6366 = vst [vmem:[#allocation87_spill] sm:$0xff] %v3595_v38  ;;  %6367 = vst [vmem:[#allocation88_spill] sm:$0xff] %v3598_v47  ;;  %v3616_v48 = vpop.permute.xlu1 %636  ;;  %v3632_v47 = vmul.f32 %v3462_v11, %v3323_v27 }
  0x9e   : > { %6368 = vst [vmem:[#allocation89_spill] sm:$0xff] %v3616_v48  ;;  %6369 = vst [vmem:[#allocation90_spill] sm:$0xff] %v3624_v54  ;;  %v3640_v48 = vmul.f32 %v3462_v11, %v3376_v41 }
  0x9f   : > { %6370 = vst [vmem:[#allocation91_spill] sm:$0xff] %v3628_v6  ;;  %6371 = vst [vmem:[#allocation92_spill] sm:$0xff] %v3632_v47  ;;  %v707_v6 = vpop.permute.xlu0 %706  ;;  %v3652_v47 = vmul.f32 %v3462_v11, %v3474_v8  ;;  %v3672_v8 = vmul.f32 %v3516_v12, %v3349_v34 }
  0xa0   : > { %6372 = vst [vmem:[#allocation93_spill] sm:$0xff] %v3636_v45  ;;  %6373 = vst [vmem:[#allocation94_spill] sm:$0xff] %v3640_v48  ;;  %v3656_v45 = vmul.f32 %v3462_v11, %v3498_v2  ;;  %v3660_v48 = vmul.f32 %v3462_v11, %v3525_v14  ;;  %v3676_v2 = vmul.f32 %v3516_v12, %v3376_v41 }
  0xa1   : > { %6374 = vst [vmem:[#allocation95_spill] sm:$0xff] %v3644_v51  ;;  %6375 = vst [vmem:[#allocation96_spill] sm:$0xff] %v3648_v49  ;;  %v3664_v51 = vmul.f32 %v3462_v11, %v3548_v0  ;;  %v3668_v49 = vmul.f32 %v3516_v12, %v3323_v27  ;;  %v3680_v14 = vmul.f32 %v3516_v12, %v3425_v55 }
  0xa2   : > { %6376 = vst [vmem:[#allocation97_spill] sm:$0xff] %v3652_v47  ;;  %6377 = vst [vmem:[#allocation98_spill] sm:$0xff] %v3656_v45  ;;  %v709_v11 = vmul.f32 %v707_v6, %v3384_v43  ;;  %v712_v0 = vmul.f32 %v707_v6, %v3388_v44  ;;  %v711_v27 = vmul.f32 %v707_v6, %v3396_v46 }
  0xa3   : > { %6378 = vst [vmem:[#allocation99_spill] sm:$0xff] %v3660_v48  ;;  %6379 = vst [vmem:[#allocation100_spill] sm:$0xff] %v3664_v51  ;;  %v710_v48 = vmul.f32 %v707_v6, %v3368_v39  ;;  %v714_v34 = vmul.f32 %v707_v6, %v3441_v60  ;;  %v716_v41 = vmul.f32 %v707_v6, %v3488_v4  ;;  %v3690_v51 = vpop.permute.xlu0 %930 }
  0xa4   : > { %6380 = vst [vmem:[#allocation101_spill] sm:$0xff] %v3668_v49  ;;  %6381 = vst [vmem:[#allocation102_spill] sm:$0xff] %v3672_v8  ;;  %v720_v49 = vpop.permute.xlu1 %719  ;;  %v713_v8 = vmul.f32 %v707_v6, %v3465_v13  ;;  %v3701_v38 = vmul.f32 %v707_v6, %v3545_v10 }
  0xa5   : > { %6382 = vst [vmem:[#allocation103_spill] sm:$0xff] %v3676_v2  ;;  %6383 = vst [vmem:[#allocation104_spill] sm:$0xff] %v3680_v14  ;;  %v715_v2 = vmul.f32 %v707_v6, %v3514_v50  ;;  %v723_v55 = vmul.f32 %v720_v49, %v3315_v25  ;;  %v722_v14 = vmul.f32 %v720_v49, %v3341_v32 }
  0xa6   : > { %v725_v45 = vmul.f32 %v720_v49, %v3361_v37  ;;  %v724_v47 = vmul.f32 %v720_v49, %v3413_v52  ;;  %v727_v46 = vmul.f32 %v720_v49, %v3444_v61  ;;  %v726_v60 = vmul.f32 %v720_v49, %v3468_v9 }
  0xa7   : > { %v729_v13 = vmul.f32 %v720_v49, %v3492_v23  ;;  %v728_v4 = vmul.f32 %v720_v49, %v3519_v3  ;;  %v732_v30 = vadd.f32 %v723_v55, %v710_v48  ;;  %v731_v50 = vadd.f32 %v722_v14, %v709_v11  ;;  %v3709_v9 = vpop.permute.xlu0 %1154 }
  0xa8   : > { %v3705_v32 = vmul.f32 %v3516_v12, %v3450_v63  ;;  %v734_v37 = vadd.f32 %v725_v45, %v712_v0  ;;  %v733_v25 = vadd.f32 %v724_v47, %v711_v27  ;;  %v736_v52 = vadd.f32 %v727_v46, %v714_v34  ;;  %v3707_v61 = vpop.permute.xlu1 %741  ;;  %6385 = vst [vmem:[#allocation106_spill] sm:$0xff] %v3709_v9 }
  0xa9   : > { %v735_v54 = vadd.f32 %v726_v60, %v713_v8  ;;  %v738_v23 = vadd.f32 %v729_v13, %v716_v41  ;;  %v737_v44 = vadd.f32 %v728_v4, %v715_v2  ;;  %v3712_v55 = vmul.f32 %v720_v49, %v3537_v36 }
  0xaa   : > { %6384 = vst [vmem:[#allocation105_spill] sm:$0xff] %v3705_v32  ;;  %v3716_v6 = vmul.f32 %v3690_v51, %v3368_v39  ;;  %v745_v14 = vmul.f32 %v3707_v61, %v3319_v26  ;;  %v744_v27 = vmul.f32 %v3707_v61, %v3345_v33  ;;  %v747_v8 = vmul.f32 %v3707_v61, %v3372_v40 }
  0xab   : > { %v746_v34 = vmul.f32 %v3707_v61, %v3417_v53  ;;  %v749_v2 = vmul.f32 %v3707_v61, %v3447_v62  ;;  %v748_v4 = vmul.f32 %v3707_v61, %v3471_v1  ;;  %v751_v41 = vmul.f32 %v3707_v61, %v3495_v24  ;;  %v3736_v63 = vpop.permute.xlu0 %1378 }
  0xac   : > { %v750_v45 = vmul.f32 %v3707_v61, %v3522_v57  ;;  %v754_v46 = vadd.f32 %v745_v14, %v732_v30  ;;  %v753_v60 = vadd.f32 %v744_v27, %v731_v50  ;;  %v756_v0 = vadd.f32 %v747_v8, %v734_v37  ;;  %6386 = vst [vmem:[#allocation107_spill] sm:$0xff] %v3736_v63  ;;  %v3738_v32 = vpop.permute.xlu1 %785 }
  0xad   : > { %v755_v13 = vadd.f32 %v746_v34, %v733_v25  ;;  %v758_v47 = vadd.f32 %v749_v2, %v736_v52  ;;  %v757_v48 = vadd.f32 %v748_v4, %v735_v54  ;;  %v760_v49 = vadd.f32 %v751_v41, %v738_v23  ;;  %v6387_v52 = vld [vmem:[#allocation44_spill] sm:$0xff] }
  0xae   : > { %v3734_v11 = vadd.f32 %v750_v45, %v737_v44  ;;  %v776_v12 = vadd.f32 %v3588_v29, %v754_v46  ;;  %v775_v9 = vadd.f32 %v3592_v31, %v753_v60  ;;  %v778_v39 = vadd.f32 %v3602_v58, %v756_v0  ;;  %v6388_v29 = vld [vmem:[#allocation52_spill] sm:$0xff]  ;;  %v6389_v45 = vld [vmem:[#allocation59_spill] sm:$0xff]  ;;  %v6390_v60 = vld [vmem:[#allocation14_spill] sm:$0xff] }
  0xaf   : > { %v777_v30 = vadd.f32 %v3606_v7, %v755_v13  ;;  %v789_v25 = vmul.f32 %v3738_v32, %v3327_v28  ;;  %v788_v23 = vmul.f32 %v3738_v32, %v3353_v35  ;;  %v791_v37 = vmul.f32 %v3738_v32, %v3380_v42  ;;  %v6391_v0 = vld [vmem:[#allocation20_spill] sm:$0xff] }
  0xb0   : > { %v790_v44 = vmul.f32 %v3738_v32, %v3429_v56  ;;  %v780_v50 = vadd.f32 %v3610_v5, %v758_v47  ;;  %v793_v31 = vmul.f32 %v3738_v32, %v6387_v52  ;;  %v779_v54 = vadd.f32 %v3614_v17, %v757_v48  ;;  %v3758_v34 = vpop.permute.xlu0 %829 }
  0xb1   : > { %v792_v58 = vmul.f32 %v3738_v32, %v6388_v29  ;;  %v798_v7 = vadd.f32 %v789_v25, %v776_v12  ;;  %v797_v14 = vadd.f32 %v788_v23, %v775_v9  ;;  %v800_v27 = vadd.f32 %v791_v37, %v778_v39  ;;  %v808_v46 = vpop.permute.xlu1 %807  ;;  %v6392_v12 = vld [vmem:[#allocation28_spill] sm:$0xff]  ;;  %v6393_v39 = vld [vmem:[#allocation38_spill] sm:$0xff]  ;;  %v6394_v23 = vld [vmem:[#allocation45_spill] sm:$0xff] }
  0xb2   : > { %v799_v8 = vadd.f32 %v790_v44, %v777_v30  ;;  %v802_v2 = vadd.f32 %v793_v31, %v780_v50  ;;  %v782_v41 = vadd.f32 %v3620_v59, %v760_v49  ;;  %v795_v5 = vmul.f32 %v3738_v32, %v6389_v45  ;;  %v6395_v50 = vld [vmem:[#allocation53_spill] sm:$0xff] }
  0xb3   : > { %v801_v4 = vadd.f32 %v792_v58, %v779_v54  ;;  %v833_v17 = vmul.f32 %v3758_v34, %v6390_v60  ;;  %v832_v13 = vmul.f32 %v3758_v34, %v6391_v0  ;;  %v835_v9 = vmul.f32 %v3758_v34, %v6392_v12 }
  0xb4   : > { %v834_v47 = vmul.f32 %v3758_v34, %v6393_v39  ;;  %v811_v48 = vmul.f32 %v808_v46, %v3558_v15  ;;  %v810_v59 = vmul.f32 %v808_v46, %v3562_v16  ;;  %v813_v49 = vmul.f32 %v808_v46, %v3566_v22  ;;  %v6398_v16 = vld [vmem:[#allocation35_spill] sm:$0xff] }
  0xb5   : > { %v812_v30 = vmul.f32 %v808_v46, %v3573_v18  ;;  %v815_v25 = vmul.f32 %v808_v46, %v3576_v20  ;;  %v837_v37 = vmul.f32 %v3758_v34, %v6394_v23  ;;  %v814_v44 = vmul.f32 %v808_v46, %v3579_v19  ;;  %v6396_v23 = vld [vmem:[#allocation31_spill] sm:$0xff]  ;;  %v6397_v19 = vld [vmem:[#allocation32_spill] sm:$0xff] }
  0xb6   : > { %v836_v31 = vmul.f32 %v3758_v34, %v6395_v50  ;;  %v820_v54 = vadd.f32 %v811_v48, %v798_v7  ;;  %v819_v58 = vadd.f32 %v810_v59, %v797_v14  ;;  %v822_v63 = vadd.f32 %v813_v49, %v800_v27  ;;  %v852_v24 = vpop.permute.xlu1 %851  ;;  %v6399_v7 = vld [vmem:[#allocation39_spill] sm:$0xff]  ;;  %v6403_v49 = vld [vmem:[#allocation61_spill] sm:$0xff] }
  0xb7   : > { %v821_v36 = vadd.f32 %v812_v30, %v799_v8  ;;  %v824_v10 = vadd.f32 %v815_v25, %v802_v2  ;;  %v823_v57 = vadd.f32 %v814_v44, %v801_v4  ;;  %v804_v3 = vadd.f32 %v795_v5, %v782_v41  ;;  %v6400_v8 = vld [vmem:[#allocation46_spill] sm:$0xff]  ;;  %v6407_v25 = vld [vmem:[#allocation87_spill] sm:$0xff] }
  0xb8   : > { %v817_v45 = vmul.f32 %v808_v46, %v3582_v21  ;;  %v842_v29 = vadd.f32 %v833_v17, %v820_v54  ;;  %v841_v20 = vadd.f32 %v832_v13, %v819_v58  ;;  %v844_v1 = vadd.f32 %v835_v9, %v822_v63  ;;  %v6401_v41 = vld [vmem:[#allocation54_spill] sm:$0xff]  ;;  %v6409_v58 = vld [vmem:[#allocation72_spill] sm:$0xff] }
  0xb9   : > { %v843_v52 = vadd.f32 %v834_v47, %v821_v36  ;;  %v855_v18 = vmul.f32 %v852_v24, %v6396_v23  ;;  %v854_v22 = vmul.f32 %v852_v24, %v6397_v19  ;;  %v857_v50 = vmul.f32 %v852_v24, %v6398_v16  ;;  %v6402_v36 = vld [vmem:[#allocation27_spill] sm:$0xff] }
  0xba   : > { %v856_v14 = vmul.f32 %v852_v24, %v6399_v7  ;;  %v846_v27 = vadd.f32 %v837_v37, %v824_v10  ;;  %v859_v2 = vmul.f32 %v852_v24, %v6400_v8  ;;  %v845_v4 = vadd.f32 %v836_v31, %v823_v57 }
  0xbb   : > { %v858_v5 = vmul.f32 %v852_v24, %v6401_v41  ;;  %v864_v48 = vadd.f32 %v855_v18, %v842_v29  ;;  %v863_v59 = vadd.f32 %v854_v22, %v841_v20  ;;  %v933_v63 = vmul.f32 %v3690_v51, %v3384_v43  ;;  %v3794_v10 = vpop.permute.xlu1 %943  ;;  %v6404_v18 = vld [vmem:[#allocation62_spill] sm:$0xff]  ;;  %v6406_v29 = vld [vmem:[#allocation68_spill] sm:$0xff] }
  0xbc   : > { %v936_v17 = vmul.f32 %v3690_v51, %v6402_v36  ;;  %v866_v13 = vadd.f32 %v857_v50, %v844_v1  ;;  %v865_v9 = vadd.f32 %v856_v14, %v843_v52  ;;  %v826_v47 = vadd.f32 %v817_v45, %v804_v3  ;;  %v6405_v22 = vld [vmem:[#allocation90_spill] sm:$0xff]  ;;  %v6408_v50 = vld [vmem:[#allocation69_spill] sm:$0xff] }
  0xbd   : > { %v839_v30 = vmul.f32 %v3758_v34, %v6403_v49  ;;  %883 = vrot.lane.b32.xlu0 %v864_v48, %s3184_s30  ;;  %881 = vrot.lane.b32.xlu1 %v863_v59, %s3184_s30  ;;  %v861_v20 = vmul.f32 %v852_v24, %v6404_v18  ;;  %v781_v57 = vadd.f32 %v6405_v22, %v3734_v11  ;;  %v6410_v11 = vld [vmem:[#allocation70_spill] sm:$0xff]  ;;  %v6411_v22 = vld [vmem:[#allocation76_spill] sm:$0xff] }
  0xbe   : > { %v794_v1 = vmul.f32 %v3738_v32, %v6406_v29  ;;  %v868_v52 = vadd.f32 %v859_v2, %v846_v27  ;;  %v867_v3 = vadd.f32 %v858_v5, %v845_v4  ;;  %v816_v37 = vmul.f32 %v808_v46, %v6407_v25  ;;  %v6412_v2 = vld [vmem:[#allocation88_spill] sm:$0xff] }
  0xbf   : > { %v848_v45 = vadd.f32 %v839_v30, %v826_v47  ;;  %v838_v31 = vmul.f32 %v3758_v34, %v6408_v50  ;;  %v739_v54 = vadd.f32 %v3712_v55, %v3701_v38  ;;  %v752_v14 = vmul.f32 %v3707_v61, %v6409_v58  ;;  %v6413_v30 = vld [vmem:[#allocation10_spill] sm:$0xff]  ;;  %v6414_v61 = vld [vmem:[#allocation77_spill] sm:$0xff] }
  0xc0   : > { %v803_v44 = vadd.f32 %v794_v1, %v781_v57  ;;  %v860_v59 = vmul.f32 %v852_v24, %v6410_v11  ;;  %v796_v27 = vmul.f32 %v3738_v32, %v6411_v22  ;;  %v818_v4 = vmul.f32 %v808_v46, %v6412_v2  ;;  %v3818_v55 = vpop.permute.xlu1 %965  ;;  %v6415_v57 = vld [vmem:[#allocation81_spill] sm:$0xff] }
  0xc1   : > { %v870_v48 = vadd.f32 %v861_v20, %v848_v45  ;;  %887 = vrot.lane.b32.xlu0 %v866_v13, %s3184_s30  ;;  %885 = vrot.lane.b32.xlu1 %v865_v9, %s3184_s30  ;;  %v761_v47 = vadd.f32 %v752_v14, %v739_v54  ;;  %v947_v38 = vmul.f32 %v3794_v10, %v6413_v30  ;;  %v6416_v45 = vld [vmem:[#allocation16_spill] sm:$0xff]  ;;  %v6417_v46 = vld [vmem:[#allocation21_spill] sm:$0xff]  ;;  %v6418_v9 = vld [vmem:[#allocation91_spill] sm:$0xff]  ;;  %v3831_v14 = vpop.permute.xlu0 %1053 }
  0xc2   : > { %v825_v5 = vadd.f32 %v816_v37, %v803_v44  ;;  %v840_v20 = vmul.f32 %v3758_v34, %v6414_v61  ;;  %v862_v1 = vmul.f32 %v852_v24, %v6415_v57  ;;  %v946_v32 = vmul.f32 %v3794_v10, %v6416_v45 }
  0xc3   : > { %v949_v13 = vmul.f32 %v3794_v10, %v6417_v46  ;;  %v783_v37 = vadd.f32 %v6418_v9, %v761_v47  ;;  %v956_v44 = vadd.f32 %v947_v38, %v3716_v6  ;;  %v969_v54 = vmul.f32 %v3818_v55, %v3319_v26 }
  0xc4   : > { %v847_v36 = vadd.f32 %v838_v31, %v825_v5  ;;  %v955_v43 = vadd.f32 %v946_v32, %v933_v63  ;;  %v968_v24 = vmul.f32 %v3818_v55, %v3345_v33  ;;  %v971_v45 = vmul.f32 %v3818_v55, %v3372_v40  ;;  %v6419_v63 = vld [vmem:[#allocation29_spill] sm:$0xff] }
  0xc5   : > { %v958_v34 = vadd.f32 %v949_v13, %v936_v17  ;;  %891 = vrot.lane.b32.xlu0 %v868_v52, %s3184_s30  ;;  %889 = vrot.lane.b32.xlu1 %v867_v3, %s3184_s30  ;;  %v805_v31 = vadd.f32 %v796_v27, %v783_v37  ;;  %v978_v5 = vadd.f32 %v969_v54, %v956_v44  ;;  %v3843_v46 = vpop.permute.xlu1 %1009  ;;  %v6420_v13 = vld [vmem:[#allocation92_spill] sm:$0xff]  ;;  %v6421_v33 = vld [vmem:[#allocation33_spill] sm:$0xff] }
  0xc6   : > { %v1057_v6 = vmul.f32 %v3831_v14, %v6390_v60  ;;  %v869_v47 = vadd.f32 %v860_v59, %v847_v36  ;;  %v977_v38 = vadd.f32 %v968_v24, %v955_v43  ;;  %v935_v32 = vmul.f32 %v3690_v51, %v6419_v63  ;;  %v6422_v36 = vld [vmem:[#allocation93_spill] sm:$0xff]  ;;  %v6432_v63 = vld [vmem:[#allocation47_spill] sm:$0xff] }
  0xc7   : > { %v980_v9 = vadd.f32 %v971_v45, %v958_v34  ;;  %v827_v17 = vadd.f32 %v818_v4, %v805_v31  ;;  %v1000_v40 = vadd.f32 %v6420_v13, %v978_v5  ;;  %v948_v52 = vmul.f32 %v3794_v10, %v6421_v33  ;;  %v6423_v45 = vld [vmem:[#allocation94_spill] sm:$0xff] }
  0xc8   : > { %v970_v3 = vmul.f32 %v3818_v55, %v3417_v53  ;;  %v1013_v27 = vmul.f32 %v3843_v46, %v3327_v28  ;;  %v999_v43 = vadd.f32 %v6422_v36, %v977_v38  ;;  %v1012_v59 = vmul.f32 %v3843_v46, %v3353_v35 }
  0xc9   : > { %v1002_v37 = vadd.f32 %v6423_v45, %v980_v9  ;;  %895 = vrot.lane.b32.xlu0 %v870_v48, %s3184_s30  ;;  %893 = vrot.lane.b32.xlu1 %v869_v47, %s3184_s30  ;;  %v849_v4 = vadd.f32 %v840_v20, %v827_v17  ;;  %v1015_v44 = vmul.f32 %v3843_v46, %v3380_v42  ;;  %v6425_v17 = vld [vmem:[#allocation41_spill] sm:$0xff]  ;;  %v6428_v45 = vld [vmem:[#allocation95_spill] sm:$0xff]  ;;  %v6433_v42 = vld [vmem:[#allocation48_spill] sm:$0xff] }
  0xca   : > { %v957_v54 = vadd.f32 %v948_v52, %v935_v32  ;;  %v1022_v24 = vadd.f32 %v1013_v27, %v1000_v40  ;;  %v1021_v34 = vadd.f32 %v1012_v59, %v999_v43  ;;  %v1056_v31 = vmul.f32 %v3831_v14, %v6391_v0  ;;  %v3868_v47 = vpop.permute.xlu1 %1031  ;;  %v6424_v32 = vld [vmem:[#allocation40_spill] sm:$0xff] }
  0xcb   : > { %v1059_v5 = vmul.f32 %v3831_v14, %v6392_v12  ;;  %v871_v38 = vadd.f32 %v862_v1, %v849_v4  ;;  %v1014_v48 = vmul.f32 %v3843_v46, %v3429_v56  ;;  %v1058_v20 = vmul.f32 %v3831_v14, %v6393_v39  ;;  %v6427_v43 = vld [vmem:[#allocation80_spill] sm:$0xff]  ;;  %v6429_v4 = vld [vmem:[#allocation82_spill] sm:$0xff] }
  0xcc   : > { %v979_v13 = vadd.f32 %v970_v3, %v957_v54  ;;  %v1024_v9 = vadd.f32 %v1015_v44, %v1002_v37  ;;  %v938_v40 = vmul.f32 %v3690_v51, %v6424_v32  ;;  %v951_v52 = vmul.f32 %v3794_v10, %v6425_v17  ;;  %v6426_v3 = vld [vmem:[#allocation79_spill] sm:$0xff]  ;;  %v6430_v39 = vld [vmem:[#allocation44_spill] sm:$0xff]  ;;  %v6431_v17 = vld [vmem:[#allocation45_spill] sm:$0xff] }
  0xcd   : > { %v973_v27 = vmul.f32 %v3818_v55, %v3447_v62  ;;  %897 = vrot.lane.b32.xlu1 %v871_v38, %s3184_s30  ;;  %v1035_v1 = vmul.f32 %v3868_v47, %v3558_v15  ;;  %v1034_v36 = vmul.f32 %v3868_v47, %v6426_v3  ;;  %v1037_v59 = vmul.f32 %v3868_v47, %v6427_v43 }
  0xce   : > { %v1001_v37 = vadd.f32 %v6428_v45, %v979_v13  ;;  %v1036_v44 = vmul.f32 %v3868_v47, %v6429_v4  ;;  %v960_v54 = vadd.f32 %v951_v52, %v938_v40  ;;  %v1017_v62 = vmul.f32 %v3843_v46, %v6430_v39  ;;  %v6434_v45 = vld [vmem:[#allocation49_spill] sm:$0xff] }
  0xcf   : > { %v1061_v38 = vmul.f32 %v3831_v14, %v6431_v17  ;;  %v1044_v32 = vadd.f32 %v1035_v1, %v1022_v24  ;;  %v1043_v56 = vadd.f32 %v1034_v36, %v1021_v34  ;;  %v1046_v12 = vadd.f32 %v1037_v59, %v1024_v9  ;;  %v3896_v52 = vpop.permute.xlu1 %1075  ;;  %v6435_v1 = vld [vmem:[#allocation96_spill] sm:$0xff]  ;;  %v6436_v59 = vld [vmem:[#allocation83_spill] sm:$0xff] }
  0xd0   : > { %v1023_v53 = vadd.f32 %v1014_v48, %v1001_v37  ;;  %v982_v33 = vadd.f32 %v973_v27, %v960_v54  ;;  %v937_v43 = vmul.f32 %v3690_v51, %v6432_v63  ;;  %v950_v13 = vmul.f32 %v3794_v10, %v6433_v42 }
  0xd1   : > { %v972_v40 = vmul.f32 %v3818_v55, %v6434_v45  ;;  %v1066_v39 = vadd.f32 %v1057_v6, %v1044_v32  ;;  %v1065_v4 = vadd.f32 %v1056_v31, %v1043_v56  ;;  %v1068_v0 = vadd.f32 %v1059_v5, %v1046_v12  ;;  %v6437_v5 = vld [vmem:[#allocation52_spill] sm:$0xff] }
  0xd2   : > { %v1045_v17 = vadd.f32 %v1036_v44, %v1023_v53  ;;  %v1079_v24 = vmul.f32 %v3896_v52, %v6396_v23  ;;  %v1078_v34 = vmul.f32 %v3896_v52, %v6397_v19  ;;  %v1081_v48 = vmul.f32 %v3896_v52, %v6398_v16  ;;  %v6438_v45 = vld [vmem:[#allocation84_spill] sm:$0xff] }
  0xd3   : > { %v1080_v9 = vmul.f32 %v3896_v52, %v6399_v7  ;;  %v1004_v36 = vadd.f32 %v6435_v1, %v982_v33  ;;  %v1039_v56 = vmul.f32 %v3868_v47, %v6436_v59  ;;  %v959_v12 = vadd.f32 %v950_v13, %v937_v43 }
  0xd4   : > { %v1067_v27 = vadd.f32 %v1058_v20, %v1045_v17  ;;  %v1088_v53 = vadd.f32 %v1079_v24, %v1066_v39  ;;  %v1087_v6 = vadd.f32 %v1078_v34, %v1065_v4  ;;  %v1083_v31 = vmul.f32 %v3896_v52, %v6400_v8  ;;  %v3915_v17 = vpop.permute.xlu1 %1167  ;;  %v6439_v39 = vld [vmem:[#allocation55_spill] sm:$0xff]  ;;  %v6440_v4 = vld [vmem:[#allocation56_spill] sm:$0xff]  ;;  %v6442_v24 = vld [vmem:[#allocation53_spill] sm:$0xff] }
  0xd5   : > { %v1016_v32 = vmul.f32 %v3843_v46, %v6437_v5  ;;  %v1090_v37 = vadd.f32 %v1081_v48, %v1068_v0  ;;  %v1026_v44 = vadd.f32 %v1017_v62, %v1004_v36  ;;  %v981_v54 = vadd.f32 %v972_v40, %v959_v12  ;;  %v6441_v62 = vld [vmem:[#allocation97_spill] sm:$0xff] }
  0xd6   : > { %v1038_v20 = vmul.f32 %v3868_v47, %v6438_v45  ;;  %1107 = vrot.lane.b32.xlu0 %v1088_v53, %s3185_s4  ;;  %1105 = vrot.lane.b32.xlu1 %v1087_v6, %s3185_s4  ;;  %v1089_v33 = vadd.f32 %v1080_v9, %v1067_v27  ;;  %v940_v43 = vmul.f32 %v3690_v51, %v6439_v39  ;;  %v6443_v48 = vld [vmem:[#allocation57_spill] sm:$0xff]  ;;  %v6444_v9 = vld [vmem:[#allocation59_spill] sm:$0xff] }
  0xd7   : > { %v953_v13 = vmul.f32 %v3794_v10, %v6440_v4  ;;  %v1048_v0 = vadd.f32 %v1039_v56, %v1026_v44  ;;  %v1003_v40 = vadd.f32 %v6441_v62, %v981_v54  ;;  %v1060_v34 = vmul.f32 %v3831_v14, %v6442_v24  ;;  %v6445_v44 = vld [vmem:[#allocation63_spill] sm:$0xff]  ;;  %v6446_v62 = vld [vmem:[#allocation65_spill] sm:$0xff] }
  0xd8   : > { %v975_v1 = vmul.f32 %v3818_v55, %v6443_v48  ;;  %v1082_v36 = vmul.f32 %v3896_v52, %v6401_v41  ;;  %v1019_v27 = vmul.f32 %v3843_v46, %v6444_v9  ;;  %v1041_v53 = vmul.f32 %v3868_v47, %v3582_v21  ;;  %v6450_v45 = vld [vmem:[#allocation71_spill] sm:$0xff] }
  0xd9   : > { %v962_v12 = vadd.f32 %v953_v13, %v940_v43  ;;  %v1070_v6 = vadd.f32 %v1061_v38, %v1048_v0  ;;  %v1025_v56 = vadd.f32 %v1016_v32, %v1003_v40  ;;  %v939_v54 = vmul.f32 %v3690_v51, %v6445_v44  ;;  %v6447_v13 = vld [vmem:[#allocation66_spill] sm:$0xff]  ;;  %v3944_v21 = vpop.permute.xlu1 %1189 }
  0xda   : > { %v952_v24 = vmul.f32 %v3794_v10, %v6446_v62  ;;  %1111 = vrot.lane.b32.xlu0 %v1090_v37, %s3185_s4  ;;  %1109 = vrot.lane.b32.xlu1 %v1089_v33, %s3185_s4  ;;  %v1063_v43 = vmul.f32 %v3831_v14, %v6403_v49  ;;  %v974_v9 = vmul.f32 %v3818_v55, %v6447_v13  ;;  %v6448_v62 = vld [vmem:[#allocation98_spill] sm:$0xff] }
  0xdb   : > { %v984_v41 = vadd.f32 %v975_v1, %v962_v12  ;;  %v1047_v38 = vadd.f32 %v1038_v20, %v1025_v56  ;;  %v1085_v32 = vmul.f32 %v3896_v52, %v6404_v18  ;;  %v1018_v40 = vmul.f32 %v3843_v46, %v6406_v29  ;;  %v6449_v12 = vld [vmem:[#allocation74_spill] sm:$0xff] }
  0xdc   : > { %v961_v0 = vadd.f32 %v952_v24, %v939_v54  ;;  %v1092_v37 = vadd.f32 %v1083_v31, %v1070_v6  ;;  %v1040_v1 = vmul.f32 %v3868_v47, %v6407_v25  ;;  %v941_v49 = vmul.f32 %v3690_v51, %v6449_v12 }
  0xdd   : > { %v1006_v33 = vadd.f32 %v6448_v62, %v984_v41  ;;  %v1069_v13 = vadd.f32 %v1060_v34, %v1047_v38  ;;  %v954_v20 = vmul.f32 %v3794_v10, %v6450_v45  ;;  %v976_v24 = vmul.f32 %v3818_v55, %v6409_v58  ;;  %v6453_v38 = vld [vmem:[#allocation106_spill] sm:$0xff] }
  0xde   : > { %v983_v44 = vadd.f32 %v974_v9, %v961_v0  ;;  %1115 = vrot.lane.b32.xlu0 %v1092_v37, %s3185_s4  ;;  %v1062_v41 = vmul.f32 %v3831_v14, %v6408_v50  ;;  %v1084_v31 = vmul.f32 %v3896_v52, %v6410_v11  ;;  %v1020_v51 = vmul.f32 %v3843_v46, %v6411_v22  ;;  %v6451_v9 = vld [vmem:[#allocation99_spill] sm:$0xff]  ;;  %v3969_v55 = vpop.permute.xlu1 %1233  ;;  %v3977_v46 = vpop.permute.xlu0 %1277 }
  0xdf   : > { %v1028_v56 = vadd.f32 %v1019_v27, %v1006_v33  ;;  %v1091_v34 = vadd.f32 %v1082_v36, %v1069_v13  ;;  %v963_v54 = vadd.f32 %v954_v20, %v941_v49  ;;  %v1042_v10 = vmul.f32 %v3868_v47, %v6412_v2  ;;  %v6452_v27 = vld [vmem:[#allocation22_spill] sm:$0xff] }
  0xe0   : > { %v1005_v6 = vadd.f32 %v6451_v9, %v983_v44  ;;  %v1158_v0 = vmul.f32 %v6453_v38, %v6452_v27  ;;  %v1171_v37 = vmul.f32 %v3915_v17, %v6413_v30  ;;  %v1193_v33 = vmul.f32 %v3944_v21, %v3319_v26  ;;  %v6454_v20 = vld [vmem:[#allocation26_spill] sm:$0xff]  ;;  %v6455_v9 = vld [vmem:[#allocation16_spill] sm:$0xff] }
  0xe1   : > { %v1050_v62 = vadd.f32 %v1041_v53, %v1028_v56  ;;  %1113 = vrot.lane.b32.xlu1 %v1091_v34, %s3185_s4  ;;  %v985_v36 = vadd.f32 %v976_v24, %v963_v54  ;;  %v1064_v47 = vmul.f32 %v3831_v14, %v6414_v61  ;;  %v1086_v53 = vmul.f32 %v3896_v52, %v6415_v57  ;;  %v6456_v30 = vld [vmem:[#allocation100_spill] sm:$0xff]  ;;  %v6457_v24 = vld [vmem:[#allocation17_spill] sm:$0xff] }
  0xe2   : > { %v1027_v49 = vadd.f32 %v1018_v40, %v1005_v6  ;;  %v1180_v13 = vadd.f32 %v1171_v37, %v1158_v0  ;;  %v1157_v56 = vmul.f32 %v6453_v38, %v6454_v20  ;;  %v1170_v26 = vmul.f32 %v3915_v17, %v6455_v9  ;;  %v6458_v37 = vld [vmem:[#allocation27_spill] sm:$0xff] }
  0xe3   : > { %v1072_v44 = vadd.f32 %v1063_v43, %v1050_v62  ;;  %v1007_v2 = vadd.f32 %v6456_v30, %v985_v36  ;;  %v1237_v40 = vmul.f32 %v3969_v55, %v3327_v28  ;;  %v1192_v14 = vmul.f32 %v3944_v21, %v6457_v24  ;;  %v3995_v62 = vpop.permute.xlu1 %1255  ;;  %v6459_v30 = vld [vmem:[#allocation21_spill] sm:$0xff] }
  0xe4   : > { %v1049_v27 = vadd.f32 %v1040_v1, %v1027_v49  ;;  %v1202_v6 = vadd.f32 %v1193_v33, %v1180_v13  ;;  %v1281_v52 = vmul.f32 %v3977_v46, %v6390_v60  ;;  %v1179_v43 = vadd.f32 %v1170_v26, %v1157_v56  ;;  %v6460_v36 = vld [vmem:[#allocation101_spill] sm:$0xff]  ;;  %v6462_v56 = vld [vmem:[#allocation102_spill] sm:$0xff] }
  0xe5   : > { %v1094_v34 = vadd.f32 %v1085_v32, %v1072_v44  ;;  %v1029_v0 = vadd.f32 %v1020_v51, %v1007_v2  ;;  %v1160_v1 = vmul.f32 %v6453_v38, %v6458_v37  ;;  %v1173_v49 = vmul.f32 %v3915_v17, %v6459_v30  ;;  %v6461_v51 = vld [vmem:[#allocation23_spill] sm:$0xff] }
  0xe6   : > { %v1071_v54 = vadd.f32 %v1062_v41, %v1049_v27  ;;  %v1224_v28 = vadd.f32 %v6460_v36, %v1202_v6  ;;  %v1259_v32 = vmul.f32 %v3995_v62, %v3558_v15  ;;  %v1201_v33 = vadd.f32 %v1192_v14, %v1179_v43  ;;  %v6463_v6 = vld [vmem:[#allocation20_spill] sm:$0xff]  ;;  %v6464_v15 = vld [vmem:[#allocation25_spill] sm:$0xff] }
  0xe7   : > { %1119 = vrot.lane.b32.xlu0 %v1094_v34, %s3185_s4  ;;  %v1236_v26 = vmul.f32 %v3969_v55, %v3353_v35  ;;  %v1051_v27 = vadd.f32 %v1042_v10, %v1029_v0  ;;  %v1182_v2 = vadd.f32 %v1173_v49, %v1160_v1  ;;  %v1195_v44 = vmul.f32 %v3944_v21, %v6461_v51  ;;  %v6465_v10 = vld [vmem:[#allocation29_spill] sm:$0xff] }
  0xe8   : > { %v1093_v41 = vadd.f32 %v1084_v31, %v1071_v54  ;;  %v1246_v13 = vadd.f32 %v1237_v40, %v1224_v28  ;;  %v1223_v24 = vadd.f32 %v6462_v56, %v1201_v33  ;;  %v1258_v34 = vmul.f32 %v3995_v62, %v6426_v3  ;;  %v4019_v0 = vpop.permute.xlu1 %1299  ;;  %v6466_v1 = vld [vmem:[#allocation33_spill] sm:$0xff]  ;;  %v6467_v33 = vld [vmem:[#allocation34_spill] sm:$0xff] }
  0xe9   : > { %v1280_v36 = vmul.f32 %v3977_v46, %v6463_v6  ;;  %v1073_v14 = vadd.f32 %v1064_v47, %v1051_v27  ;;  %v1204_v43 = vadd.f32 %v1195_v44, %v1182_v2  ;;  %v1239_v31 = vmul.f32 %v3969_v55, %v6464_v15  ;;  %v6469_v2 = vld [vmem:[#allocation80_spill] sm:$0xff] }
  0xea   : > { %1117 = vrot.lane.b32.xlu1 %v1093_v41, %s3185_s4  ;;  %v1159_v54 = vmul.f32 %v6453_v38, %v6465_v10  ;;  %v1268_v28 = vadd.f32 %v1259_v32, %v1246_v13  ;;  %v1245_v40 = vadd.f32 %v1236_v26, %v1223_v24  ;;  %v1172_v49 = vmul.f32 %v3915_v17, %v6466_v1  ;;  %v6468_v41 = vld [vmem:[#allocation103_spill] sm:$0xff]  ;;  %v6470_v13 = vld [vmem:[#allocation28_spill] sm:$0xff] }
  0xeb   : > { %v1194_v56 = vmul.f32 %v3944_v21, %v6467_v33  ;;  %v1095_v3 = vadd.f32 %v1086_v53, %v1073_v14  ;;  %v1303_v47 = vmul.f32 %v4019_v0, %v6396_v23  ;;  %v1226_v27 = vadd.f32 %v6468_v41, %v1204_v43  ;;  %v6471_v23 = vld [vmem:[#allocation50_spill] sm:$0xff]  ;;  %v6472_v43 = vld [vmem:[#allocation64_spill] sm:$0xff]  ;;  %v6488_v33 = vld [vmem:[#allocation63_spill] sm:$0xff] }
  0xec   : > { %v1261_v44 = vmul.f32 %v3995_v62, %v6469_v2  ;;  %v1290_v6 = vadd.f32 %v1281_v52, %v1268_v28  ;;  %v1267_v15 = vadd.f32 %v1258_v34, %v1245_v40  ;;  %v1302_v24 = vmul.f32 %v4019_v0, %v6397_v19  ;;  %v6473_v34 = vld [vmem:[#allocation37_spill] sm:$0xff] }
  0xed   : > { %v1181_v32 = vadd.f32 %v1172_v49, %v1159_v54  ;;  %v1248_v26 = vadd.f32 %v1239_v31, %v1226_v27  ;;  %v1283_v53 = vmul.f32 %v3977_v46, %v6470_v13  ;;  %v1305_v14 = vmul.f32 %v4019_v0, %v6398_v16  ;;  %v6474_v54 = vld [vmem:[#allocation40_spill] sm:$0xff]  ;;  %v6475_v31 = vld [vmem:[#allocation41_spill] sm:$0xff]  ;;  %v6476_v27 = vld [vmem:[#allocation42_spill] sm:$0xff] }
  0xee   : > { %1121 = vrot.lane.b32.xlu1 %v1095_v3, %s3185_s4  ;;  %v1218_v41 = vmul.f32 %v6472_v43, %v6471_v23  ;;  %v1312_v35 = vadd.f32 %v1303_v47, %v1290_v6  ;;  %v1289_v2 = vadd.f32 %v1280_v36, %v1267_v15  ;;  %v1238_v28 = vmul.f32 %v3969_v55, %v6473_v34  ;;  %v6477_v6 = vld [vmem:[#allocation104_spill] sm:$0xff]  ;;  %v6478_v36 = vld [vmem:[#allocation82_spill] sm:$0xff]  ;;  %v6481_v23 = vld [vmem:[#allocation67_spill] sm:$0xff] }
  0xef   : > { %v1203_v52 = vadd.f32 %v1194_v56, %v1181_v32  ;;  %v1270_v40 = vadd.f32 %v1261_v44, %v1248_v26  ;;  %v1162_v3 = vmul.f32 %v6453_v38, %v6474_v54  ;;  %v1175_v49 = vmul.f32 %v3915_v17, %v6475_v31  ;;  %v6479_v47 = vld [vmem:[#allocation58_spill] sm:$0xff] }
  0xf0   : > { %v1197_v19 = vmul.f32 %v3944_v21, %v6476_v27  ;;  %1331 = vrot.lane.b32.xlu0 %v1312_v35, %s3186_s5  ;;  %v1311_v16 = vadd.f32 %v1302_v24, %v1289_v2  ;;  %v1260_v56 = vmul.f32 %v3995_v62, %v6478_v36  ;;  %v1221_v44 = vmul.f32 %v6472_v43, %v6479_v47  ;;  %v6480_v26 = vld [vmem:[#allocation38_spill] sm:$0xff] }
  0xf1   : > { %v1225_v15 = vadd.f32 %v6477_v6, %v1203_v52  ;;  %v1292_v32 = vadd.f32 %v1283_v53, %v1270_v40  ;;  %v1282_v13 = vmul.f32 %v3977_v46, %v6480_v26  ;;  %v1184_v34 = vadd.f32 %v1175_v49, %v1162_v3  ;;  %v6482_v52 = vld [vmem:[#allocation49_spill] sm:$0xff]  ;;  %v6483_v49 = vld [vmem:[#allocation44_spill] sm:$0xff] }
  0xf2   : > { %v1220_v27 = vmul.f32 %v6472_v43, %v6481_v23  ;;  %1329 = vrot.lane.b32.xlu1 %v1311_v16, %s3186_s5  ;;  %v1161_v2 = vmul.f32 %v6453_v38, %v6432_v63  ;;  %v1174_v24 = vmul.f32 %v3915_v17, %v6433_v42  ;;  %v1196_v6 = vmul.f32 %v3944_v21, %v6482_v52  ;;  %v6485_v26 = vld [vmem:[#allocation105_spill] sm:$0xff] }
  0xf3   : > { %v1247_v35 = vadd.f32 %v1238_v28, %v1225_v15  ;;  %v1314_v53 = vadd.f32 %v1305_v14, %v1292_v32  ;;  %v1304_v40 = vmul.f32 %v4019_v0, %v6399_v7  ;;  %v1206_v3 = vadd.f32 %v1197_v19, %v1184_v34  ;;  %v6484_v28 = vld [vmem:[#allocation45_spill] sm:$0xff] }
  0xf4   : > { %v1241_v36 = vmul.f32 %v3969_v55, %v6483_v49  ;;  %v1263_v16 = vmul.f32 %v3995_v62, %v6436_v59  ;;  %v1285_v15 = vmul.f32 %v3977_v46, %v6484_v28  ;;  %v1183_v47 = vadd.f32 %v1174_v24, %v1161_v2 }
  0xf5   : > { %v1269_v23 = vadd.f32 %v1260_v56, %v1247_v35  ;;  %1335 = vrot.lane.b32.xlu0 %v1314_v53, %s3186_s5  ;;  %v1228_v52 = vadd.f32 %v6485_v26, %v1206_v3  ;;  %v1164_v14 = vmul.f32 %v6453_v38, %v6439_v39  ;;  %v1177_v19 = vmul.f32 %v3915_v17, %v6440_v4  ;;  %v6486_v53 = vld [vmem:[#allocation84_spill] sm:$0xff]  ;;  %v6487_v3 = vld [vmem:[#allocation53_spill] sm:$0xff] }
  0xf6   : > { %v1199_v34 = vmul.f32 %v3944_v21, %v6443_v48  ;;  %v1307_v32 = vmul.f32 %v4019_v0, %v6400_v8  ;;  %v1205_v35 = vadd.f32 %v1196_v6, %v1183_v47  ;;  %v1240_v2 = vmul.f32 %v3969_v55, %v6437_v5  ;;  %v6490_v48 = vld [vmem:[#allocation59_spill] sm:$0xff] }
  0xf7   : > { %v1291_v56 = vadd.f32 %v1282_v13, %v1269_v23  ;;  %v1250_v24 = vadd.f32 %v1241_v36, %v1228_v52  ;;  %v1262_v26 = vmul.f32 %v3995_v62, %v6486_v53  ;;  %v1284_v7 = vmul.f32 %v3977_v46, %v6487_v3  ;;  %v6489_v13 = vld [vmem:[#allocation65_spill] sm:$0xff]  ;;  %v6491_v52 = vld [vmem:[#allocation66_spill] sm:$0xff] }
  0xf8   : > { %v1186_v59 = vadd.f32 %v1177_v19, %v1164_v14  ;;  %v1227_v28 = vadd.f32 %v1218_v41, %v1205_v35  ;;  %v1163_v23 = vmul.f32 %v6453_v38, %v6488_v33  ;;  %v1176_v8 = vmul.f32 %v3915_v17, %v6489_v13  ;;  %v6492_v14 = vld [vmem:[#allocation54_spill] sm:$0xff] }
  0xf9   : > { %v1313_v49 = vadd.f32 %v1304_v40, %v1291_v56  ;;  %v1272_v47 = vadd.f32 %v1263_v16, %v1250_v24  ;;  %v1243_v36 = vmul.f32 %v3969_v55, %v6490_v48  ;;  %v1198_v53 = vmul.f32 %v3944_v21, %v6491_v52  ;;  %v6493_v40 = vld [vmem:[#allocation85_spill] sm:$0xff] }
  0xfa   : > { %v1208_v6 = vadd.f32 %v1199_v34, %v1186_v59  ;;  %v1249_v3 = vadd.f32 %v1240_v2, %v1227_v28  ;;  %v1306_v41 = vmul.f32 %v4019_v0, %v6492_v14  ;;  %v1265_v19 = vmul.f32 %v3995_v62, %v6493_v40 }
  0xfb   : > { %1333 = vrot.lane.b32.xlu1 %v1313_v49, %s3186_s5  ;;  %v1185_v56 = vadd.f32 %v1176_v8, %v1163_v23  ;;  %v1294_v35 = vadd.f32 %v1285_v15, %v1272_v47  ;;  %v1242_v59 = vmul.f32 %v3969_v55, %v6406_v29  ;;  %v1165_v16 = vmul.f32 %v6453_v38, %v6449_v12  ;;  %v6494_v38 = vld [vmem:[#allocation61_spill] sm:$0xff] }
  0xfc   : > { %v1230_v5 = vadd.f32 %v1221_v44, %v1208_v6  ;;  %v1271_v34 = vadd.f32 %v1262_v26, %v1249_v3  ;;  %v1178_v49 = vmul.f32 %v3915_v17, %v6450_v45  ;;  %v1200_v28 = vmul.f32 %v3944_v21, %v6409_v58  ;;  %v6495_v26 = vld [vmem:[#allocation75_spill] sm:$0xff] }
  0xfd   : > { %v1207_v24 = vadd.f32 %v1198_v53, %v1185_v56  ;;  %v1316_v2 = vadd.f32 %v1307_v32, %v1294_v35  ;;  %v1264_v44 = vmul.f32 %v3995_v62, %v6407_v25  ;;  %v1287_v53 = vmul.f32 %v3977_v46, %v6494_v38 }
  0xfe   : > { %v1252_v14 = vadd.f32 %v1243_v36, %v1230_v5  ;;  %v1293_v40 = vadd.f32 %v1284_v7, %v1271_v34  ;;  %v1187_v15 = vadd.f32 %v1178_v49, %v1165_v16  ;;  %v1309_v17 = vmul.f32 %v4019_v0, %v6404_v18 }
  0xff   : > { %v1229_v8 = vadd.f32 %v1220_v27, %v1207_v24  ;;  %1339 = vrot.lane.b32.xlu0 %v1316_v2, %s3186_s5  ;;  %v1222_v21 = vmul.f32 %v6472_v43, %v6495_v26  ;;  %v1244_v27 = vmul.f32 %v3969_v55, %v6411_v22  ;;  %v1286_v47 = vmul.f32 %v3977_v46, %v6408_v50 }
 0x100   : > { %v1274_v23 = vadd.f32 %v1265_v19, %v1252_v14  ;;  %v1315_v32 = vadd.f32 %v1306_v41, %v1293_v40  ;;  %v1209_v7 = vadd.f32 %v1200_v28, %v1187_v15  ;;  %v1308_v36 = vmul.f32 %v4019_v0, %v6410_v11  ;;  %v6496_v19 = vld [vmem:[#allocation88_spill] sm:$0xff] }
 0x101   : > { %v1251_v5 = vadd.f32 %v1242_v59, %v1229_v8  ;;  %v1266_v43 = vmul.f32 %v3995_v62, %v6496_v19  ;;  %v1288_v59 = vmul.f32 %v3977_v46, %v6414_v61  ;;  %v1310_v16 = vmul.f32 %v4019_v0, %v6415_v57  ;;  %v3150_v62 = vld [vmem:[%s5895_s1 + $0x20] sm:$0xff]  ;;  %v1392_v8 = vpop.permute.xlu1 %1391 }
 0x102   : > { %v1296_v3 = vadd.f32 %v1287_v53, %v1274_v23  ;;  %1337 = vrot.lane.b32.xlu1 %v1315_v32, %s3186_s5  ;;  %v1231_v14 = vadd.f32 %v1222_v21, %v1209_v7  ;;  %v6497_v49 = vmov 3   ;;  %v6498_v28 = vmov 4  }
 0x103   : > { %v1273_v6 = vadd.f32 %v1264_v44, %v1251_v5  ;;  %v6499_v46 = vmov 5   ;;  %v6500_v0 = vmov 7   ;;  %v6501_v2 = vmov 1  }
 0x104   : > { %v1318_v41 = vadd.f32 %v1309_v17, %v1296_v3  ;;  %v1253_v56 = vadd.f32 %v1244_v27, %v1231_v14 }
 0x105   : > { %v1295_v40 = vadd.f32 %v1286_v47, %v1273_v6 }
 0x106   : > { %1343 = vrot.lane.b32.xlu0 %v1318_v41, %s3186_s5  ;;  %v1275_v35 = vadd.f32 %v1266_v43, %v1253_v56 }
 0x107   : > { %v1317_v55 = vadd.f32 %v1308_v36, %v1295_v40 }
 0x108   : > { %v1297_v34 = vadd.f32 %v1288_v59, %v1275_v35 }
 0x109   : > { %1341 = vrot.lane.b32.xlu1 %v1317_v55, %s3186_s5 }
 0x10a   : > { %1501 = vperm.xlu0 %3113, %v3150_v62   ;;  %v1319_v24 = vadd.f32 %v1310_v16, %v1297_v34 }
 0x10d   : > { %1345 = vrot.lane.b32.xlu1 %v1319_v24, %s3186_s5 }
 0x10e   : > { %3118 = vset.pattern.permute.xlu0 %v6497_v49 }
 0x10f   : > { %1435 = vperm.xlu0 %3118, %v3150_v62  }
 0x111   : > { %1413 = vperm.xlu1 %3115, %v3150_v62  }
 0x115   : > { %3116 = vset.pattern.permute.xlu1 %v6498_v28 }
 0x116   : > { %1457 = vperm.xlu1 %3116, %v3150_v62  }
 0x11a   : > { %3117 = vset.pattern.permute.xlu1 %v6499_v46 }
 0x11b   : > { %1479 = vperm.xlu1 %3117, %v3150_v62  }
 0x11f   : > { %3119 = vset.pattern.permute.xlu1 %v6500_v0 }
 0x120   : > { %1523 = vperm.xlu1 %3119, %v3150_v62  }
 0x124   : > { %3120 = vset.pattern.permute.xlu1 %v6501_v2 }
 0x12f   : > { %v4142_v44 = vpop.permute.xlu1 %881  ;;  %v4146_v23 = vpop.permute.xlu0 %883 }
 0x130   : > { %6502 = vst [vmem:[#allocation90_spill] sm:$0xff] %v4142_v44  ;;  %6504 = vst [vmem:[#allocation92_spill] sm:$0xff] %v4146_v23 }
 0x133   : > { %v4144_v15 = vpop.permute.xlu1 %885  ;;  %v4150_v17 = vpop.permute.xlu0 %887 }
 0x134   : > { %6503 = vst [vmem:[#allocation91_spill] sm:$0xff] %v4144_v15  ;;  %6506 = vst [vmem:[#allocation94_spill] sm:$0xff] %v4150_v17 }
 0x137   : > { %v4148_v53 = vpop.permute.xlu1 %889  ;;  %v4154_v32 = vpop.permute.xlu0 %891 }
 0x138   : > { %6505 = vst [vmem:[#allocation93_spill] sm:$0xff] %v4148_v53  ;;  %6508 = vst [vmem:[#allocation96_spill] sm:$0xff] %v4154_v32 }
 0x13b   : > { %v4152_v21 = vpop.permute.xlu1 %893  ;;  %v4160_v27 = vpop.permute.xlu0 %895 }
 0x13c   : > { %6507 = vst [vmem:[#allocation95_spill] sm:$0xff] %v4152_v21  ;;  %6511 = vst [vmem:[#allocation99_spill] sm:$0xff] %v4160_v27 }
 0x13f   : > { %v4156_v5 = vpop.permute.xlu1 %897 }
 0x140   : > { %6509 = vst [vmem:[#allocation97_spill] sm:$0xff] %v4156_v5  ;;  %v6528_v5 = vld [vmem:[#allocation10_spill] sm:$0xff] }
 0x148   : > { %v4158_v7 = vpop.permute.xlu1 %1105  ;;  %v4162_v3 = vpop.permute.xlu0 %1107 }
 0x149   : > { %6510 = vst [vmem:[#allocation98_spill] sm:$0xff] %v4158_v7  ;;  %6512 = vst [vmem:[#allocation106_spill] sm:$0xff] %v4162_v3 }
 0x14c   : > { %v4164_v47 = vpop.permute.xlu1 %1109  ;;  %v4166_v6 = vpop.permute.xlu0 %1111 }
 0x14d   : > { %6513 = vst [vmem:[#allocation100_spill] sm:$0xff] %v4164_v47  ;;  %6514 = vst [vmem:[#allocation101_spill] sm:$0xff] %v4166_v6  ;;  %v1400_v6 = vmul.f32 %v1392_v8, %v6489_v13  ;;  %v1402_v47 = vmul.f32 %v1392_v8, %v6450_v45 }
 0x150   : > { %v4170_v14 = vpop.permute.xlu0 %1115 }
 0x151   : > { %6516 = vst [vmem:[#allocation103_spill] sm:$0xff] %v4170_v14 }
 0x153   : > { %v4168_v36 = vpop.permute.xlu1 %1113 }
 0x154   : > { %6515 = vst [vmem:[#allocation102_spill] sm:$0xff] %v4168_v36  ;;  %v1401_v36 = vmul.f32 %v1392_v8, %v6440_v4 }
 0x159   : > { %v4174_v41 = vpop.permute.xlu0 %1119 }
 0x15a   : > { %6518 = vst [vmem:[#allocation104_spill] sm:$0xff] %v4174_v41  ;;  %v1395_v41 = vmul.f32 %v1392_v8, %v6528_v5 }
 0x15c   : > { %v4172_v43 = vpop.permute.xlu1 %1117 }
 0x15d   : > { %6517 = vst [vmem:[#allocation64_spill] sm:$0xff] %v4172_v43  ;;  %v6529_v43 = vld [vmem:[#allocation22_spill] sm:$0xff] }
 0x160   : > { %v4176_v40 = vpop.permute.xlu1 %1121 }
 0x161   : > { %6519 = vst [vmem:[#allocation105_spill] sm:$0xff] %v4176_v40  ;;  %v6530_v40 = vld [vmem:[#allocation107_spill] sm:$0xff] }
 0x162   : > { %v4178_v56 = vpop.permute.xlu0 %1331  ;;  %v1382_v14 = vmul.f32 %v6530_v40, %v6529_v43  ;;  %v1383_v27 = vmul.f32 %v6530_v40, %v6465_v10  ;;  %v1386_v21 = vmul.f32 %v6530_v40, %v6474_v54  ;;  %v1385_v32 = vmul.f32 %v6530_v40, %v6432_v63  ;;  %v6541_v54 = vld [vmem:[#allocation49_spill] sm:$0xff] }
 0x163   : > { %6520 = vst [vmem:[#allocation108_spill] sm:$0xff] %v4178_v56  ;;  %v1388_v17 = vmul.f32 %v6530_v40, %v6439_v39  ;;  %v1387_v15 = vmul.f32 %v6530_v40, %v6488_v33  ;;  %v6532_v33 = vld [vmem:[#allocation12_spill] sm:$0xff] }
 0x164   : > { %v4180_v55 = vpop.permute.xlu1 %1329  ;;  %v1404_v3 = vadd.f32 %v1395_v41, %v1382_v14 }
 0x165   : > { %6521 = vst [vmem:[#allocation109_spill] sm:$0xff] %v4180_v55  ;;  %v1381_v55 = vmul.f32 %v6530_v40, %v6454_v20 }
 0x167   : > { %v4182_v35 = vpop.permute.xlu0 %1335 }
 0x168   : > { %6522 = vst [vmem:[#allocation110_spill] sm:$0xff] %v4182_v35  ;;  %v1394_v35 = vmul.f32 %v1392_v8, %v6455_v9 }
 0x16a   : > { %v1403_v53 = vadd.f32 %v1394_v35, %v1381_v55  ;;  %v1410_v55 = vadd.f32 %v1401_v36, %v1388_v17  ;;  %v1409_v35 = vadd.f32 %v1400_v6, %v1387_v15  ;;  %v6537_v15 = vld [vmem:[#allocation17_spill] sm:$0xff]  ;;  %v6538_v36 = vld [vmem:[#allocation34_spill] sm:$0xff] }
 0x16d   : > { %v4184_v59 = vpop.permute.xlu1 %1333 }
 0x16e   : > { %6523 = vst [vmem:[#allocation111_spill] sm:$0xff] %v4184_v59  ;;  %v1384_v59 = vmul.f32 %v6530_v40, %v6458_v37  ;;  %v6542_v37 = vld [vmem:[#allocation50_spill] sm:$0xff] }
 0x171   : > { %v4186_v16 = vpop.permute.xlu0 %1339 }
 0x172   : > { %6524 = vst [vmem:[#allocation112_spill] sm:$0xff] %v4186_v16  ;;  %v1397_v16 = vmul.f32 %v1392_v8, %v6459_v30 }
 0x174   : > { %v4188_v34 = vpop.permute.xlu1 %1337  ;;  %v1406_v41 = vadd.f32 %v1397_v16, %v1384_v59  ;;  %v6534_v59 = vld [vmem:[#allocation24_spill] sm:$0xff]  ;;  %v6536_v16 = vld [vmem:[#allocation11_spill] sm:$0xff] }
 0x175   : > { %6525 = vst [vmem:[#allocation113_spill] sm:$0xff] %v4188_v34  ;;  %v1396_v34 = vmul.f32 %v1392_v8, %v6466_v1 }
 0x178   : > { %v4190_v62 = vpop.permute.xlu0 %1343 }
 0x179   : > { %6526 = vst [vmem:[#allocation114_spill] sm:$0xff] %v4190_v62  ;;  %v1399_v62 = vmul.f32 %v1392_v8, %v6475_v31  ;;  %v6543_v31 = vld [vmem:[#allocation57_spill] sm:$0xff] }
 0x17b   : > { %v4192_v24 = vpop.permute.xlu1 %1341  ;;  %v1408_v44 = vadd.f32 %v1399_v62, %v1386_v21  ;;  %v6539_v62 = vld [vmem:[#allocation42_spill] sm:$0xff] }
 0x17c   : > { %6527 = vst [vmem:[#allocation115_spill] sm:$0xff] %v4192_v24  ;;  %v1398_v24 = vmul.f32 %v1392_v8, %v6433_v42  ;;  %v1389_v8 = vmul.f32 %v6530_v40, %v6449_v12  ;;  %v6533_v40 = vld [vmem:[#allocation18_spill] sm:$0xff] }
 0x17e   : > { %v1407_v23 = vadd.f32 %v1398_v24, %v1385_v32  ;;  %v4231_v45 = vadd.f32 %v1402_v47, %v1389_v8  ;;  %v6535_v32 = vld [vmem:[#allocation36_spill] sm:$0xff]  ;;  %v6540_v8 = vld [vmem:[#allocation43_spill] sm:$0xff] }
 0x17f   : > { %v4211_v7 = vpop.permute.xlu1 %1345 }
 0x180   : > { %6531 = vst [vmem:[#allocation107_spill] sm:$0xff] %v4211_v7  ;;  %v1405_v7 = vadd.f32 %v1396_v34, %v1383_v27 }
 0x185   : > { %v4200_v56 = vpop.permute.xlu0 %1501 }
 0x186   : > { %v4229_v49 = vmul.f32 %v4200_v56, %v6390_v60 }
 0x18a   : > { %v4225_v14 = vpop.permute.xlu0 %1435 }
 0x18b   : > { %v1439_v39 = vmul.f32 %v4225_v14, %v6532_v33  ;;  %v1438_v12 = vmul.f32 %v4225_v14, %v6533_v40  ;;  %v1441_v21 = vmul.f32 %v4225_v14, %v6534_v59  ;;  %v1440_v27 = vmul.f32 %v4225_v14, %v6535_v32  ;;  %v6560_v59 = vld [vmem:[#allocation83_spill] sm:$0xff] }
 0x18c   : > { %v4233_v13 = vpop.permute.xlu1 %1413  ;;  %v1443_v63 = vmul.f32 %v4225_v14, %v6540_v8  ;;  %v1442_v20 = vmul.f32 %v4225_v14, %v6542_v37  ;;  %v6544_v8 = vld [vmem:[#allocation13_spill] sm:$0xff] }
 0x18d   : > { %v1417_v17 = vmul.f32 %v4233_v13, %v6536_v16  ;;  %v1416_v47 = vmul.f32 %v4233_v13, %v6537_v15  ;;  %v1419_v6 = vmul.f32 %v4233_v13, %v6461_v51  ;;  %v1418_v34 = vmul.f32 %v4233_v13, %v6538_v36 }
 0x18e   : > { %v1421_v24 = vmul.f32 %v4233_v13, %v6539_v62  ;;  %v1420_v10 = vmul.f32 %v4233_v13, %v6541_v54  ;;  %v1423_v36 = vmul.f32 %v4233_v13, %v6543_v31  ;;  %v1422_v62 = vmul.f32 %v4233_v13, %v6491_v52 }
 0x18f   : > { %v1426_v43 = vadd.f32 %v1417_v17, %v1404_v3  ;;  %v1425_v15 = vadd.f32 %v1416_v47, %v1403_v53  ;;  %v1428_v16 = vadd.f32 %v1419_v6, %v1406_v41  ;;  %v1427_v4 = vadd.f32 %v1418_v34, %v1405_v7  ;;  %v6545_v53 = vld [vmem:[#allocation19_spill] sm:$0xff]  ;;  %v6548_v17 = vld [vmem:[#allocation20_spill] sm:$0xff] }
 0x190   : > { %v1430_v51 = vadd.f32 %v1421_v24, %v1408_v44  ;;  %v1429_v42 = vadd.f32 %v1420_v10, %v1407_v23  ;;  %v6546_v44 = vld [vmem:[#allocation25_spill] sm:$0xff]  ;;  %v1504_v47 = vmul.f32 %v4200_v56, %v6548_v17  ;;  %v6549_v6 = vld [vmem:[#allocation28_spill] sm:$0xff]  ;;  %v1432_v34 = vadd.f32 %v1423_v36, %v1410_v55  ;;  %v6553_v24 = vld [vmem:[#allocation58_spill] sm:$0xff] }
 0x191   : > { %v4263_v1 = vpop.permute.xlu1 %1457  ;;  %v1448_v30 = vadd.f32 %v1439_v39, %v1426_v43  ;;  %v1447_v9 = vadd.f32 %v1438_v12, %v1425_v15  ;;  %v1450_v54 = vadd.f32 %v1441_v21, %v1428_v16  ;;  %v1449_v60 = vadd.f32 %v1440_v27, %v1427_v4  ;;  %v6547_v23 = vld [vmem:[#allocation37_spill] sm:$0xff]  ;;  %v6550_v12 = vld [vmem:[#allocation38_spill] sm:$0xff]  ;;  %v6552_v16 = vld [vmem:[#allocation44_spill] sm:$0xff] }
 0x192   : > { %v1461_v3 = vmul.f32 %v4263_v1, %v6544_v8  ;;  %v1460_v7 = vmul.f32 %v4263_v1, %v6545_v53  ;;  %v1463_v10 = vmul.f32 %v4263_v1, %v6546_v44  ;;  %v1462_v41 = vmul.f32 %v4263_v1, %v6547_v23  ;;  %v6551_v43 = vld [vmem:[#allocation45_spill] sm:$0xff]  ;;  %v6554_v44 = vld [vmem:[#allocation52_spill] sm:$0xff] }
 0x193   : > { %v1507_v39 = vmul.f32 %v4200_v56, %v6549_v6  ;;  %v1506_v4 = vmul.f32 %v4200_v56, %v6550_v12  ;;  %v1509_v21 = vmul.f32 %v4200_v56, %v6551_v43  ;;  %v1452_v27 = vadd.f32 %v1443_v63, %v1430_v51  ;;  %v6555_v6 = vld [vmem:[#allocation67_spill] sm:$0xff]  ;;  %v6556_v51 = vld [vmem:[#allocation78_spill] sm:$0xff]  ;;  %v6558_v36 = vld [vmem:[#allocation80_spill] sm:$0xff] }
 0x194   : > { %v1465_v15 = vmul.f32 %v4263_v1, %v6552_v16  ;;  %v1445_v52 = vmul.f32 %v4225_v14, %v6553_v24  ;;  %v1451_v23 = vadd.f32 %v1442_v20, %v1429_v42  ;;  %v1464_v53 = vmul.f32 %v4263_v1, %v6554_v44  ;;  %v6557_v16 = vld [vmem:[#allocation79_spill] sm:$0xff]  ;;  %v6559_v24 = vld [vmem:[#allocation82_spill] sm:$0xff] }
 0x195   : > { %v1431_v8 = vadd.f32 %v1422_v62, %v1409_v35  ;;  %v1444_v31 = vmul.f32 %v4225_v14, %v6555_v6  ;;  %v1470_v17 = vadd.f32 %v1461_v3, %v1448_v30  ;;  %v1469_v37 = vadd.f32 %v1460_v7, %v1447_v9 }
 0x196   : > { %v1480_v12 = vpop.permute.xlu1 %1479  ;;  %v1472_v43 = vadd.f32 %v1463_v10, %v1450_v54  ;;  %v1471_v63 = vadd.f32 %v1462_v41, %v1449_v60  ;;  %v1474_v20 = vadd.f32 %v1465_v15, %v1452_v27  ;;  %v1454_v35 = vadd.f32 %v1445_v52, %v1432_v34  ;;  %v6561_v54 = vld [vmem:[#allocation84_spill] sm:$0xff]  ;;  %v6562_v52 = vld [vmem:[#allocation85_spill] sm:$0xff] }
 0x197   : > { %v1483_v32 = vmul.f32 %v1480_v12, %v6556_v51  ;;  %v1482_v55 = vmul.f32 %v1480_v12, %v6557_v16  ;;  %v1485_v5 = vmul.f32 %v1480_v12, %v6558_v36  ;;  %v1484_v42 = vmul.f32 %v1480_v12, %v6559_v24  ;;  %v6563_v24 = vld [vmem:[#allocation31_spill] sm:$0xff] }
 0x198   : > { %v1487_v44 = vmul.f32 %v1480_v12, %v6560_v59  ;;  %v1467_v62 = vmul.f32 %v4263_v1, %v6490_v48  ;;  %v1486_v60 = vmul.f32 %v1480_v12, %v6561_v54  ;;  %v1473_v7 = vadd.f32 %v1464_v53, %v1451_v23  ;;  %v6565_v53 = vld [vmem:[#allocation35_spill] sm:$0xff] }
 0x199   : > { %v1492_v6 = vadd.f32 %v1483_v32, %v1470_v17  ;;  %v1491_v30 = vadd.f32 %v1482_v55, %v1469_v37  ;;  %v1494_v9 = vadd.f32 %v1485_v5, %v1472_v43  ;;  %v1493_v3 = vadd.f32 %v1484_v42, %v1471_v63  ;;  %v6564_v32 = vld [vmem:[#allocation32_spill] sm:$0xff]  ;;  %v6567_v42 = vld [vmem:[#allocation53_spill] sm:$0xff] }
 0x19a   : > { %v1453_v10 = vadd.f32 %v1444_v31, %v1431_v8  ;;  %v1466_v41 = vmul.f32 %v4263_v1, %v6406_v29  ;;  %v1496_v59 = vadd.f32 %v1487_v44, %v1474_v20  ;;  %v1489_v34 = vmul.f32 %v1480_v12, %v6562_v52 }
 0x19b   : > { %v1524_v36 = vpop.permute.xlu1 %1523  ;;  %v1514_v27 = vadd.f32 %v4229_v49, %v1492_v6  ;;  %v1513_v15 = vadd.f32 %v1504_v47, %v1491_v30  ;;  %v1424_v5 = vmul.f32 %v4233_v13, %v6409_v58  ;;  %v1446_v31 = vmul.f32 %v4225_v14, %v6495_v26  ;;  %v6566_v6 = vld [vmem:[#allocation39_spill] sm:$0xff]  ;;  %v6568_v13 = vld [vmem:[#allocation46_spill] sm:$0xff] }
 0x19c   : > { %v1527_v48 = vmul.f32 %v1524_v36, %v6563_v24  ;;  %v1526_v37 = vmul.f32 %v1524_v36, %v6564_v32  ;;  %v1516_v8 = vadd.f32 %v1507_v39, %v1494_v9  ;;  %v1529_v23 = vmul.f32 %v1524_v36, %v6565_v53 }
 0x19d   : > { %v1495_v17 = vadd.f32 %v1486_v60, %v1473_v7  ;;  %v1476_v43 = vadd.f32 %v1467_v62, %v1454_v35  ;;  %v1515_v44 = vadd.f32 %v1506_v4, %v1493_v3  ;;  %v1528_v63 = vmul.f32 %v1524_v36, %v6566_v6  ;;  %v6569_v62 = vld [vmem:[#allocation54_spill] sm:$0xff] }
 0x19e   : > { %v1536_v49 = vadd.f32 %v1527_v48, %v1514_v27  ;;  %v1535_v47 = vadd.f32 %v1526_v37, %v1513_v15  ;;  %v1518_v55 = vadd.f32 %v1509_v21, %v1496_v59  ;;  %v1508_v20 = vmul.f32 %v4200_v56, %v6567_v42 }
 0x19f   : > { %v1498_v30 = vadd.f32 %v1489_v34, %v1476_v43  ;;  %v1475_v29 = vadd.f32 %v1466_v41, %v1453_v10  ;;  %v1531_v14 = vmul.f32 %v1524_v36, %v6568_v13  ;;  %v1488_v39 = vmul.f32 %v1480_v12, %v6407_v25  ;;  %v3042_v43 = vld [vmem:[%s5895_s1 + $0x28] sm:$0xff] }
 0x1a0   : > { %1555 = vrot.lane.b32.xlu0 %v1536_v49, %s3187_s8  ;;  %1553 = vrot.lane.b32.xlu1 %v1535_v47, %s3187_s8  ;;  %v1433_v48 = vadd.f32 %v1424_v5, %v4231_v45  ;;  %v1538_v4 = vadd.f32 %v1529_v23, %v1516_v8  ;;  %v1517_v35 = vadd.f32 %v1508_v20, %v1495_v17  ;;  %v6570_v47 = vmov 6  }
 0x1a1   : > { %v1530_v59 = vmul.f32 %v1524_v36, %v6569_v62  ;;  %v1468_v21 = vmul.f32 %v4263_v1, %v6411_v22  ;;  %v1537_v9 = vadd.f32 %v1528_v63, %v1515_v44  ;;  %v1497_v60 = vadd.f32 %v1488_v39, %v1475_v29 }
 0x1a2   : > { %v1455_v3 = vadd.f32 %v1446_v31, %v1433_v48  ;;  %v1490_v7 = vmul.f32 %v1480_v12, %v6496_v19  ;;  %v1511_v10 = vmul.f32 %v4200_v56, %v6494_v38  ;;  %v1510_v45 = vmul.f32 %v4200_v56, %v6408_v50  ;;  %v6609_v19 = vld [vmem:[#allocation13_spill] sm:$0xff] }
 0x1a3   : > { %v1540_v27 = vadd.f32 %v1531_v14, %v1518_v55  ;;  %v1539_v15 = vadd.f32 %v1530_v59, %v1517_v35  ;;  %v1533_v1 = vmul.f32 %v1524_v36, %v6404_v18  ;;  %v1532_v37 = vmul.f32 %v1524_v36, %v6410_v11  ;;  %v6608_v11 = vld [vmem:[#allocation57_spill] sm:$0xff] }
 0x1a4   : > { %1559 = vrot.lane.b32.xlu0 %v1538_v4, %s3187_s8  ;;  %1557 = vrot.lane.b32.xlu1 %v1537_v9, %s3187_s8  ;;  %v1477_v41 = vadd.f32 %v1468_v21, %v1455_v3  ;;  %v1520_v34 = vadd.f32 %v1511_v10, %v1498_v30  ;;  %v1519_v29 = vadd.f32 %v1510_v45, %v1497_v60  ;;  %v6572_v44 = vmov 0  }
 0x1a5   : > { %v1512_v5 = vmul.f32 %v4200_v56, %v6414_v61  ;;  %v1534_v17 = vmul.f32 %v1524_v36, %v6415_v57  ;;  %v6571_v56 = vmov 2   ;;  %v6607_v61 = vld [vmem:[#allocation55_spill] sm:$0xff] }
 0x1a6   : > { %v1499_v12 = vadd.f32 %v1490_v7, %v1477_v41  ;;  %v1542_v31 = vadd.f32 %v1533_v1, %v1520_v34  ;;  %v1541_v8 = vadd.f32 %v1532_v37, %v1519_v29  ;;  %v6582_v34 = vld [vmem:[#allocation24_spill] sm:$0xff]  ;;  %v6583_v29 = vld [vmem:[#allocation10_spill] sm:$0xff] }
 0x1a8   : > { %1563 = vrot.lane.b32.xlu0 %v1540_v27, %s3187_s8  ;;  %1561 = vrot.lane.b32.xlu1 %v1539_v15, %s3187_s8  ;;  %v1521_v23 = vadd.f32 %v1512_v5, %v1499_v12  ;;  %v6584_v12 = vld [vmem:[#allocation36_spill] sm:$0xff] }
 0x1aa   : > { %v1543_v49 = vadd.f32 %v1534_v17, %v1521_v23  ;;  %v6586_v23 = vld [vmem:[#allocation50_spill] sm:$0xff] }
 0x1ac   : > { %1567 = vrot.lane.b32.xlu0 %v1542_v31, %s3187_s8  ;;  %1565 = vrot.lane.b32.xlu1 %v1541_v8, %s3187_s8  ;;  %v6585_v31 = vld [vmem:[#allocation43_spill] sm:$0xff] }
 0x1b0   : > { %1659 = vperm.xlu0 %3118, %v3042_v43   ;;  %1569 = vrot.lane.b32.xlu1 %v1543_v49, %s3187_s8 }
 0x1b4   : > { %3124 = vset.pattern.permute.xlu0 %v6570_v47  ;;  %1615 = vperm.xlu1 %3120, %v3042_v43   ;;  %v6604_v47 = vld [vmem:[#allocation42_spill] sm:$0xff] }
 0x1b5   : > { %1725 = vperm.xlu0 %3124, %v3042_v43  }
 0x1b8   : > { %3121 = vset.pattern.permute.xlu1 %v6571_v56 }
 0x1b9   : > { %3125 = vset.pattern.permute.xlu0 %v6572_v44  ;;  %1637 = vperm.xlu1 %3121, %v3042_v43  }
 0x1ba   : > { %1602 = vperm.xlu0 %3125, %v3042_v43  }
 0x1bd   : > { %3122 = vset.pattern.permute.xlu1 %v6498_v28 }
 0x1be   : > { %1681 = vperm.xlu1 %3122, %v3042_v43  }
 0x1c2   : > { %3123 = vset.pattern.permute.xlu1 %v6499_v46  ;;  %v6606_v46 = vld [vmem:[#allocation49_spill] sm:$0xff] }
 0x1c3   : > { %1703 = vperm.xlu1 %3123, %v3042_v43  }
 0x1c7   : > { %3126 = vset.pattern.permute.xlu1 %v6500_v0  ;;  %v6603_v0 = vld [vmem:[#allocation40_spill] sm:$0xff] }
 0x1c8   : > { %1747 = vperm.xlu1 %3126, %v3042_v43   ;;  %v6587_v43 = vld [vmem:[#allocation14_spill] sm:$0xff] }
 0x1cc   : > { %3127 = vset.pattern.permute.xlu1 %v6501_v2  ;;  %v6605_v2 = vld [vmem:[#allocation47_spill] sm:$0xff] }
 0x212   : > { %v1556_v36 = vpop.permute.xlu0 %1555  ;;  %v1554_v63 = vpop.permute.xlu1 %1553 }
 0x213   : > { %v4347_v55 = vsel %vm1571_vm0, %v1554_v63, %v1556_v36 }
 0x214   : > { %6573 = vst [vmem:[#allocation31_spill] sm:$0xff] %v4347_v55 }
 0x216   : > { %v1560_v20 = vpop.permute.xlu0 %1559  ;;  %v1558_v30 = vpop.permute.xlu1 %1557 }
 0x217   : > { %v4350_v14 = vsel %vm1571_vm0, %v1556_v36, %v1558_v30  ;;  %v4353_v39 = vsel %vm1571_vm0, %v1558_v30, %v1560_v20  ;;  %v6588_v36 = vld [vmem:[#allocation16_spill] sm:$0xff] }
 0x218   : > { %6574 = vst [vmem:[#allocation32_spill] sm:$0xff] %v4350_v14  ;;  %6575 = vst [vmem:[#allocation35_spill] sm:$0xff] %v4353_v39  ;;  %v6594_v39 = vld [vmem:[#allocation56_spill] sm:$0xff] }
 0x21a   : > { %v1564_v48 = vpop.permute.xlu0 %1563  ;;  %v1562_v4 = vpop.permute.xlu1 %1561 }
 0x21b   : > { %v4356_v35 = vsel %vm1571_vm0, %v1560_v20, %v1562_v4  ;;  %v4359_v59 = vsel %vm1571_vm0, %v1562_v4, %v1564_v48  ;;  %v6589_v20 = vld [vmem:[#allocation21_spill] sm:$0xff] }
 0x21c   : > { %6576 = vst [vmem:[#allocation39_spill] sm:$0xff] %v4356_v35  ;;  %6577 = vst [vmem:[#allocation53_spill] sm:$0xff] %v4359_v59  ;;  %v6593_v59 = vld [vmem:[#allocation48_spill] sm:$0xff] }
 0x21e   : > { %v4361_v21 = vpop.permute.xlu0 %1567  ;;  %v1566_v9 = vpop.permute.xlu1 %1565 }
 0x21f   : > { %6578 = vst [vmem:[#allocation46_spill] sm:$0xff] %v4361_v21  ;;  %v4364_v60 = vsel %vm1571_vm0, %v1564_v48, %v1566_v9  ;;  %v4368_v3 = vsel %vm1571_vm0, %v1566_v9, %v4361_v21  ;;  %v6590_v48 = vld [vmem:[#allocation33_spill] sm:$0xff]  ;;  %v6591_v21 = vld [vmem:[#allocation20_spill] sm:$0xff] }
 0x220   : > { %6579 = vst [vmem:[#allocation54_spill] sm:$0xff] %v4364_v60  ;;  %6580 = vst [vmem:[#allocation116_spill] sm:$0xff] %v4368_v3  ;;  %v6592_v3 = vld [vmem:[#allocation41_spill] sm:$0xff] }
 0x222   : > { %v4370_v7 = vpop.permute.xlu1 %1569 }
 0x223   : > { %6581 = vst [vmem:[#allocation117_spill] sm:$0xff] %v4370_v7 }
 0x22b   : > { %v4372_v10 = vpop.permute.xlu0 %1659 }
 0x22c   : > { %v1663_v27 = vmul.f32 %v4372_v10, %v6532_v33  ;;  %v1662_v15 = vmul.f32 %v4372_v10, %v6533_v40  ;;  %v1665_v1 = vmul.f32 %v4372_v10, %v6582_v34  ;;  %v1664_v5 = vmul.f32 %v4372_v10, %v6584_v12  ;;  %v6597_v12 = vld [vmem:[#allocation23_spill] sm:$0xff]  ;;  %v6598_v33 = vld [vmem:[#allocation34_spill] sm:$0xff] }
 0x22d   : > { %v1667_v8 = vmul.f32 %v4372_v10, %v6585_v31  ;;  %v4392_v17 = vmul.f32 %v4372_v10, %v6586_v23  ;;  %v6596_v23 = vld [vmem:[#allocation17_spill] sm:$0xff] }
 0x22f   : > { %v4374_v45 = vpop.permute.xlu1 %1615 }
 0x230   : > { %v4376_v41 = vpop.permute.xlu0 %1725  ;;  %v1619_v37 = vmul.f32 %v4374_v45, %v6583_v29  ;;  %v1618_v63 = vmul.f32 %v4374_v45, %v6588_v36  ;;  %v1621_v30 = vmul.f32 %v4374_v45, %v6589_v20  ;;  %v1620_v4 = vmul.f32 %v4374_v45, %v6590_v48  ;;  %v6600_v20 = vld [vmem:[#allocation26_spill] sm:$0xff]  ;;  %v6601_v48 = vld [vmem:[#allocation27_spill] sm:$0xff]  ;;  %v6602_v36 = vld [vmem:[#allocation29_spill] sm:$0xff] }
 0x231   : > { %v4396_v49 = vmul.f32 %v4376_v41, %v6587_v43  ;;  %v4408_v7 = vmul.f32 %v4376_v41, %v6591_v21  ;;  %v1623_v60 = vmul.f32 %v4374_v45, %v6592_v3  ;;  %v1622_v35 = vmul.f32 %v4374_v45, %v6593_v59  ;;  %v6595_v43 = vld [vmem:[#allocation11_spill] sm:$0xff]  ;;  %v6599_v3 = vld [vmem:[#allocation22_spill] sm:$0xff] }
 0x232   : > { %v1625_v14 = vmul.f32 %v4374_v45, %v6594_v39 }
 0x234   : > { %v4404_v9 = vpop.permute.xlu1 %1637 }
 0x235   : > { %v4416_v55 = vpop.permute.xlu0 %1602  ;;  %v1641_v31 = vmul.f32 %v4404_v9, %v6595_v43  ;;  %v1640_v34 = vmul.f32 %v4404_v9, %v6596_v23  ;;  %v1643_v21 = vmul.f32 %v4404_v9, %v6597_v12  ;;  %v1642_v40 = vmul.f32 %v4404_v9, %v6598_v33 }
 0x236   : > { %v1606_v59 = vmul.f32 %v4416_v55, %v6599_v3  ;;  %v1605_v39 = vmul.f32 %v4416_v55, %v6600_v20  ;;  %v1608_v29 = vmul.f32 %v4416_v55, %v6601_v48  ;;  %v1607_v43 = vmul.f32 %v4416_v55, %v6602_v36 }
 0x237   : > { %v1610_v23 = vmul.f32 %v4416_v55, %v6603_v0  ;;  %v1645_v12 = vmul.f32 %v4404_v9, %v6604_v47  ;;  %v1609_v33 = vmul.f32 %v4416_v55, %v6605_v2  ;;  %v1644_v3 = vmul.f32 %v4404_v9, %v6606_v46  ;;  %v6610_v46 = vld [vmem:[#allocation19_spill] sm:$0xff] }
 0x238   : > { %v1628_v44 = vadd.f32 %v1619_v37, %v1606_v59  ;;  %v1627_v20 = vadd.f32 %v1618_v63, %v1605_v39  ;;  %v1630_v28 = vadd.f32 %v1621_v30, %v1608_v29  ;;  %v1629_v56 = vadd.f32 %v1620_v4, %v1607_v43  ;;  %v6611_v29 = vld [vmem:[#allocation25_spill] sm:$0xff]  ;;  %v6613_v30 = vld [vmem:[#allocation44_spill] sm:$0xff] }
 0x239   : > { %v4442_v48 = vpop.permute.xlu1 %1681  ;;  %v1632_v57 = vadd.f32 %v1623_v60, %v1610_v23  ;;  %v1631_v36 = vadd.f32 %v1622_v35, %v1609_v33  ;;  %v1612_v0 = vmul.f32 %v4416_v55, %v6607_v61  ;;  %v1647_v47 = vmul.f32 %v4404_v9, %v6608_v11  ;;  %v6612_v33 = vld [vmem:[#allocation37_spill] sm:$0xff] }
 0x23a   : > { %v1650_v50 = vadd.f32 %v1641_v31, %v1628_v44  ;;  %v1685_v2 = vmul.f32 %v4442_v48, %v6609_v19  ;;  %v1649_v22 = vadd.f32 %v1640_v34, %v1627_v20  ;;  %v1684_v39 = vmul.f32 %v4442_v48, %v6610_v46  ;;  %v6614_v20 = vld [vmem:[#allocation52_spill] sm:$0xff] }
 0x23b   : > { %v1652_v59 = vadd.f32 %v1643_v21, %v1630_v28  ;;  %v1687_v37 = vmul.f32 %v4442_v48, %v6611_v29  ;;  %v1651_v60 = vadd.f32 %v1642_v40, %v1629_v56  ;;  %v1686_v35 = vmul.f32 %v4442_v48, %v6612_v33 }
 0x23c   : > { %v1672_v23 = vadd.f32 %v1663_v27, %v1650_v50  ;;  %v1671_v43 = vadd.f32 %v1662_v15, %v1649_v22  ;;  %v1654_v63 = vadd.f32 %v1645_v12, %v1632_v57  ;;  %v1689_v44 = vmul.f32 %v4442_v48, %v6613_v30  ;;  %v6615_v27 = vld [vmem:[#allocation80_spill] sm:$0xff] }
 0x23d   : > { %v1674_v31 = vadd.f32 %v1665_v1, %v1652_v59  ;;  %v1673_v4 = vadd.f32 %v1664_v5, %v1651_v60  ;;  %v1653_v34 = vadd.f32 %v1644_v3, %v1631_v36  ;;  %v1688_v19 = vmul.f32 %v4442_v48, %v6614_v20  ;;  %v6616_v1 = vld [vmem:[#allocation82_spill] sm:$0xff]  ;;  %v6617_v36 = vld [vmem:[#allocation83_spill] sm:$0xff]  ;;  %v6618_v59 = vld [vmem:[#allocation28_spill] sm:$0xff] }
 0x23e   : > { %v4460_v28 = vpop.permute.xlu1 %1703  ;;  %v1694_v21 = vadd.f32 %v1685_v2, %v1672_v23  ;;  %v1693_v29 = vadd.f32 %v1684_v39, %v1671_v43  ;;  %v1676_v40 = vadd.f32 %v1667_v8, %v1654_v63  ;;  %v1634_v56 = vadd.f32 %v1625_v14, %v1612_v0  ;;  %v6619_v23 = vld [vmem:[#allocation38_spill] sm:$0xff] }
 0x23f   : > { %v1707_v50 = vmul.f32 %v4460_v28, %v6556_v51  ;;  %v1706_v22 = vmul.f32 %v4460_v28, %v6557_v16  ;;  %v1696_v57 = vadd.f32 %v1687_v37, %v1674_v31  ;;  %v1709_v15 = vmul.f32 %v4460_v28, %v6615_v27  ;;  %v6673_v16 = vld [vmem:[#allocation51_spill] sm:$0xff] }
 0x240   : > { %v1695_v3 = vadd.f32 %v1686_v35, %v1673_v4  ;;  %v1708_v12 = vmul.f32 %v4460_v28, %v6616_v1  ;;  %v1698_v5 = vadd.f32 %v1689_v44, %v1676_v40  ;;  %v1711_v2 = vmul.f32 %v4460_v28, %v6617_v36  ;;  %v6620_v40 = vld [vmem:[#allocation58_spill] sm:$0xff] }
 0x241   : > { %v1716_v8 = vadd.f32 %v1707_v50, %v1694_v21  ;;  %v1715_v0 = vadd.f32 %v1706_v22, %v1693_v29  ;;  %v1718_v14 = vadd.f32 %v1709_v15, %v1696_v57  ;;  %v1675_v39 = vadd.f32 %v4392_v17, %v1653_v34 }
 0x242   : > { %v1731_v60 = vmul.f32 %v4376_v41, %v6618_v59  ;;  %v1717_v37 = vadd.f32 %v1708_v12, %v1695_v3  ;;  %v1730_v43 = vmul.f32 %v4376_v41, %v6619_v23  ;;  %v1710_v35 = vmul.f32 %v4460_v28, %v6561_v54 }
 0x243   : > { %v4479_v63 = vpop.permute.xlu1 %1747  ;;  %v1738_v44 = vadd.f32 %v4396_v49, %v1716_v8  ;;  %v1737_v31 = vadd.f32 %v4408_v7, %v1715_v0  ;;  %v1697_v29 = vadd.f32 %v1688_v19, %v1675_v39  ;;  %v1656_v4 = vadd.f32 %v1647_v47, %v1634_v56  ;;  %v6621_v49 = vld [vmem:[#allocation45_spill] sm:$0xff]  ;;  %v6623_v0 = vld [vmem:[#allocation71_spill] sm:$0xff] }
 0x244   : > { %v1751_v17 = vmul.f32 %v4479_v63, %v6563_v24  ;;  %v1750_v34 = vmul.f32 %v4479_v63, %v6564_v32  ;;  %v1720_v21 = vadd.f32 %v1711_v2, %v1698_v5  ;;  %v1669_v50 = vmul.f32 %v4372_v10, %v6620_v40  ;;  %v6622_v2 = vld [vmem:[#allocation65_spill] sm:$0xff] }
 0x245   : > { %v1740_v22 = vadd.f32 %v1731_v60, %v1718_v14  ;;  %v1753_v57 = vmul.f32 %v4479_v63, %v6565_v53  ;;  %v1739_v15 = vadd.f32 %v1730_v43, %v1717_v37  ;;  %v1733_v7 = vmul.f32 %v4376_v41, %v6621_v49  ;;  %v6624_v60 = vld [vmem:[#allocation59_spill] sm:$0xff] }
 0x246   : > { %v1760_v19 = vadd.f32 %v1751_v17, %v1738_v44  ;;  %v1759_v47 = vadd.f32 %v1750_v34, %v1737_v31  ;;  %v1752_v56 = vmul.f32 %v4479_v63, %v6566_v6  ;;  %v1719_v3 = vadd.f32 %v1710_v35, %v1697_v29 }
 0x247   : > { %v1732_v12 = vmul.f32 %v4376_v41, %v6567_v42  ;;  %v1678_v5 = vadd.f32 %v1669_v50, %v1656_v4  ;;  %v1624_v8 = vmul.f32 %v4374_v45, %v6622_v2  ;;  %v1626_v14 = vmul.f32 %v4374_v45, %v6623_v0  ;;  %v6625_v45 = vld [vmem:[#allocation63_spill] sm:$0xff] }
 0x248   : > { %1779 = vrot.lane.b32.xlu0 %v1760_v19, %s3188_s11  ;;  %1777 = vrot.lane.b32.xlu1 %v1759_v47, %s3188_s11  ;;  %v1742_v39 = vadd.f32 %v1733_v7, %v1720_v21  ;;  %v1691_v37 = vmul.f32 %v4442_v48, %v6624_v60  ;;  %v1713_v43 = vmul.f32 %v4460_v28, %v6562_v52  ;;  %v6626_v21 = vld [vmem:[#allocation74_spill] sm:$0xff]  ;;  %v6666_v52 = vld [vmem:[#allocation36_spill] sm:$0xff] }
 0x249   : > { %v1762_v35 = vadd.f32 %v1753_v57, %v1740_v22  ;;  %v1755_v44 = vmul.f32 %v4479_v63, %v6568_v13  ;;  %v1754_v31 = vmul.f32 %v4479_v63, %v6569_v62  ;;  %v1611_v29 = vmul.f32 %v4416_v55, %v6625_v45  ;;  %v6627_v22 = vld [vmem:[#allocation66_spill] sm:$0xff] }
 0x24a   : > { %v1761_v4 = vadd.f32 %v1752_v56, %v1739_v15  ;;  %v1741_v17 = vadd.f32 %v1732_v12, %v1719_v3  ;;  %v1700_v34 = vadd.f32 %v1691_v37, %v1678_v5  ;;  %v1613_v50 = vmul.f32 %v4416_v55, %v6626_v21  ;;  %v6628_v12 = vld [vmem:[#allocation67_spill] sm:$0xff]  ;;  %v6665_v21 = vld [vmem:[#allocation56_spill] sm:$0xff] }
 0x24b   : > { %v1735_v7 = vmul.f32 %v4376_v41, %v6494_v38  ;;  %v1633_v19 = vadd.f32 %v1624_v8, %v1611_v29  ;;  %v1646_v57 = vmul.f32 %v4404_v9, %v6627_v22  ;;  %v1648_v15 = vmul.f32 %v4404_v9, %v6409_v58  ;;  %v6664_v58 = vld [vmem:[#allocation12_spill] sm:$0xff] }
 0x24c   : > { %1783 = vrot.lane.b32.xlu0 %v1762_v35, %s3188_s11  ;;  %1781 = vrot.lane.b32.xlu1 %v1761_v4, %s3188_s11  ;;  %v1722_v47 = vadd.f32 %v1713_v43, %v1700_v34  ;;  %v1635_v0 = vadd.f32 %v1626_v14, %v1613_v50  ;;  %v1764_v56 = vadd.f32 %v1755_v44, %v1742_v39  ;;  %v6629_v43 = vld [vmem:[#allocation68_spill] sm:$0xff] }
 0x24d   : > { %v1655_v3 = vadd.f32 %v1646_v57, %v1633_v19  ;;  %v1668_v55 = vmul.f32 %v4372_v10, %v6628_v12  ;;  %v1670_v5 = vmul.f32 %v4372_v10, %v6495_v26  ;;  %v1763_v8 = vadd.f32 %v1754_v31, %v1741_v17  ;;  %v6630_v44 = vld [vmem:[#allocation76_spill] sm:$0xff]  ;;  %v6632_v19 = vld [vmem:[#allocation69_spill] sm:$0xff]  ;;  %v6663_v26 = vld [vmem:[#allocation18_spill] sm:$0xff] }
 0x24e   : > { %v1744_v37 = vadd.f32 %v1735_v7, %v1722_v47  ;;  %v1757_v35 = vmul.f32 %v4479_v63, %v6404_v18  ;;  %v1657_v29 = vadd.f32 %v1648_v15, %v1635_v0  ;;  %v1690_v14 = vmul.f32 %v4442_v48, %v6629_v43  ;;  %v6631_v31 = vld [vmem:[#allocation88_spill] sm:$0xff]  ;;  %v6633_v47 = vld [vmem:[#allocation70_spill] sm:$0xff] }
 0x24f   : > { %v1677_v4 = vadd.f32 %v1668_v55, %v1655_v3  ;;  %v1712_v9 = vmul.f32 %v4460_v28, %v6407_v25  ;;  %v1692_v10 = vmul.f32 %v4442_v48, %v6630_v44  ;;  %v1714_v17 = vmul.f32 %v4460_v28, %v6631_v31  ;;  %v3043_v48 = vld [vmem:[%s5895_s1 + $0x30] sm:$0xff]  ;;  %v6634_v55 = vld [vmem:[#allocation77_spill] sm:$0xff]  ;;  %v6667_v25 = vld [vmem:[#allocation27_spill] sm:$0xff] }
 0x250   : > { %1787 = vrot.lane.b32.xlu0 %v1764_v56, %s3188_s11  ;;  %1785 = vrot.lane.b32.xlu1 %v1763_v8, %s3188_s11  ;;  %v1679_v39 = vadd.f32 %v1670_v5, %v1657_v29  ;;  %v1766_v0 = vadd.f32 %v1757_v35, %v1744_v37  ;;  %v1734_v57 = vmul.f32 %v4376_v41, %v6632_v19  ;;  %v6635_v37 = vld [vmem:[#allocation81_spill] sm:$0xff] }
 0x251   : > { %v1699_v34 = vadd.f32 %v1690_v14, %v1677_v4  ;;  %v1756_v15 = vmul.f32 %v4479_v63, %v6633_v47  ;;  %v1736_v28 = vmul.f32 %v4376_v41, %v6634_v55  ;;  %v1758_v35 = vmul.f32 %v4479_v63, %v6635_v37  ;;  %v3044_v14 = vld [vmem:[%s5895_s1 + $0x38] sm:$0xff]  ;;  %v6658_v37 = vld [vmem:[#allocation86_spill] sm:$0xff] }
 0x252   : > { %v1701_v50 = vadd.f32 %v1692_v10, %v1679_v39  ;;  %v6636_v4 = vmov 3   ;;  %v6637_v41 = vmov 2   ;;  %v6638_v63 = vmov 4   ;;  %v3151_v10 = vld [vmem:[%s5895_s1] sm:$0xff] }
 0x253   : > { %v1721_v7 = vadd.f32 %v1712_v9, %v1699_v34  ;;  %v6639_v9 = vmov 0   ;;  %v6640_v39 = vmov 5   ;;  %v3045_v34 = vld [vmem:[%s5895_s1 + $0x40] sm:$0xff] }
 0x254   : > { %1791 = vrot.lane.b32.xlu0 %v1766_v0, %s3188_s11  ;;  %v1723_v56 = vadd.f32 %v1714_v17, %v1701_v50  ;;  %v6641_v17 = vmov 1   ;;  %v6642_v0 = vmov 6   ;;  %v6643_v50 = vmov 7  }
 0x255   : > { %v1743_v3 = vadd.f32 %v1734_v57, %v1721_v7  ;;  %v6644_v7 = vld [vmem:[#allocation9_spill] sm:$0xff]  ;;  %v6645_v57 = vld [vmem:[#allocation16_spill] sm:$0xff] }
 0x256   : > { %v1745_v8 = vadd.f32 %v1736_v28, %v1723_v56  ;;  %v6646_v56 = vld [vmem:[#allocation8_spill] sm:$0xff]  ;;  %v6648_v28 = vld [vmem:[#allocation10_spill] sm:$0xff] }
 0x257   : > { %v1765_v5 = vadd.f32 %v1756_v15, %v1743_v3  ;;  %v327_v15 = vmul.f32 %v6645_v57, %v6644_v7  ;;  %v6647_v3 = vld [vmem:[#allocation17_spill] sm:$0xff] }
 0x258   : > { %1836 = vperm.xlu0 %3125, %v3043_v48   ;;  %v1767_v29 = vadd.f32 %v1758_v35, %v1745_v8  ;;  %v6649_v8 = vld [vmem:[#allocation33_spill] sm:$0xff] }
 0x259   : > { %1789 = vrot.lane.b32.xlu1 %v1765_v5, %s3188_s11  ;;  %v328_v5 = vmul.f32 %v6648_v28, %v6644_v7  ;;  %v329_v35 = vmul.f32 %v6649_v8, %v6644_v7  ;;  %v333_v8 = vmul.f32 %v6622_v2, %v6644_v7 }
 0x25c   : > { %3129 = vset.pattern.permute.xlu0 %v6636_v4 }
 0x25d   : > { %1793 = vrot.lane.b32.xlu1 %v1767_v29, %s3188_s11  ;;  %2018 = vperm.xlu0 %3129, %v3043_v48   ;;  %v6650_v29 = vld [vmem:[#allocation11_spill] sm:$0xff] }
 0x261   : > { %1890 = vperm.xlu1 %3127, %v3043_v48   ;;  %3132 = vset.pattern.permute.xlu0 %v6637_v41 }
 0x262   : > { %2437 = vperm.xlu0 %3132, %v3044_v14  }
 0x265   : > { %3128 = vset.pattern.permute.xlu1 %v6637_v41 }
 0x266   : > { %1954 = vperm.xlu1 %3128, %v3043_v48   ;;  %3135 = vset.pattern.permute.xlu0 %v6638_v63 }
 0x267   : > { %2082 = vperm.xlu0 %3135, %v3043_v48  }
 0x26a   : > { %3130 = vset.pattern.permute.xlu1 %v6639_v9 }
 0x26b   : > { %2399 = vperm.xlu1 %3130, %v3044_v14   ;;  %3136 = vset.pattern.permute.xlu0 %v6640_v39 }
 0x26c   : > { %520 = vperm.xlu0 %3136, %v3151_v10   ;;  %v6653_v10 = vld [vmem:[#allocation48_spill] sm:$0xff] }
 0x26f   : > { %3131 = vset.pattern.permute.xlu1 %v6641_v17 }
 0x270   : > { %2413 = vperm.xlu1 %3131, %v3044_v14   ;;  %2146 = vperm.xlu0 %3136, %v3043_v48  }
 0x274   : > { %3133 = vset.pattern.permute.xlu1 %v6639_v9  ;;  %3141 = vset.pattern.permute.xlu0 %v6642_v0 }
 0x275   : > { %2642 = vperm.xlu1 %3133, %v3045_v34   ;;  %2210 = vperm.xlu0 %3141, %v3043_v48  }
 0x279   : > { %3134 = vset.pattern.permute.xlu1 %v6641_v17  ;;  %3144 = vset.pattern.permute.xlu0 %v6643_v50  ;;  %v331_v17 = vmul.f32 %v6653_v10, %v6644_v7  ;;  %v6655_v50 = vld [vmem:[#allocation49_spill] sm:$0xff]  ;;  %v6660_v10 = vld [vmem:[#allocation22_spill] sm:$0xff] }
 0x27a   : > { %2656 = vperm.xlu1 %3134, %v3045_v34   ;;  %2274 = vperm.xlu0 %3144, %v3043_v48   ;;  %v385_v48 = vmul.f32 %v6647_v3, %v6646_v56  ;;  %v389_v57 = vmul.f32 %v6655_v50, %v6646_v56  ;;  %v6656_v3 = vld [vmem:[#allocation41_spill] sm:$0xff]  ;;  %v279_v31 = vmul.f32 %v6660_v10, %v6658_v37 }
 0x27b   : > { %v332_v28 = vmul.f32 %v6656_v3, %v6644_v7  ;;  %v391_v50 = vmul.f32 %v6627_v22, %v6646_v56  ;;  %v6662_v3 = vld [vmem:[#allocation30_spill] sm:$0xff]  ;;  %v392_v10 = vmul.f32 %v6608_v11, %v6646_v56  ;;  %v281_v22 = vmul.f32 %v6667_v25, %v6658_v37 }
 0x27c   : > { %v443_v2 = vmul.f32 %v6663_v26, %v6662_v3  ;;  %v6669_v26 = vld [vmem:[#allocation24_spill] sm:$0xff]  ;;  %v284_v11 = vmul.f32 %v6625_v45, %v6658_v37  ;;  %v337_v25 = vadd.f32 %v328_v5, %v279_v31  ;;  %v449_v45 = vmul.f32 %v6628_v12, %v6662_v3  ;;  %v6675_v31 = vld [vmem:[#allocation25_spill] sm:$0xff] }
 0x27d   : > { %v446_v54 = vmul.f32 %v6669_v26, %v6662_v3  ;;  %v501_v26 = vmul.f32 %v6610_v46, %v6673_v16  ;;  %v506_v46 = vmul.f32 %v6613_v30, %v6673_v16  ;;  %v507_v12 = vmul.f32 %v6629_v43, %v6673_v16 }
 0x27e   : > { %3137 = vset.pattern.permute.xlu1 %v6636_v4  ;;  %2557 = vperm.xlu0 %3144, %v3044_v14   ;;  %v342_v5 = vadd.f32 %v333_v8, %v284_v11 }
 0x27f   : > { %2461 = vperm.xlu1 %3137, %v3044_v14  }
 0x282   : > { %2800 = vperm.xlu0 %3144, %v3045_v34  }
 0x283   : > { %3138 = vset.pattern.permute.xlu1 %v6637_v41 }
 0x284   : > { %2680 = vperm.xlu1 %3138, %v3045_v34  }
 0x286   : > { %3149 = vset.pattern.permute.xlu0 %v6639_v9 }
 0x288   : > { %3139 = vset.pattern.permute.xlu1 %v6638_v63 }
 0x289   : > { %2485 = vperm.xlu1 %3139, %v3044_v14  }
 0x28d   : > { %3140 = vset.pattern.permute.xlu1 %v6636_v4  ;;  %v386_v4 = vmul.f32 %v6650_v29, %v6646_v56  ;;  %v6657_v29 = vld [vmem:[#allocation42_spill] sm:$0xff] }
 0x28e   : > { %2704 = vperm.xlu1 %3140, %v3045_v34  }
 0x292   : > { %3142 = vset.pattern.permute.xlu1 %v6640_v39 }
 0x293   : > { %2509 = vperm.xlu1 %3142, %v3044_v14  }
 0x297   : > { %3143 = vset.pattern.permute.xlu1 %v6638_v63  ;;  %v6652_v63 = vld [vmem:[#allocation21_spill] sm:$0xff] }
 0x298   : > { %2728 = vperm.xlu1 %3143, %v3045_v34  }
 0x29c   : > { %3145 = vset.pattern.permute.xlu1 %v6642_v0 }
 0x29d   : > { %2533 = vperm.xlu1 %3145, %v3044_v14   ;;  %v6651_v14 = vld [vmem:[#allocation34_spill] sm:$0xff] }
 0x29e   : > { %v387_v41 = vmul.f32 %v6651_v14, %v6646_v56  ;;  %v390_v14 = vmul.f32 %v6657_v29, %v6646_v56  ;;  %v444_v29 = vmul.f32 %v6664_v58, %v6662_v3  ;;  %v6670_v58 = vld [vmem:[#allocation50_spill] sm:$0xff] }
 0x29f   : > { %v447_v27 = vmul.f32 %v6670_v58, %v6662_v3  ;;  %v6674_v58 = vld [vmem:[#allocation13_spill] sm:$0xff] }
 0x2a0   : > { %v502_v18 = vmul.f32 %v6674_v58, %v6673_v16  ;;  %v395_v58 = vadd.f32 %v386_v4, %v337_v25  ;;  %v400_v4 = vadd.f32 %v391_v50, %v342_v5 }
 0x2a1   : > { %3146 = vset.pattern.permute.xlu1 %v6640_v39  ;;  %v330_v39 = vmul.f32 %v6652_v63, %v6644_v7  ;;  %v6659_v63 = vld [vmem:[#allocation26_spill] sm:$0xff] }
 0x2a2   : > { %2752 = vperm.xlu1 %3146, %v3045_v34   ;;  %v278_v55 = vmul.f32 %v6659_v63, %v6658_v37  ;;  %v334_v63 = vmul.f32 %v6665_v21, %v6644_v7  ;;  %v6671_v21 = vld [vmem:[#allocation40_spill] sm:$0xff] }
 0x2a3   : > { %v283_v7 = vmul.f32 %v6671_v21, %v6658_v37  ;;  %v503_v21 = vmul.f32 %v6612_v33, %v6673_v16  ;;  %v339_v38 = vadd.f32 %v330_v39, %v281_v22  ;;  %v6676_v39 = vld [vmem:[#allocation73_spill] sm:$0xff]  ;;  %v6679_v22 = vld [vmem:[#allocation14_spill] sm:$0xff] }
 0x2a4   : > { %v4674_v30 = vmul.f32 %v6618_v59, %v6676_v39  ;;  %v4678_v43 = vmul.f32 %v6567_v42, %v6676_v39  ;;  %v453_v59 = vadd.f32 %v444_v29, %v395_v58 }
 0x2a6   : > { %3147 = vset.pattern.permute.xlu1 %v6642_v0  ;;  %6682 = vst [vmem:[#allocation37_spill] sm:$0xff] %v4674_v30  ;;  %6683 = vst [vmem:[#allocation44_spill] sm:$0xff] %v4678_v43 }
 0x2a7   : > { %2776 = vperm.xlu1 %3147, %v3045_v34   ;;  %v6654_v34 = vld [vmem:[#allocation23_spill] sm:$0xff] }
 0x2a8   : > { %v388_v0 = vmul.f32 %v6654_v34, %v6646_v56  ;;  %v6661_v34 = vld [vmem:[#allocation29_spill] sm:$0xff]  ;;  %v336_v56 = vadd.f32 %v327_v15, %v278_v55  ;;  %v505_v55 = vmul.f32 %v6614_v20, %v6673_v16  ;;  %v341_v15 = vadd.f32 %v332_v28, %v283_v7 }
 0x2a9   : > { %v280_v44 = vmul.f32 %v6661_v34, %v6658_v37  ;;  %v445_v34 = vmul.f32 %v6666_v52, %v6662_v3  ;;  %v285_v52 = vmul.f32 %v6607_v61, %v6658_v37  ;;  %v4670_v20 = vmul.f32 %v6619_v23, %v6676_v39 }
 0x2aa   : > { %v4686_v23 = vmul.f32 %v6632_v19, %v6676_v39  ;;  %v508_v19 = vmul.f32 %v6624_v60, %v6673_v16 }
 0x2ab   : > { %3148 = vset.pattern.permute.xlu1 %v6639_v9  ;;  %v6668_v9 = vld [vmem:[#allocation47_spill] sm:$0xff]  ;;  %v338_v1 = vadd.f32 %v329_v35, %v280_v44  ;;  %v504_v44 = vmul.f32 %v6675_v31, %v6673_v16  ;;  %v343_v35 = vadd.f32 %v334_v63, %v285_v52  ;;  %v4666_v31 = vmul.f32 %v6679_v22, %v6676_v39  ;;  %v6700_v52 = vld [vmem:[#allocation61_spill] sm:$0xff] }
 0x2ac   : > { %v282_v36 = vmul.f32 %v6668_v9, %v6658_v37  ;;  %v6672_v9 = vld [vmem:[#allocation43_spill] sm:$0xff]  ;;  %6681 = vst [vmem:[#allocation19_spill] sm:$0xff] %v4670_v20  ;;  %6685 = vst [vmem:[#allocation28_spill] sm:$0xff] %v4686_v23  ;;  %v6758_v37 = vld [vmem:[#allocation5_spill] sm:$0xff] }
 0x2ad   : > { %v448_v51 = vmul.f32 %v6672_v9, %v6662_v3  ;;  %v394_v9 = vadd.f32 %v385_v48, %v336_v56  ;;  %v396_v33 = vadd.f32 %v387_v41, %v338_v1  ;;  %6680 = vst [vmem:[#allocation57_spill] sm:$0xff] %v4666_v31  ;;  %v397_v1 = vadd.f32 %v388_v0, %v339_v38  ;;  %v6686_v0 = vld [vmem:[#allocation89_spill] sm:$0xff]  ;;  %v1828_v31 = vld [vmem:[%s3283_s29 + $0x30] sm:$0xff] }
 0x2ae   : > { %v340_v61 = vadd.f32 %v331_v17, %v282_v36  ;;  %v6677_v36 = vld [vmem:[#allocation20_spill] sm:$0xff]  ;;  %v4682_v56 = vmul.f32 %v6621_v49, %v6676_v39  ;;  %v399_v48 = vadd.f32 %v390_v14, %v341_v15  ;;  %v401_v41 = vadd.f32 %v392_v10, %v343_v35  ;;  %v6712_v15 = vld [vmem:[#allocation94_spill] sm:$0xff] }
 0x2af   : > { %v4662_v17 = vmul.f32 %v6677_v36, %v6676_v39  ;;  %v452_v28 = vadd.f32 %v443_v2, %v394_v9  ;;  %v454_v8 = vadd.f32 %v445_v34, %v396_v33  ;;  %v450_v38 = vmul.f32 %v6620_v40, %v6662_v3  ;;  %v6716_v33 = vld [vmem:[#allocation96_spill] sm:$0xff]  ;;  %v6718_v36 = vld [vmem:[#allocation95_spill] sm:$0xff] }
 0x2b0   : > { %v398_v7 = vadd.f32 %v389_v57, %v340_v61  ;;  %6684 = vst [vmem:[#allocation52_spill] sm:$0xff] %v4682_v56  ;;  %v4692_v42 = vmul.f32 %v6564_v32, %v6686_v0  ;;  %v4696_v49 = vmul.f32 %v6563_v24, %v6686_v0  ;;  %v4700_v57 = vmul.f32 %v6566_v6, %v6686_v0  ;;  %v6708_v61 = vld [vmem:[#allocation90_spill] sm:$0xff] }
 0x2b1   : > { %6678 = vst [vmem:[#allocation55_spill] sm:$0xff] %v4662_v17  ;;  %v455_v14 = vadd.f32 %v446_v54, %v397_v1  ;;  %v457_v40 = vadd.f32 %v448_v51, %v399_v48  ;;  %v458_v2 = vadd.f32 %v449_v45, %v400_v4  ;;  %v459_v32 = vadd.f32 %v450_v38, %v401_v41  ;;  %v6707_v45 = vld [vmem:[#allocation92_spill] sm:$0xff]  ;;  %v6722_v48 = vld [vmem:[#allocation99_spill] sm:$0xff]  ;;  %v6724_v41 = vld [vmem:[#allocation106_spill] sm:$0xff] }
 0x2b2   : > { %6687 = vst [vmem:[#allocation38_spill] sm:$0xff] %v4692_v42  ;;  %6688 = vst [vmem:[#allocation58_spill] sm:$0xff] %v4696_v49  ;;  %v456_v50 = vadd.f32 %v447_v27, %v398_v7  ;;  %v4704_v24 = vadd.f32 %v501_v26, %v452_v28  ;;  %v4706_v10 = vadd.f32 %v502_v18, %v453_v59  ;;  %v6725_v28 = vld [vmem:[#allocation98_spill] sm:$0xff] }
 0x2b3   : > { %6689 = vst [vmem:[#allocation45_spill] sm:$0xff] %v4700_v57  ;;  %v4708_v6 = vadd.f32 %v503_v21, %v454_v8  ;;  %v4715_v54 = vmul.f32 %v6565_v53, %v6686_v0  ;;  %v4719_v51 = vmul.f32 %v6569_v62, %v6686_v0  ;;  %v4723_v27 = vmul.f32 %v6568_v13, %v6686_v0  ;;  %v6705_v13 = vld [vmem:[#allocation62_spill] sm:$0xff]  ;;  %v6727_v8 = vld [vmem:[#allocation100_spill] sm:$0xff] }
 0x2b4   : > { %6690 = vst [vmem:[#allocation65_spill] sm:$0xff] %v4704_v24  ;;  %6691 = vst [vmem:[#allocation59_spill] sm:$0xff] %v4706_v10  ;;  %v4725_v60 = vadd.f32 %v504_v44, %v455_v14  ;;  %v4727_v18 = vadd.f32 %v505_v55, %v456_v50  ;;  %v4731_v11 = vmul.f32 %v6633_v47, %v6686_v0  ;;  %v6710_v44 = vld [vmem:[#allocation91_spill] sm:$0xff] }
 0x2b5   : > { %6692 = vst [vmem:[#allocation63_spill] sm:$0xff] %v4708_v6  ;;  %6694 = vst [vmem:[#allocation67_spill] sm:$0xff] %v4715_v54  ;;  %v4735_v53 = vmul.f32 %v6700_v52, %v6676_v39  ;;  %v4737_v25 = vadd.f32 %v506_v46, %v457_v40  ;;  %v4739_v62 = vadd.f32 %v507_v12, %v458_v2  ;;  %v6714_v46 = vld [vmem:[#allocation93_spill] sm:$0xff]  ;;  %v1823_v50 = vld [vmem:[%s3283_s29 + $0x8] sm:$0xff] }
 0x2b6   : > { %6695 = vst [vmem:[#allocation68_spill] sm:$0xff] %v4719_v51  ;;  %6696 = vst [vmem:[#allocation69_spill] sm:$0xff] %v4723_v27  ;;  %v4741_v26 = vadd.f32 %v508_v19, %v459_v32  ;;  %v4745_v21 = vmul.f32 %v6705_v13, %v6686_v0  ;;  %v4750_v47 = vsel %vm899_vm1, %v6708_v61, %v6707_v45  ;;  %v6729_v19 = vld [vmem:[#allocation101_spill] sm:$0xff]  ;;  %v6731_v40 = vld [vmem:[#allocation102_spill] sm:$0xff] }
 0x2b7   : > { %6697 = vst [vmem:[#allocation70_spill] sm:$0xff] %v4725_v60  ;;  %6698 = vst [vmem:[#allocation16_spill] sm:$0xff] %v4727_v18  ;;  %v4755_v55 = vsel %vm899_vm1, %v6707_v45, %v6710_v44  ;;  %v4760_v5 = vsel %vm899_vm1, %v6710_v44, %v6712_v15  ;;  %v4765_v35 = vsel %vm899_vm1, %v6712_v15, %v6714_v46  ;;  %v6733_v32 = vld [vmem:[#allocation103_spill] sm:$0xff]  ;;  %v6737_v13 = vld [vmem:[#allocation108_spill] sm:$0xff] }
 0x2b8   : > { %6699 = vst [vmem:[#allocation17_spill] sm:$0xff] %v4731_v11  ;;  %6701 = vst [vmem:[#allocation10_spill] sm:$0xff] %v4735_v53  ;;  %v4770_v12 = vsel %vm899_vm1, %v6714_v46, %v6716_v33  ;;  %v4775_v22 = vsel %vm899_vm1, %v6716_v33, %v6718_v36  ;;  %v4786_v4 = vsel %vm899_vm1, %v6718_v36, %v6722_v48  ;;  %v6738_v45 = vld [vmem:[#allocation109_spill] sm:$0xff]  ;;  %v6740_v44 = vld [vmem:[#allocation111_spill] sm:$0xff] }
 0x2b9   : > { %6702 = vst [vmem:[#allocation33_spill] sm:$0xff] %v4737_v25  ;;  %6703 = vst [vmem:[#allocation11_spill] sm:$0xff] %v4739_v62  ;;  %v4791_v59 = vsel %vm1123_vm3, %v6725_v28, %v6724_v41  ;;  %v4796_v38 = vsel %vm1123_vm3, %v6724_v41, %v6727_v8  ;;  %v4801_v14 = vsel %vm1123_vm3, %v6727_v8, %v6729_v19  ;;  %v6742_v46 = vld [vmem:[#allocation110_spill] sm:$0xff]  ;;  %v6744_v33 = vld [vmem:[#allocation113_spill] sm:$0xff] }
 0x2ba   : > { %v1780_v29 = vpop.permute.xlu0 %1779  ;;  %v1778_v63 = vpop.permute.xlu1 %1777  ;;  %6704 = vst [vmem:[#allocation34_spill] sm:$0xff] %v4741_v26  ;;  %6706 = vst [vmem:[#allocation21_spill] sm:$0xff] %v4745_v21  ;;  %v4807_v2 = vsel %vm1123_vm3, %v6729_v19, %v6731_v40  ;;  %v4822_v61 = vsel %vm1347_vm4, %v6738_v45, %v6737_v13  ;;  %v4827_v15 = vsel %vm1347_vm4, %v6737_v13, %v6740_v44  ;;  %v6746_v41 = vld [vmem:[#allocation112_spill] sm:$0xff]  ;;  %v6750_v45 = vld [vmem:[#allocation7_spill] sm:$0xff] }
 0x2bb   : > { %v4711_v34 = vsel %vm1795_vm2, %v1778_v63, %v1780_v29  ;;  %6709 = vst [vmem:[#allocation48_spill] sm:$0xff] %v4750_v47  ;;  %6711 = vst [vmem:[#allocation23_spill] sm:$0xff] %v4755_v55  ;;  %v6735_v63 = vld [vmem:[#allocation64_spill] sm:$0xff]  ;;  %v4837_v36 = vsel %vm1347_vm4, %v6742_v46, %v6744_v33  ;;  %v4842_v28 = vsel %vm1347_vm4, %v6744_v33, %v6746_v41  ;;  %v6754_v39 = vld [vmem:[#allocation3_spill] sm:$0xff] }
 0x2bc   : > { %6693 = vst [vmem:[#allocation66_spill] sm:$0xff] %v4711_v34  ;;  %6713 = vst [vmem:[#allocation49_spill] sm:$0xff] %v4760_v5  ;;  %v4817_v52 = vsel %vm1123_vm3, %v6733_v32, %v6735_v63  ;;  %v4858_v16 = vrot.slane %v1823_v50, %v6754_v39  ;;  %v6756_v33 = vld [vmem:[#allocation4_spill] sm:$0xff]  ;;  %v4864_v48 = vrot.slane %v1823_v50, %v6758_v37  ;;  %v6762_v53 = vld [vmem:[#allocation6_spill] sm:$0xff] }
 0x2bd   : > { %6715 = vst [vmem:[#allocation41_spill] sm:$0xff] %v4765_v35  ;;  %6717 = vst [vmem:[#allocation42_spill] sm:$0xff] %v4770_v12  ;;  %v4861_v3 = vrot.slane %v1823_v50, %v6756_v33  ;;  %v6764_v41 = vld [vmem:[#allocation15_spill] sm:$0xff]  ;;  %v1826_v51 = vld [vmem:[%s3283_s29 + $0x20] sm:$0xff] }
 0x2be   : > { %v1784_v9 = vpop.permute.xlu0 %1783  ;;  %v1782_v58 = vpop.permute.xlu1 %1781  ;;  %6719 = vst [vmem:[#allocation26_spill] sm:$0xff] %v4775_v22  ;;  %6723 = vst [vmem:[#allocation18_spill] sm:$0xff] %v4786_v4  ;;  %v4992_v49 = vrot.slane %v1826_v51, %v6754_v39  ;;  %v4995_v42 = vrot.slane %v1826_v51, %v6756_v33  ;;  %v4998_v30 = vrot.slane %v1826_v51, %v6758_v37 }
 0x2bf   : > { %v4778_v1 = vsel %vm1795_vm2, %v1780_v29, %v1782_v58  ;;  %v4781_v7 = vsel %vm1795_vm2, %v1782_v58, %v1784_v9  ;;  %6726 = vst [vmem:[#allocation12_spill] sm:$0xff] %v4791_v59  ;;  %6728 = vst [vmem:[#allocation56_spill] sm:$0xff] %v4796_v38  ;;  %v4812_v29 = vsel %vm1123_vm3, %v6731_v40, %v6733_v32  ;;  %v1822_v40 = vld [vmem:[%s3283_s29] sm:$0xff] }
 0x2c0   : > { %6720 = vst [vmem:[#allocation22_spill] sm:$0xff] %v4778_v1  ;;  %6721 = vst [vmem:[#allocation29_spill] sm:$0xff] %v4781_v7  ;;  %v4832_v58 = vsel %vm1347_vm4, %v6740_v44, %v6742_v46  ;;  %v4852_v44 = vrot.slane %v1823_v50, %v6750_v45  ;;  %v6752_v46 = vld [vmem:[#allocation2_spill] sm:$0xff]  ;;  %v4883_v26 = vrot.slane %v1822_v40, %v6754_v39 }
 0x2c1   : > { %6730 = vst [vmem:[#allocation36_spill] sm:$0xff] %v4801_v14  ;;  %6732 = vst [vmem:[#allocation27_spill] sm:$0xff] %v4807_v2  ;;  %v4855_v0 = vrot.slane %v1823_v50, %v6752_v46  ;;  %v4880_v7 = vrot.slane %v1822_v40, %v6752_v46  ;;  %v4886_v1 = vrot.slane %v1822_v40, %v6756_v33 }
 0x2c2   : > { %6734 = vst [vmem:[#allocation47_spill] sm:$0xff] %v4812_v29  ;;  %6736 = vst [vmem:[#allocation24_spill] sm:$0xff] %v4817_v52  ;;  %v1788_v8 = vpop.permute.xlu0 %1787  ;;  %v1786_v19 = vpop.permute.xlu1 %1785  ;;  %v4874_v52 = vrot.slane %v1823_v50, %v6764_v41  ;;  %v4889_v34 = vrot.slane %v1822_v40, %v6758_v37  ;;  %v4896_v22 = vrot.slane %v1822_v40, %v6762_v53 }
 0x2c3   : > { %6739 = vst [vmem:[#allocation50_spill] sm:$0xff] %v4822_v61  ;;  %6741 = vst [vmem:[#allocation40_spill] sm:$0xff] %v4827_v15  ;;  %v4846_v32 = vsel %vm1795_vm2, %v1784_v9, %v1786_v19  ;;  %v4849_v13 = vsel %vm1795_vm2, %v1786_v19, %v1788_v8  ;;  %v6760_v9 = vld [vmem:[#allocation60_spill] sm:$0xff]  ;;  %v1825_v19 = vld [vmem:[%s3283_s29 + $0x18] sm:$0xff]  ;;  %v5004_v20 = vrot.slane %v1826_v51, %v6762_v53 }
 0x2c4   : > { %6743 = vst [vmem:[#allocation43_spill] sm:$0xff] %v4832_v58  ;;  %6745 = vst [vmem:[#allocation13_spill] sm:$0xff] %v4837_v36  ;;  %v4867_v21 = vrot.slane %v1823_v50, %v6760_v9  ;;  %v4892_v4 = vrot.slane %v1822_v40, %v6760_v9  ;;  %v4902_v63 = vrot.slane %v1825_v19, %v6750_v45 }
 0x2c5   : > { %6747 = vst [vmem:[#allocation25_spill] sm:$0xff] %v4842_v28  ;;  %6748 = vst [vmem:[#allocation20_spill] sm:$0xff] %v4846_v32  ;;  %v4877_v32 = vrot.slane %v1822_v40, %v6750_v45  ;;  %v4899_v28 = vrot.slane %v1822_v40, %v6764_v41  ;;  %v4905_v11 = vrot.slane %v1825_v19, %v6752_v46  ;;  %v1827_v40 = vld [vmem:[%s3283_s29 + $0x28] sm:$0xff] }
 0x2c6   : > { %6749 = vst [vmem:[#allocation14_spill] sm:$0xff] %v4849_v13  ;;  %6751 = vst [vmem:[#allocation61_spill] sm:$0xff] %v4852_v44  ;;  %v4871_v13 = vrot.slane %v1823_v50, %v6762_v53  ;;  %v1824_v50 = vld [vmem:[%s3283_s29 + $0x10] sm:$0xff]  ;;  %v4908_v27 = vrot.slane %v1825_v19, %v6754_v39  ;;  %v4911_v36 = vrot.slane %v1825_v19, %v6756_v33  ;;  %v4920_v15 = vpop.permute.xlu0 %1791 }
 0x2c7   : > { %6753 = vst [vmem:[#allocation62_spill] sm:$0xff] %v4855_v0  ;;  %6755 = vst [vmem:[#allocation92_spill] sm:$0xff] %v4858_v16  ;;  %v4914_v58 = vrot.slane %v1825_v19, %v6758_v37  ;;  %v4917_v29 = vrot.slane %v1825_v19, %v6760_v9  ;;  %v4923_v61 = vrot.slane %v1825_v19, %v6762_v53 }
 0x2c8   : > { %6757 = vst [vmem:[#allocation90_spill] sm:$0xff] %v4861_v3  ;;  %6759 = vst [vmem:[#allocation91_spill] sm:$0xff] %v4864_v48  ;;  %v4926_v23 = vrot.slane %v1825_v19, %v6764_v41  ;;  %v4929_v56 = vrot.slane %v1824_v50, %v6750_v45  ;;  %v4932_v2 = vrot.slane %v1824_v50, %v6752_v46 }
 0x2c9   : > { %6761 = vst [vmem:[#allocation94_spill] sm:$0xff] %v4867_v21  ;;  %6763 = vst [vmem:[#allocation93_spill] sm:$0xff] %v4871_v13  ;;  %v4935_v14 = vrot.slane %v1824_v50, %v6754_v39  ;;  %v4938_v12 = vrot.slane %v1824_v50, %v6756_v33  ;;  %v4941_v38 = vrot.slane %v1824_v50, %v6758_v37 }
 0x2ca   : > { %6765 = vst [vmem:[#allocation96_spill] sm:$0xff] %v4874_v52  ;;  %6766 = vst [vmem:[#allocation95_spill] sm:$0xff] %v4877_v32  ;;  %v4944_v59 = vrot.slane %v1824_v50, %v6760_v9  ;;  %v4947_v62 = vrot.slane %v1824_v50, %v6762_v53  ;;  %v4950_v25 = vrot.slane %v1824_v50, %v6764_v41 }
 0x2cb   : > { %6767 = vst [vmem:[#allocation106_spill] sm:$0xff] %v4880_v7  ;;  %6768 = vst [vmem:[#allocation98_spill] sm:$0xff] %v4883_v26  ;;  %v1790_v19 = vpop.permute.xlu1 %1789  ;;  %v4953_v35 = vrot.slane %v1827_v40, %v6750_v45  ;;  %v4956_v5 = vrot.slane %v1827_v40, %v6752_v46  ;;  %v4967_v54 = vrot.slane %v1827_v40, %v6754_v39 }
 0x2cc   : > { %6769 = vst [vmem:[#allocation100_spill] sm:$0xff] %v4886_v1  ;;  %6770 = vst [vmem:[#allocation101_spill] sm:$0xff] %v4892_v4  ;;  %v4960_v55 = vsel %vm1795_vm2, %v1788_v8, %v1790_v19  ;;  %v4964_v47 = vsel %vm1795_vm2, %v1790_v19, %v4920_v15  ;;  %v4970_v50 = vrot.slane %v1827_v40, %v6756_v33  ;;  %v1829_v19 = vld [vmem:[%s3283_s29 + $0x38] sm:$0xff] }
 0x2cd   : > { %6771 = vst [vmem:[#allocation102_spill] sm:$0xff] %v4896_v22  ;;  %6772 = vst [vmem:[#allocation103_spill] sm:$0xff] %v4899_v28  ;;  %v4973_v57 = vrot.slane %v1827_v40, %v6758_v37  ;;  %v4976_v43 = vrot.slane %v1827_v40, %v6760_v9  ;;  %v4979_v8 = vrot.slane %v1827_v40, %v6762_v53 }
 0x2ce   : > { %6773 = vst [vmem:[#allocation108_spill] sm:$0xff] %v4902_v63  ;;  %6774 = vst [vmem:[#allocation109_spill] sm:$0xff] %v4905_v11  ;;  %v5007_v18 = vrot.slane %v1826_v51, %v6764_v41  ;;  %v5011_v17 = vrot.slane %v1829_v19, %v6750_v45  ;;  %v5014_v60 = vrot.slane %v1829_v19, %v6752_v46 }
 0x2cf   : > { %6775 = vst [vmem:[#allocation111_spill] sm:$0xff] %v4908_v27  ;;  %6776 = vst [vmem:[#allocation110_spill] sm:$0xff] %v4911_v36  ;;  %v5017_v6 = vrot.slane %v1829_v19, %v6754_v39  ;;  %v5020_v10 = vrot.slane %v1829_v19, %v6756_v33  ;;  %v5023_v24 = vrot.slane %v1829_v19, %v6758_v37 }
 0x2d0   : > { %6777 = vst [vmem:[#allocation113_spill] sm:$0xff] %v4914_v58  ;;  %6778 = vst [vmem:[#allocation7_spill] sm:$0xff] %v4917_v29  ;;  %v5039_v28 = vrot.slane %v1828_v31, %v6752_v46  ;;  %v5042_v52 = vrot.slane %v1828_v31, %v6754_v39 }
 0x2d1   : > { %6779 = vst [vmem:[#allocation2_spill] sm:$0xff] %v4920_v15  ;;  %6780 = vst [vmem:[#allocation3_spill] sm:$0xff] %v4923_v61  ;;  %v4986_v15 = vrot.slane %v1826_v51, %v6750_v45 }
 0x2d2   : > { %6781 = vst [vmem:[#allocation4_spill] sm:$0xff] %v4926_v23  ;;  %6782 = vst [vmem:[#allocation5_spill] sm:$0xff] %v4929_v56  ;;  %v5036_v23 = vrot.slane %v1828_v31, %v6750_v45 }
 0x2d3   : > { %6783 = vst [vmem:[#allocation60_spill] sm:$0xff] %v4932_v2  ;;  %6784 = vst [vmem:[#allocation6_spill] sm:$0xff] %v4935_v14  ;;  %v1837_v61 = vpop.permute.xlu0 %1836 }
 0x2d4   : > { %6785 = vst [vmem:[#allocation15_spill] sm:$0xff] %v4938_v12  ;;  %6786 = vst [vmem:[#allocation118_spill] sm:$0xff] %v4941_v38 }
 0x2d5   : > { %6787 = vst [vmem:[#allocation119_spill] sm:$0xff] %v4944_v59  ;;  %6788 = vst [vmem:[#allocation120_spill] sm:$0xff] %v4947_v62  ;;  %v1830_v62 = vld [vmem:[%s3283_s29 + $0x40] sm:$0xff] }
 0x2d6   : > { %6789 = vst [vmem:[#allocation121_spill] sm:$0xff] %v4950_v25  ;;  %6790 = vst [vmem:[#allocation122_spill] sm:$0xff] %v4953_v35  ;;  %v1831_v25 = vld [vmem:[%s3283_s29 + $0x48] sm:$0xff]  ;;  %v5088_v59 = vrot.slane %v1830_v62, %v6752_v46  ;;  %v5091_v29 = vrot.slane %v1830_v62, %v6754_v39  ;;  %v5094_v4 = vrot.slane %v1830_v62, %v6756_v33  ;;  %s3049_s29 = smul.u32 72, %s7104_s12 }
 0x2d7   : > { %6791 = vst [vmem:[#allocation123_spill] sm:$0xff] %v4956_v5  ;;  %6792 = vst [vmem:[#allocation124_spill] sm:$0xff] %v4960_v55  ;;  %v4982_v55 = vrot.slane %v1827_v40, %v6764_v41  ;;  %v5001_v40 = vrot.slane %v1826_v51, %v6760_v9  ;;  %v5061_v22 = vrot.slane %v1831_v25, %v6750_v45 }
 0x2d8   : > { %6793 = vst [vmem:[#allocation125_spill] sm:$0xff] %v4964_v47  ;;  %6794 = vst [vmem:[#allocation126_spill] sm:$0xff] %v4967_v54  ;;  %v4989_v47 = vrot.slane %v1826_v51, %v6752_v46  ;;  %v5026_v51 = vrot.slane %v1829_v19, %v6760_v9  ;;  %v5064_v13 = vrot.slane %v1831_v25, %v6752_v46  ;;  %v5108_v46 = vpop.permute.xlu1 %1793  ;;  %s5836_s4 = scalar_lea.vmem %s5897_s3, %s3049_s29 }
 0x2d9   : > { %6795 = vst [vmem:[#allocation127_spill] sm:$0xff] %v4970_v50  ;;  %6796 = vst [vmem:[#allocation128_spill] sm:$0xff] %v4973_v57 }
 0x2da   : > { %6797 = vst [vmem:[#allocation129_spill] sm:$0xff] %v4976_v43  ;;  %6798 = vst [vmem:[#allocation130_spill] sm:$0xff] %v4979_v8  ;;  %v5048_v8 = vrot.slane %v1828_v31, %v6758_v37  ;;  %v5085_v43 = vrot.slane %v1830_v62, %v6750_v45  ;;  %v5106_v45 = vrot.slane %v1830_v62, %v6764_v41 }
 0x2db   : > { %6799 = vst [vmem:[#allocation131_spill] sm:$0xff] %v4982_v55  ;;  %6800 = vst [vmem:[#allocation132_spill] sm:$0xff] %v4986_v15  ;;  %v5032_v55 = vrot.slane %v1829_v19, %v6764_v41 }
 0x2dc   : > { %6801 = vst [vmem:[#allocation133_spill] sm:$0xff] %v4989_v47  ;;  %6802 = vst [vmem:[#allocation134_spill] sm:$0xff] %v4992_v49 }
 0x2dd   : > { %6803 = vst [vmem:[#allocation135_spill] sm:$0xff] %v4995_v42  ;;  %6804 = vst [vmem:[#allocation136_spill] sm:$0xff] %v4998_v30 }
 0x2de   : > { %6805 = vst [vmem:[#allocation137_spill] sm:$0xff] %v5001_v40  ;;  %6806 = vst [vmem:[#allocation138_spill] sm:$0xff] %v5004_v20  ;;  %v5045_v20 = vrot.slane %v1828_v31, %v6756_v33  ;;  %v5070_v40 = vrot.slane %v1831_v25, %v6756_v33  ;;  %v1879_v33 = vmul.f32 %v4877_v32, %v1837_v61 }
 0x2df   : > { %6807 = vst [vmem:[#allocation139_spill] sm:$0xff] %v5007_v18  ;;  %6808 = vst [vmem:[#allocation140_spill] sm:$0xff] %v5011_v17  ;;  %v5029_v18 = vrot.slane %v1829_v19, %v6762_v53  ;;  %v5054_v19 = vrot.slane %v1828_v31, %v6762_v53  ;;  %v5124_v32 = vmul.f32 %v5085_v43, %v1837_v61 }
 0x2e0   : > { %6809 = vst [vmem:[#allocation141_spill] sm:$0xff] %v5014_v60  ;;  %6810 = vst [vmem:[#allocation142_spill] sm:$0xff] %v5017_v6 }
 0x2e1   : > { %6811 = vst [vmem:[#allocation143_spill] sm:$0xff] %v5020_v10  ;;  %6812 = vst [vmem:[#allocation144_spill] sm:$0xff] %v5023_v24 }
 0x2e2   : > { %6813 = vst [vmem:[#allocation145_spill] sm:$0xff] %v5026_v51  ;;  %6814 = vst [vmem:[#allocation146_spill] sm:$0xff] %v5029_v18  ;;  %v5051_v18 = vrot.slane %v1828_v31, %v6760_v9  ;;  %v5067_v51 = vrot.slane %v1831_v25, %v6754_v39  ;;  %v1880_v39 = vmul.f32 %v4852_v44, %v1837_v61 }
 0x2e3   : > { %6815 = vst [vmem:[#allocation147_spill] sm:$0xff] %v5032_v55  ;;  %6816 = vst [vmem:[#allocation148_spill] sm:$0xff] %v5036_v23  ;;  %v5057_v55 = vrot.slane %v1828_v31, %v6764_v41  ;;  %v5076_v31 = vrot.slane %v1831_v25, %v6760_v9  ;;  %v5121_v44 = vmul.f32 %v5061_v22, %v1837_v61 }
 0x2e4   : > { %6817 = vst [vmem:[#allocation149_spill] sm:$0xff] %v5039_v28  ;;  %6818 = vst [vmem:[#allocation150_spill] sm:$0xff] %v5042_v52 }
 0x2e5   : > { %6819 = vst [vmem:[#allocation151_spill] sm:$0xff] %v5045_v20  ;;  %6820 = vst [vmem:[#allocation152_spill] sm:$0xff] %v5048_v8 }
 0x2e6   : > { %6821 = vst [vmem:[#allocation153_spill] sm:$0xff] %v5051_v18  ;;  %6822 = vst [vmem:[#allocation154_spill] sm:$0xff] %v5054_v19  ;;  %v5073_v18 = vrot.slane %v1831_v25, %v6758_v37  ;;  %v5082_v19 = vrot.slane %v1831_v25, %v6764_v41 }
 0x2e7   : > { %6823 = vst [vmem:[#allocation155_spill] sm:$0xff] %v5057_v55  ;;  %6824 = vst [vmem:[#allocation156_spill] sm:$0xff] %v5061_v22  ;;  %v5079_v55 = vrot.slane %v1831_v25, %v6762_v53  ;;  %v5103_v25 = vrot.slane %v1830_v62, %v6762_v53  ;;  %v1886_v53 = vmul.f32 %v5011_v17, %v1837_v61 }
 0x2e8   : > { %6825 = vst [vmem:[#allocation157_spill] sm:$0xff] %v5064_v13  ;;  %6826 = vst [vmem:[#allocation158_spill] sm:$0xff] %v5067_v51 }
 0x2e9   : > { %6827 = vst [vmem:[#allocation159_spill] sm:$0xff] %v5070_v40  ;;  %6828 = vst [vmem:[#allocation160_spill] sm:$0xff] %v5073_v18 }
 0x2ea   : > { %6829 = vst [vmem:[#allocation161_spill] sm:$0xff] %v5076_v31  ;;  %6830 = vst [vmem:[#allocation162_spill] sm:$0xff] %v5079_v55  ;;  %v5097_v31 = vrot.slane %v1830_v62, %v6758_v37  ;;  %v5100_v55 = vrot.slane %v1830_v62, %v6760_v9  ;;  %v1881_v37 = vmul.f32 %v4929_v56, %v1837_v61 }
 0x2eb   : > { %6831 = vst [vmem:[#allocation163_spill] sm:$0xff] %v5082_v19  ;;  %6832 = vst [vmem:[#allocation164_spill] sm:$0xff] %v5085_v43  ;;  %v2019_v19 = vpop.permute.xlu0 %2018  ;;  %v1884_v9 = vmul.f32 %v4953_v35, %v1837_v61  ;;  %v1885_v62 = vmul.f32 %v5036_v23, %v1837_v61 }
 0x2ec   : > { %6833 = vst [vmem:[#allocation165_spill] sm:$0xff] %v5088_v59  ;;  %6834 = vst [vmem:[#allocation166_spill] sm:$0xff] %v5091_v29  ;;  %v1882_v29 = vmul.f32 %v4902_v63, %v1837_v61  ;;  %v2062_v41 = vmul.f32 %v4861_v3, %v2019_v19  ;;  %v2064_v56 = vmul.f32 %v4911_v36, %v2019_v19  ;;  %v1891_v63 = vpop.permute.xlu1 %1890 }
 0x2ed   : > { %6835 = vst [vmem:[#allocation167_spill] sm:$0xff] %v5094_v4  ;;  %6836 = vst [vmem:[#allocation168_spill] sm:$0xff] %v5097_v31  ;;  %v2063_v35 = vmul.f32 %v4938_v12, %v2019_v19  ;;  %v2065_v17 = vmul.f32 %v4995_v42, %v2019_v19  ;;  %v5131_v23 = vmul.f32 %v5020_v10, %v2019_v19 }
 0x2ee   : > { %6837 = vst [vmem:[#allocation169_spill] sm:$0xff] %v5100_v55  ;;  %6838 = vst [vmem:[#allocation170_spill] sm:$0xff] %v5103_v25  ;;  %v1883_v55 = vmul.f32 %v4986_v15, %v1837_v61  ;;  %v2066_v15 = vmul.f32 %v4970_v50, %v2019_v19  ;;  %v5137_v22 = vmul.f32 %v5070_v40, %v2019_v19 }
 0x2ef   : > { %6839 = vst [vmem:[#allocation171_spill] sm:$0xff] %v5106_v45  ;;  %6840 = vst [vmem:[#allocation172_spill] sm:$0xff] %v5108_v46  ;;  %v2061_v46 = vmul.f32 %v4886_v1, %v2019_v19  ;;  %v5134_v1 = vmul.f32 %v5045_v20, %v2019_v19  ;;  %v5140_v61 = vmul.f32 %v5094_v4, %v2019_v19  ;;  %v5142_v43 = vpop.permute.xlu0 %2437 }
 0x2f0   : > { %6841 = vst [vmem:[#allocation173_spill] sm:$0xff] %v5137_v22  ;;  %v1934_v12 = vmul.f32 %v4855_v0, %v1891_v63  ;;  %v1933_v50 = vmul.f32 %v4880_v7, %v1891_v63  ;;  %v1936_v42 = vmul.f32 %v4905_v11, %v1891_v63  ;;  %v1935_v10 = vmul.f32 %v4932_v2, %v1891_v63  ;;  %v5152_v22 = vpop.permute.xlu1 %1954 }
 0x2f1   : > { %6842 = vst [vmem:[#allocation174_spill] sm:$0xff] %v5140_v61  ;;  %v1938_v36 = vmul.f32 %v4956_v5, %v1891_v63  ;;  %v1937_v20 = vmul.f32 %v4989_v47, %v1891_v63  ;;  %v1940_v40 = vmul.f32 %v5014_v60, %v1891_v63  ;;  %v1939_v3 = vmul.f32 %v5039_v28, %v1891_v63 }
 0x2f2   : > { %v1944_v19 = vadd.f32 %v1934_v12, %v1880_v39  ;;  %v1943_v4 = vadd.f32 %v1933_v50, %v1879_v33  ;;  %v1946_v45 = vadd.f32 %v1936_v42, %v1882_v29  ;;  %v1945_v61 = vadd.f32 %v1935_v10, %v1881_v37 }
 0x2f3   : > { %v1948_v25 = vadd.f32 %v1938_v36, %v1884_v9  ;;  %v1947_v0 = vadd.f32 %v1937_v20, %v1883_v55  ;;  %v1950_v31 = vadd.f32 %v1940_v40, %v1886_v53  ;;  %v1949_v7 = vadd.f32 %v1939_v3, %v1885_v62  ;;  %v5166_v42 = vpop.permute.xlu0 %2082 }
 0x2f4   : > { %v1942_v2 = vmul.f32 %v5064_v13, %v1891_v63  ;;  %v5156_v5 = vmul.f32 %v5088_v59, %v1891_v63  ;;  %v5160_v60 = vmul.f32 %v5142_v43, %v4858_v16  ;;  %v5164_v12 = vmul.f32 %v5142_v43, %v4883_v26 }
 0x2f5   : > { %v1998_v3 = vmul.f32 %v4858_v16, %v5152_v22  ;;  %v1997_v20 = vmul.f32 %v4883_v26, %v5152_v22  ;;  %v2000_v10 = vmul.f32 %v4908_v27, %v5152_v22  ;;  %v1999_v55 = vmul.f32 %v4935_v14, %v5152_v22  ;;  %v5192_v26 = vpop.permute.xlu1 %2399 }
 0x2f6   : > { %v2126_v29 = vmul.f32 %v4864_v48, %v5166_v42  ;;  %v2125_v63 = vmul.f32 %v4889_v34, %v5166_v42  ;;  %v2128_v36 = vmul.f32 %v4914_v58, %v5166_v42  ;;  %v2127_v50 = vmul.f32 %v4941_v38, %v5166_v42 }
 0x2f7   : > { %v2008_v40 = vadd.f32 %v1998_v3, %v1944_v19  ;;  %v2007_v39 = vadd.f32 %v1997_v20, %v1943_v4  ;;  %v2010_v33 = vadd.f32 %v2000_v10, %v1946_v45  ;;  %v2009_v37 = vadd.f32 %v1999_v55, %v1945_v61  ;;  %v5194_v45 = vpop.permute.xlu0 %520 }
 0x2f8   : > { %v2002_v9 = vmul.f32 %v4967_v54, %v5152_v22  ;;  %v2130_v53 = vmul.f32 %v4973_v57, %v5166_v42  ;;  %v2001_v62 = vmul.f32 %v4992_v49, %v5152_v22  ;;  %v2129_v16 = vmul.f32 %v4998_v30, %v5166_v42  ;;  %6843 = vst [vmem:[#allocation175_spill] sm:$0xff] %v5194_v45  ;;  %v6851_v45 = vld [vmem:[#allocation153_spill] sm:$0xff] }
 0x2f9   : > { %v2072_v59 = vadd.f32 %v2062_v41, %v2008_v40  ;;  %v2071_v13 = vadd.f32 %v2061_v46, %v2007_v39  ;;  %v2074_v19 = vadd.f32 %v2064_v56, %v2010_v33  ;;  %v2073_v4 = vadd.f32 %v2063_v35, %v2009_v37  ;;  %v6846_v40 = vld [vmem:[#allocation119_spill] sm:$0xff]  ;;  %v6847_v33 = vld [vmem:[#allocation129_spill] sm:$0xff] }
 0x2fa   : > { %v2012_v61 = vadd.f32 %v2002_v9, %v1948_v25  ;;  %v2011_v3 = vadd.f32 %v2001_v62, %v1947_v0  ;;  %v2004_v20 = vmul.f32 %v5017_v6, %v5152_v22  ;;  %v2132_v10 = vmul.f32 %v5023_v24, %v5166_v42 }
 0x2fb   : > { %v2136_v55 = vadd.f32 %v2126_v29, %v2072_v59  ;;  %v2135_v28 = vadd.f32 %v2125_v63, %v2071_v13  ;;  %v2138_v49 = vadd.f32 %v2128_v36, %v2074_v19  ;;  %v2137_v30 = vadd.f32 %v2127_v50, %v2073_v4  ;;  %v5211_v13 = vpop.permute.xlu1 %2413  ;;  %v6845_v36 = vld [vmem:[#allocation7_spill] sm:$0xff] }
 0x2fc   : > { %v2076_v47 = vadd.f32 %v2066_v15, %v2012_v61  ;;  %v2075_v57 = vadd.f32 %v2065_v17, %v2011_v3  ;;  %v2014_v41 = vadd.f32 %v2004_v20, %v1950_v31  ;;  %v2003_v56 = vmul.f32 %v5042_v52, %v5152_v22  ;;  %v5213_v15 = vpop.permute.xlu0 %2146  ;;  %v6862_v52 = vld [vmem:[#allocation173_spill] sm:$0xff] }
 0x2fd   : > { %v2131_v35 = vmul.f32 %v5048_v8, %v5166_v42  ;;  %v1952_v0 = vadd.f32 %v1942_v2, %v5121_v44  ;;  %v2006_v25 = vmul.f32 %v5067_v51, %v5152_v22  ;;  %v5209_v59 = vmul.f32 %v5073_v18, %v5166_v42  ;;  %v6844_v2 = vld [vmem:[#allocation101_spill] sm:$0xff]  ;;  %v6861_v8 = vld [vmem:[#allocation154_spill] sm:$0xff] }
 0x2fe   : > { %v2140_v17 = vadd.f32 %v2130_v53, %v2076_v47  ;;  %v2139_v31 = vadd.f32 %v2129_v16, %v2075_v57  ;;  %v2078_v46 = vadd.f32 %v5131_v23, %v2014_v41  ;;  %v2013_v29 = vadd.f32 %v2003_v56, %v1949_v7  ;;  %v6848_v16 = vld [vmem:[#allocation137_spill] sm:$0xff] }
 0x2ff   : > { %v2190_v63 = vmul.f32 %v4867_v21, %v5213_v15  ;;  %v2189_v44 = vmul.f32 %v6844_v2, %v5213_v15  ;;  %v2192_v50 = vmul.f32 %v6845_v36, %v5213_v15  ;;  %v2191_v39 = vmul.f32 %v6846_v40, %v5213_v15  ;;  %v6849_v47 = vld [vmem:[#allocation145_spill] sm:$0xff]  ;;  %v5231_v41 = vpop.permute.xlu1 %2642  ;;  %v6873_v40 = vld [vmem:[#allocation163_spill] sm:$0xff] }
 0x300   : > { %v2194_v37 = vmul.f32 %v6847_v33, %v5213_v15  ;;  %v2193_v57 = vmul.f32 %v6848_v16, %v5213_v15  ;;  %v2142_v23 = vadd.f32 %v2132_v10, %v2078_v46  ;;  %v2196_v7 = vmul.f32 %v6849_v47, %v5213_v15  ;;  %6850 = vst [vmem:[#allocation176_spill] sm:$0xff] %v5231_v41  ;;  %v2211_v56 = vpop.permute.xlu0 %2210  ;;  %v6852_v10 = vld [vmem:[#allocation161_spill] sm:$0xff]  ;;  %v6863_v47 = vld [vmem:[#allocation162_spill] sm:$0xff] }
 0x301   : > { %v2200_v9 = vadd.f32 %v2190_v63, %v2136_v55  ;;  %v2199_v53 = vadd.f32 %v2189_v44, %v2135_v28  ;;  %v2202_v62 = vadd.f32 %v2192_v50, %v2138_v49  ;;  %v2201_v19 = vadd.f32 %v2191_v39, %v2137_v30  ;;  %v6853_v49 = vld [vmem:[#allocation93_spill] sm:$0xff]  ;;  %v6854_v55 = vld [vmem:[#allocation102_spill] sm:$0xff] }
 0x302   : > { %v2204_v4 = vadd.f32 %v2194_v37, %v2140_v17  ;;  %v2203_v61 = vadd.f32 %v2193_v57, %v2139_v31  ;;  %v2206_v3 = vadd.f32 %v2196_v7, %v2142_v23  ;;  %v2077_v20 = vadd.f32 %v5134_v1, %v2013_v29  ;;  %v6855_v31 = vld [vmem:[#allocation3_spill] sm:$0xff]  ;;  %v6856_v1 = vld [vmem:[#allocation120_spill] sm:$0xff]  ;;  %v6857_v44 = vld [vmem:[#allocation130_spill] sm:$0xff] }
 0x303   : > { %v2195_v18 = vmul.f32 %v6851_v45, %v5213_v15  ;;  %v2016_v51 = vadd.f32 %v2006_v25, %v1952_v0  ;;  %v2198_v46 = vmul.f32 %v6852_v10, %v5213_v15  ;;  %v1951_v28 = vadd.f32 %v5156_v5, %v5124_v32  ;;  %v6858_v39 = vld [vmem:[#allocation138_spill] sm:$0xff] }
 0x304   : > { %v2254_v30 = vmul.f32 %v6853_v49, %v2211_v56  ;;  %v2253_v17 = vmul.f32 %v6854_v55, %v2211_v56  ;;  %v2256_v63 = vmul.f32 %v6855_v31, %v2211_v56  ;;  %v2255_v29 = vmul.f32 %v6856_v1, %v2211_v56  ;;  %v6859_v57 = vld [vmem:[#allocation146_spill] sm:$0xff]  ;;  %v5246_v55 = vpop.permute.xlu1 %2656  ;;  %v2275_v31 = vpop.permute.xlu0 %2274 }
 0x305   : > { %v2258_v50 = vmul.f32 %v6857_v44, %v2211_v56  ;;  %v2257_v37 = vmul.f32 %v6858_v39, %v2211_v56  ;;  %v2260_v0 = vmul.f32 %v6859_v57, %v2211_v56  ;;  %v2141_v25 = vadd.f32 %v2131_v35, %v2077_v20  ;;  %6860 = vst [vmem:[#allocation177_spill] sm:$0xff] %v5246_v55  ;;  %v6864_v57 = vld [vmem:[#allocation166_spill] sm:$0xff]  ;;  %v6869_v20 = vld [vmem:[#allocation131_spill] sm:$0xff] }
 0x306   : > { %v2264_v23 = vadd.f32 %v2254_v30, %v2200_v9  ;;  %v2263_v7 = vadd.f32 %v2253_v17, %v2199_v53  ;;  %v2266_v41 = vadd.f32 %v2256_v63, %v2202_v62  ;;  %v2265_v10 = vadd.f32 %v2255_v29, %v2201_v19  ;;  %v6865_v9 = vld [vmem:[#allocation96_spill] sm:$0xff]  ;;  %v6866_v62 = vld [vmem:[#allocation103_spill] sm:$0xff] }
 0x307   : > { %v2268_v5 = vadd.f32 %v2258_v50, %v2204_v4  ;;  %v2267_v32 = vadd.f32 %v2257_v37, %v2203_v61  ;;  %v2270_v49 = vadd.f32 %v2260_v0, %v2206_v3  ;;  %v2205_v45 = vadd.f32 %v2195_v18, %v2141_v25  ;;  %v6867_v4 = vld [vmem:[#allocation4_spill] sm:$0xff]  ;;  %v6868_v3 = vld [vmem:[#allocation121_spill] sm:$0xff]  ;;  %v6870_v17 = vld [vmem:[#allocation139_spill] sm:$0xff] }
 0x308   : > { %v2259_v1 = vmul.f32 %v6861_v8, %v2211_v56  ;;  %v2080_v44 = vadd.f32 %v6862_v52, %v2016_v51  ;;  %v2262_v39 = vmul.f32 %v6863_v47, %v2211_v56  ;;  %v2005_v35 = vmul.f32 %v6864_v57, %v5152_v22  ;;  %v6871_v29 = vld [vmem:[#allocation147_spill] sm:$0xff]  ;;  %v5261_v16 = vpop.permute.xlu1 %2461 }
 0x309   : > { %v2318_v53 = vmul.f32 %v6865_v9, %v2275_v31  ;;  %v2317_v19 = vmul.f32 %v6866_v62, %v2275_v31  ;;  %v2320_v61 = vmul.f32 %v6867_v4, %v2275_v31  ;;  %v2319_v18 = vmul.f32 %v6868_v3, %v2275_v31  ;;  %v6872_v8 = vld [vmem:[#allocation155_spill] sm:$0xff] }
 0x30a   : > { %v2322_v30 = vmul.f32 %v6869_v20, %v2275_v31  ;;  %v2321_v63 = vmul.f32 %v6870_v17, %v2275_v31  ;;  %v2324_v50 = vmul.f32 %v6871_v29, %v2275_v31  ;;  %v2269_v52 = vadd.f32 %v2259_v1, %v2205_v45 }
 0x30b   : > { %v2328_v51 = vadd.f32 %v2318_v53, %v2264_v23  ;;  %v2327_v37 = vadd.f32 %v2317_v19, %v2263_v7  ;;  %v2330_v0 = vadd.f32 %v2320_v61, %v2266_v41  ;;  %v2329_v25 = vadd.f32 %v2319_v18, %v2265_v10  ;;  %v6874_v41 = vld [vmem:[#allocation168_spill] sm:$0xff]  ;;  %v5272_v53 = vpop.permute.xlu0 %2557  ;;  %v6877_v61 = vld [vmem:[#allocation174_spill] sm:$0xff] }
 0x30c   : > { %v2332_v22 = vadd.f32 %v2322_v30, %v2268_v5  ;;  %v2331_v55 = vadd.f32 %v2321_v63, %v2267_v32  ;;  %v2334_v47 = vadd.f32 %v2324_v50, %v2270_v49  ;;  %v2323_v57 = vmul.f32 %v6872_v8, %v2275_v31  ;;  %v6875_v49 = vld [vmem:[#allocation169_spill] sm:$0xff]  ;;  %v6876_v5 = vld [vmem:[#allocation170_spill] sm:$0xff]  ;;  %v6878_v30 = vld [vmem:[#allocation171_spill] sm:$0xff] }
 0x30d   : > { %2349 = vrot.lane.b32.xlu0 %v2328_v51, %s3189_s24  ;;  %2347 = vrot.lane.b32.xlu1 %v2327_v37, %s3189_s24  ;;  %v2144_v33 = vadd.f32 %v5209_v59, %v2080_v44  ;;  %v2326_v45 = vmul.f32 %v6873_v40, %v2275_v31  ;;  %v2015_v1 = vadd.f32 %v2005_v35, %v1951_v28  ;;  %v6879_v59 = vld [vmem:[#allocation61_spill] sm:$0xff]  ;;  %v6880_v28 = vld [vmem:[#allocation62_spill] sm:$0xff]  ;;  %v5292_v51 = vpop.permute.xlu1 %2680 }
 0x30e   : > { %v2333_v23 = vadd.f32 %v2323_v57, %v2269_v52  ;;  %v2133_v10 = vmul.f32 %v6874_v41, %v5166_v42  ;;  %v2197_v7 = vmul.f32 %v6875_v49, %v5213_v15  ;;  %v2261_v32 = vmul.f32 %v6876_v5, %v2211_v56  ;;  %v6881_v35 = vld [vmem:[#allocation90_spill] sm:$0xff]  ;;  %v6882_v56 = vld [vmem:[#allocation95_spill] sm:$0xff] }
 0x30f   : > { %v2208_v19 = vadd.f32 %v2198_v46, %v2144_v33  ;;  %v2079_v18 = vadd.f32 %v6877_v61, %v2015_v1  ;;  %v2325_v63 = vmul.f32 %v6878_v30, %v2275_v31  ;;  %v2403_v44 = vmul.f32 %v5192_v26, %v6879_v59  ;;  %v6883_v50 = vld [vmem:[#allocation106_spill] sm:$0xff]  ;;  %v6884_v1 = vld [vmem:[#allocation100_spill] sm:$0xff] }
 0x310   : > { %v2417_v57 = vmul.f32 %v5211_v13, %v6880_v28  ;;  %v2465_v42 = vmul.f32 %v5261_v16, %v6881_v35  ;;  %v5284_v15 = vmul.f32 %v5272_v53, %v6865_v9  ;;  %v2402_v33 = vmul.f32 %v5192_v26, %v6882_v56  ;;  %v6885_v35 = vld [vmem:[#allocation108_spill] sm:$0xff] }
 0x311   : > { %2353 = vrot.lane.b32.xlu0 %v2330_v0, %s3189_s24  ;;  %2351 = vrot.lane.b32.xlu1 %v2329_v25, %s3189_s24  ;;  %v2272_v46 = vadd.f32 %v2262_v39, %v2208_v19  ;;  %v2143_v31 = vadd.f32 %v2133_v10, %v2079_v18  ;;  %v2416_v52 = vmul.f32 %v5211_v13, %v6883_v50 }
 0x312   : > { %v2427_v37 = vadd.f32 %v2417_v57, %v2403_v44  ;;  %v2464_v61 = vmul.f32 %v5261_v16, %v6884_v1  ;;  %v5298_v9 = vmul.f32 %v5272_v53, %v6866_v62  ;;  %v2405_v0 = vmul.f32 %v5192_v26, %v6885_v35  ;;  %v6886_v44 = vld [vmem:[#allocation110_spill] sm:$0xff]  ;;  %v6893_v35 = vld [vmem:[#allocation128_spill] sm:$0xff] }
 0x313   : > { %v2336_v28 = vadd.f32 %v2326_v45, %v2272_v46  ;;  %v2207_v25 = vadd.f32 %v2197_v7, %v2143_v31  ;;  %v2426_v39 = vadd.f32 %v2416_v52, %v2402_v33  ;;  %v2419_v10 = vmul.f32 %v5211_v13, %v4905_v11  ;;  %v6888_v52 = vld [vmem:[#allocation60_spill] sm:$0xff] }
 0x314   : > { %v2451_v19 = vadd.f32 %v5160_v60, %v2427_v37  ;;  %v2443_v18 = vmul.f32 %v5142_v43, %v4908_v27  ;;  %v2467_v57 = vmul.f32 %v5261_v16, %v6886_v44  ;;  %v5311_v59 = vmul.f32 %v5272_v53, %v6867_v4  ;;  %v6887_v60 = vld [vmem:[#allocation5_spill] sm:$0xff]  ;;  %v5322_v4 = vpop.permute.xlu1 %2485 }
 0x315   : > { %2357 = vrot.lane.b32.xlu0 %v2332_v22, %s3189_s24  ;;  %2355 = vrot.lane.b32.xlu1 %v2331_v55, %s3189_s24  ;;  %v2271_v45 = vadd.f32 %v2261_v32, %v2207_v25  ;;  %v2450_v7 = vadd.f32 %v5164_v12, %v2426_v39  ;;  %v2429_v33 = vadd.f32 %v2419_v10, %v2405_v0  ;;  %v6889_v55 = vld [vmem:[#allocation15_spill] sm:$0xff] }
 0x316   : > { %v2475_v46 = vadd.f32 %v2465_v42, %v2451_v19  ;;  %v2404_v31 = vmul.f32 %v5192_v26, %v6887_v60  ;;  %v2418_v37 = vmul.f32 %v5211_v13, %v6888_v52  ;;  %v2442_v44 = vmul.f32 %v5142_v43, %v4935_v14  ;;  %v6906_v60 = vld [vmem:[#allocation145_spill] sm:$0xff] }
 0x317   : > { %v2335_v27 = vadd.f32 %v2325_v63, %v2271_v45  ;;  %v2474_v22 = vadd.f32 %v2464_v61, %v2450_v7  ;;  %v2453_v11 = vadd.f32 %v2443_v18, %v2429_v33  ;;  %v2466_v32 = vmul.f32 %v5261_v16, %v6889_v55  ;;  %v6890_v45 = vld [vmem:[#allocation122_spill] sm:$0xff] }
 0x318   : > { %v2489_v12 = vmul.f32 %v5322_v4, %v4864_v48  ;;  %v2488_v42 = vmul.f32 %v5322_v4, %v4889_v34  ;;  %v2491_v0 = vmul.f32 %v5322_v4, %v4914_v58  ;;  %v2428_v25 = vadd.f32 %v2418_v37, %v2404_v31  ;;  %v6891_v31 = vld [vmem:[#allocation123_spill] sm:$0xff]  ;;  %v5348_v37 = vpop.permute.xlu1 %2704  ;;  %v6930_v48 = vld [vmem:[#allocation146_spill] sm:$0xff] }
 0x319   : > { %2361 = vrot.lane.b32.xlu0 %v2334_v47, %s3189_s24  ;;  %2359 = vrot.lane.b32.xlu1 %v2333_v23, %s3189_s24  ;;  %v2477_v63 = vadd.f32 %v2467_v57, %v2453_v11  ;;  %v2490_v61 = vmul.f32 %v5322_v4, %v4941_v38  ;;  %v5338_v39 = vmul.f32 %v5272_v53, %v6868_v3  ;;  %v6892_v23 = vld [vmem:[#allocation127_spill] sm:$0xff]  ;;  %v6904_v3 = vld [vmem:[#allocation129_spill] sm:$0xff] }
 0x31a   : > { %v2499_v10 = vadd.f32 %v2489_v12, %v2475_v46  ;;  %v2498_v19 = vadd.f32 %v2488_v42, %v2474_v22  ;;  %v2452_v18 = vadd.f32 %v2442_v44, %v2428_v25  ;;  %v2407_v7 = vmul.f32 %v5192_v26, %v6890_v45  ;;  %v6894_v22 = vld [vmem:[#allocation132_spill] sm:$0xff]  ;;  %v6900_v45 = vld [vmem:[#allocation141_spill] sm:$0xff] }
 0x31b   : > { %v2501_v33 = vadd.f32 %v2491_v0, %v2477_v63  ;;  %v2421_v47 = vmul.f32 %v5211_v13, %v6891_v31  ;;  %v2445_v11 = vmul.f32 %v5142_v43, %v4967_v54  ;;  %v2469_v57 = vmul.f32 %v5261_v16, %v6892_v23  ;;  %v6895_v0 = vld [vmem:[#allocation133_spill] sm:$0xff]  ;;  %v6896_v63 = vld [vmem:[#allocation134_spill] sm:$0xff] }
 0x31c   : > { %v2476_v58 = vadd.f32 %v2466_v32, %v2452_v18  ;;  %v2493_v46 = vmul.f32 %v5322_v4, %v6893_v35  ;;  %v5354_v44 = vmul.f32 %v5272_v53, %v6869_v20  ;;  %v2406_v12 = vmul.f32 %v5192_v26, %v6894_v22  ;;  %v6897_v35 = vld [vmem:[#allocation135_spill] sm:$0xff]  ;;  %v6898_v20 = vld [vmem:[#allocation136_spill] sm:$0xff] }
 0x31d   : > { %2365 = vrot.lane.b32.xlu0 %v2336_v28, %s3189_s24  ;;  %2363 = vrot.lane.b32.xlu1 %v2335_v27, %s3189_s24  ;;  %v2431_v42 = vadd.f32 %v2421_v47, %v2407_v7  ;;  %v2420_v25 = vmul.f32 %v5211_v13, %v6895_v0  ;;  %v2444_v32 = vmul.f32 %v5142_v43, %v6896_v63  ;;  %v6899_v7 = vld [vmem:[#allocation140_spill] sm:$0xff]  ;;  %v6903_v63 = vld [vmem:[#allocation119_spill] sm:$0xff] }
 0x31e   : > { %v2500_v18 = vadd.f32 %v2490_v61, %v2476_v58  ;;  %v2468_v23 = vmul.f32 %v5261_v16, %v6897_v35  ;;  %v2492_v54 = vmul.f32 %v5322_v4, %v6898_v20  ;;  %v5370_v31 = vmul.f32 %v5272_v53, %v6870_v17  ;;  %v6901_v61 = vld [vmem:[#allocation143_spill] sm:$0xff] }
 0x31f   : > { %v2455_v28 = vadd.f32 %v2445_v11, %v2431_v42  ;;  %v2430_v27 = vadd.f32 %v2420_v25, %v2406_v12  ;;  %v2409_v47 = vmul.f32 %v5192_v26, %v6899_v7  ;;  %v2423_v0 = vmul.f32 %v5211_v13, %v6900_v45  ;;  %v5386_v11 = vpop.permute.xlu1 %2509  ;;  %v6902_v7 = vld [vmem:[#allocation148_spill] sm:$0xff] }
 0x320   : > { %v2447_v58 = vmul.f32 %v5142_v43, %v5017_v6  ;;  %v2471_v35 = vmul.f32 %v5261_v16, %v6901_v61  ;;  %v2495_v20 = vmul.f32 %v5322_v4, %v5023_v24  ;;  %v5384_v17 = vmul.f32 %v5272_v53, %v6871_v29 }
 0x321   : > { %v2479_v12 = vadd.f32 %v2469_v57, %v2455_v28  ;;  %v2454_v42 = vadd.f32 %v2444_v32, %v2430_v27  ;;  %v2433_v25 = vadd.f32 %v2423_v0, %v2409_v47  ;;  %v2408_v45 = vmul.f32 %v5192_v26, %v6902_v7  ;;  %v6905_v32 = vld [vmem:[#allocation137_spill] sm:$0xff] }
 0x322   : > { %v2513_v6 = vmul.f32 %v5386_v11, %v4867_v21  ;;  %v2512_v61 = vmul.f32 %v5386_v11, %v6844_v2  ;;  %v2515_v24 = vmul.f32 %v5386_v11, %v6845_v36  ;;  %v2514_v29 = vmul.f32 %v5386_v11, %v6903_v63  ;;  %v6927_v63 = vld [vmem:[#allocation120_spill] sm:$0xff] }
 0x323   : > { %v2503_v22 = vadd.f32 %v2493_v46, %v2479_v12  ;;  %v2517_v57 = vmul.f32 %v5386_v11, %v6904_v3  ;;  %v2478_v0 = vadd.f32 %v2468_v23, %v2454_v42  ;;  %v2516_v28 = vmul.f32 %v5386_v11, %v6905_v32  ;;  %v5404_v21 = vpop.permute.xlu1 %2728  ;;  %v6907_v46 = vld [vmem:[#allocation149_spill] sm:$0xff]  ;;  %v6908_v3 = vld [vmem:[#allocation150_spill] sm:$0xff]  ;;  %v6909_v42 = vld [vmem:[#allocation151_spill] sm:$0xff] }
 0x324   : > { %v2523_v27 = vadd.f32 %v2513_v6, %v2499_v10  ;;  %v2522_v47 = vadd.f32 %v2512_v61, %v2498_v19  ;;  %v2525_v7 = vadd.f32 %v2515_v24, %v2501_v33  ;;  %v2524_v38 = vadd.f32 %v2514_v29, %v2500_v18  ;;  %v6910_v10 = vld [vmem:[#allocation152_spill] sm:$0xff]  ;;  %v6911_v19 = vld [vmem:[#allocation153_spill] sm:$0xff] }
 0x325   : > { %v2527_v55 = vadd.f32 %v2517_v57, %v2503_v22  ;;  %v2502_v14 = vadd.f32 %v2492_v54, %v2478_v0  ;;  %v2457_v52 = vadd.f32 %v2447_v58, %v2433_v25  ;;  %v2519_v36 = vmul.f32 %v5386_v11, %v6906_v60  ;;  %v6912_v58 = vld [vmem:[#allocation156_spill] sm:$0xff]  ;;  %v6913_v25 = vld [vmem:[#allocation157_spill] sm:$0xff]  ;;  %v6914_v0 = vld [vmem:[#allocation158_spill] sm:$0xff] }
 0x326   : > { %v2422_v12 = vmul.f32 %v5211_v13, %v6907_v46  ;;  %v2446_v23 = vmul.f32 %v5142_v43, %v6908_v3  ;;  %v2470_v6 = vmul.f32 %v5261_v16, %v6909_v42  ;;  %v2494_v24 = vmul.f32 %v5322_v4, %v6910_v10  ;;  %v6921_v42 = vld [vmem:[#allocation165_spill] sm:$0xff]  ;;  %v6922_v3 = vld [vmem:[#allocation166_spill] sm:$0xff]  ;;  %v6923_v46 = vld [vmem:[#allocation167_spill] sm:$0xff] }
 0x327   : > { %v2526_v29 = vadd.f32 %v2516_v28, %v2502_v14  ;;  %v2481_v54 = vadd.f32 %v2471_v35, %v2457_v52  ;;  %v2518_v33 = vmul.f32 %v5386_v11, %v6911_v19  ;;  %v5418_v22 = vmul.f32 %v5272_v53, %v6872_v8  ;;  %v6915_v14 = vld [vmem:[#allocation159_spill] sm:$0xff]  ;;  %v6916_v52 = vld [vmem:[#allocation160_spill] sm:$0xff]  ;;  %v6917_v19 = vld [vmem:[#allocation161_spill] sm:$0xff] }
 0x328   : > { %v2432_v18 = vadd.f32 %v2422_v12, %v2408_v45  ;;  %v2411_v61 = vmul.f32 %v5192_v26, %v6912_v58  ;;  %v2425_v57 = vmul.f32 %v5211_v13, %v6913_v25  ;;  %v2449_v60 = vmul.f32 %v5142_v43, %v6914_v0  ;;  %v6920_v25 = vld [vmem:[#allocation164_spill] sm:$0xff] }
 0x329   : > { %v2505_v10 = vadd.f32 %v2495_v20, %v2481_v54  ;;  %v2473_v35 = vmul.f32 %v5261_v16, %v6915_v14  ;;  %v2497_v28 = vmul.f32 %v5322_v4, %v6916_v52  ;;  %v5432_v8 = vmul.f32 %v5386_v11, %v6917_v19  ;;  %v2534_v20 = vpop.permute.xlu1 %2533 }
 0x32a   : > { %v2456_v45 = vadd.f32 %v2446_v23, %v2432_v18  ;;  %v2435_v12 = vadd.f32 %v2425_v57, %v2411_v61  ;;  %v5436_v58 = vmul.f32 %v5272_v53, %v6873_v40  ;;  %v2410_v0 = vmul.f32 %v5192_v26, %v6920_v25  ;;  %v6924_v23 = vld [vmem:[#allocation93_spill] sm:$0xff]  ;;  %v6925_v61 = vld [vmem:[#allocation102_spill] sm:$0xff]  ;;  %v6926_v40 = vld [vmem:[#allocation3_spill] sm:$0xff] }
 0x32b   : > { %6918 = vst [vmem:[#allocation173_spill] sm:$0xff] %v5432_v8  ;;  %v2529_v54 = vadd.f32 %v2519_v36, %v2505_v10  ;;  %v2424_v14 = vmul.f32 %v5211_v13, %v6921_v42  ;;  %v2448_v52 = vmul.f32 %v5142_v43, %v6922_v3  ;;  %v2472_v19 = vmul.f32 %v5261_v16, %v6923_v46  ;;  %v6928_v26 = vld [vmem:[#allocation130_spill] sm:$0xff] }
 0x32c   : > { %6919 = vst [vmem:[#allocation168_spill] sm:$0xff] %v5436_v58  ;;  %v2537_v18 = vmul.f32 %v2534_v20, %v6924_v23  ;;  %v2536_v57 = vmul.f32 %v2534_v20, %v6925_v61  ;;  %v2539_v32 = vmul.f32 %v2534_v20, %v6926_v40  ;;  %v2538_v58 = vmul.f32 %v2534_v20, %v6927_v63  ;;  %v6929_v36 = vld [vmem:[#allocation138_spill] sm:$0xff] }
 0x32d   : > { %v2541_v25 = vmul.f32 %v2534_v20, %v6928_v26  ;;  %v2540_v10 = vmul.f32 %v2534_v20, %v6929_v36  ;;  %v2543_v13 = vmul.f32 %v2534_v20, %v6930_v48  ;;  %v2480_v42 = vadd.f32 %v2470_v6, %v2456_v45  ;;  %v5453_v61 = vpop.permute.xlu1 %2752 }
 0x32e   : > { %v2547_v62 = vadd.f32 %v2537_v18, %v2523_v27  ;;  %v2546_v43 = vadd.f32 %v2536_v57, %v2522_v47  ;;  %v2549_v3 = vadd.f32 %v2539_v32, %v2525_v7  ;;  %v2548_v8 = vadd.f32 %v2538_v58, %v2524_v38  ;;  %v6931_v7 = vld [vmem:[#allocation154_spill] sm:$0xff] }
 0x32f   : > { %v2551_v16 = vadd.f32 %v2541_v25, %v2527_v55  ;;  %v2550_v46 = vadd.f32 %v2540_v10, %v2526_v29  ;;  %v2553_v23 = vadd.f32 %v2543_v13, %v2529_v54  ;;  %v2504_v2 = vadd.f32 %v2494_v24, %v2480_v42  ;;  %v6935_v42 = vld [vmem:[#allocation98_spill] sm:$0xff]  ;;  %v6936_v25 = vld [vmem:[#allocation101_spill] sm:$0xff]  ;;  %v6942_v54 = vld [vmem:[#allocation92_spill] sm:$0xff] }
 0x330   : > { %v2571_v40 = vadd.f32 %v5284_v15, %v2547_v62  ;;  %v2570_v63 = vadd.f32 %v5298_v9, %v2546_v43  ;;  %v2573_v26 = vadd.f32 %v5311_v59, %v2549_v3  ;;  %v2572_v36 = vadd.f32 %v5338_v39, %v2548_v8  ;;  %v6932_v9 = vld [vmem:[#allocation162_spill] sm:$0xff]  ;;  %v6944_v10 = vld [vmem:[#allocation91_spill] sm:$0xff] }
 0x331   : > { %v2575_v6 = vadd.f32 %v5354_v44, %v2551_v16  ;;  %v2574_v27 = vadd.f32 %v5370_v31, %v2550_v46  ;;  %v2577_v38 = vadd.f32 %v5384_v17, %v2553_v23  ;;  %v2528_v55 = vadd.f32 %v2518_v33, %v2504_v2  ;;  %v6933_v31 = vld [vmem:[#allocation176_spill] sm:$0xff]  ;;  %v6943_v18 = vld [vmem:[#allocation90_spill] sm:$0xff] }
 0x332   : > { %2592 = vrot.lane.b32.xlu0 %v2571_v40, %s3190_s25  ;;  %2590 = vrot.lane.b32.xlu1 %v2570_v63, %s3190_s25  ;;  %v2542_v62 = vmul.f32 %v2534_v20, %v6931_v7  ;;  %v2459_v15 = vadd.f32 %v2449_v60, %v2435_v12  ;;  %v2545_v32 = vmul.f32 %v2534_v20, %v6932_v9  ;;  %v5475_v60 = vpop.permute.xlu0 %2800  ;;  %v5477_v63 = vpop.permute.xlu1 %2776  ;;  %v6940_v12 = vld [vmem:[#allocation61_spill] sm:$0xff] }
 0x333   : > { %v2434_v3 = vadd.f32 %v2424_v14, %v2410_v0  ;;  %v2496_v8 = vmul.f32 %v5322_v4, %v6874_v41  ;;  %v2520_v59 = vmul.f32 %v5386_v11, %v6875_v49  ;;  %v2544_v17 = vmul.f32 %v2534_v20, %v6876_v5  ;;  %v6934_v4 = vld [vmem:[#allocation177_spill] sm:$0xff]  ;;  %v6937_v0 = vld [vmem:[#allocation102_spill] sm:$0xff] }
 0x334   : > { %v2552_v2 = vadd.f32 %v2542_v62, %v2528_v55  ;;  %v2483_v39 = vadd.f32 %v2473_v35, %v2459_v15  ;;  %v2568_v40 = vmul.f32 %v5272_v53, %v6878_v30  ;;  %v2645_v44 = vmul.f32 %v6933_v31, %v6882_v56  ;;  %v6938_v35 = vld [vmem:[#allocation173_spill] sm:$0xff]  ;;  %v6945_v55 = vld [vmem:[#allocation94_spill] sm:$0xff] }
 0x335   : > { %v2458_v47 = vadd.f32 %v2448_v52, %v2434_v3  ;;  %v2659_v46 = vmul.f32 %v6934_v4, %v6883_v50  ;;  %v2683_v11 = vmul.f32 %v5292_v51, %v6935_v42  ;;  %v2707_v24 = vmul.f32 %v5348_v37, %v6884_v1  ;;  %v6939_v52 = vld [vmem:[#allocation103_spill] sm:$0xff]  ;;  %v6946_v15 = vld [vmem:[#allocation93_spill] sm:$0xff]  ;;  %v6950_v42 = vld [vmem:[#allocation60_spill] sm:$0xff] }
 0x336   : > { %2596 = vrot.lane.b32.xlu0 %v2573_v26, %s3190_s25  ;;  %2594 = vrot.lane.b32.xlu1 %v2572_v36, %s3190_s25  ;;  %v2576_v53 = vadd.f32 %v5418_v22, %v2552_v2  ;;  %v2507_v56 = vadd.f32 %v2497_v28, %v2483_v39  ;;  %v2731_v29 = vmul.f32 %v5404_v21, %v4889_v34  ;;  %v6941_v28 = vld [vmem:[#allocation62_spill] sm:$0xff] }
 0x337   : > { %v2482_v33 = vadd.f32 %v2472_v19, %v2458_v47  ;;  %v2669_v58 = vadd.f32 %v2659_v46, %v2645_v44  ;;  %v2755_v50 = vmul.f32 %v5453_v61, %v6936_v25  ;;  %v2779_v14 = vmul.f32 %v5477_v63, %v6937_v0  ;;  %v6948_v44 = vld [vmem:[#allocation96_spill] sm:$0xff]  ;;  %v6953_v25 = vld [vmem:[#allocation118_spill] sm:$0xff] }
 0x338   : > { %v2531_v1 = vadd.f32 %v6938_v35, %v2507_v56  ;;  %v2803_v45 = vmul.f32 %v5475_v60, %v6939_v52  ;;  %v2646_v22 = vmul.f32 %v6933_v31, %v6940_v12  ;;  %v2660_v20 = vmul.f32 %v6934_v4, %v6941_v28 }
 0x339   : > { %v2506_v34 = vadd.f32 %v2496_v8, %v2482_v33  ;;  %v2693_v19 = vadd.f32 %v2683_v11, %v2669_v58  ;;  %v2684_v23 = vmul.f32 %v5292_v51, %v6942_v54  ;;  %v2708_v57 = vmul.f32 %v5348_v37, %v6943_v18  ;;  %v6947_v8 = vld [vmem:[#allocation168_spill] sm:$0xff]  ;;  %v6951_v11 = vld [vmem:[#allocation6_spill] sm:$0xff]  ;;  %v6952_v33 = vld [vmem:[#allocation15_spill] sm:$0xff] }
 0x33a   : > { %2600 = vrot.lane.b32.xlu0 %v2575_v6, %s3190_s25  ;;  %2598 = vrot.lane.b32.xlu1 %v2574_v27, %s3190_s25  ;;  %v2555_v26 = vadd.f32 %v2545_v32, %v2531_v1  ;;  %v2670_v36 = vadd.f32 %v2660_v20, %v2646_v22  ;;  %v2732_v13 = vmul.f32 %v5404_v21, %v6944_v10  ;;  %v6949_v27 = vld [vmem:[#allocation5_spill] sm:$0xff]  ;;  %v6954_v1 = vld [vmem:[#allocation119_spill] sm:$0xff]  ;;  %v6955_v22 = vld [vmem:[#allocation120_spill] sm:$0xff] }
 0x33b   : > { %v2530_v43 = vadd.f32 %v2520_v59, %v2506_v34  ;;  %v2717_v16 = vadd.f32 %v2707_v24, %v2693_v19  ;;  %v2756_v62 = vmul.f32 %v5453_v61, %v6945_v55  ;;  %v2780_v3 = vmul.f32 %v5477_v63, %v6946_v15  ;;  %v6957_v20 = vld [vmem:[#allocation108_spill] sm:$0xff]  ;;  %v6961_v10 = vld [vmem:[#allocation113_spill] sm:$0xff]  ;;  %v6962_v15 = vld [vmem:[#allocation7_spill] sm:$0xff] }
 0x33c   : > { %v2579_v2 = vadd.f32 %v6947_v8, %v2555_v26  ;;  %v2694_v39 = vadd.f32 %v2684_v23, %v2670_v36  ;;  %v2804_v6 = vmul.f32 %v5475_v60, %v6948_v44  ;;  %v2647_v32 = vmul.f32 %v6933_v31, %v6949_v27  ;;  %v6958_v23 = vld [vmem:[#allocation109_spill] sm:$0xff]  ;;  %v6960_v26 = vld [vmem:[#allocation110_spill] sm:$0xff]  ;;  %v6964_v44 = vld [vmem:[#allocation4_spill] sm:$0xff] }
 0x33d   : > { %v2554_v47 = vadd.f32 %v2544_v17, %v2530_v43  ;;  %v2741_v46 = vadd.f32 %v2731_v29, %v2717_v16  ;;  %v2661_v59 = vmul.f32 %v6934_v4, %v6950_v42  ;;  %v2685_v24 = vmul.f32 %v5292_v51, %v6951_v11  ;;  %v6967_v11 = vld [vmem:[#allocation134_spill] sm:$0xff] }
 0x33e   : > { %2604 = vrot.lane.b32.xlu0 %v2577_v38, %s3190_s25  ;;  %2602 = vrot.lane.b32.xlu1 %v2576_v53, %s3190_s25  ;;  %v2718_v56 = vadd.f32 %v2708_v57, %v2694_v39  ;;  %v2709_v58 = vmul.f32 %v5348_v37, %v6952_v33  ;;  %v2733_v0 = vmul.f32 %v5404_v21, %v6953_v25  ;;  %v6956_v38 = vld [vmem:[#allocation121_spill] sm:$0xff]  ;;  %v6963_v39 = vld [vmem:[#allocation3_spill] sm:$0xff] }
 0x33f   : > { %v2578_v35 = vadd.f32 %v2568_v40, %v2554_v47  ;;  %v2765_v17 = vadd.f32 %v2755_v50, %v2741_v46  ;;  %v2671_v29 = vadd.f32 %v2661_v59, %v2647_v32  ;;  %v2757_v52 = vmul.f32 %v5453_v61, %v6954_v1  ;;  %v6959_v50 = vld [vmem:[#allocation111_spill] sm:$0xff]  ;;  %v6965_v32 = vld [vmem:[#allocation132_spill] sm:$0xff]  ;;  %v6966_v59 = vld [vmem:[#allocation133_spill] sm:$0xff] }
 0x340   : > { %v2742_v12 = vadd.f32 %v2732_v13, %v2718_v56  ;;  %v2781_v28 = vmul.f32 %v5477_v63, %v6955_v22  ;;  %v2805_v53 = vmul.f32 %v5475_v60, %v6956_v38  ;;  %v2648_v34 = vmul.f32 %v6933_v31, %v6957_v20  ;;  %v6968_v56 = vld [vmem:[#allocation135_spill] sm:$0xff] }
 0x341   : > { %v2789_v19 = vadd.f32 %v2779_v14, %v2765_v17  ;;  %v2695_v54 = vadd.f32 %v2685_v24, %v2671_v29  ;;  %v2662_v40 = vmul.f32 %v6934_v4, %v6958_v23  ;;  %v2686_v18 = vmul.f32 %v5292_v51, %v6959_v50  ;;  %v2881_v14 = vld [vmem:[%s5896_s2] sm:$0xff]  ;;  %v6970_v29 = vld [vmem:[#allocation137_spill] sm:$0xff]  ;;  %v6972_v38 = vld [vmem:[#allocation139_spill] sm:$0xff] }
 0x342   : > { %2608 = vrot.lane.b32.xlu0 %v2579_v2, %s3190_s25  ;;  %2606 = vrot.lane.b32.xlu1 %v2578_v35, %s3190_s25  ;;  %v2766_v57 = vadd.f32 %v2756_v62, %v2742_v12  ;;  %v2710_v36 = vmul.f32 %v5348_v37, %v6960_v26  ;;  %v2734_v13 = vmul.f32 %v5404_v21, %v6961_v10  ;;  %v6971_v12 = vld [vmem:[#allocation138_spill] sm:$0xff]  ;;  %v6976_v26 = vld [vmem:[#allocation127_spill] sm:$0xff]  ;;  %v6977_v10 = vld [vmem:[#allocation128_spill] sm:$0xff] }
 0x343   : > { %v2813_v43 = vadd.f32 %v2803_v45, %v2789_v19  ;;  %v2719_v16 = vadd.f32 %v2709_v58, %v2695_v54  ;;  %v2672_v55 = vadd.f32 %v2662_v40, %v2648_v34  ;;  %v2758_v8 = vmul.f32 %v5453_v61, %v6962_v15  ;;  %v6969_v58 = vld [vmem:[#allocation136_spill] sm:$0xff]  ;;  %v6973_v34 = vld [vmem:[#allocation122_spill] sm:$0xff]  ;;  %v6974_v19 = vld [vmem:[#allocation123_spill] sm:$0xff] }
 0x344   : > { %v2790_v2 = vadd.f32 %v2780_v3, %v2766_v57  ;;  %v2782_v62 = vmul.f32 %v5477_v63, %v6963_v39  ;;  %v2806_v27 = vmul.f32 %v5475_v60, %v6964_v44  ;;  %v2649_v47 = vmul.f32 %v6933_v31, %v6965_v32  ;;  %v6975_v50 = vld [vmem:[#allocation126_spill] sm:$0xff]  ;;  %v6980_v44 = vld [vmem:[#allocation131_spill] sm:$0xff] }
 0x345   : > { %v2743_v46 = vadd.f32 %v2733_v0, %v2719_v16  ;;  %v2696_v42 = vadd.f32 %v2686_v18, %v2672_v55  ;;  %v2663_v45 = vmul.f32 %v6934_v4, %v6966_v59  ;;  %v2687_v24 = vmul.f32 %v5292_v51, %v6967_v11 }
 0x346   : > { %2884 = vperm.xlu1 %3148, %v2881_v14   ;;  %2833 = vrot.lane.b32.xlu0 %v2813_v43, %s3191_s28  ;;  %v2814_v3 = vadd.f32 %v2804_v6, %v2790_v2  ;;  %v2711_v33 = vmul.f32 %v5348_v37, %v6968_v56  ;;  %v2735_v25 = vmul.f32 %v5404_v21, %v6969_v58  ;;  %v6978_v43 = vld [vmem:[#allocation129_spill] sm:$0xff]  ;;  %v6985_v58 = vld [vmem:[#allocation152_spill] sm:$0xff] }
 0x347   : > { %v2767_v35 = vadd.f32 %v2757_v52, %v2743_v46  ;;  %v2720_v0 = vadd.f32 %v2710_v36, %v2696_v42  ;;  %v2673_v17 = vadd.f32 %v2663_v45, %v2649_v47  ;;  %v2759_v1 = vmul.f32 %v5453_v61, %v6970_v29  ;;  %v6981_v47 = vld [vmem:[#allocation148_spill] sm:$0xff]  ;;  %v6982_v42 = vld [vmem:[#allocation149_spill] sm:$0xff] }
 0x348   : > { %v2783_v22 = vmul.f32 %v5477_v63, %v6971_v12  ;;  %v2807_v20 = vmul.f32 %v5475_v60, %v6972_v38  ;;  %v2650_v6 = vmul.f32 %v6933_v31, %v6973_v34  ;;  %v2664_v54 = vmul.f32 %v6934_v4, %v6974_v19  ;;  %v6988_v19 = vld [vmem:[#allocation140_spill] sm:$0xff] }
 0x349   : > { %v2791_v23 = vadd.f32 %v2781_v28, %v2767_v35  ;;  %v2744_v40 = vadd.f32 %v2734_v13, %v2720_v0  ;;  %v2697_v52 = vadd.f32 %v2687_v24, %v2673_v17  ;;  %v2688_v18 = vmul.f32 %v5292_v51, %v6975_v50  ;;  %v6979_v13 = vld [vmem:[#allocation130_spill] sm:$0xff]  ;;  %v6984_v24 = vld [vmem:[#allocation151_spill] sm:$0xff]  ;;  %v6986_v0 = vld [vmem:[#allocation153_spill] sm:$0xff] }
 0x34a   : > { %2835 = vrot.lane.b32.xlu1 %v2814_v3, %s3191_s28  ;;  %v2674_v57 = vadd.f32 %v2664_v54, %v2650_v6  ;;  %v2712_v36 = vmul.f32 %v5348_v37, %v6976_v26  ;;  %v2736_v14 = vmul.f32 %v5404_v21, %v6977_v10  ;;  %v2760_v16 = vmul.f32 %v5453_v61, %v6978_v43  ;;  %v6990_v50 = vld [vmem:[#allocation142_spill] sm:$0xff] }
 0x34b   : > { %v2815_v55 = vadd.f32 %v2805_v53, %v2791_v23  ;;  %v2768_v15 = vadd.f32 %v2758_v8, %v2744_v40  ;;  %v2721_v28 = vadd.f32 %v2711_v33, %v2697_v52  ;;  %v2784_v2 = vmul.f32 %v5477_v63, %v6979_v13  ;;  %v6983_v53 = vld [vmem:[#allocation150_spill] sm:$0xff]  ;;  %v6989_v23 = vld [vmem:[#allocation141_spill] sm:$0xff]  ;;  %v6995_v13 = vld [vmem:[#allocation164_spill] sm:$0xff] }
 0x34c   : > { %v2698_v39 = vadd.f32 %v2688_v18, %v2674_v57  ;;  %v2808_v32 = vmul.f32 %v5475_v60, %v6980_v44  ;;  %v2651_v46 = vmul.f32 %v6933_v31, %v6981_v47  ;;  %v2665_v59 = vmul.f32 %v6934_v4, %v6982_v42  ;;  %v6992_v18 = vld [vmem:[#allocation144_spill] sm:$0xff]  ;;  %v6996_v42 = vld [vmem:[#allocation165_spill] sm:$0xff] }
 0x34d   : > { %2837 = vrot.lane.b32.xlu0 %v2815_v55, %s3191_s28  ;;  %v2792_v45 = vadd.f32 %v2782_v62, %v2768_v15  ;;  %v2745_v11 = vadd.f32 %v2735_v25, %v2721_v28  ;;  %v2689_v8 = vmul.f32 %v5292_v51, %v6983_v53  ;;  %v2713_v3 = vmul.f32 %v5348_v37, %v6984_v24  ;;  %v6987_v25 = vld [vmem:[#allocation155_spill] sm:$0xff] }
 0x34e   : > { %v2722_v56 = vadd.f32 %v2712_v36, %v2698_v39  ;;  %v2675_v33 = vadd.f32 %v2665_v59, %v2651_v46  ;;  %v2737_v35 = vmul.f32 %v5404_v21, %v6985_v58  ;;  %v2761_v17 = vmul.f32 %v5453_v61, %v6986_v0  ;;  %v6997_v59 = vld [vmem:[#allocation166_spill] sm:$0xff]  ;;  %v6999_v58 = vld [vmem:[#allocation156_spill] sm:$0xff]  ;;  %v7000_v0 = vld [vmem:[#allocation157_spill] sm:$0xff] }
 0x34f   : > { %v2816_v29 = vadd.f32 %v2806_v27, %v2792_v45  ;;  %v2769_v12 = vadd.f32 %v2759_v1, %v2745_v11  ;;  %v2785_v62 = vmul.f32 %v5477_v63, %v6931_v7  ;;  %v2809_v38 = vmul.f32 %v5475_v60, %v6987_v25  ;;  %v6991_v1 = vld [vmem:[#allocation143_spill] sm:$0xff] }
 0x350   : > { %v2746_v34 = vadd.f32 %v2736_v14, %v2722_v56  ;;  %v2699_v6 = vadd.f32 %v2689_v8, %v2675_v33  ;;  %v2652_v54 = vmul.f32 %v6933_v31, %v6988_v19  ;;  %v2666_v40 = vmul.f32 %v6934_v4, %v6989_v23  ;;  %v6993_v14 = vld [vmem:[#allocation145_spill] sm:$0xff]  ;;  %v6998_v45 = vld [vmem:[#allocation167_spill] sm:$0xff] }
 0x351   : > { %2839 = vrot.lane.b32.xlu1 %v2816_v29, %s3191_s28  ;;  %v2793_v52 = vadd.f32 %v2783_v22, %v2769_v12  ;;  %v2690_v27 = vmul.f32 %v5292_v51, %v6990_v50  ;;  %v2714_v7 = vmul.f32 %v5348_v37, %v6991_v1  ;;  %v2738_v57 = vmul.f32 %v5404_v21, %v6992_v18  ;;  %v6994_v22 = vld [vmem:[#allocation147_spill] sm:$0xff]  ;;  %v7004_v19 = vld [vmem:[#allocation161_spill] sm:$0xff] }
 0x352   : > { %v2770_v26 = vadd.f32 %v2760_v16, %v2746_v34  ;;  %v2723_v36 = vadd.f32 %v2713_v3, %v2699_v6  ;;  %v2676_v10 = vadd.f32 %v2666_v40, %v2652_v54  ;;  %v2762_v43 = vmul.f32 %v5453_v61, %v6993_v14  ;;  %v7002_v34 = vld [vmem:[#allocation159_spill] sm:$0xff]  ;;  %v7003_v6 = vld [vmem:[#allocation160_spill] sm:$0xff] }
 0x353   : > { %v2817_v55 = vadd.f32 %v2807_v20, %v2793_v52  ;;  %v2786_v15 = vmul.f32 %v5477_v63, %v6930_v48  ;;  %v2810_v28 = vmul.f32 %v5475_v60, %v6994_v22  ;;  %v2653_v39 = vmul.f32 %v6933_v31, %v6995_v13  ;;  %v7005_v52 = vld [vmem:[#allocation163_spill] sm:$0xff]  ;;  %v7013_v14 = vld [vmem:[#allocation84_spill] sm:$0xff] }
 0x354   : > { %v2794_v44 = vadd.f32 %v2784_v2, %v2770_v26  ;;  %v2747_v47 = vadd.f32 %v2737_v35, %v2723_v36  ;;  %v2700_v46 = vadd.f32 %v2690_v27, %v2676_v10  ;;  %v2667_v16 = vmul.f32 %v6934_v4, %v6996_v42  ;;  %v7006_v50 = vld [vmem:[#allocation175_spill] sm:$0xff]  ;;  %v7011_v26 = vld [vmem:[#allocation65_spill] sm:$0xff] }
 0x355   : > { %2841 = vrot.lane.b32.xlu0 %v2817_v55, %s3191_s28  ;;  %v2691_v20 = vmul.f32 %v5292_v51, %v6997_v59  ;;  %v2715_v48 = vmul.f32 %v5348_v37, %v6998_v45  ;;  %v2739_v11 = vmul.f32 %v5404_v21, %v6874_v41  ;;  %v2763_v53 = vmul.f32 %v5453_v61, %v6875_v49  ;;  %v7007_v27 = vld [vmem:[#allocation79_spill] sm:$0xff] }
 0x356   : > { %v2818_v2 = vadd.f32 %v2808_v32, %v2794_v44  ;;  %v2771_v8 = vadd.f32 %v2761_v17, %v2747_v47  ;;  %v2724_v24 = vadd.f32 %v2714_v7, %v2700_v46  ;;  %v2677_v3 = vadd.f32 %v2667_v16, %v2653_v39  ;;  %v7001_v17 = vld [vmem:[#allocation158_spill] sm:$0xff]  ;;  %v7014_v13 = vld [vmem:[#allocation63_spill] sm:$0xff]  ;;  %v7017_v16 = vld [vmem:[#allocation57_spill] sm:$0xff] }
 0x357   : > { %v2787_v56 = vmul.f32 %v5477_v63, %v6876_v5  ;;  %v2811_v33 = vmul.f32 %v5475_v60, %v6878_v30  ;;  %v2654_v35 = vmul.f32 %v6933_v31, %v6999_v58  ;;  %v2668_v29 = vmul.f32 %v6934_v4, %v7000_v0  ;;  %v7016_v46 = vld [vmem:[#allocation55_spill] sm:$0xff]  ;;  %v7022_v58 = vld [vmem:[#allocation38_spill] sm:$0xff] }
 0x358   : > { %2843 = vrot.lane.b32.xlu1 %v2818_v2, %s3191_s28  ;;  %v2795_v41 = vadd.f32 %v2785_v62, %v2771_v8  ;;  %v2748_v49 = vadd.f32 %v2738_v57, %v2724_v24  ;;  %v2701_v32 = vadd.f32 %v2691_v20, %v2677_v3  ;;  %v2692_v12 = vmul.f32 %v5292_v51, %v7001_v17  ;;  %v7010_v57 = vld [vmem:[#allocation80_spill] sm:$0xff]  ;;  %v7020_v8 = vld [vmem:[#allocation37_spill] sm:$0xff]  ;;  %v7023_v0 = vld [vmem:[#allocation58_spill] sm:$0xff] }
 0x359   : > { %v2678_v25 = vadd.f32 %v2668_v29, %v2654_v35  ;;  %v2716_v5 = vmul.f32 %v5348_v37, %v7002_v34  ;;  %v2740_v30 = vmul.f32 %v5404_v21, %v7003_v6  ;;  %v2764_v31 = vmul.f32 %v5453_v61, %v7004_v19  ;;  %v7008_v37 = vld [vmem:[#allocation78_spill] sm:$0xff]  ;;  %v7018_v20 = vld [vmem:[#allocation16_spill] sm:$0xff]  ;;  %v7025_v17 = vld [vmem:[#allocation45_spill] sm:$0xff] }
 0x35a   : > { %v2819_v54 = vadd.f32 %v2809_v38, %v2795_v41  ;;  %v2772_v4 = vadd.f32 %v2762_v43, %v2748_v49  ;;  %v2725_v23 = vadd.f32 %v2715_v48, %v2701_v32  ;;  %v2788_v62 = vmul.f32 %v5477_v63, %v6932_v9  ;;  %v7009_v38 = vld [vmem:[#allocation82_spill] sm:$0xff]  ;;  %v7024_v41 = vld [vmem:[#allocation44_spill] sm:$0xff] }
 0x35b   : > { %v2702_v40 = vadd.f32 %v2692_v12, %v2678_v25  ;;  %v2812_v51 = vmul.f32 %v5475_v60, %v7005_v52  ;;  %v559_v1 = vmul.f32 %v7007_v27, %v7006_v50  ;;  %v560_v7 = vmul.f32 %v7008_v37, %v7006_v50  ;;  %v7012_v60 = vld [vmem:[#allocation59_spill] sm:$0xff]  ;;  %v7032_v27 = vld [vmem:[#allocation41_spill] sm:$0xff] }
 0x35c   : > { %2845 = vrot.lane.b32.xlu0 %v2819_v54, %s3191_s28  ;;  %v2796_v21 = vadd.f32 %v2786_v15, %v2772_v4  ;;  %v2749_v61 = vadd.f32 %v2739_v11, %v2725_v23  ;;  %v561_v18 = vmul.f32 %v7009_v38, %v7006_v50  ;;  %v562_v9 = vmul.f32 %v7010_v57, %v7006_v50  ;;  %v7015_v15 = vld [vmem:[#allocation70_spill] sm:$0xff]  ;;  %v7019_v11 = vld [vmem:[#allocation19_spill] sm:$0xff]  ;;  %v7035_v38 = vld [vmem:[#allocation12_spill] sm:$0xff] }
 0x35d   : > { %v2726_v63 = vadd.f32 %v2716_v5, %v2702_v40  ;;  %v568_v36 = vadd.f32 %v559_v1, %v7011_v26  ;;  %v569_v10 = vadd.f32 %v560_v7, %v7012_v60  ;;  %v563_v43 = vmul.f32 %v7013_v14, %v7006_v50  ;;  %v7026_v25 = vld [vmem:[#allocation67_spill] sm:$0xff]  ;;  %v7031_v40 = vld [vmem:[#allocation49_spill] sm:$0xff]  ;;  %v7038_v26 = vld [vmem:[#allocation36_spill] sm:$0xff] }
 0x35e   : > { %v2820_v55 = vadd.f32 %v2810_v28, %v2796_v21  ;;  %v2773_v22 = vadd.f32 %v2763_v53, %v2749_v61  ;;  %v570_v39 = vadd.f32 %v561_v18, %v7014_v13  ;;  %v571_v44 = vadd.f32 %v562_v9, %v7015_v15  ;;  %v7021_v28 = vld [vmem:[#allocation83_spill] sm:$0xff]  ;;  %v7033_v1 = vld [vmem:[#allocation33_spill] sm:$0xff]  ;;  %v7037_v9 = vld [vmem:[#allocation42_spill] sm:$0xff] }
 0x35f   : > { %v2750_v47 = vadd.f32 %v2740_v30, %v2726_v63  ;;  %v626_v42 = vadd.f32 %v7016_v46, %v568_v36  ;;  %v627_v59 = vadd.f32 %v7017_v16, %v569_v10  ;;  %v572_v45 = vadd.f32 %v563_v43, %v7018_v20  ;;  %v7028_v30 = vld [vmem:[#allocation48_spill] sm:$0xff]  ;;  %v7029_v54 = vld [vmem:[#allocation23_spill] sm:$0xff]  ;;  %v7042_v13 = vld [vmem:[#allocation50_spill] sm:$0xff] }
 0x360   : > { %2847 = vrot.lane.b32.xlu1 %v2820_v55, %s3191_s28  ;;  %v2797_v48 = vadd.f32 %v2787_v56, %v2773_v22  ;;  %v628_v2 = vadd.f32 %v7019_v11, %v570_v39  ;;  %v629_v24 = vadd.f32 %v7020_v8, %v571_v44  ;;  %v564_v53 = vmul.f32 %v7021_v28, %v7006_v50  ;;  %v7027_v56 = vld [vmem:[#allocation87_spill] sm:$0xff]  ;;  %v7040_v14 = vld [vmem:[#allocation52_spill] sm:$0xff]  ;;  %v7045_v46 = vld [vmem:[#allocation85_spill] sm:$0xff] }
 0x361   : > { %v2774_v3 = vadd.f32 %v2764_v31, %v2750_v47  ;;  %v684_v35 = vadd.f32 %v7022_v58, %v626_v42  ;;  %v685_v29 = vadd.f32 %v7023_v0, %v627_v59  ;;  %v630_v49 = vadd.f32 %v7024_v41, %v572_v45  ;;  %v7030_v31 = vld [vmem:[#allocation68_spill] sm:$0xff]  ;;  %v7034_v7 = vld [vmem:[#allocation11_spill] sm:$0xff]  ;;  %v7047_v20 = vld [vmem:[#allocation13_spill] sm:$0xff] }
 0x362   : > { %v2821_v32 = vadd.f32 %v2811_v33, %v2797_v48  ;;  %v686_v12 = vadd.f32 %v7025_v17, %v628_v2  ;;  %v687_v34 = vadd.f32 %v7026_v25, %v629_v24  ;;  %v565_v5 = vmul.f32 %v7027_v56, %v7006_v50  ;;  %v7039_v60 = vld [vmem:[#allocation27_spill] sm:$0xff]  ;;  %v7041_v55 = vld [vmem:[#allocation28_spill] sm:$0xff]  ;;  %v7048_v48 = vld [vmem:[#allocation69_spill] sm:$0xff] }
 0x363   : > { %v2798_v6 = vadd.f32 %v2788_v62, %v2774_v3  ;;  %v917_v19 = vadd.f32 %v7028_v30, %v684_v35  ;;  %v918_v4 = vadd.f32 %v7029_v54, %v685_v29  ;;  %v688_v23 = vadd.f32 %v7030_v31, %v630_v49  ;;  %v7036_v62 = vld [vmem:[#allocation56_spill] sm:$0xff]  ;;  %v7044_v44 = vld [vmem:[#allocation47_spill] sm:$0xff]  ;;  %v7049_v2 = vld [vmem:[#allocation17_spill] sm:$0xff] }
 0x364   : > { %2849 = vrot.lane.b32.xlu0 %v2821_v32, %s3191_s28  ;;  %v919_v52 = vadd.f32 %v7031_v40, %v686_v12  ;;  %v920_v33 = vadd.f32 %v7032_v27, %v687_v34  ;;  %v573_v37 = vadd.f32 %v564_v53, %v7033_v1  ;;  %v574_v21 = vadd.f32 %v565_v5, %v7034_v7  ;;  %v7043_v15 = vld [vmem:[#allocation40_spill] sm:$0xff]  ;;  %v7046_v16 = vld [vmem:[#allocation43_spill] sm:$0xff]  ;;  %v7054_v29 = vld [vmem:[#allocation25_spill] sm:$0xff] }
 0x365   : > { %v2822_v61 = vadd.f32 %v2812_v51, %v2798_v6  ;;  %v1141_v18 = vadd.f32 %v7035_v38, %v917_v19  ;;  %v1142_v57 = vadd.f32 %v7036_v62, %v918_v4  ;;  %v921_v63 = vadd.f32 %v7037_v9, %v688_v23  ;;  %v7050_v24 = vld [vmem:[#allocation104_spill] sm:$0xff]  ;;  %v7052_v3 = vld [vmem:[#allocation31_spill] sm:$0xff]  ;;  %v7057_v25 = vld [vmem:[#allocation26_spill] sm:$0xff] }
 0x366   : > { %v1143_v36 = vadd.f32 %v7038_v26, %v919_v52  ;;  %v1144_v10 = vadd.f32 %v7039_v60, %v920_v33  ;;  %v631_v43 = vadd.f32 %v7040_v14, %v573_v37  ;;  %v632_v22 = vadd.f32 %v7041_v55, %v574_v21  ;;  %v7051_v28 = vld [vmem:[#allocation64_spill] sm:$0xff]  ;;  %v7055_v49 = vld [vmem:[#allocation35_spill] sm:$0xff]  ;;  %v7058_v56 = vld [vmem:[#allocation18_spill] sm:$0xff] }
 0x367   : > { %2851 = vrot.lane.b32.xlu1 %v2822_v61, %s3191_s28  ;;  %v1365_v39 = vadd.f32 %v7042_v13, %v1141_v18  ;;  %v1366_v51 = vadd.f32 %v7043_v15, %v1142_v57  ;;  %v1145_v47 = vadd.f32 %v7044_v44, %v921_v63  ;;  %v566_v42 = vmul.f32 %v7045_v46, %v7006_v50  ;;  %v7053_v35 = vld [vmem:[#allocation32_spill] sm:$0xff]  ;;  %v7056_v17 = vld [vmem:[#allocation39_spill] sm:$0xff]  ;;  %v7059_v6 = vld [vmem:[#allocation66_spill] sm:$0xff] }
 0x368   : > { %v1367_v59 = vadd.f32 %v7046_v16, %v1143_v36  ;;  %v1368_v45 = vadd.f32 %v7047_v20, %v1144_v10  ;;  %v689_v11 = vadd.f32 %v7048_v48, %v631_v43  ;;  %v690_v8 = vadd.f32 %v7049_v2, %v632_v22  ;;  %v7060_v19 = vld [vmem:[#allocation22_spill] sm:$0xff]  ;;  %v7061_v4 = vld [vmem:[#allocation53_spill] sm:$0xff]  ;;  %v7064_v33 = vld [vmem:[#allocation20_spill] sm:$0xff] }
 0x369   : > { %v1130_v53 = vsel %vm1123_vm3, %v7051_v28, %v7050_v24  ;;  %v1589_v58 = vadd.f32 %v7052_v3, %v1365_v39  ;;  %v1590_v0 = vadd.f32 %v7053_v35, %v1366_v51  ;;  %v1369_v41 = vadd.f32 %v7054_v29, %v1145_v47  ;;  %v7062_v23 = vld [vmem:[#allocation34_spill] sm:$0xff]  ;;  %v7063_v52 = vld [vmem:[#allocation29_spill] sm:$0xff]  ;;  %v7065_v37 = vld [vmem:[#allocation24_spill] sm:$0xff] }
 0x36a   : > { %v1591_v32 = vadd.f32 %v7055_v49, %v1367_v59  ;;  %v1592_v12 = vadd.f32 %v7056_v17, %v1368_v45  ;;  %v922_v34 = vadd.f32 %v7057_v25, %v689_v11  ;;  %v923_v5 = vadd.f32 %v7058_v56, %v690_v8  ;;  %v7066_v61 = vld [vmem:[#allocation115_spill] sm:$0xff]  ;;  %v7067_v38 = vld [vmem:[#allocation112_spill] sm:$0xff]  ;;  %v7068_v62 = vld [vmem:[#allocation114_spill] sm:$0xff] }
 0x36b   : > { %v5723_v30 = vadd.f32 %v7059_v6, %v1589_v58  ;;  %v5726_v54 = vadd.f32 %v7060_v19, %v1590_v0  ;;  %v1593_v31 = vadd.f32 %v7061_v4, %v1369_v41  ;;  %v575_v40 = vadd.f32 %v566_v42, %v7062_v23  ;;  %v7069_v9 = vld [vmem:[#allocation14_spill] sm:$0xff]  ;;  %v7071_v14 = vld [vmem:[#allocation21_spill] sm:$0xff]  ;;  %v7073_v22 = vld [vmem:[#allocation99_spill] sm:$0xff] }
 0x36c   : > { %v5731_v27 = vadd.f32 %v7063_v52, %v1591_v32  ;;  %v5734_v1 = vadd.f32 %v7064_v33, %v1592_v12  ;;  %v1146_v7 = vadd.f32 %v7065_v37, %v922_v34  ;;  %v1147_v21 = vadd.f32 %v1130_v53, %v923_v5  ;;  %v7070_v26 = vld [vmem:[#allocation10_spill] sm:$0xff]  ;;  %v7072_v55 = vld [vmem:[#allocation97_spill] sm:$0xff]  ;;  %v7075_v51 = vld [vmem:[#allocation116_spill] sm:$0xff] }
 0x36d   : > { %v1353_v18 = vsel %vm1347_vm4, %v7067_v38, %v7066_v61  ;;  %v1354_v57 = vsel %vm1347_vm4, %v7066_v61, %v7068_v62  ;;  %v5744_v63 = vadd.f32 %v7069_v9, %v1593_v31  ;;  %v633_v36 = vadd.f32 %v7070_v26, %v575_v40  ;;  %v7074_v39 = vld [vmem:[#allocation54_spill] sm:$0xff]  ;;  %v7076_v46 = vld [vmem:[#allocation105_spill] sm:$0xff]  ;;  %v7077_v16 = vld [vmem:[#allocation124_spill] sm:$0xff] }
 0x36e   : > { %v1370_v60 = vadd.f32 %v1353_v18, %v1146_v7  ;;  %v1371_v10 = vadd.f32 %v1354_v57, %v1147_v21  ;;  %v907_v13 = vsel %vm899_vm1, %v7073_v22, %v7072_v55  ;;  %v1131_v42 = vsel %vm1123_vm3, %v7050_v24, %v7076_v46  ;;  %v7078_v20 = vld [vmem:[#allocation125_spill] sm:$0xff]  ;;  %v7079_v11 = vld [vmem:[#allocation107_spill] sm:$0xff]  ;;  %v7081_v53 = vld [vmem:[#allocation46_spill] sm:$0xff] }
 0x36f   : > { %v691_v43 = vadd.f32 %v7071_v14, %v633_v36  ;;  %v1355_v2 = vsel %vm1347_vm4, %v7068_v62, %v7079_v11  ;;  %v7080_v28 = vld [vmem:[#allocation117_spill] sm:$0xff]  ;;  %v7082_v35 = vld [vmem:[#allocation172_spill] sm:$0xff]  ;;  %v7083_v0 = vld [vmem:[#allocation2_spill] sm:$0xff] }
 0x370   : > { %v1594_v15 = vadd.f32 %v7074_v39, %v1370_v60  ;;  %v1595_v44 = vadd.f32 %v7075_v51, %v1371_v10  ;;  %v1579_v3 = vsel %vm1571_vm0, %v7081_v53, %v7080_v28  ;;  %v1803_v24 = vsel %vm1795_vm2, %v7083_v0, %v7082_v35  ;;  %v7084_v31 = vld [vmem:[#allocation86_spill] sm:$0xff]  ;;  %v7086_v52 = vld [vmem:[#allocation9_spill] sm:$0xff]  ;;  %v7087_v33 = vld [vmem:[#allocation71_spill] sm:$0xff] }
 0x371   : > { %v924_v47 = vadd.f32 %v907_v13, %v691_v43  ;;  %v7085_v23 = vld [vmem:[#allocation74_spill] sm:$0xff]  ;;  %v335_v37 = vmul.f32 %v7087_v33, %v7086_v52  ;;  %v7088_v38 = vld [vmem:[#allocation8_spill] sm:$0xff]  ;;  %v7091_v36 = vld [vmem:[#allocation75_spill] sm:$0xff] }
 0x372   : > { %v5757_v59 = vadd.f32 %v7077_v16, %v1594_v15  ;;  %v5760_v45 = vadd.f32 %v7078_v20, %v1595_v44  ;;  %v286_v40 = vmul.f32 %v7085_v23, %v7084_v31  ;;  %v7089_v18 = vld [vmem:[#allocation72_spill] sm:$0xff]  ;;  %v7090_v26 = vld [vmem:[#allocation30_spill] sm:$0xff]  ;;  %v7092_v22 = vld [vmem:[#allocation51_spill] sm:$0xff] }
 0x373   : > { %v1148_v48 = vadd.f32 %v1131_v42, %v924_v47  ;;  %v393_v62 = vmul.f32 %v7089_v18, %v7088_v38  ;;  %v451_v60 = vmul.f32 %v7091_v36, %v7090_v26  ;;  %v7093_v13 = vld [vmem:[#allocation76_spill] sm:$0xff]  ;;  %v7095_v20 = vld [vmem:[#allocation73_spill] sm:$0xff] }
 0x374   : > { %v344_v21 = vadd.f32 %v335_v37, %v286_v40  ;;  %v509_v39 = vmul.f32 %v7093_v13, %v7092_v22  ;;  %v7094_v15 = vld [vmem:[#allocation88_spill] sm:$0xff]  ;;  %v7098_v0 = vld [vmem:[#allocation81_spill] sm:$0xff] }
 0x375   : > { %v1372_v8 = vadd.f32 %v1355_v2, %v1148_v48  ;;  %v567_v51 = vmul.f32 %v7094_v15, %v7006_v50  ;;  %v7096_v48 = vld [vmem:[#allocation77_spill] sm:$0xff] }
 0x376   : > { %v402_v9 = vadd.f32 %v393_v62, %v344_v21  ;;  %v625_v2 = vmul.f32 %v7096_v48, %v7095_v20 }
 0x377   : > { %v1596_v58 = vadd.f32 %v1579_v3, %v1372_v8 }
 0x378   : > { %v460_v43 = vadd.f32 %v451_v60, %v402_v9 }
 0x379   : > { %v5771_v29 = vadd.f32 %v1803_v24, %v1596_v58  ;;  %v7097_v58 = vld [vmem:[#allocation89_spill] sm:$0xff] }
 0x37a   : > { %v518_v44 = vadd.f32 %v509_v39, %v460_v43  ;;  %v683_v24 = vmul.f32 %v7098_v0, %v7097_v58 }
 0x37c   : > { %v576_v16 = vadd.f32 %v567_v51, %v518_v44 }
 0x37e   : > { %v634_v8 = vadd.f32 %v625_v2, %v576_v16 }
 0x37f   : > { %v2350_v41 = vpop.permute.xlu0 %2349  ;;  %v2348_v49 = vpop.permute.xlu1 %2347 }
 0x380   : > { %v2368_v50 = vsel %vm2367_vm5, %v2348_v49, %v2350_v41  ;;  %v692_v23 = vadd.f32 %v683_v24, %v634_v8 }
 0x381   : > { %v2386_v21 = vadd.f32 %v2368_v50, %v5723_v30 }
 0x383   : > { %v2354_v32 = vpop.permute.xlu0 %2353  ;;  %v2352_v17 = vpop.permute.xlu1 %2351 }
 0x384   : > { %v2369_v31 = vsel %vm2367_vm5, %v2350_v41, %v2352_v17  ;;  %v2370_v18 = vsel %vm2367_vm5, %v2352_v17, %v2354_v32  ;;  %v925_v41 = vadd.f32 %v7072_v55, %v692_v23 }
 0x385   : > { %v2387_v38 = vadd.f32 %v2369_v31, %v5726_v54  ;;  %v2388_v17 = vadd.f32 %v2370_v18, %v5731_v27 }
 0x387   : > { %v2358_v12 = vpop.permute.xlu0 %2357  ;;  %v2356_v25 = vpop.permute.xlu1 %2355 }
 0x388   : > { %v2371_v49 = vsel %vm2367_vm5, %v2354_v32, %v2356_v25  ;;  %v2372_v62 = vsel %vm2367_vm5, %v2356_v25, %v2358_v12 }
 0x389   : > { %v2389_v32 = vadd.f32 %v2371_v49, %v5734_v1  ;;  %v2390_v25 = vadd.f32 %v2372_v62, %v5744_v63 }
 0x38b   : > { %v5773_v34 = vpop.permute.xlu0 %2361  ;;  %v5775_v56 = vpop.permute.xlu1 %2359 }
 0x38c   : > { %v2373_v43 = vsel %vm2367_vm5, %v2358_v12, %v5775_v56 }
 0x38f   : > { %v5777_v5 = vpop.permute.xlu0 %2365  ;;  %v5779_v6 = vpop.permute.xlu1 %2363 }
 0x3a4   : > { %v2593_v19 = vpop.permute.xlu0 %2592  ;;  %v2591_v4 = vpop.permute.xlu1 %2590 }
 0x3a5   : > { %v2611_v52 = vsel %vm2610_vm6, %v2591_v4, %v2593_v19 }
 0x3a6   : > { %v2629_v9 = vadd.f32 %v2611_v52, %v2386_v21  ;;  %v2375_v21 = vsel %vm2367_vm5, %v5773_v34, %v5779_v6 }
 0x3a7   : > { %v2393_v62 = vadd.f32 %v2375_v21, %v5771_v29 }
 0x3a8   : > { %v2597_v7 = vpop.permute.xlu0 %2596  ;;  %v2595_v61 = vpop.permute.xlu1 %2594 }
 0x3a9   : > { %v2612_v33 = vsel %vm2610_vm6, %v2593_v19, %v2595_v61  ;;  %v2613_v4 = vsel %vm2610_vm6, %v2595_v61, %v2597_v7  ;;  %v1149_v61 = vadd.f32 %v7076_v46, %v925_v41 }
 0x3aa   : > { %v2630_v26 = vadd.f32 %v2612_v33, %v2387_v38 }
 0x3ab   : > { %v1373_v48 = vadd.f32 %v7079_v11, %v1149_v61 }
 0x3ac   : > { %v2601_v57 = vpop.permute.xlu0 %2600  ;;  %v2599_v14 = vpop.permute.xlu1 %2598 }
 0x3ad   : > { %v2614_v19 = vsel %vm2610_vm6, %v2597_v7, %v2599_v14  ;;  %v2631_v7 = vadd.f32 %v2613_v4, %v2388_v17  ;;  %v2615_v27 = vsel %vm2610_vm6, %v2599_v14, %v2601_v57  ;;  %v2391_v14 = vadd.f32 %v2373_v43, %v5757_v59 }
 0x3ae   : > { %v2632_v13 = vadd.f32 %v2614_v19, %v2389_v32  ;;  %v2633_v2 = vadd.f32 %v2615_v27, %v2390_v25 }
 0x3b0   : > { %v5789_v10 = vpop.permute.xlu0 %2604  ;;  %v5797_v42 = vpop.permute.xlu1 %2602 }
 0x3b1   : > { %v2616_v1 = vsel %vm2610_vm6, %v2601_v57, %v5797_v42  ;;  %v2374_v57 = vsel %vm2367_vm5, %v5775_v56, %v5773_v34  ;;  %v2617_v59 = vsel %vm2610_vm6, %v5797_v42, %v5789_v10  ;;  %v2376_v34 = vsel %vm2367_vm5, %v5779_v6, %v5777_v5 }
 0x3b2   : > { %v2634_v0 = vadd.f32 %v2616_v1, %v2391_v14  ;;  %v2392_v52 = vadd.f32 %v2374_v57, %v5760_v45 }
 0x3b4   : > { %v5795_v47 = vpop.permute.xlu0 %2608  ;;  %v5801_v3 = vpop.permute.xlu1 %2606  ;;  %v2635_v38 = vadd.f32 %v2617_v59, %v2392_v52 }
 0x3b5   : > { %v2618_v45 = vsel %vm2610_vm6, %v5789_v10, %v5801_v3  ;;  %v2619_v4 = vsel %vm2610_vm6, %v5801_v3, %v5795_v47 }
 0x3b6   : > { %v2636_v10 = vadd.f32 %v2618_v45, %v2393_v62 }
 0x3b8   : > { %v2834_v53 = vpop.permute.xlu0 %2833 }
 0x3bf   : > { %v2838_v37 = vpop.permute.xlu0 %2837 }
 0x3c1   : > { %v5807_v40 = vpop.permute.xlu1 %2884 }
 0x3c5   : > { %v2836_v36 = vpop.permute.xlu1 %2835 }
 0x3c6   : > { %v2854_v30 = vsel %vm2853_vm7, %v2834_v53, %v2836_v36  ;;  %v2855_v54 = vsel %vm2853_vm7, %v2836_v36, %v2838_v37 }
 0x3c7   : > { %v2872_v60 = vadd.f32 %v2854_v30, %v2629_v9  ;;  %v2873_v55 = vadd.f32 %v2855_v54, %v2630_v26  ;;  %v2842_v22 = vpop.permute.xlu0 %2841 }
 0x3c9   : > { %v2887_v39 = vadd.f32 %v5807_v40, %v2872_v60  ;;  %v2888_v15 = vadd.f32 %v5807_v40, %v2873_v55  ;;  %v2840_v51 = vpop.permute.xlu1 %2839 }
 0x3ca   : > { %v2856_v63 = vsel %vm2853_vm7, %v2838_v37, %v2840_v51  ;;  %v2857_v46 = vsel %vm2853_vm7, %v2840_v51, %v2842_v22  ;;  %v1597_v37 = vadd.f32 %v7080_v28, %v1373_v48 }
 0x3cb   : > { %v2896_v12 = vmax.f32 %v2887_v39, 0.0  ;;  %v2897_v44 = vmax.f32 %v2888_v15, 0.0  ;;  %v2874_v16 = vadd.f32 %v2856_v63, %v2631_v7  ;;  %v2875_v20 = vadd.f32 %v2857_v46, %v2632_v13 }
 0x3cc   : > { %v1821_v36 = vadd.f32 %v7082_v35, %v1597_v37 }
 0x3cd   : > { %2905 = vst [vmem:[%s5836_s4] sm:$0xff] %v2896_v12  ;;  %2906 = vst [vmem:[%s5836_s4 + $0x8] sm:$0xff] %v2897_v44  ;;  %v2889_v8 = vadd.f32 %v5807_v40, %v2874_v16  ;;  %v2890_v53 = vadd.f32 %v5807_v40, %v2875_v20  ;;  %v2844_v58 = vpop.permute.xlu1 %2843 }
 0x3ce   : > { %v2846_v11 = vpop.permute.xlu0 %2845  ;;  %v2858_v24 = vsel %vm2853_vm7, %v2842_v22, %v2844_v58  ;;  %v2394_v5 = vadd.f32 %v2376_v34, %v1821_v36 }
 0x3cf   : > { %v2898_v50 = vmax.f32 %v2889_v8, 0.0  ;;  %v2899_v56 = vmax.f32 %v2890_v53, 0.0  ;;  %v2859_v31 = vsel %vm2853_vm7, %v2844_v58, %v2846_v11  ;;  %v2876_v23 = vadd.f32 %v2858_v24, %v2633_v2 }
 0x3d0   : > { %v2877_v33 = vadd.f32 %v2859_v31, %v2634_v0  ;;  %v2637_v17 = vadd.f32 %v2619_v4, %v2394_v5 }
 0x3d1   : > { %2907 = vst [vmem:[%s5836_s4 + $0x10] sm:$0xff] %v2898_v50  ;;  %2908 = vst [vmem:[%s5836_s4 + $0x18] sm:$0xff] %v2899_v56  ;;  %v2891_v42 = vadd.f32 %v5807_v40, %v2876_v23 }
 0x3d2   : > { %v2892_v18 = vadd.f32 %v5807_v40, %v2877_v33  ;;  %v2848_v49 = vpop.permute.xlu1 %2847 }
 0x3d3   : > { %v2900_v41 = vmax.f32 %v2891_v42, 0.0  ;;  %v2860_v28 = vsel %vm2853_vm7, %v2846_v11, %v2848_v49 }
 0x3d4   : > { %v2901_v9 = vmax.f32 %v2892_v18, 0.0  ;;  %v2878_v26 = vadd.f32 %v2860_v28, %v2635_v38 }
 0x3d5   : > { %2909 = vst [vmem:[%s5836_s4 + $0x20] sm:$0xff] %v2900_v41 }
 0x3d6   : > { %v2850_v19 = vpop.permute.xlu0 %2849  ;;  %2910 = vst [vmem:[%s5836_s4 + $0x28] sm:$0xff] %v2901_v9  ;;  %v2893_v30 = vadd.f32 %v5807_v40, %v2878_v26 }
 0x3d7   : > { %v2861_v29 = vsel %vm2853_vm7, %v2848_v49, %v2850_v19 }
 0x3d8   : > { %v2879_v6 = vadd.f32 %v2861_v29, %v2636_v10  ;;  %v2902_v54 = vmax.f32 %v2893_v30, 0.0 }
 0x3d9   : > { %v2852_v32 = vpop.permute.xlu1 %2851 }
 0x3da   : > { %v2894_v35 = vadd.f32 %v5807_v40, %v2879_v6  ;;  %2911 = vst [vmem:[%s5836_s4 + $0x30] sm:$0xff] %v2902_v54  ;;  %v2862_v60 = vsel %vm2853_vm7, %v2850_v19, %v2852_v32 }
 0x3db   : > { %v2880_v47 = vadd.f32 %v2862_v60, %v2637_v17 }
 0x3dc   : > { %v2903_v3 = vmax.f32 %v2894_v35, 0.0 }
 0x3dd   : > { %v2895_v55 = vadd.f32 %v5807_v40, %v2880_v47 }
 0x3de   : > { %2912 = vst [vmem:[%s5836_s4 + $0x38] sm:$0xff] %v2903_v3 }
 0x3df   : > { %v2904_v25 = vmax.f32 %v2895_v55, 0.0 }
 0x3e1   : > { %2914 = vst.msk [vmem:[%s5836_s4 + $0x40] sm:$0xff] %vm2913_vm8, %v2904_v25 }
 0x3e2 PF: > { %s13_s14 = sadd.s32 1, %s3174_s14   ;;  %s7099_s12 = smov %s3170_s13 }
 0x3e3   : > { %p10_p5 = scmp.ge.s32.totalorder %s13_s14, 4   ;;  %s7100_s13 = smov %s7102_s15 }
 0x3e5   :  { %12 = sbr.rel (!%p10_p5) target bundleno = 2 (0x2), region = 76 }

</bundles_post_ra>
